<compile_context>
chip_gen: v5e
topology: v5e:2x2
jax: 0.10.0
libtpu: 0.0.40
codegen_flags: <defaults>
</compile_context>

<pallas_src>
import functools

import jax
import jax.numpy as jnp
from jax.experimental import pallas as pl
from jax.experimental.pallas import tpu as pltpu


def _prelu(v, a):
    return jnp.where(v >= 0, v, a * v)


# --------------------------------------------------------------------------
# In-kernel helpers
# --------------------------------------------------------------------------
def _im2col_3x3_reflect(x, H, W):
    """x: (H, W, C) -> (H*W, 9*C) bf16 im2col patch, reflect pad of 1.

    Column order matches weights reshaped from (9, Cin, Cout) with tap
    index dy*3+dx: patch[:, (dy*3+dx)*C : (dy*3+dx+1)*C].
    """
    C = x.shape[-1]
    xb = x.astype(jnp.bfloat16)                  # cast first: halves relayout traffic
    # reflect pad along H (leading, untiled axis -> cheap slices/concat)
    xh = jnp.concatenate([xb[1:2], xb, xb[H - 2:H - 1]], axis=0)        # (H+2, W, C)
    # W-shifted copies with reflect borders, built from 0-aligned concats
    left = jnp.concatenate([xh[:, 1:2], xh[:, :W - 1]], axis=1)         # col j -> j-1
    right = jnp.concatenate([xh[:, 1:], xh[:, W - 2:W - 1]], axis=1)    # col j -> j+1
    shifted = (left, xh, right)                                         # dx = 0, 1, 2
    taps = []
    for dy in range(3):
        for dx in range(3):
            taps.append(shifted[dx][dy:dy + H])                         # (H, W, C)
    patch = jnp.concatenate(taps, axis=-1)                              # (H, W, 9C)
    return patch.reshape(H * W, 9 * C)


def _conv3x3_mxu(x, w_ref, H, W):
    """Reflect-padded 3x3 conv as a single bf16 MXU matmul (f32 accum)."""
    patch = _im2col_3x3_reflect(x, H, W)                                # (HW, 9C) bf16
    return jnp.dot(patch, w_ref[...], preferred_element_type=jnp.float32)


# --------------------------------------------------------------------------
# Fused DRAB kernel (one batch element per grid step)
# --------------------------------------------------------------------------
def _drab_kernel(x_ref, res_ref, w1_ref, w2_ref, wup_ref,
                 wm_ref, wfc1_ref, wfc2_ref, wd_ref, a_ref,
                 x5_ref, x3_ref, *, H, W):
    # x_ref: (1,H,W,Cin)   res_ref: (1,H,W,Cres)
    # w1/w2/wup: (9*Cin, Cout) bf16     wm: (Cres,1) f32
    # wfc1: (Cres,Cr) f32  wfc2: (Cr,Cres) f32   wd: (Cres,Cout) bf16
    # a_ref: (5,) f32 SMEM -> PReLU slopes (relu1, relu2, up_relu, fc, down)
    cin = x_ref.shape[-1]
    cres = res_ref.shape[-1]
    cout = wd_ref.shape[-1]
    HW = H * W

    x = x_ref[0].astype(jnp.float32)                                    # (H, W, Cin)
    x_flat = x.reshape(HW, cin)

    # conv1 + PReLU (no residual -> no zero array read from HBM)
    h1 = _prelu(_conv3x3_mxu(x, w1_ref, H, W), a_ref[0])                # (HW, Cin)
    # conv2 + x_r + PReLU
    h2 = _prelu(_conv3x3_mxu(h1.reshape(H, W, cin), w2_ref, H, W) + x_flat,
                a_ref[1])
    # up_conv + res + PReLU
    x3 = _conv3x3_mxu(h2.reshape(H, W, cin), wup_ref, H, W)
    x3 = _prelu(x3 + res_ref[0].reshape(HW, cres).astype(jnp.float32), a_ref[2])
    x3_ref[0] = x3.reshape(H, W, cres).astype(x3_ref.dtype)             # res output

    # ---- AWCA: 1x1 mask conv -> softmax over HW -> weighted channel pool ----
    logits = jnp.dot(x3, wm_ref[...], preferred_element_type=jnp.float32)  # (HW, 1)
    m = jnp.max(logits)
    p = jnp.exp(logits - m)
    z = jnp.sum(p)
    y = jnp.sum(x3 * p, axis=0, keepdims=True) / z                      # (1, Cres)
    # 2-layer FC (PReLU, sigmoid) -> channel re-scale
    h = _prelu(jnp.dot(y, wfc1_ref[...], preferred_element_type=jnp.float32),
               a_ref[3])
    s = jax.nn.sigmoid(jnp.dot(h, wfc2_ref[...],
                               preferred_element_type=jnp.float32))     # (1, Cres)
    x4 = (x3 * s).astype(jnp.bfloat16)                                  # (HW, Cres)

    # ---- down 1x1 conv + x_r + PReLU (single bf16 MXU matmul) ----
    acc = jnp.dot(x4, wd_ref[...], preferred_element_type=jnp.float32)  # (HW, Cout)
    acc = _prelu(acc + x_flat, a_ref[4])
    x5_ref[0] = acc.reshape(H, W, cout).astype(x5_ref.dtype)


# --------------------------------------------------------------------------
# pallas_call wrapper (grid over batch)
# --------------------------------------------------------------------------
_CPARAMS = pltpu.CompilerParams(
    dimension_semantics=("parallel",),          # shard batch across TCs on v7x
    vmem_limit_bytes=64 * 1024 * 1024,
)


def drab_pallas(x, res, kp):
    B, H, W, Cin = x.shape
    Cres = res.shape[-1]
    Crd = kp["wfc1"].shape[-1]
    Cout = kp["wdown"].shape[-1]
    kernel = functools.partial(_drab_kernel, H=H, W=W)
    return pl.pallas_call(
        kernel,
        out_shape=(jax.ShapeDtypeStruct((B, H, W, Cout), x.dtype),      # x5
                   jax.ShapeDtypeStruct((B, H, W, Cres), x.dtype)),     # x3 (res)
        grid=(B,),
        in_specs=[
            pl.BlockSpec((1, H, W, Cin), lambda b: (b, 0, 0, 0)),
            pl.BlockSpec((1, H, W, Cres), lambda b: (b, 0, 0, 0)),
            pl.BlockSpec((9 * Cin, Cin), lambda b: (0, 0)),
            pl.BlockSpec((9 * Cin, Cin), lambda b: (0, 0)),
            pl.BlockSpec((9 * Cin, Cres), lambda b: (0, 0)),
            pl.BlockSpec((Cres, 1), lambda b: (0, 0)),
            pl.BlockSpec((Cres, Crd), lambda b: (0, 0)),
            pl.BlockSpec((Crd, Cres), lambda b: (0, 0)),
            pl.BlockSpec((Cres, Cout), lambda b: (0, 0)),
            pl.BlockSpec(memory_space=pltpu.MemorySpace.SMEM),
        ],
        out_specs=(pl.BlockSpec((1, H, W, Cout), lambda b: (b, 0, 0, 0)),
                   pl.BlockSpec((1, H, W, Cres), lambda b: (b, 0, 0, 0))),
        compiler_params=_CPARAMS,
    )(x, res, kp["w1"], kp["w2"], kp["wup"], kp["wm"], kp["wfc1"],
      kp["wfc2"], kp["wdown"], kp["alphas"])


# --------------------------------------------------------------------------
# DRAB forward (weights repacked once; hot path entirely in the fused kernel)
# --------------------------------------------------------------------------
def _pack_params(p):
    def fold(w):                                  # (9, Cin, Cout) -> (9*Cin, Cout) bf16
        k, ci, co = w.shape
        return w.reshape(k * ci, co).astype(jnp.bfloat16)
    return dict(
        w1=fold(p["w_conv1"]), w2=fold(p["w_conv2"]), wup=fold(p["w_up"]),
        wm=p["w_mask"].astype(jnp.float32),
        wfc1=p["w_fc1"].astype(jnp.float32),
        wfc2=p["w_fc2"].astype(jnp.float32),
        wdown=p["w_down"].astype(jnp.bfloat16),
        alphas=jnp.concatenate([p["a1"], p["a2"], p["a_up"],
                                p["a_fc"], p["a_down"]]).astype(jnp.float32),
    )


def drab_forward(x_nhwc, res_nhwc, p):
    kp = _pack_params(p)
    x5, x3 = drab_pallas(x_nhwc, res_nhwc, kp)
    return x5, x3


# --------------------------------------------------------------------------
# Pure-JAX reference (numerical check)
# --------------------------------------------------------------------------
def _ref_conv3x3(x, w_taps):
    B, H, W, Cin = x.shape
    xp = jnp.pad(x, ((0, 0), (1, 1), (1, 1), (0, 0)), mode="reflect")
    out = jnp.zeros((B, H, W, w_taps.shape[2]), jnp.float32)
    for dy in range(3):
        for dx in range(3):
            out = out + jnp.einsum("bhwi,io->bhwo",
                                   xp[:, dy:dy + H, dx:dx + W, :],
                                   w_taps[dy * 3 + dx],
                                   precision=jax.lax.Precision.HIGHEST)
    return out


def drab_reference(x, res, p):
    x_r = x
    x1 = _prelu(_ref_conv3x3(x, p["w_conv1"]), p["a1"][0])
    x2 = _prelu(_ref_conv3x3(x1, p["w_conv2"]) + x_r, p["a2"][0])
    x3 = _prelu(_ref_conv3x3(x2, p["w_up"]) + res, p["a_up"][0])
    res_out = x3
    B, H, W, C = x3.shape
    xf = x3.reshape(B, H * W, C)
    logits = jnp.einsum("bnc,c->bn", xf, p["w_mask"][:, 0],
                        precision=jax.lax.Precision.HIGHEST)
    prob = jax.nn.softmax(logits, axis=1)
    y = jnp.einsum("bnc,bn->bc", xf, prob, precision=jax.lax.Precision.HIGHEST)
    h = _prelu(y @ p["w_fc1"], p["a_fc"][0])
    s = jax.nn.sigmoid(h @ p["w_fc2"])
    x4 = x3 * s[:, None, None, :]
    x5 = _prelu(jnp.einsum("bhwi,io->bhwo", x4, p["w_down"],
                           precision=jax.lax.Precision.HIGHEST) + x_r,
                p["a_down"][0])
    return x5, res_out


# --------------------------------------------------------------------------
# Deterministic parameter init + test
# --------------------------------------------------------------------------
def init_params(key, in_dim, out_dim, res_dim, reduction=16):
    ks = jax.random.split(key, 8)
    cr = res_dim // reduction

    def w(k, shape, fan_in):
        return (jax.random.normal(k, shape, jnp.float32) / jnp.sqrt(fan_in))

    return {
        # tap-major conv weights: (9, Cin, Cout)  (tap = dy*3+dx)
        "w_conv1": w(ks[0], (9, in_dim, in_dim), 9 * in_dim),
        "w_conv2": w(ks[1], (9, in_dim, in_dim), 9 * in_dim),
        "w_up":    w(ks[2], (9, in_dim, res_dim), 9 * in_dim),
        # AWCA
        "w_mask":  w(ks[3], (res_dim, 1), res_dim),
        "w_fc1":   w(ks[4], (res_dim, cr), res_dim),
        "w_fc2":   w(ks[5], (cr, res_dim), cr),
        # down 1x1 conv: (Cin=res_dim, Cout=out_dim)
        "w_down":  w(ks[6], (res_dim, out_dim), res_dim),
        # PReLU slopes (PyTorch default init = 0.25, single parameter each)
        "a1": jnp.array([0.25], jnp.float32),
        "a2": jnp.array([0.25], jnp.float32),
        "a_up": jnp.array([0.25], jnp.float32),
        "a_fc": jnp.array([0.25], jnp.float32),
        "a_down": jnp.array([0.25], jnp.float32),
    }


if __name__ == "__main__":
    B, in_dim, out_dim, res_dim = 2, 16, 16, 32
    H = W = 16

    key = jax.random.PRNGKey(0)
    kx, kr, kp = jax.random.split(key, 3)

    # inputs in PyTorch NCHW convention, moved to NHWC once at the boundary
    x_nchw = jax.random.normal(kx, (B, in_dim, H, W), jnp.float32)
    res_nchw = jax.random.normal(kr, (B, res_dim, H, W), jnp.float32)
    x = jnp.transpose(x_nchw, (0, 2, 3, 1))      # NHWC
    res = jnp.transpose(res_nchw, (0, 2, 3, 1))  # NHWC

    params = init_params(kp, in_dim, out_dim, res_dim)

    out, res_out = jax.jit(drab_forward)(x, res, params)
    out = jax.block_until_ready(out)
    res_out = jax.block_until_ready(res_out)

    # verify against pure-JAX reference (bf16 MXU inputs, f32 accumulation)
    ref_out, ref_res = drab_reference(x, res, params)
    err1 = float(jnp.max(jnp.abs(out - ref_out))) / (float(jnp.max(jnp.abs(ref_out))) + 1e-6)
    err2 = float(jnp.max(jnp.abs(res_out - ref_res))) / (float(jnp.max(jnp.abs(ref_res))) + 1e-6)
    assert err1 < 3e-2 and err2 < 3e-2, (err1, err2)

    print("KERNEL_OK")
</pallas_src>

<mosaic_0001>
module attributes {stable_mosaic.version = 11 : i64} {
  func.func @_drab_kernel(%arg0: i32, %arg1: memref<1x16x16x16xf32, #tpu.memory_space<vmem>>, %arg2: memref<1x16x16x32xf32, #tpu.memory_space<vmem>>, %arg3: memref<144x16xbf16, #tpu.memory_space<vmem>>, %arg4: memref<144x16xbf16, #tpu.memory_space<vmem>>, %arg5: memref<144x32xbf16, #tpu.memory_space<vmem>>, %arg6: memref<32x1xf32, #tpu.memory_space<vmem>>, %arg7: memref<32x2xf32, #tpu.memory_space<vmem>>, %arg8: memref<2x32xf32, #tpu.memory_space<vmem>>, %arg9: memref<32x16xbf16, #tpu.memory_space<vmem>>, %arg10: memref<5xf32, #tpu.memory_space<smem>>, %arg11: memref<1x16x16x16xf32, #tpu.memory_space<vmem>>, %arg12: memref<1x16x16x32xf32, #tpu.memory_space<vmem>>) attributes {dimension_semantics = [#tpu.dimension_semantics<parallel>], iteration_bounds = array<i64: 2>, scalar_prefetch = 0 : i64, scratch_operands = 0 : i64, tpu.core_type = #tpu.core_type<tc>, window_params = [{transform_indices = @transform_0, window_bounds = array<i64: 1, 16, 16, 16>}, {transform_indices = @transform_1, window_bounds = array<i64: 1, 16, 16, 32>}, {pipeline_mode = #tpu.pipeline_mode<synchronous>, transform_indices = @transform_2, window_bounds = array<i64: 144, 16>}, {pipeline_mode = #tpu.pipeline_mode<synchronous>, transform_indices = @transform_3, window_bounds = array<i64: 144, 16>}, {pipeline_mode = #tpu.pipeline_mode<synchronous>, transform_indices = @transform_4, window_bounds = array<i64: 144, 32>}, {pipeline_mode = #tpu.pipeline_mode<synchronous>, transform_indices = @transform_5, window_bounds = array<i64: 32, 1>}, {pipeline_mode = #tpu.pipeline_mode<synchronous>, transform_indices = @transform_6, window_bounds = array<i64: 32, 2>}, {pipeline_mode = #tpu.pipeline_mode<synchronous>, transform_indices = @transform_7, window_bounds = array<i64: 2, 32>}, {pipeline_mode = #tpu.pipeline_mode<synchronous>, transform_indices = @transform_8, window_bounds = array<i64: 32, 16>}, {transform_indices = @transform_9, window_bounds = array<i64: 5>}, {transform_indices = @transform_10, window_bounds = array<i64: 1, 16, 16, 16>}, {transform_indices = @transform_11, window_bounds = array<i64: 1, 16, 16, 32>}]} {
    %c0 = arith.constant 0 : index
    %c0_0 = arith.constant 0 : index
    %c0_1 = arith.constant 0 : index
    %c0_2 = arith.constant 0 : index
    %0 = vector.load %arg1[%c0, %c0_0, %c0_1, %c0_2] : memref<1x16x16x16xf32, #tpu.memory_space<vmem>>, vector<1x16x16x16xf32>
    %1 = vector.shape_cast %0 : vector<1x16x16x16xf32> to vector<16x16x16xf32>
    %2 = vector.shape_cast %1 : vector<16x16x16xf32> to vector<256x16xf32>
    %3 = arith.truncf %1 : vector<16x16x16xf32> to vector<16x16x16xbf16>
    %4 = vector.extract_strided_slice %3 {offsets = [1, 0, 0], sizes = [1, 16, 16], strides = [1, 1, 1]} : vector<16x16x16xbf16> to vector<1x16x16xbf16>
    %5 = vector.extract_strided_slice %3 {offsets = [14, 0, 0], sizes = [1, 16, 16], strides = [1, 1, 1]} : vector<16x16x16xbf16> to vector<1x16x16xbf16>
    %6 = tpu.concatenate %4, %3, %5 in 0 : vector<1x16x16xbf16>, vector<16x16x16xbf16>, vector<1x16x16xbf16> -> vector<18x16x16xbf16>
    %7 = vector.extract_strided_slice %6 {offsets = [0, 1, 0], sizes = [18, 1, 16], strides = [1, 1, 1]} : vector<18x16x16xbf16> to vector<18x1x16xbf16>
    %8 = vector.extract_strided_slice %6 {offsets = [0, 0, 0], sizes = [18, 15, 16], strides = [1, 1, 1]} : vector<18x16x16xbf16> to vector<18x15x16xbf16>
    %9 = tpu.concatenate %7, %8 in 1 : vector<18x1x16xbf16>, vector<18x15x16xbf16> -> vector<18x16x16xbf16>
    %10 = vector.extract_strided_slice %6 {offsets = [0, 1, 0], sizes = [18, 15, 16], strides = [1, 1, 1]} : vector<18x16x16xbf16> to vector<18x15x16xbf16>
    %11 = vector.extract_strided_slice %6 {offsets = [0, 14, 0], sizes = [18, 1, 16], strides = [1, 1, 1]} : vector<18x16x16xbf16> to vector<18x1x16xbf16>
    %12 = tpu.concatenate %10, %11 in 1 : vector<18x15x16xbf16>, vector<18x1x16xbf16> -> vector<18x16x16xbf16>
    %13 = vector.extract_strided_slice %9 {offsets = [0, 0, 0], sizes = [16, 16, 16], strides = [1, 1, 1]} : vector<18x16x16xbf16> to vector<16x16x16xbf16>
    %14 = vector.extract_strided_slice %6 {offsets = [0, 0, 0], sizes = [16, 16, 16], strides = [1, 1, 1]} : vector<18x16x16xbf16> to vector<16x16x16xbf16>
    %15 = vector.extract_strided_slice %12 {offsets = [0, 0, 0], sizes = [16, 16, 16], strides = [1, 1, 1]} : vector<18x16x16xbf16> to vector<16x16x16xbf16>
    %16 = vector.extract_strided_slice %9 {offsets = [1, 0, 0], sizes = [16, 16, 16], strides = [1, 1, 1]} : vector<18x16x16xbf16> to vector<16x16x16xbf16>
    %17 = vector.extract_strided_slice %6 {offsets = [1, 0, 0], sizes = [16, 16, 16], strides = [1, 1, 1]} : vector<18x16x16xbf16> to vector<16x16x16xbf16>
    %18 = vector.extract_strided_slice %12 {offsets = [1, 0, 0], sizes = [16, 16, 16], strides = [1, 1, 1]} : vector<18x16x16xbf16> to vector<16x16x16xbf16>
    %19 = vector.extract_strided_slice %9 {offsets = [2, 0, 0], sizes = [16, 16, 16], strides = [1, 1, 1]} : vector<18x16x16xbf16> to vector<16x16x16xbf16>
    %20 = vector.extract_strided_slice %6 {offsets = [2, 0, 0], sizes = [16, 16, 16], strides = [1, 1, 1]} : vector<18x16x16xbf16> to vector<16x16x16xbf16>
    %21 = vector.extract_strided_slice %12 {offsets = [2, 0, 0], sizes = [16, 16, 16], strides = [1, 1, 1]} : vector<18x16x16xbf16> to vector<16x16x16xbf16>
    %22 = tpu.concatenate %13, %14, %15, %16, %17, %18, %19, %20, %21 in 2 : vector<16x16x16xbf16>, vector<16x16x16xbf16>, vector<16x16x16xbf16>, vector<16x16x16xbf16>, vector<16x16x16xbf16>, vector<16x16x16xbf16>, vector<16x16x16xbf16>, vector<16x16x16xbf16>, vector<16x16x16xbf16> -> vector<16x16x144xbf16>
    %23 = vector.shape_cast %22 : vector<16x16x144xbf16> to vector<256x144xbf16>
    %c0_3 = arith.constant 0 : index
    %c0_4 = arith.constant 0 : index
    %24 = vector.load %arg3[%c0_3, %c0_4] : memref<144x16xbf16, #tpu.memory_space<vmem>>, vector<144x16xbf16>
    %cst = arith.constant dense<0.000000e+00> : vector<256x16xf32>
    %25 = tpu.matmul %23, %24, %cst {dimension_numbers = #tpu.dot_dimension_numbers<[1], [0], [0], [1], [0, 0, 1, 1], [], []>} : vector<256x144xbf16>, vector<144x16xbf16>, vector<256x16xf32> -> vector<256x16xf32>
    %c0_5 = arith.constant 0 : index
    %26 = memref.load %arg10[%c0_5] : memref<5xf32, #tpu.memory_space<smem>>
    %cst_6 = arith.constant 0.000000e+00 : f32
    %27 = vector.broadcast %cst_6 : f32 to vector<256x16xf32>
    %28 = arith.cmpf oge, %25, %27 : vector<256x16xf32>
    %29 = vector.broadcast %26 : f32 to vector<256x16xf32>
    %30 = arith.mulf %29, %25 : vector<256x16xf32>
    %31 = arith.select %28, %25, %30 : vector<256x16xi1>, vector<256x16xf32>
    %32 = vector.shape_cast %31 : vector<256x16xf32> to vector<16x16x16xf32>
    %33 = arith.truncf %32 : vector<16x16x16xf32> to vector<16x16x16xbf16>
    %34 = vector.extract_strided_slice %33 {offsets = [1, 0, 0], sizes = [1, 16, 16], strides = [1, 1, 1]} : vector<16x16x16xbf16> to vector<1x16x16xbf16>
    %35 = vector.extract_strided_slice %33 {offsets = [14, 0, 0], sizes = [1, 16, 16], strides = [1, 1, 1]} : vector<16x16x16xbf16> to vector<1x16x16xbf16>
    %36 = tpu.concatenate %34, %33, %35 in 0 : vector<1x16x16xbf16>, vector<16x16x16xbf16>, vector<1x16x16xbf16> -> vector<18x16x16xbf16>
    %37 = vector.extract_strided_slice %36 {offsets = [0, 1, 0], sizes = [18, 1, 16], strides = [1, 1, 1]} : vector<18x16x16xbf16> to vector<18x1x16xbf16>
    %38 = vector.extract_strided_slice %36 {offsets = [0, 0, 0], sizes = [18, 15, 16], strides = [1, 1, 1]} : vector<18x16x16xbf16> to vector<18x15x16xbf16>
    %39 = tpu.concatenate %37, %38 in 1 : vector<18x1x16xbf16>, vector<18x15x16xbf16> -> vector<18x16x16xbf16>
    %40 = vector.extract_strided_slice %36 {offsets = [0, 1, 0], sizes = [18, 15, 16], strides = [1, 1, 1]} : vector<18x16x16xbf16> to vector<18x15x16xbf16>
    %41 = vector.extract_strided_slice %36 {offsets = [0, 14, 0], sizes = [18, 1, 16], strides = [1, 1, 1]} : vector<18x16x16xbf16> to vector<18x1x16xbf16>
    %42 = tpu.concatenate %40, %41 in 1 : vector<18x15x16xbf16>, vector<18x1x16xbf16> -> vector<18x16x16xbf16>
    %43 = vector.extract_strided_slice %39 {offsets = [0, 0, 0], sizes = [16, 16, 16], strides = [1, 1, 1]} : vector<18x16x16xbf16> to vector<16x16x16xbf16>
    %44 = vector.extract_strided_slice %36 {offsets = [0, 0, 0], sizes = [16, 16, 16], strides = [1, 1, 1]} : vector<18x16x16xbf16> to vector<16x16x16xbf16>
    %45 = vector.extract_strided_slice %42 {offsets = [0, 0, 0], sizes = [16, 16, 16], strides = [1, 1, 1]} : vector<18x16x16xbf16> to vector<16x16x16xbf16>
    %46 = vector.extract_strided_slice %39 {offsets = [1, 0, 0], sizes = [16, 16, 16], strides = [1, 1, 1]} : vector<18x16x16xbf16> to vector<16x16x16xbf16>
    %47 = vector.extract_strided_slice %36 {offsets = [1, 0, 0], sizes = [16, 16, 16], strides = [1, 1, 1]} : vector<18x16x16xbf16> to vector<16x16x16xbf16>
    %48 = vector.extract_strided_slice %42 {offsets = [1, 0, 0], sizes = [16, 16, 16], strides = [1, 1, 1]} : vector<18x16x16xbf16> to vector<16x16x16xbf16>
    %49 = vector.extract_strided_slice %39 {offsets = [2, 0, 0], sizes = [16, 16, 16], strides = [1, 1, 1]} : vector<18x16x16xbf16> to vector<16x16x16xbf16>
    %50 = vector.extract_strided_slice %36 {offsets = [2, 0, 0], sizes = [16, 16, 16], strides = [1, 1, 1]} : vector<18x16x16xbf16> to vector<16x16x16xbf16>
    %51 = vector.extract_strided_slice %42 {offsets = [2, 0, 0], sizes = [16, 16, 16], strides = [1, 1, 1]} : vector<18x16x16xbf16> to vector<16x16x16xbf16>
    %52 = tpu.concatenate %43, %44, %45, %46, %47, %48, %49, %50, %51 in 2 : vector<16x16x16xbf16>, vector<16x16x16xbf16>, vector<16x16x16xbf16>, vector<16x16x16xbf16>, vector<16x16x16xbf16>, vector<16x16x16xbf16>, vector<16x16x16xbf16>, vector<16x16x16xbf16>, vector<16x16x16xbf16> -> vector<16x16x144xbf16>
    %53 = vector.shape_cast %52 : vector<16x16x144xbf16> to vector<256x144xbf16>
    %c0_7 = arith.constant 0 : index
    %c0_8 = arith.constant 0 : index
    %54 = vector.load %arg4[%c0_7, %c0_8] : memref<144x16xbf16, #tpu.memory_space<vmem>>, vector<144x16xbf16>
    %cst_9 = arith.constant dense<0.000000e+00> : vector<256x16xf32>
    %55 = tpu.matmul %53, %54, %cst_9 {dimension_numbers = #tpu.dot_dimension_numbers<[1], [0], [0], [1], [0, 0, 1, 1], [], []>} : vector<256x144xbf16>, vector<144x16xbf16>, vector<256x16xf32> -> vector<256x16xf32>
    %56 = arith.addf %55, %2 : vector<256x16xf32>
    %c1 = arith.constant 1 : index
    %57 = memref.load %arg10[%c1] : memref<5xf32, #tpu.memory_space<smem>>
    %cst_10 = arith.constant 0.000000e+00 : f32
    %58 = vector.broadcast %cst_10 : f32 to vector<256x16xf32>
    %59 = arith.cmpf oge, %56, %58 : vector<256x16xf32>
    %60 = vector.broadcast %57 : f32 to vector<256x16xf32>
    %61 = arith.mulf %60, %56 : vector<256x16xf32>
    %62 = arith.select %59, %56, %61 : vector<256x16xi1>, vector<256x16xf32>
    %63 = vector.shape_cast %62 : vector<256x16xf32> to vector<16x16x16xf32>
    %64 = arith.truncf %63 : vector<16x16x16xf32> to vector<16x16x16xbf16>
    %65 = vector.extract_strided_slice %64 {offsets = [1, 0, 0], sizes = [1, 16, 16], strides = [1, 1, 1]} : vector<16x16x16xbf16> to vector<1x16x16xbf16>
    %66 = vector.extract_strided_slice %64 {offsets = [14, 0, 0], sizes = [1, 16, 16], strides = [1, 1, 1]} : vector<16x16x16xbf16> to vector<1x16x16xbf16>
    %67 = tpu.concatenate %65, %64, %66 in 0 : vector<1x16x16xbf16>, vector<16x16x16xbf16>, vector<1x16x16xbf16> -> vector<18x16x16xbf16>
    %68 = vector.extract_strided_slice %67 {offsets = [0, 1, 0], sizes = [18, 1, 16], strides = [1, 1, 1]} : vector<18x16x16xbf16> to vector<18x1x16xbf16>
    %69 = vector.extract_strided_slice %67 {offsets = [0, 0, 0], sizes = [18, 15, 16], strides = [1, 1, 1]} : vector<18x16x16xbf16> to vector<18x15x16xbf16>
    %70 = tpu.concatenate %68, %69 in 1 : vector<18x1x16xbf16>, vector<18x15x16xbf16> -> vector<18x16x16xbf16>
    %71 = vector.extract_strided_slice %67 {offsets = [0, 1, 0], sizes = [18, 15, 16], strides = [1, 1, 1]} : vector<18x16x16xbf16> to vector<18x15x16xbf16>
    %72 = vector.extract_strided_slice %67 {offsets = [0, 14, 0], sizes = [18, 1, 16], strides = [1, 1, 1]} : vector<18x16x16xbf16> to vector<18x1x16xbf16>
    %73 = tpu.concatenate %71, %72 in 1 : vector<18x15x16xbf16>, vector<18x1x16xbf16> -> vector<18x16x16xbf16>
    %74 = vector.extract_strided_slice %70 {offsets = [0, 0, 0], sizes = [16, 16, 16], strides = [1, 1, 1]} : vector<18x16x16xbf16> to vector<16x16x16xbf16>
    %75 = vector.extract_strided_slice %67 {offsets = [0, 0, 0], sizes = [16, 16, 16], strides = [1, 1, 1]} : vector<18x16x16xbf16> to vector<16x16x16xbf16>
    %76 = vector.extract_strided_slice %73 {offsets = [0, 0, 0], sizes = [16, 16, 16], strides = [1, 1, 1]} : vector<18x16x16xbf16> to vector<16x16x16xbf16>
    %77 = vector.extract_strided_slice %70 {offsets = [1, 0, 0], sizes = [16, 16, 16], strides = [1, 1, 1]} : vector<18x16x16xbf16> to vector<16x16x16xbf16>
    %78 = vector.extract_strided_slice %67 {offsets = [1, 0, 0], sizes = [16, 16, 16], strides = [1, 1, 1]} : vector<18x16x16xbf16> to vector<16x16x16xbf16>
    %79 = vector.extract_strided_slice %73 {offsets = [1, 0, 0], sizes = [16, 16, 16], strides = [1, 1, 1]} : vector<18x16x16xbf16> to vector<16x16x16xbf16>
    %80 = vector.extract_strided_slice %70 {offsets = [2, 0, 0], sizes = [16, 16, 16], strides = [1, 1, 1]} : vector<18x16x16xbf16> to vector<16x16x16xbf16>
    %81 = vector.extract_strided_slice %67 {offsets = [2, 0, 0], sizes = [16, 16, 16], strides = [1, 1, 1]} : vector<18x16x16xbf16> to vector<16x16x16xbf16>
    %82 = vector.extract_strided_slice %73 {offsets = [2, 0, 0], sizes = [16, 16, 16], strides = [1, 1, 1]} : vector<18x16x16xbf16> to vector<16x16x16xbf16>
    %83 = tpu.concatenate %74, %75, %76, %77, %78, %79, %80, %81, %82 in 2 : vector<16x16x16xbf16>, vector<16x16x16xbf16>, vector<16x16x16xbf16>, vector<16x16x16xbf16>, vector<16x16x16xbf16>, vector<16x16x16xbf16>, vector<16x16x16xbf16>, vector<16x16x16xbf16>, vector<16x16x16xbf16> -> vector<16x16x144xbf16>
    %84 = vector.shape_cast %83 : vector<16x16x144xbf16> to vector<256x144xbf16>
    %c0_11 = arith.constant 0 : index
    %c0_12 = arith.constant 0 : index
    %85 = vector.load %arg5[%c0_11, %c0_12] : memref<144x32xbf16, #tpu.memory_space<vmem>>, vector<144x32xbf16>
    %cst_13 = arith.constant dense<0.000000e+00> : vector<256x32xf32>
    %86 = tpu.matmul %84, %85, %cst_13 {dimension_numbers = #tpu.dot_dimension_numbers<[1], [0], [0], [1], [0, 0, 1, 1], [], []>} : vector<256x144xbf16>, vector<144x32xbf16>, vector<256x32xf32> -> vector<256x32xf32>
    %c0_14 = arith.constant 0 : index
    %c0_15 = arith.constant 0 : index
    %c0_16 = arith.constant 0 : index
    %c0_17 = arith.constant 0 : index
    %87 = vector.load %arg2[%c0_14, %c0_15, %c0_16, %c0_17] : memref<1x16x16x32xf32, #tpu.memory_space<vmem>>, vector<1x16x16x32xf32>
    %88 = vector.shape_cast %87 : vector<1x16x16x32xf32> to vector<16x16x32xf32>
    %89 = vector.shape_cast %88 : vector<16x16x32xf32> to vector<256x32xf32>
    %90 = arith.addf %86, %89 : vector<256x32xf32>
    %c2 = arith.constant 2 : index
    %91 = memref.load %arg10[%c2] : memref<5xf32, #tpu.memory_space<smem>>
    %cst_18 = arith.constant 0.000000e+00 : f32
    %92 = vector.broadcast %cst_18 : f32 to vector<256x32xf32>
    %93 = arith.cmpf oge, %90, %92 : vector<256x32xf32>
    %94 = vector.broadcast %91 : f32 to vector<256x32xf32>
    %95 = arith.mulf %94, %90 : vector<256x32xf32>
    %96 = arith.select %93, %90, %95 : vector<256x32xi1>, vector<256x32xf32>
    %97 = vector.shape_cast %96 : vector<256x32xf32> to vector<16x16x32xf32>
    %c0_19 = arith.constant 0 : index
    %c0_20 = arith.constant 0 : index
    %c0_21 = arith.constant 0 : index
    %c0_22 = arith.constant 0 : index
    %98 = vector.load %arg12[%c0_19, %c0_20, %c0_21, %c0_22] : memref<1x16x16x32xf32, #tpu.memory_space<vmem>>, vector<1x16x16x32xf32>
    %99 = vector.shape_cast %98 : vector<1x16x16x32xf32> to vector<16x16x32xf32>
    %100 = vector.shape_cast %97 : vector<16x16x32xf32> to vector<1x16x16x32xf32>
    tpu.vector_store %arg12[%c0_19, %c0_20, %c0_21, %c0_22], %100 {strides = array<i32>} : memref<1x16x16x32xf32, #tpu.memory_space<vmem>>, vector<1x16x16x32xf32>,
    %c0_23 = arith.constant 0 : index
    %c0_24 = arith.constant 0 : index
    %101 = vector.load %arg6[%c0_23, %c0_24] : memref<32x1xf32, #tpu.memory_space<vmem>>, vector<32x1xf32>
    %cst_25 = arith.constant dense<0.000000e+00> : vector<256x1xf32>
    %102 = tpu.matmul %96, %101, %cst_25 {dimension_numbers = #tpu.dot_dimension_numbers<[1], [0], [0], [1], [0, 0, 1, 1], [], []>} : vector<256x32xf32>, vector<32x1xf32>, vector<256x1xf32> -> vector<256x1xf32>
    %103 = vector.shape_cast %102 : vector<256x1xf32> to vector<1x256x1xf32>
    %cst_26 = arith.constant dense<0xFF800000> : vector<1xf32>
    %104 = vector.multi_reduction <maximumf>, %103, %cst_26 [1, 2] : vector<1x256x1xf32> to vector<1xf32>
    %105 = vector.shape_cast %104 : vector<1xf32> to vector<1x1x1xf32>
    %106 = vector.extract %105[0, 0, 0] : f32 from vector<1x1x1xf32>
    %107 = vector.broadcast %106 : f32 to vector<256x1xf32>
    %108 = arith.subf %102, %107 : vector<256x1xf32>
    %109 = math.exp %108 : vector<256x1xf32>
    %110 = vector.shape_cast %109 : vector<256x1xf32> to vector<1x256x1xf32>
    %cst_27 = arith.constant dense<0.000000e+00> : vector<1xf32>
    %111 = vector.multi_reduction <add>, %110, %cst_27 [1, 2] : vector<1x256x1xf32> to vector<1xf32>
    %112 = vector.shape_cast %111 : vector<1xf32> to vector<1x1x1xf32>
    %113 = vector.extract %112[0, 0, 0] : f32 from vector<1x1x1xf32>
    %114 = vector.broadcast %109 : vector<256x1xf32> to vector<256x32xf32>
    %115 = arith.mulf %96, %114 : vector<256x32xf32>
    %cst_28 = arith.constant dense<0.000000e+00> : vector<32xf32>
    %116 = vector.multi_reduction <add>, %115, %cst_28 [0] : vector<256x32xf32> to vector<32xf32>
    %117 = vector.shape_cast %116 : vector<32xf32> to vector<1x32xf32>
    %118 = vector.broadcast %113 : f32 to vector<1x32xf32>
    %119 = arith.divf %117, %118 : vector<1x32xf32>
    %c0_29 = arith.constant 0 : index
    %c0_30 = arith.constant 0 : index
    %120 = vector.load %arg7[%c0_29, %c0_30] : memref<32x2xf32, #tpu.memory_space<vmem>>, vector<32x2xf32>
    %cst_31 = arith.constant dense<0.000000e+00> : vector<1x2xf32>
    %121 = tpu.matmul %119, %120, %cst_31 {dimension_numbers = #tpu.dot_dimension_numbers<[1], [0], [0], [1], [0, 0, 1, 1], [], []>} : vector<1x32xf32>, vector<32x2xf32>, vector<1x2xf32> -> vector<1x2xf32>
    %c3 = arith.constant 3 : index
    %122 = memref.load %arg10[%c3] : memref<5xf32, #tpu.memory_space<smem>>
    %cst_32 = arith.constant 0.000000e+00 : f32
    %123 = vector.broadcast %cst_32 : f32 to vector<1x2xf32>
    %124 = arith.cmpf oge, %121, %123 : vector<1x2xf32>
    %125 = vector.broadcast %122 : f32 to vector<1x2xf32>
    %126 = arith.mulf %125, %121 : vector<1x2xf32>
    %127 = arith.select %124, %121, %126 : vector<1x2xi1>, vector<1x2xf32>
    %c0_33 = arith.constant 0 : index
    %c0_34 = arith.constant 0 : index
    %128 = vector.load %arg8[%c0_33, %c0_34] : memref<2x32xf32, #tpu.memory_space<vmem>>, vector<2x32xf32>
    %cst_35 = arith.constant dense<0.000000e+00> : vector<1x32xf32>
    %129 = tpu.matmul %127, %128, %cst_35 {dimension_numbers = #tpu.dot_dimension_numbers<[1], [0], [0], [1], [0, 0, 1, 1], [], []>} : vector<1x2xf32>, vector<2x32xf32>, vector<1x32xf32> -> vector<1x32xf32>
    %130 = arith.negf %129 : vector<1x32xf32>
    %131 = math.exp %130 : vector<1x32xf32>
    %cst_36 = arith.constant 1.000000e+00 : f32
    %132 = vector.broadcast %cst_36 : f32 to vector<1x32xf32>
    %133 = arith.addf %132, %131 : vector<1x32xf32>
    %134 = arith.divf %132, %133 : vector<1x32xf32>
    %135 = vector.broadcast %134 : vector<1x32xf32> to vector<256x32xf32>
    %136 = arith.mulf %96, %135 : vector<256x32xf32>
    %137 = arith.truncf %136 : vector<256x32xf32> to vector<256x32xbf16>
    %c0_37 = arith.constant 0 : index
    %c0_38 = arith.constant 0 : index
    %138 = vector.load %arg9[%c0_37, %c0_38] : memref<32x16xbf16, #tpu.memory_space<vmem>>, vector<32x16xbf16>
    %cst_39 = arith.constant dense<0.000000e+00> : vector<256x16xf32>
    %139 = tpu.matmul %137, %138, %cst_39 {dimension_numbers = #tpu.dot_dimension_numbers<[1], [0], [0], [1], [0, 0, 1, 1], [], []>} : vector<256x32xbf16>, vector<32x16xbf16>, vector<256x16xf32> -> vector<256x16xf32>
    %140 = arith.addf %139, %2 : vector<256x16xf32>
    %c4 = arith.constant 4 : index
    %141 = memref.load %arg10[%c4] : memref<5xf32, #tpu.memory_space<smem>>
    %cst_40 = arith.constant 0.000000e+00 : f32
    %142 = vector.broadcast %cst_40 : f32 to vector<256x16xf32>
    %143 = arith.cmpf oge, %140, %142 : vector<256x16xf32>
    %144 = vector.broadcast %141 : f32 to vector<256x16xf32>
    %145 = arith.mulf %144, %140 : vector<256x16xf32>
    %146 = arith.select %143, %140, %145 : vector<256x16xi1>, vector<256x16xf32>
    %147 = vector.shape_cast %146 : vector<256x16xf32> to vector<16x16x16xf32>
    %c0_41 = arith.constant 0 : index
    %c0_42 = arith.constant 0 : index
    %c0_43 = arith.constant 0 : index
    %c0_44 = arith.constant 0 : index
    %148 = vector.load %arg11[%c0_41, %c0_42, %c0_43, %c0_44] : memref<1x16x16x16xf32, #tpu.memory_space<vmem>>, vector<1x16x16x16xf32>
    %149 = vector.shape_cast %148 : vector<1x16x16x16xf32> to vector<16x16x16xf32>
    %150 = vector.shape_cast %147 : vector<16x16x16xf32> to vector<1x16x16x16xf32>
    tpu.vector_store %arg11[%c0_41, %c0_42, %c0_43, %c0_44], %150 {strides = array<i32>} : memref<1x16x16x16xf32, #tpu.memory_space<vmem>>, vector<1x16x16x16xf32>,
    return
  }
  func.func @transform_0(%arg0: i32) -> (i32, i32, i32, i32) {
    %c0_i32 = arith.constant 0 : i32
    %c0_i32_0 = arith.constant 0 : i32
    %c0_i32_1 = arith.constant 0 : i32
    %c0_i32_2 = arith.constant 0 : i32
    return %arg0, %c0_i32, %c0_i32_0, %c0_i32_1 : i32, i32, i32, i32
  }
  func.func @transform_1(%arg0: i32) -> (i32, i32, i32, i32) {
    %c0_i32 = arith.constant 0 : i32
    %c0_i32_0 = arith.constant 0 : i32
    %c0_i32_1 = arith.constant 0 : i32
    %c0_i32_2 = arith.constant 0 : i32
    return %arg0, %c0_i32, %c0_i32_0, %c0_i32_1 : i32, i32, i32, i32
  }
  func.func @transform_2(%arg0: i32) -> (i32, i32) {
    %c0_i32 = arith.constant 0 : i32
    %c0_i32_0 = arith.constant 0 : i32
    %c0_i32_1 = arith.constant 0 : i32
    return %c0_i32, %c0_i32_0 : i32, i32
  }
  func.func @transform_3(%arg0: i32) -> (i32, i32) {
    %c0_i32 = arith.constant 0 : i32
    %c0_i32_0 = arith.constant 0 : i32
    %c0_i32_1 = arith.constant 0 : i32
    return %c0_i32, %c0_i32_0 : i32, i32
  }
  func.func @transform_4(%arg0: i32) -> (i32, i32) {
    %c0_i32 = arith.constant 0 : i32
    %c0_i32_0 = arith.constant 0 : i32
    %c0_i32_1 = arith.constant 0 : i32
    return %c0_i32, %c0_i32_0 : i32, i32
  }
  func.func @transform_5(%arg0: i32) -> (i32, i32) {
    %c0_i32 = arith.constant 0 : i32
    %c0_i32_0 = arith.constant 0 : i32
    %c0_i32_1 = arith.constant 0 : i32
    return %c0_i32, %c0_i32_0 : i32, i32
  }
  func.func @transform_6(%arg0: i32) -> (i32, i32) {
    %c0_i32 = arith.constant 0 : i32
    %c0_i32_0 = arith.constant 0 : i32
    %c0_i32_1 = arith.constant 0 : i32
    return %c0_i32, %c0_i32_0 : i32, i32
  }
  func.func @transform_7(%arg0: i32) -> (i32, i32) {
    %c0_i32 = arith.constant 0 : i32
    %c0_i32_0 = arith.constant 0 : i32
    %c0_i32_1 = arith.constant 0 : i32
    return %c0_i32, %c0_i32_0 : i32, i32
  }
  func.func @transform_8(%arg0: i32) -> (i32, i32) {
    %c0_i32 = arith.constant 0 : i32
    %c0_i32_0 = arith.constant 0 : i32
    %c0_i32_1 = arith.constant 0 : i32
    return %c0_i32, %c0_i32_0 : i32, i32
  }
  func.func @transform_9(%arg0: i32) -> i32 {
    %c0_i32 = arith.constant 0 : i32
    %c0_i32_0 = arith.constant 0 : i32
    return %c0_i32 : i32
  }
  func.func @transform_10(%arg0: i32) -> (i32, i32, i32, i32) {
    %c0_i32 = arith.constant 0 : i32
    %c0_i32_0 = arith.constant 0 : i32
    %c0_i32_1 = arith.constant 0 : i32
    %c0_i32_2 = arith.constant 0 : i32
    return %arg0, %c0_i32, %c0_i32_0, %c0_i32_1 : i32, i32, i32, i32
  }
  func.func @transform_11(%arg0: i32) -> (i32, i32, i32, i32) {
    %c0_i32 = arith.constant 0 : i32
    %c0_i32_0 = arith.constant 0 : i32
    %c0_i32_1 = arith.constant 0 : i32
    %c0_i32_2 = arith.constant 0 : i32
    return %arg0, %c0_i32, %c0_i32_0, %c0_i32_1 : i32, i32, i32, i32
  }
}

</mosaic_0001>

<bundles_post_ra>
// kernel: drab_forward.1
= control target key start
LH: loop header
LB: loop body
LE: loop exit
PB: predicated region body
PF: predicated region fallthrough
CT: control target
= control target key end

     0   :  { %s10194_s0 = inlined_call_operand.hbm [shape: f32[2,16,16,16], index: 0, kind: input, shape index: {}]   ;;  %s10195_s1 = inlined_call_operand.hbm [shape: f32[2,16,16,32], index: 1, kind: input, shape index: {}]   ;;  %s10196_s2 = inlined_call_operand.vmem [shape: bf16[144,16], index: 2, kind: input, shape index: {}]   ;;  %s10197_s3 = inlined_call_operand.vmem [shape: bf16[144,16], index: 3, kind: input, shape index: {}]   ;;  %s10198_s4 = inlined_call_operand.vmem [shape: bf16[144,32], index: 4, kind: input, shape index: {}]   ;;  %s10199_s5 = inlined_call_operand.vmem [shape: f32[32,1], index: 5, kind: input, shape index: {}]   ;;  %s10200_s6 = inlined_call_operand.vmem [shape: f32[32,2], index: 6, kind: input, shape index: {}]   ;;  %s10201_s7 = inlined_call_operand.vmem [shape: f32[2,32], index: 7, kind: input, shape index: {}]   ;;  %s10202_s8 = inlined_call_operand.vmem [shape: bf16[32,16], index: 8, kind: input, shape index: {}]   ;;  %s10203_s9 = inlined_call_operand.vmem [shape: f32[5], index: 9, kind: input, shape index: {}]   ;;  %s10204_s10 = inlined_call_operand.hbm [shape: f32[2,16,16,16], index: 10, kind: output, shape index: {0}]   ;;  %s10205_s11 = inlined_call_operand.hbm [shape: f32[2,16,16,32], index: 11, kind: output, shape index: {1}]  }
   0x1   :  { %10267 = sst [smem:[#allocation49_spill]] %s10203_s9 }
   0x2   :  { %10268 = sst [smem:[#allocation50_spill]] %s10204_s10 }
   0x3   :  { %10269 = sst [smem:[#allocation51_spill]] %s10205_s11 }
   0x4   :  { %17 = vsyncpa [#allocation3], 0 }
   0x5   :  { %19 = vsyncpa [#allocation3 + $0x1], 0 }
   0x6   :  { %20 = vsyncpa [#allocation7], 0 }
   0x7   :  { %22 = vsyncpa [#allocation7 + $0x1], 0 }
   0x8   :  { %23 = vsyncpa [#allocation5], 0 }
   0x9   :  { %24 = vsyncpa [#allocation4], 0 }
   0xa   :  { %26 = vsyncpa [#allocation4 + $0x1], 0 }
   0xb   :  { %27 = vsyncpa [#allocation11], 0 }
   0xc   :  { %29 = vsyncpa [#allocation11 + $0x1], 0  ;;  %s6824_s17 = smov 0   ;;  %s6826_s18 = smov 0  }
   0xd   :  { %s6828_s19 = smov 0   ;;  %s6830_s20 = smov 0  }
   0xe LB: > { %10270 = sst [smem:[#allocation17_spill]] %s6737_s17  ;;  %s6845_s21 = sadd.s32 4294967295, %s6749_s20   ;;  %s6749_s20 = sphi %s6830_s20, %s10347_s20   ;;  %s6745_s19 = sphi %s6828_s19, %s10349_s19   ;;  %s6741_s18 = sphi %s6826_s18, %s10351_s18   ;;  %s6737_s17 = sphi %s6824_s17, %s10350_s17  }
   0xf   : > { %10271 = sst [smem:[#allocation18_spill]] %s6745_s19  ;;  %s6065_s22 = sadd.s32 4294967294, %s6749_s20  }
  0x10   : > { %10272 = sst [smem:[#allocation19_spill]] %s6749_s20  ;;  %s6849_s23 = sadd.s32 1, %s6749_s20  }
  0x11   : > { %10273 = sst [smem:[#allocation20_spill]] %s6849_s23  ;;  %s42_s24 = sadd.s32 1, %s6745_s19 }
  0x12   : > { %s39_s25 = ssub.s32 %s6749_s20, %s6849_s23  ;;  %p49_p0 = scmp.ne.s32.totalorder %s6745_s19, %s6741_s18 }
  0x13   : > { %p40_p1 = scmp.eq.s32.totalorder %s39_s25, 0  ;;  %p50_p2 = scmp.eq.s32.totalorder %s6749_s20, 0 }
  0x14   : > { %p55_p3 = scmp.ne.s32.totalorder %s6741_s18, %s6737_s17  ;;  %p56_p4 = scmp.eq.s32.totalorder %s6845_s21, 0 }
  0x15   : > { %s6861_s26 = scalar_select %p40_p1, %s6745_s19, %s42_s24  }
  0x16   : > { %p6863_p5 = por %p50_p2, %p49_p0  ;;  %p6869_p6 = por %p56_p4, %p55_p3 }
  0x17   : > { %10274 = sst [smem:[#allocation21_spill]] %s6861_s26  ;;  %p273_p7 = scmp.eq.s32.totalorder %s6845_s21, 1 }
  0x18   : > { %p279_p8 = scmp.eq.s32.totalorder %s6065_s22, 1  ;;  %p6066_p9 = scmp.ge.s32.totalorder %s6749_s20, 1 }
  0x19   : > { %p312_p10 = scmp.lt.s32.totalorder %s6749_s20, 3  ;;  %p6876_p11 = por %p273_p7, %p49_p0 }
  0x1a   : > { %p6880_p12 = por %p279_p8, %p55_p3  ;;  %s10282_s9 = sld [smem:[#allocation49_spill]] }
  0x1b   : > { %s10277_s29 = scalar_select %p6876_p11, 1, 0 }
  0x1c   : > { %s10279_s30 = scalar_select %p6880_p12, 1, 0 }
  0x1d   : > { %10278 = sst [smem:[#allocation22_spill]] %s10277_s29  ;;  %p6884_p13 = pnand %p6066_p9, %p312_p10 }
  0x1e   : > { %10280 = sst [smem:[#allocation23_spill]] %s10279_s30  ;;  %p6383_p2 = scmp.lt.s32.totalorder %s6749_s20, 2 }
  0x1f   : > { %p6364_p1 = pneg %p6884_p13  ;;  %s6898_s16 = sand.u32 1, %s6745_s19  }
  0x20   : > { %s345_s15 = sshll.u32 %s10282_s9, 4  ;;  %p6902_p3 = pnand %p6383_p2, %p6863_p5  ;;  %s346_s15 = int_to_ptr.vmem [resolvable:$true] %s345_s15 }
  0x21   : > { %p6365_p7 = pnand %p6364_p1, %p56_p4  ;;  %s10212_s24 = sshll.u32 %s6898_s16, 8 }
  0x22   : > { %s6751_s25 = smov [#allocation8]   ;;  %s6309_s13 = sshll.u32 %s6749_s20, 8 }
  0x23   : > { %6367 = dma.vmem_to_smem (!%p6365_p7), %s346_s15, 16, %s6751_s25, [#allocation5]  }
  0x24   : > { %s360_s14 = scalar_lea.vmem [#allocation2], %s10212_s24  ;;  %s365_s27 = scalar_lea.hbm %s10194_s0, %s6309_s13 }
  0x25   : > { %s368_s9 = sshll.u32 %s360_s14, 4  ;;  %s366_s23 = sshll.u32 %s365_s27, 4  ;;  %s369_s9 = int_to_ptr.vmem [resolvable:$true] %s368_s9  ;;  %s367_s23 = int_to_ptr.hbm [resolvable:$true] %s366_s23 }
  0x26   : > { %s357_s30 = scalar_lea.sflag [#allocation3], %s6898_s16  ;;  %s6583_s17 = sshra.s32 %s367_s23, 4  ;;  %s6584_s17 = int_to_ptr.hbm [resolvable:$true] %s6583_s17 }
  0x27   : > { %s6585_s10 = scalar_lea.hbm %s6584_s17, 256  ;;  %p6587_p8 = pneg %p6902_p3 }
  0x28   : > { %p6586_p5 = scmp.ne.s32.totalorder %s6584_s17, %s6585_s10  ;;  %s6590_s14 = scalar_lea.hbm %s10194_s0, 512 }
  0x29   : > { %p6591_p1 = scmp.lt.s32.totalorder %s6584_s17, %s10194_s0  ;;  %p6592_p2 = scmp.lt.s32.totalorder %s6590_s14, %s6585_s10 }
  0x2a   : > { %p6588_p9 = pnand %p6587_p8, %p6586_p5 }
  0x2b   : > { %p6593_p7 = por %p6592_p2, %p6591_p1 }
  0x2c   : > { %p6589_p10 = pneg %p6588_p9 }
  0x2e   : > { %p6594_p0 = pnand %p6593_p7, %p6589_p10 }
  0x30   : > { %6597 = shalt.err (!%p6594_p0)
}
  0x31   : > { %s6752_s27 = smov 128   ;;  %s6753_s24 = smov 8  }
  0x32   : > { %6371 = dma.hbm_to_vmem [thread:$0]  (!%p6902_p3), %s367_s23, 4096, %s369_s9, %s357_s30, %s6752_s27, %s6752_s27, %s6753_s24  }
  0x33   : > { %s387_s15 = scalar_lea.hbm %s10195_s1, %s6309_s13  ;;  %s10284_s25 = sshll.u32 %s6898_s16, 8 }
  0x34   : > { %s382_s29 = scalar_lea.vmem [#allocation6], %s10284_s25  ;;  %s388_s17 = sshll.u32 %s387_s15, 4  ;;  %s389_s17 = int_to_ptr.hbm [resolvable:$true] %s388_s17 }
  0x35   : > { %s390_s19 = sshll.u32 %s382_s29, 4  ;;  %s379_s10 = scalar_lea.sflag [#allocation7], %s6898_s16  ;;  %s391_s19 = int_to_ptr.vmem [resolvable:$true] %s390_s19 }
  0x36   : > { %s6613_s14 = sshra.s32 %s389_s17, 4  ;;  %s6620_s11 = scalar_lea.hbm %s10195_s1, 512  ;;  %s6614_s14 = int_to_ptr.hbm [resolvable:$true] %s6613_s14 }
  0x37   : > { %s6615_s26 = scalar_lea.hbm %s6614_s14, 256  ;;  %p6621_p10 = scmp.lt.s32.totalorder %s6614_s14, %s10195_s1 }
  0x38   : > { %p6616_p0 = scmp.ne.s32.totalorder %s6614_s14, %s6615_s26  ;;  %p6622_p1 = scmp.lt.s32.totalorder %s6620_s11, %s6615_s26 }
  0x3a   : > { %p6618_p5 = pnand %p6616_p0, %p6587_p8  ;;  %p6623_p2 = por %p6622_p1, %p6621_p10 }
  0x3c   : > { %p6619_p9 = pneg %p6618_p5 }
  0x3e   : > { %p6624_p7 = pnand %p6623_p2, %p6619_p9 }
  0x40   : > { %6627 = shalt.err (!%p6624_p7)
}
  0x41   : > { %6374 = dma.hbm_to_vmem [thread:$0]  (!%p6902_p3), %s389_s17, 4096, %s391_s19, %s379_s10, %s6752_s27, %s6752_s27, %s6753_s24  }
  0x42   : > { %402 = sbr.rel (%p6884_p13) target bundleno = 2574 (0xa0e), region = 60 }
  0x47   : > { %s6947_s29 = sand.u32 1, %s6741_s18  }
  0x48   : > { %s6950_s16 = sshll.u32 %s6947_s29, 8  ;;  %s405_s13 = scalar_lea.sflag [#allocation3], %s6947_s29 }
  0x49   : > { %s6954_s15 = scalar_lea.vmem [#allocation2], %s6950_s16 }
  0x4a   : > { %6716 = dma.done.wait (%p6869_p6), %s405_s13, 4096  }
  0x4b   : > { %6718 = vsyncadd (%p6869_p6), %s405_s13, 4294963200  ;;  %s415_s12 = scalar_lea.sflag [#allocation7], %s6947_s29  ;;  %s6962_s22 = scalar_lea.vmem [#allocation6], %s6950_s16 }
  0x4c   : > { %6720 = dma.done.wait (%p6869_p6), %s415_s12, 4096  }
  0x4d   : > { %6722 = vsyncadd (%p6869_p6), %s415_s12, 4294963200 }
  0x4e   : > { %6724 = dma.done.wait (%p56_p4), [#allocation5], 16  }
  0x4f   : > { %6726 = vsyncadd (%p56_p4), [#allocation5], 4294967280 }
  0x50   : > { %429 = sfence }
  0x51   : > { %v477_v0 = vld [vmem:[%s6954_s15 + $0x10] sm:$0xff]  ;;  %v478_v1 = vld [vmem:[%s6954_s15 + $0x18] sm:$0xff]  ;;  %v475_v2 = vld [vmem:[%s6954_s15] sm:$0xff]  ;;  %vm990_vm0 = vcmask 1047552   ;;  %vm991_vm1 = vsmask.f32 7424 }
  0x52   : > { %v509_v3 = vpack.c.bf16 %v477_v0, %v477_v0  ;;  %v510_v4 = vpack.c.bf16 %v478_v1, %v478_v1  ;;  %v476_v5 = vld [vmem:[%s6954_s15 + $0x8] sm:$0xff]  ;;  %v507_v6 = vpack.c.bf16 %v475_v2, %v475_v2  ;;  %s6754_s28 = smov 16   ;;  %vm827_vm2 = vcmask 1040384   ;;  %v479_v20 = vld [vmem:[%s6954_s15 + $0x20] sm:$0xff]  ;;  %s6755_s24 = smov 64   ;;  %vm6987_vm4 = vmand %vm990_vm0, %vm991_vm1 }
  0x53   : > { %v508_v7 = vpack.c.bf16 %v476_v5, %v476_v5  ;;  %vm828_vm3 = vsmask.f32 256  ;;  %v480_v24 = vld [vmem:[%s6954_s15 + $0x28] sm:$0xff]  ;;  %v511_v34 = vpack.c.bf16 %v479_v20, %v479_v20  ;;  %s6756_s27 = smov 80   ;;  %s6757_s25 = smov 32   ;;  %v481_v50 = vld [vmem:[%s6954_s15 + $0x30] sm:$0xff] }
  0x54   : > { %v555_v8 = vunpack.c.l.b16 %v509_v3  ;;  %v667_v9 = vunpack.c.l.b16 %v510_v4  ;;  %v556_v10 = vunpack.c.l.b16 %v507_v6  ;;  %vm6992_vm5 = vmand %vm827_vm2, %vm828_vm3  ;;  %v512_v35 = vpack.c.bf16 %v480_v24, %v480_v24  ;;  %s6758_s19 = smov 48   ;;  %s6759_s17 = smov 96   ;;  %v482_v51 = vld [vmem:[%s6954_s15 + $0x38] sm:$0xff]  ;;  %v483_v5 = vld [vmem:[%s6954_s15 + $0x40] sm:$0xff] }
  0x55   : > { %v668_v11 = vunpack.c.l.b16 %v508_v7  ;;  %v557_v45 = vunpack.c.l.b16 %v511_v34  ;;  %s6760_s10 = smov 112   ;;  %v513_v55 = vpack.c.bf16 %v481_v50, %v481_v50  ;;  %v514_v56 = vpack.c.bf16 %v482_v51, %v482_v51  ;;  %v484_v6 = vld [vmem:[%s6954_s15 + $0x48] sm:$0xff]  ;;  %s1808_s14 = sld [smem:[#allocation8]] }
  0x56   : > { %v6976_v12 = vpack.c.b16 %v667_v9, %v555_v8  ;;  %v894_v13 = vpack.c.b16 %v667_v9, %v667_v9  ;;  %v572_v16 = vpack.c.b16 %v556_v10, %v556_v10  ;;  %v571_v38 = vpack.c.b16 %v555_v8, %v555_v8  ;;  %s8257_s13 = sld [smem:[#allocation8 + $0x1]]  ;;  %s9181_s9 = scalar_lea.vmem [#allocation10], %s6950_s16 }
  0x57   : > { %v684_v14 = vpack.c.b16 %v668_v11, %v556_v10  ;;  %v895_v15 = vpack.c.b16 %v668_v11, %v668_v11  ;;  %v669_v46 = vunpack.c.l.b16 %v512_v35  ;;  %v573_v52 = vpack.c.b16 %v557_v45, %v557_v45  ;;  %s6238_s26 = sld [smem:[#allocation8 + $0x2]]  ;;  %s5921_s11 = sshll.u32 %s9181_s9, 4  ;;  %s5922_s11 = int_to_ptr.vmem [resolvable:$true] %s5921_s11 }
  0x58   : > { %1009 = vrot.lane.b32.xlu0 %v6976_v12, %s6754_s28  ;;  %v700_v17 = vshrl.u32 %v6976_v12, 16  ;;  %v703_v18 = vshll.u32 %v6976_v12, 16  ;;  %v911_v19 = vshll.u32 %v894_v13, 16  ;;  %v591_v30 = vshrl.u32 %v572_v16, 16 }
  0x59   : > { %1132 = vrot.lane.b32.xlu1 %v684_v14, %s6755_s24  ;;  %v707_v21 = vshrl.u32 %v684_v14, 16  ;;  %v710_v22 = vshll.u32 %v684_v14, 16  ;;  %v915_v23 = vshll.u32 %v895_v15, 16  ;;  %v588_v43 = vshrl.u32 %v571_v38, 16 }
  0x5a   : > { %v846_v25 = vrot.slane %v703_v18, 1  ;;  %v913_v26 = vrot.slane %v911_v19, 4  ;;  %v702_v39 = vrot.slane %v700_v17, 7  ;;  %v685_v48 = vpack.c.b16 %v669_v46, %v557_v45  ;;  %v6318_v45 = vld [vmem:[%s10196_s2 + $0x38] sm:$0xff] }
  0x5b   : > { %v848_v27 = vrot.slane %v710_v22, 1  ;;  %v917_v28 = vrot.slane %v915_v23, 4  ;;  %v709_v31 = vrot.slane %v707_v21, 7  ;;  %v594_v57 = vshrl.u32 %v573_v52, 16  ;;  %1630 = vmatpush.bf16.msra.mxu0 %v6318_v45  ;;  %v6317_v52 = vld [vmem:[%s10196_s2 + $0x30] sm:$0xff] }
  0x5c   : > { %v847_v32 = vor.u32 %v846_v25, %v700_v17  ;;  %v705_v44 = vor.u32 %v703_v18, %v702_v39  ;;  %v714_v49 = vshrl.u32 %v685_v48, 16  ;;  %v717_v54 = vshll.u32 %v685_v48, 16 }
  0x5d   : > { %v849_v36 = vor.u32 %v848_v27, %v707_v21  ;;  %v712_v37 = vor.u32 %v710_v22, %v709_v31  ;;  %v558_v59 = vunpack.c.l.b16 %v513_v55  ;;  %v670_v60 = vunpack.c.l.b16 %v514_v56  ;;  %v485_v21 = vld [vmem:[%s6954_s15 + $0x50] sm:$0xff]  ;;  %v486_v22 = vld [vmem:[%s6954_s15 + $0x58] sm:$0xff]  ;;  %v487_v55 = vld [vmem:[%s6954_s15 + $0x60] sm:$0xff] }
  0x5e   : > { %v6998_v40 = vsel %vm6987_vm4, %v847_v32, %v913_v26  ;;  %v7013_v47 = vsel %vm6992_vm5, %v588_v43, %v705_v44  ;;  %v716_v53 = vrot.slane %v714_v49, 7  ;;  %v896_v61 = vpack.c.b16 %v669_v46, %v669_v46  ;;  %v488_v56 = vld [vmem:[%s6954_s15 + $0x68] sm:$0xff] }
  0x5f   : > { %v994_v41 = vsel %vm6987_vm4, %v849_v36, %v917_v28  ;;  %v7004_v42 = vsel %vm6992_vm5, %v591_v30, %v712_v37  ;;  %v7031_v63 = vpack.c.b16 %v670_v60, %v558_v59  ;;  %v850_v0 = vrot.slane %v717_v54, 1  ;;  %1631 = vmatpush.bf16.msra.mxu0 %v6317_v52 }
  0x60   : > { %1165 = vrot.lane.b32.xlu2 %v994_v41, %s6756_s27  ;;  %1054 = vrot.lane.b32.xlu0 %v6998_v40, %s6757_s25  ;;  %v719_v58 = vor.u32 %v717_v54, %v716_v53  ;;  %v919_v1 = vshll.u32 %v896_v61, 16  ;;  %v574_v7 = vpack.c.b16 %v558_v59, %v558_v59  ;;  %v515_v10 = vpack.c.bf16 %v483_v5, %v483_v5  ;;  %v6316_v59 = vld [vmem:[%s10196_s2 + $0x28] sm:$0xff]  ;;  %v6314_v5 = vld [vmem:[%s10196_s2 + $0x18] sm:$0xff] }
  0x61   : > { %1100 = vrot.lane.b32.xlu1 %v7004_v42, %s6758_s19  ;;  %v721_v2 = vshrl.u32 %v7031_v63, 16  ;;  %v851_v3 = vor.u32 %v850_v0, %v714_v49  ;;  %v724_v9 = vshll.u32 %v7031_v63, 16  ;;  %v516_v11 = vpack.c.bf16 %v484_v6, %v484_v6 }
  0x62   : > { %v7029_v62 = vsel %vm6992_vm5, %v594_v57, %v719_v58  ;;  %v921_v4 = vrot.slane %v919_v1, 4  ;;  %v597_v13 = vshrl.u32 %v574_v7, 16  ;;  %v559_v15 = vunpack.c.l.b16 %v515_v10  ;;  %v6313_v10 = vld [vmem:[%s10196_s2 + $0x10] sm:$0xff] }
  0x63   : > { %v723_v8 = vrot.slane %v721_v2, 7  ;;  %v671_v16 = vunpack.c.l.b16 %v516_v11  ;;  %v897_v20 = vpack.c.b16 %v670_v60, %v670_v60  ;;  %v852_v26 = vrot.slane %v724_v9, 1  ;;  %1632 = vmatpush.bf16.msra.mxu0 %v6316_v59  ;;  %v6319_v11 = vld [vmem:[%s10196_s2 + $0x40] sm:$0xff] }
  0x64   : > { %v575_v23 = vpack.c.b16 %v559_v15, %v559_v15  ;;  %v517_v28 = vpack.c.bf16 %v485_v21, %v485_v21  ;;  %v518_v30 = vpack.c.bf16 %v486_v22, %v486_v22  ;;  %v519_v60 = vpack.c.bf16 %v487_v55, %v487_v55  ;;  %1726 = vmatpush.bf16.msra.mxu1 %v6319_v11 }
  0x65   : > { %v7055_v18 = vpack.c.b16 %v671_v16, %v559_v15  ;;  %v923_v27 = vshll.u32 %v897_v20, 16  ;;  %v853_v34 = vor.u32 %v852_v26, %v721_v2  ;;  %v898_v43 = vpack.c.b16 %v671_v16, %v671_v16  ;;  %v489_v15 = vld [vmem:[%s6954_s15 + $0x70] sm:$0xff]  ;;  %v490_v16 = vld [vmem:[%s6954_s15 + $0x78] sm:$0xff]  ;;  %v6312_v20 = vld [vmem:[%s10196_s2 + $0x8] sm:$0xff] }
  0x66   : > { %v600_v31 = vshrl.u32 %v575_v23, 16  ;;  %v560_v36 = vunpack.c.l.b16 %v517_v28  ;;  %v672_v37 = vunpack.c.l.b16 %v518_v30  ;;  %v520_v61 = vpack.c.bf16 %v488_v56, %v488_v56 }
  0x67   : > { %v728_v19 = vshrl.u32 %v7055_v18, 16  ;;  %v731_v25 = vshll.u32 %v7055_v18, 16  ;;  %v925_v35 = vrot.slane %v923_v27, 4  ;;  %v561_v1 = vunpack.c.l.b16 %v519_v60 }
  0x68   : > { %1197 = vrot.lane.b32.xlu2 %v7013_v47, %s6759_s17  ;;  %1227 = vrot.lane.b32.xlu0 %v6976_v12, %s6760_s10  ;;  %v576_v49 = vpack.c.b16 %v560_v36, %v560_v36  ;;  %v673_v2 = vunpack.c.l.b16 %v520_v61  ;;  %vm1257_vm6 = vcmask 130048   ;;  %v521_v22 = vpack.c.bf16 %v489_v15, %v489_v15 }
  0x69   : > { %1011 = vrot.lane.b32.xlu1 %v684_v14, %s6754_s28  ;;  %v726_v14 = vor.u32 %v724_v9, %v723_v8  ;;  %v730_v24 = vrot.slane %v728_v19, 7  ;;  %v7078_v39 = vsel %vm6987_vm4, %v853_v34, %v925_v35  ;;  %v854_v46 = vrot.slane %v731_v25, 1  ;;  %6117 = vmatmul.msk.bf16.vlgmr.msra.gmra.mxu1 %vm1257_vm6, %v6998_v40 }
  0x6a   : > { %v603_v57 = vshrl.u32 %v576_v49, 16  ;;  %v7127_v6 = vpack.c.b16 %v673_v2, %v561_v1  ;;  %v522_v23 = vpack.c.bf16 %v490_v16, %v490_v16  ;;  %v562_v28 = vunpack.c.l.b16 %v521_v22 }
  0x6b   : > { %v7053_v17 = vsel %vm6992_vm5, %v597_v13, %v726_v14  ;;  %v733_v32 = vor.u32 %v731_v25, %v730_v24  ;;  %v855_v53 = vor.u32 %v854_v46, %v728_v19  ;;  %v6311_v25 = vld [vmem:[%s10196_s2] sm:$0xff]  ;;  %v900_v35 = vpack.c.b16 %v673_v2, %v673_v2 }
  0x6c   : > { %v742_v9 = vshrl.u32 %v7127_v6, 16  ;;  %v745_v21 = vshll.u32 %v7127_v6, 16  ;;  %v674_v30 = vunpack.c.l.b16 %v522_v23  ;;  %vm1303_vm7 = vcmask 261120  }
  0x6d   : > { %v7074_v38 = vsel %vm6992_vm5, %v600_v31, %v733_v32  ;;  %v935_v49 = vshll.u32 %v900_v35, 16  ;;  %vm1334_vm8 = vcmask 392192   ;;  %vm1367_vm9 = vcmask 523264  }
  0x6e   : > { %v744_v19 = vrot.slane %v742_v9, 7  ;;  %v7167_v32 = vpack.c.b16 %v674_v30, %v562_v28  ;;  %vm1400_vm10 = vcmask 654336   ;;  %vm1433_vm11 = vcmask 785408  }
  0x6f   : > { %vm1465_vm12 = vcmask 916480  }
  0x70   : > { %1056 = vrot.lane.b32.xlu2 %v994_v41, %s6757_s25  ;;  %1102 = vrot.lane.b32.xlu0 %v7013_v47, %s6758_s19  ;;  %v7080_v41 = vpack.c.b16 %v672_v37, %v560_v36  ;;  %v747_v27 = vor.u32 %v745_v21, %v744_v19  ;;  %v749_v34 = vshrl.u32 %v7167_v32, 16  ;;  %v752_v46 = vshll.u32 %v7167_v32, 16 }
  0x71   : > { %1134 = vrot.lane.b32.xlu1 %v6976_v12, %s6755_s24  ;;  %v7044_v12 = vsel %vm6987_vm4, %v851_v3, %v921_v4  ;;  %v6315_v3 = vld [vmem:[%s10196_s2 + $0x20] sm:$0xff]  ;;  %v899_v4 = vpack.c.b16 %v672_v37, %v672_v37 }
  0x72   : > { %v735_v44 = vshrl.u32 %v7080_v41, 16  ;;  %v738_v51 = vshll.u32 %v7080_v41, 16  ;;  %1633 = vmatpush.bf16.msra.mxu0 %v6315_v3  ;;  %v491_v37 = vld [vmem:[%s6954_s15 + $0x80] sm:$0xff]  ;;  %v751_v45 = vrot.slane %v749_v34, 7  ;;  %v860_v11 = vrot.slane %v752_v46, 1 }
  0x73   : > { %v931_v8 = vshll.u32 %v899_v4, 16 }
  0x74   : > { %v737_v50 = vrot.slane %v735_v44, 7  ;;  %v856_v7 = vrot.slane %v738_v51, 1  ;;  %v754_v52 = vor.u32 %v752_v46, %v751_v45 }
  0x75   : > { %v933_v14 = vrot.slane %v931_v8, 4 }
  0x76   : > { %v740_v58 = vor.u32 %v738_v51, %v737_v50  ;;  %1634 = vmatpush.bf16.msra.mxu0 %v6314_v5  ;;  %v857_v13 = vor.u32 %v856_v7, %v735_v44  ;;  %v578_v44 = vpack.c.b16 %v562_v28, %v562_v28  ;;  %v523_v50 = vpack.c.bf16 %v491_v37, %v491_v37 }
  0x78   : > { %1167 = vrot.lane.b32.xlu2 %v6998_v40, %s6756_s27  ;;  %1199 = vrot.lane.b32.xlu0 %v7029_v62, %s6759_s17  ;;  %v7113_v0 = vsel %vm6992_vm5, %v603_v57, %v740_v58  ;;  %v7150_v24 = vsel %vm6987_vm4, %v857_v13, %v933_v14  ;;  %v563_v57 = vunpack.c.l.b16 %v523_v50 }
  0x79   : > { %1229 = vrot.lane.b32.xlu1 %v685_v48, %s6760_s10  ;;  %6118 = vmatmul.msk.bf16.gmra.mxu1 %vm1257_vm6, %v7044_v12 }
  0x7a   : > { %1635 = vmatpush.bf16.msra.mxu0 %v6313_v10  ;;  %v579_v14 = vpack.c.b16 %v563_v57, %v563_v57 }
  0x7e   : > { %1636 = vmatpush.bf16.msra.mxu0 %v6312_v20 }
  0x80   : > { %1104 = vrot.lane.b32.xlu2 %v7029_v62, %s6758_s19  ;;  %1136 = vrot.lane.b32.xlu0 %v685_v48, %s6755_s24 }
  0x81   : > { %1169 = vrot.lane.b32.xlu1 %v7044_v12, %s6756_s27 }
  0x82   : > { %1637 = vmatpush.bf16.msra.mxu0 %v6311_v25  ;;  %v493_v25 = vld [vmem:[%s6954_s15 + $0x90] sm:$0xff] }
  0x88   : > { %1231 = vrot.lane.b32.xlu0 %v7031_v63, %s6760_s10  ;;  %1201 = vrot.lane.b32.xlu2 %v7053_v17, %s6759_s17 }
  0x89   : > { %1013 = vrot.lane.b32.xlu1 %v685_v48, %s6754_s28  ;;  %v927_v48 = vshll.u32 %v898_v43, 16  ;;  %v492_v43 = vld [vmem:[%s6954_s15 + $0x88] sm:$0xff]  ;;  %6119 = vmatmul.msk.bf16.gmra.mxu1 %vm1257_vm6, %v7078_v39 }
  0x8a   : > { %v524_v51 = vpack.c.bf16 %v492_v43, %v492_v43 }
  0x8b   : > { %v929_v54 = vrot.slane %v927_v48, 4  ;;  %v858_v48 = vrot.slane %v745_v21, 1 }
  0x8c   : > { %v7187_v58 = vunpack.c.l.b16 %v524_v51 }
  0x8e   : > { %v7198_v61 = vpack.c.b16 %v7187_v58, %v563_v57  ;;  %v902_v45 = vpack.c.b16 %v7187_v58, %v7187_v58 }
  0x90   : > { %1106 = vrot.lane.b32.xlu0 %v7053_v17, %s6758_s19  ;;  %1058 = vrot.lane.b32.xlu2 %v7044_v12, %s6757_s25  ;;  %v756_v5 = vshrl.u32 %v7198_v61, 16  ;;  %v943_v51 = vshll.u32 %v902_v45, 16 }
  0x91   : > { %1138 = vrot.lane.b32.xlu1 %v7031_v63, %s6755_s24 }
  0x92   : > { %v758_v15 = vrot.slane %v756_v5, 7  ;;  %v945_v58 = vrot.slane %v943_v51, 4 }
  0x98   : > { %1203 = vrot.lane.b32.xlu0 %v7074_v38, %s6759_s17  ;;  %1171 = vrot.lane.b32.xlu2 %v7078_v39, %s6756_s27 }
  0x99   : > { %1233 = vrot.lane.b32.xlu1 %v7055_v18, %s6760_s10 }
  0xa0   : > { %1060 = vrot.lane.b32.xlu0 %v7078_v39, %s6757_s25  ;;  %1015 = vrot.lane.b32.xlu2 %v7031_v63, %s6754_s28  ;;  %v7109_v63 = vsel %vm6987_vm4, %v855_v53, %v929_v54  ;;  %v859_v53 = vor.u32 %v858_v48, %v742_v9  ;;  %v937_v54 = vrot.slane %v935_v49, 4  ;;  %v612_v39 = vshrl.u32 %v579_v14, 16 }
  0xa1   : > { %1108 = vrot.lane.b32.xlu1 %v7074_v38, %s6758_s19  ;;  %6120 = vmatmul.msk.bf16.gmra.mxu1 %vm1257_vm6, %v7109_v63 }
  0xa2   : > { %v7195_v60 = vsel %vm6987_vm4, %v859_v53, %v937_v54  ;;  %v495_v53 = vld [vmem:[%s6954_s15 + $0xa0] sm:$0xff]  ;;  %v496_v54 = vld [vmem:[%s6954_s15 + $0xa8] sm:$0xff] }
  0xa8   : > { %1173 = vrot.lane.b32.xlu0 %v7109_v63, %s6756_s27  ;;  %1140 = vrot.lane.b32.xlu2 %v7055_v18, %s6755_s24 }
  0xa9   : > { %1205 = vrot.lane.b32.xlu1 %v7113_v0, %s6759_s17 }
  0xb0   : > { %1017 = vrot.lane.b32.xlu0 %v7055_v18, %s6754_s28  ;;  %1235 = vrot.lane.b32.xlu2 %v7080_v41, %s6760_s10  ;;  %v577_v18 = vpack.c.b16 %v561_v1, %v561_v1  ;;  %v901_v1 = vpack.c.b16 %v674_v30, %v674_v30  ;;  %v525_v30 = vpack.c.bf16 %v493_v25, %v493_v25 }
  0xb1   : > { %1062 = vrot.lane.b32.xlu1 %v7109_v63, %s6757_s25  ;;  %6121 = vmatmul.msk.bf16.gmra.mxu1 %vm1257_vm6, %v7150_v24 }
  0xb2   : > { %v606_v26 = vshrl.u32 %v577_v18, 16  ;;  %v939_v13 = vshll.u32 %v901_v1, 16  ;;  %v861_v18 = vor.u32 %v860_v11, %v749_v34 }
  0xb4   : > { %v7165_v31 = vsel %vm6992_vm5, %v606_v26, %v747_v27  ;;  %v941_v19 = vrot.slane %v939_v13, 4  ;;  %v494_v26 = vld [vmem:[%s6954_s15 + $0x98] sm:$0xff] }
  0xb8   : > { %1142 = vrot.lane.b32.xlu0 %v7080_v41, %s6755_s24  ;;  %1110 = vrot.lane.b32.xlu2 %v7113_v0, %s6758_s19 }
  0xb9   : > { %1175 = vrot.lane.b32.xlu1 %v7150_v24, %s6756_s27 }
  0xba   : > { %v1166_v40 = vpop.permute.xlu2 %1165 }
  0xc0   : > { %1237 = vrot.lane.b32.xlu0 %v7127_v6, %s6760_s10  ;;  %1207 = vrot.lane.b32.xlu2 %v7165_v31, %s6759_s17 }
  0xc1   : > { %1019 = vrot.lane.b32.xlu1 %v7080_v41, %s6754_s28  ;;  %v609_v41 = vshrl.u32 %v578_v44, 16  ;;  %6122 = vmatmul.msk.bf16.gmra.mxu1 %vm1257_vm6, %v7195_v60 }
  0xc2   : > { %v1198_v36 = vpop.permute.xlu2 %1197 }
  0xc3   : > { %v7191_v12 = vsel %vm6992_vm5, %v609_v41, %v754_v52 }
  0xc8   : > { %1112 = vrot.lane.b32.xlu0 %v7165_v31, %s6758_s19  ;;  %1064 = vrot.lane.b32.xlu2 %v7150_v24, %s6757_s25 }
  0xc9   : > { %1144 = vrot.lane.b32.xlu1 %v7127_v6, %s6755_s24 }
  0xca   : > { %v1057_v55 = vpop.permute.xlu2 %1056  ;;  %v1010_v56 = vpop.permute.xlu0 %1009 }
  0xcb   : > { %v1133_v59 = vpop.permute.xlu1 %1132  ;;  %v1260_v2 = vsel %vm1257_vm6, %v7013_v47, %v1010_v56  ;;  %v759_v47 = vshll.u32 %v7198_v61, 16 }
  0xcd   : > { %v761_v23 = vor.u32 %v759_v47, %v758_v15  ;;  %v862_v50 = vrot.slane %v759_v47, 1 }
  0xcf   : > { %v7235_v34 = vsel %vm6992_vm5, %v612_v39, %v761_v23  ;;  %v863_v63 = vor.u32 %v862_v50, %v756_v5 }
  0xd0   : > { %1209 = vrot.lane.b32.xlu0 %v7191_v12, %s6759_s17  ;;  %1177 = vrot.lane.b32.xlu2 %v7195_v60, %s6756_s27 }
  0xd1   : > { %1239 = vrot.lane.b32.xlu1 %v7167_v32, %s6760_s10  ;;  %v7272_v11 = vsel %vm6987_vm4, %v863_v63, %v945_v58 }
  0xd2   : > { %v1168_v3 = vpop.permute.xlu2 %1167  ;;  %v1055_v4 = vpop.permute.xlu0 %1054 }
  0xd3   : > { %v7210_v7 = vsel %vm1303_vm7, %v1260_v2, %v1055_v4  ;;  %v1101_v8 = vpop.permute.xlu1 %1100  ;;  %v527_v2 = vpack.c.bf16 %v495_v53, %v495_v53  ;;  %v528_v4 = vpack.c.bf16 %v496_v54, %v496_v54 }
  0xd4   : > { %v1336_v9 = vsel %vm1334_vm8, %v7210_v7, %v1101_v8 }
  0xd5   : > { %v1369_v10 = vsel %vm1367_vm9, %v1336_v9, %v1133_v59  ;;  %v7278_v5 = vunpack.c.l.b16 %v528_v4 }
  0xd6   : > { %v1402_v16 = vsel %vm1400_vm10, %v1369_v10, %v1166_v40  ;;  %v526_v40 = vpack.c.bf16 %v494_v26, %v494_v26 }
  0xd7   : > { %v1435_v22 = vsel %vm1433_vm11, %v1402_v16, %v1198_v36  ;;  %v564_v36 = vunpack.c.l.b16 %v525_v30  ;;  %v498_v30 = vld [vmem:[%s6954_s15 + $0xb8] sm:$0xff] }
  0xd8   : > { %1066 = vrot.lane.b32.xlu0 %v7195_v60, %s6757_s25  ;;  %1021 = vrot.lane.b32.xlu2 %v7127_v6, %s6754_s28  ;;  %v7231_v6 = vsel %vm6987_vm4, %v861_v18, %v941_v19  ;;  %v7245_v37 = vunpack.c.l.b16 %v526_v40 }
  0xd9   : > { %1114 = vrot.lane.b32.xlu1 %v7191_v12, %s6758_s19  ;;  %v580_v8 = vpack.c.b16 %v564_v36, %v564_v36  ;;  %6123 = vmatmul.msk.bf16.gmra.mxu1 %vm1257_vm6, %v7231_v6 }
  0xda   : > { %v1105_v20 = vpop.permute.xlu2 %1104  ;;  %v1228_v21 = vpop.permute.xlu0 %1227  ;;  %v7252_v49 = vpack.c.b16 %v7245_v37, %v564_v36 }
  0xdb   : > { %v1012_v27 = vpop.permute.xlu1 %1011  ;;  %v1467_v28 = vsel %vm1465_vm12, %v1435_v22, %v1228_v21  ;;  %v615_v13 = vshrl.u32 %v580_v8, 16  ;;  %v1340_v16 = vsel %vm1334_vm8, %v7210_v7, %v1105_v20  ;;  %v903_v20 = vpack.c.b16 %v7245_v37, %v7245_v37 }
  0xdc   : > { %1638 = vmatmul.bf16.vlgmr.msra.gmra.mxu0 %v1467_v28  ;;  %v1263_v35 = vsel %vm1257_vm6, %v7004_v42, %v1012_v27  ;;  %v763_v52 = vshrl.u32 %v7252_v49, 16  ;;  %v766_v10 = vshll.u32 %v7252_v49, 16  ;;  %v497_v28 = vld [vmem:[%s6954_s15 + $0xb0] sm:$0xff] }
  0xdd   : > { %v1307_v42 = vsel %vm1303_vm7, %v1263_v35, %v1057_v55  ;;  %v947_v45 = vshll.u32 %v903_v20, 16  ;;  %v529_v37 = vpack.c.bf16 %v497_v28, %v497_v28 }
  0xde   : > { %v765_v9 = vrot.slane %v763_v52, 7 }
  0xdf   : > { %v949_v50 = vrot.slane %v947_v45, 4  ;;  %v566_v53 = vunpack.c.l.b16 %v529_v37 }
  0xe0   : > { %1179 = vrot.lane.b32.xlu0 %v7231_v6, %s6756_s27  ;;  %1146 = vrot.lane.b32.xlu2 %v7167_v32, %s6755_s24  ;;  %v768_v14 = vor.u32 %v766_v10, %v765_v9 }
  0xe1   : > { %1211 = vrot.lane.b32.xlu1 %v7235_v34, %s6759_s17 }
  0xe2   : > { %v1103_v43 = vpop.permute.xlu0 %1102  ;;  %v1202_v44 = vpop.permute.xlu2 %1201  ;;  %v7290_v22 = vsel %vm6992_vm5, %v615_v13, %v768_v14  ;;  %v582_v13 = vpack.c.b16 %v566_v53, %v566_v53 }
  0xe3   : > { %v1135_v46 = vpop.permute.xlu1 %1134  ;;  %v1338_v48 = vsel %vm1334_vm8, %v1307_v42, %v1103_v43  ;;  %v864_v43 = vrot.slane %v766_v10, 1  ;;  %v530_v42 = vpack.c.bf16 %v498_v30, %v498_v30 }
  0xe4   : > { %v1371_v41 = vsel %vm1367_vm9, %v1338_v48, %v1135_v46 }
  0xe5   : > { %v1404_v56 = vsel %vm1400_vm10, %v1371_v41, %v1168_v3  ;;  %v565_v3 = vunpack.c.l.b16 %v527_v2  ;;  %v865_v48 = vor.u32 %v864_v43, %v763_v52  ;;  %v678_v54 = vunpack.c.l.b16 %v530_v42 }
  0xe7   : > { %v7286_v21 = vpack.c.b16 %v7278_v5, %v565_v3  ;;  %v581_v40 = vpack.c.b16 %v565_v3, %v565_v3  ;;  %v7326_v58 = vsel %vm6987_vm4, %v865_v48, %v949_v50  ;;  %v905_v43 = vpack.c.b16 %v678_v54, %v678_v54  ;;  %v501_v50 = vld [vmem:[%s6954_s15 + $0xd0] sm:$0xff] }
  0xe8   : > { %1023 = vrot.lane.b32.xlu0 %v7167_v32, %s6754_s28  ;;  %1241 = vrot.lane.b32.xlu2 %v7198_v61, %s6760_s10 }
  0xe9   : > { %1068 = vrot.lane.b32.xlu1 %v7231_v6, %s6757_s25  ;;  %v770_v7 = vshrl.u32 %v7286_v21, 16  ;;  %v618_v46 = vshrl.u32 %v581_v40, 16  ;;  %6124 = vmatmul.msk.bf16.gmra.mxu1 %vm1257_vm6, %v7272_v11 }
  0xea   : > { %v1200_v55 = vpop.permute.xlu0 %1199  ;;  %v1059_v57 = vpop.permute.xlu2 %1058 }
  0xeb   : > { %v1437_v59 = vsel %vm1433_vm11, %v1404_v56, %v1200_v55  ;;  %v1230_v1 = vpop.permute.xlu1 %1229  ;;  %v772_v35 = vrot.slane %v770_v7, 7 }
  0xec   : > { %v1470_v32 = vsel %vm1465_vm12, %v1437_v59, %v1230_v1  ;;  %v7328_v59 = vpack.c.b16 %v678_v54, %v566_v53  ;;  %v904_v1 = vpack.c.b16 %v7278_v5, %v7278_v5 }
  0xed   : > { %1643 = vmatmul.bf16.gmra.mxu0 %v1470_v32 }
  0xee   : > { %v777_v4 = vshrl.u32 %v7328_v59, 16  ;;  %v951_v3 = vshll.u32 %v904_v1, 16 }
  0xf0   : > { %1148 = vrot.lane.b32.xlu0 %v7198_v61, %s6755_s24  ;;  %1116 = vrot.lane.b32.xlu2 %v7235_v34, %s6758_s19  ;;  %v779_v14 = vrot.slane %v777_v4, 7 }
  0xf1   : > { %1181 = vrot.lane.b32.xlu1 %v7272_v11, %s6756_s27 }
  0xf2   : > { %v1137_v15 = vpop.permute.xlu0 %1136  ;;  %v1172_v47 = vpop.permute.xlu2 %1171 }
  0xf3   : > { %v1170_v18 = vpop.permute.xlu1 %1169  ;;  %v1373_v19 = vsel %vm1367_vm9, %v1340_v16, %v1137_v15  ;;  %v780_v15 = vshll.u32 %v7328_v59, 16  ;;  %v953_v16 = vrot.slane %v951_v3, 4 }
  0xf4   : > { %v1406_v39 = vsel %vm1400_vm10, %v1373_v19, %v1170_v18 }
  0xf5   : > { %v1439_v25 = vsel %vm1433_vm11, %v1406_v39, %v1202_v44  ;;  %v621_v39 = vshrl.u32 %v582_v13, 16  ;;  %v782_v20 = vor.u32 %v780_v15, %v779_v14 }
  0xf8   : > { %1243 = vrot.lane.b32.xlu0 %v7252_v49, %s6760_s10  ;;  %1213 = vrot.lane.b32.xlu2 %v7290_v22, %s6759_s17 }
  0xf9   : > { %1025 = vrot.lane.b32.xlu1 %v7198_v61, %s6754_s28  ;;  %v773_v61 = vshll.u32 %v7286_v21, 16  ;;  %6125 = vmatmul.msk.bf16.gmra.mxu1 %vm1257_vm6, %v7326_v58 }
  0xfa   : > { %v1232_v23 = vpop.permute.xlu0 %1231  ;;  %v1016_v24 = vpop.permute.xlu2 %1015 }
  0xfb   : > { %v1014_v26 = vpop.permute.xlu1 %1013  ;;  %v1473_v27 = vsel %vm1465_vm12, %v1439_v25, %v1232_v23  ;;  %v866_v10 = vrot.slane %v773_v61, 1  ;;  %v1269_v5 = vsel %vm1257_vm6, %v7053_v17, %v1016_v24  ;;  %v499_v23 = vld [vmem:[%s6954_s15 + $0xc0] sm:$0xff]  ;;  %v500_v25 = vld [vmem:[%s6954_s15 + $0xc8] sm:$0xff] }
  0xfc   : > { %v1266_v36 = vsel %vm1257_vm6, %v7029_v62, %v1014_v26  ;;  %v775_v62 = vor.u32 %v773_v61, %v772_v35  ;;  %v532_v28 = vpack.c.bf16 %v500_v25, %v500_v25 }
  0xfd   : > { %1648 = vmatmul.bf16.gmra.mxu0 %v1473_v27  ;;  %v1309_v44 = vsel %vm1303_vm7, %v1266_v36, %v1059_v57 }
  0xfe   : > { %v7322_v57 = vsel %vm6992_vm5, %v618_v46, %v775_v62  ;;  %v7374_v35 = vunpack.c.l.b16 %v532_v28  ;;  %v868_v46 = vrot.slane %v780_v15, 1  ;;  %v955_v62 = vshll.u32 %v905_v43, 16 }
 0x100   : > { %1118 = vrot.lane.b32.xlu0 %v7290_v22, %s6758_s19  ;;  %1070 = vrot.lane.b32.xlu2 %v7272_v11, %s6757_s25  ;;  %v869_v54 = vor.u32 %v868_v46, %v777_v4 }
 0x101   : > { %1150 = vrot.lane.b32.xlu1 %v7252_v49, %s6755_s24 }
 0x102   : > { %v1107_v51 = vpop.permute.xlu0 %1106  ;;  %v1141_v41 = vpop.permute.xlu2 %1140 }
 0x103   : > { %v1342_v55 = vsel %vm1334_vm8, %v1309_v44, %v1107_v51  ;;  %v1139_v56 = vpop.permute.xlu1 %1138  ;;  %v502_v51 = vld [vmem:[%s6954_s15 + $0xd8] sm:$0xff] }
 0x104   : > { %v1375_v63 = vsel %vm1367_vm9, %v1342_v55, %v1139_v56  ;;  %v957_v55 = vrot.slane %v955_v62, 4 }
 0x105   : > { %v1408_v52 = vsel %vm1400_vm10, %v1375_v63, %v1172_v47  ;;  %v867_v47 = vor.u32 %v866_v10, %v770_v7  ;;  %v7363_v7 = vsel %vm6992_vm5, %v621_v39, %v782_v20  ;;  %v906_v39 = vpack.c.b16 %v7374_v35, %v7374_v35 }
 0x107   : > { %v7359_v27 = vsel %vm6987_vm4, %v867_v47, %v953_v16 }
 0x108   : > { %1215 = vrot.lane.b32.xlu0 %v7322_v57, %s6759_s17  ;;  %1183 = vrot.lane.b32.xlu2 %v7326_v58, %s6756_s27 }
 0x109   : > { %1245 = vrot.lane.b32.xlu1 %v7286_v21, %s6760_s10  ;;  %6126 = vmatmul.msk.bf16.gmra.mxu1 %vm1257_vm6, %v7359_v27 }
 0x10a   : > { %v1204_v32 = vpop.permute.xlu0 %1203  ;;  %v1236_v2 = vpop.permute.xlu2 %1235 }
 0x10b   : > { %v1441_v60 = vsel %vm1433_vm11, %v1408_v52, %v1204_v32  ;;  %v1234_v8 = vpop.permute.xlu1 %1233  ;;  %v533_v52 = vpack.c.bf16 %v501_v50, %v501_v50 }
 0x10c   : > { %v1476_v9 = vsel %vm1465_vm12, %v1441_v60, %v1234_v8  ;;  %v7397_v8 = vsel %vm6987_vm4, %v869_v54, %v957_v55 }
 0x10d   : > { %1653 = vmatmul.bf16.gmra.mxu0 %v1476_v9  ;;  %v568_v4 = vunpack.c.l.b16 %v533_v52 }
 0x110   : > { %1072 = vrot.lane.b32.xlu0 %v7326_v58, %s6757_s25  ;;  %1027 = vrot.lane.b32.xlu2 %v7252_v49, %s6754_s28  ;;  %v531_v49 = vpack.c.bf16 %v499_v23, %v499_v23 }
 0x111   : > { %1120 = vrot.lane.b32.xlu1 %v7322_v57, %s6758_s19 }
 0x112   : > { %v1061_v18 = vpop.permute.xlu0 %1060  ;;  %v1111_v19 = vpop.permute.xlu2 %1110  ;;  %v567_v40 = vunpack.c.l.b16 %v531_v49  ;;  %v584_v49 = vpack.c.b16 %v568_v4, %v568_v4 }
 0x113   : > { %v1311_v26 = vsel %vm1303_vm7, %v1269_v5, %v1061_v18  ;;  %v1109_v17 = vpop.permute.xlu1 %1108 }
 0x114   : > { %v1344_v24 = vsel %vm1334_vm8, %v1311_v26, %v1109_v17  ;;  %v7380_v44 = vpack.c.b16 %v7374_v35, %v567_v40  ;;  %v583_v32 = vpack.c.b16 %v567_v40, %v567_v40  ;;  %v503_v17 = vld [vmem:[%s6954_s15 + $0xe0] sm:$0xff] }
 0x115   : > { %v1377_v30 = vsel %vm1367_vm9, %v1344_v24, %v1141_v41  ;;  %v504_v24 = vld [vmem:[%s6954_s15 + $0xe8] sm:$0xff] }
 0x116   : > { %v784_v48 = vshrl.u32 %v7380_v44, 16  ;;  %v787_v60 = vshll.u32 %v7380_v44, 16  ;;  %v624_v10 = vshrl.u32 %v583_v32, 16  ;;  %v536_v43 = vpack.c.bf16 %v504_v24, %v504_v24 }
 0x118   : > { %1185 = vrot.lane.b32.xlu0 %v7359_v27, %s6756_s27  ;;  %1152 = vrot.lane.b32.xlu2 %v7286_v21, %s6755_s24  ;;  %v681_v50 = vunpack.c.l.b16 %v536_v43 }
 0x119   : > { %1217 = vrot.lane.b32.xlu1 %v7363_v7, %s6759_s17  ;;  %6127 = vmatmul.msk.bf16.gmra.mxu1 %vm1257_vm6, %v7397_v8 }
 0x11a   : > { %v1174_v36 = vpop.permute.xlu0 %1173  ;;  %v1208_v61 = vpop.permute.xlu2 %1207  ;;  %v908_v24 = vpack.c.b16 %v681_v50, %v681_v50 }
 0x11b   : > { %v1410_v6 = vsel %vm1400_vm10, %v1377_v30, %v1174_v36  ;;  %v1206_v45 = vpop.permute.xlu1 %1205  ;;  %v870_v36 = vrot.slane %v787_v60, 1 }
 0x11c   : > { %v1443_v37 = vsel %vm1433_vm11, %v1410_v6, %v1206_v45 }
 0x11d   : > { %v1479_v42 = vsel %vm1465_vm12, %v1443_v37, %v1236_v2  ;;  %v786_v2 = vrot.slane %v784_v48, 7  ;;  %v871_v45 = vor.u32 %v870_v36, %v784_v48 }
 0x11e   : > { %1658 = vmatmul.bf16.gmra.mxu0 %v1479_v42 }
 0x11f   : > { %v789_v3 = vor.u32 %v787_v60, %v786_v2  ;;  %v1728_v2 = vpop.f32.mrf.mxu1 }
 0x120   : > { %1029 = vrot.lane.b32.xlu0 %v7286_v21, %s6754_s28  ;;  %1247 = vrot.lane.b32.xlu2 %v7328_v59, %s6760_s10  ;;  %v534_v21 = vpack.c.bf16 %v502_v51, %v502_v51 }
 0x121   : > { %1074 = vrot.lane.b32.xlu1 %v7359_v27, %s6757_s25  ;;  %v7417_v16 = vsel %vm6992_vm5, %v624_v10, %v789_v3 }
 0x122   : > { %v1018_v41 = vpop.permute.xlu0 %1017  ;;  %v1065_v53 = vpop.permute.xlu2 %1064  ;;  %v7406_v9 = vunpack.c.l.b16 %v534_v21 }
 0x123   : > { %v1272_v56 = vsel %vm1257_vm6, %v7074_v38, %v1018_v41  ;;  %v1063_v63 = vpop.permute.xlu1 %1062 }
 0x124   : > { %v1313_v1 = vsel %vm1303_vm7, %v1272_v56, %v1063_v63  ;;  %v7412_v5 = vpack.c.b16 %v7406_v9, %v568_v4  ;;  %v907_v56 = vpack.c.b16 %v7406_v9, %v7406_v9 }
 0x125   : > { %v1346_v38 = vsel %vm1334_vm8, %v1313_v1, %v1111_v19 }
 0x126   : > { %v791_v19 = vshrl.u32 %v7412_v5, 16  ;;  %v794_v40 = vshll.u32 %v7412_v5, 16  ;;  %v963_v4 = vshll.u32 %v907_v56, 16 }
 0x128   : > { %1154 = vrot.lane.b32.xlu0 %v7328_v59, %s6755_s24  ;;  %1122 = vrot.lane.b32.xlu2 %v7363_v7, %s6758_s19  ;;  %v793_v28 = vrot.slane %v791_v19, 7 }
 0x129   : > { %1187 = vrot.lane.b32.xlu1 %v7397_v8, %s6756_s27 }
 0x12a   : > { %v1143_v13 = vpop.permute.xlu0 %1142  ;;  %v1178_v14 = vpop.permute.xlu2 %1177  ;;  %v796_v6 = vor.u32 %v794_v40, %v793_v28 }
 0x12b   : > { %v1379_v11 = vsel %vm1367_vm9, %v1346_v38, %v1143_v13  ;;  %v1176_v15 = vpop.permute.xlu1 %1175  ;;  %v872_v38 = vrot.slane %v794_v40, 1 }
 0x12c   : > { %v1412_v47 = vsel %vm1400_vm10, %v1379_v11, %v1176_v15  ;;  %v965_v11 = vrot.slane %v963_v4, 4 }
 0x12d   : > { %v1445_v18 = vsel %vm1433_vm11, %v1412_v47, %v1208_v61  ;;  %v535_v61 = vpack.c.bf16 %v503_v17, %v503_v17 }
 0x12f   : > { %v569_v62 = vunpack.c.l.b16 %v535_v61 }
 0x130   : > { %1249 = vrot.lane.b32.xlu0 %v7380_v44, %s6760_s10  ;;  %1219 = vrot.lane.b32.xlu2 %v7417_v16, %s6759_s17 }
 0x131   : > { %1031 = vrot.lane.b32.xlu1 %v7328_v59, %s6754_s28  ;;  %v959_v59 = vshll.u32 %v906_v39, 16  ;;  %v7454_v55 = vpack.c.b16 %v681_v50, %v569_v62  ;;  %v585_v10 = vpack.c.b16 %v569_v62, %v569_v62 }
 0x132   : > { %v1238_v20 = vpop.permute.xlu0 %1237  ;;  %v1022_v23 = vpop.permute.xlu2 %1021 }
 0x133   : > { %v1020_v25 = vpop.permute.xlu1 %1019  ;;  %v1482_v26 = vsel %vm1465_vm12, %v1445_v18, %v1238_v20  ;;  %v961_v37 = vrot.slane %v959_v59, 4  ;;  %v798_v21 = vshrl.u32 %v7454_v55, 16  ;;  %v801_v13 = vshll.u32 %v7454_v55, 16 }
 0x134   : > { %1663 = vmatmul.bf16.gmra.mxu0 %v1482_v26  ;;  %v1275_v30 = vsel %vm1257_vm6, %v7113_v0, %v1020_v25  ;;  %v627_v0 = vshrl.u32 %v584_v49, 16  ;;  %v1278_v9 = vsel %vm1257_vm6, %v7165_v31, %v1022_v23  ;;  %v630_v18 = vshrl.u32 %v585_v10, 16  ;;  %v1730_v23 = vpop.f32.mrf.mxu1 }
 0x135   : > { %v1315_v35 = vsel %vm1303_vm7, %v1275_v30, %v1065_v53  ;;  %v7452_v54 = vsel %vm6987_vm4, %v871_v45, %v961_v37  ;;  %v800_v3 = vrot.slane %v798_v21, 7  ;;  %v874_v36 = vrot.slane %v801_v13, 1 }
 0x136   : > { %v7448_v53 = vsel %vm6992_vm5, %v627_v0, %v796_v6  ;;  %v967_v59 = vshll.u32 %v908_v24, 16  ;;  %6128 = vmatmul.msk.bf16.gmra.mxu1 %vm1257_vm6, %v7452_v54 }
 0x137   : > { %v803_v39 = vor.u32 %v801_v13, %v800_v3  ;;  %v875_v45 = vor.u32 %v874_v36, %v798_v21 }
 0x138   : > { %1124 = vrot.lane.b32.xlu0 %v7417_v16, %s6758_s19  ;;  %1076 = vrot.lane.b32.xlu2 %v7397_v8, %s6757_s25  ;;  %v969_v37 = vrot.slane %v967_v59, 4 }
 0x139   : > { %1156 = vrot.lane.b32.xlu1 %v7380_v44, %s6755_s24  ;;  %v7487_v25 = vsel %vm6992_vm5, %v630_v18, %v803_v39 }
 0x13a   : > { %v1113_v42 = vpop.permute.xlu0 %1112  ;;  %v1147_v46 = vpop.permute.xlu2 %1146 }
 0x13b   : > { %v1348_v58 = vsel %vm1334_vm8, %v1315_v35, %v1113_v42  ;;  %v1145_v51 = vpop.permute.xlu1 %1144  ;;  %v7507_v42 = vstv %s1808_s14 }
 0x13c   : > { %v1381_v41 = vsel %vm1367_vm9, %v1348_v58, %v1145_v51  ;;  %v1733_v61 = vpop.f32.mrf.mxu1 }
 0x13d   : > { %v1414_v48 = vsel %vm1400_vm10, %v1381_v41, %v1178_v14  ;;  %v873_v14 = vor.u32 %v872_v38, %v791_v19  ;;  %v6328_v41 = vld [vmem:[%s10197_s3 + $0x40] sm:$0xff] }
 0x13e   : > { %3112 = vmatpush.bf16.msra.mxu3 %v6328_v41 }
 0x140   : > { %1221 = vrot.lane.b32.xlu0 %v7448_v53, %s6759_s17  ;;  %1189 = vrot.lane.b32.xlu2 %v7452_v54, %s6756_s27 }
 0x141   : > { %1251 = vrot.lane.b32.xlu1 %v7412_v5, %s6760_s10 }
 0x142   : > { %v1210_v63 = vpop.permute.xlu0 %1209  ;;  %v1242_v52 = vpop.permute.xlu2 %1241 }
 0x143   : > { %v1447_v1 = vsel %vm1433_vm11, %v1414_v48, %v1210_v63  ;;  %v1240_v32 = vpop.permute.xlu1 %1239 }
 0x144   : > { %v1485_v60 = vsel %vm1465_vm12, %v1447_v1, %v1240_v32 }
 0x145   : > { %1668 = vmatmul.bf16.gmra.mxu0 %v1485_v60 }
 0x148   : > { %1033 = vrot.lane.b32.xlu0 %v7380_v44, %s6754_s28  ;;  %1078 = vrot.lane.b32.xlu2 %v7452_v54, %s6757_s25  ;;  %v7483_v44 = vsel %vm6987_vm4, %v873_v14, %v965_v11 }
 0x149   : > { %1126 = vrot.lane.b32.xlu1 %v7448_v53, %s6758_s19  ;;  %6129 = vmatmul.msk.bf16.gmra.mxu1 %vm1257_vm6, %v7483_v44 }
 0x14a   : > { %v1067_v15 = vpop.permute.xlu0 %1066  ;;  %v1117_v47 = vpop.permute.xlu2 %1116 }
 0x14b   : > { %v1317_v27 = vsel %vm1303_vm7, %v1278_v9, %v1067_v15  ;;  %v1115_v20 = vpop.permute.xlu1 %1114 }
 0x14c   : > { %v1350_v31 = vsel %vm1334_vm8, %v1317_v27, %v1115_v20 }
 0x14d   : > { %v1383_v19 = vsel %vm1367_vm9, %v1350_v31, %v1147_v46 }
 0x150   : > { %1158 = vrot.lane.b32.xlu0 %v7412_v5, %s6755_s24  ;;  %1191 = vrot.lane.b32.xlu2 %v7483_v44, %s6756_s27 }
 0x151   : > { %1223 = vrot.lane.b32.xlu1 %v7487_v25, %s6759_s17 }
 0x152   : > { %v1180_v26 = vpop.permute.xlu0 %1179  ;;  %v1214_v17 = vpop.permute.xlu2 %1213 }
 0x153   : > { %v1416_v49 = vsel %vm1400_vm10, %v1383_v19, %v1180_v26  ;;  %v1212_v28 = vpop.permute.xlu1 %1211 }
 0x154   : > { %v1449_v30 = vsel %vm1433_vm11, %v1416_v49, %v1212_v28 }
 0x155   : > { %v1488_v40 = vsel %vm1465_vm12, %v1449_v30, %v1242_v52 }
 0x156   : > { %1673 = vmatmul.bf16.gmra.mxu0 %v1488_v40 }
 0x158   : > { %1253 = vrot.lane.b32.xlu0 %v7454_v55, %s6760_s10  ;;  %1035 = vrot.lane.b32.xlu2 %v7412_v5, %s6754_s28  ;;  %v7515_v5 = vsel %vm6987_vm4, %v875_v45, %v969_v37 }
 0x159   : > { %v1639_v43 = vpop.f32.mrf.mxu0  ;;  %1080 = vrot.lane.b32.xlu1 %v7483_v44, %s6757_s25 }
 0x15a   : > { %v1729_v35 = vadd.f32 %v1728_v2, %v1639_v43  ;;  %v1024_v0 = vpop.permute.xlu0 %1023  ;;  %v1071_v6 = vpop.permute.xlu2 %1070 }
 0x15b   : > { %v1281_v8 = vsel %vm1257_vm6, %v7191_v12, %v1024_v0  ;;  %v1069_v46 = vpop.permute.xlu1 %1068  ;;  %v1735_v12 = vpop.f32.mrf.mxu1  ;;  %6130 = vmatmul.msk.bf16.gmra.mxu1 %vm1257_vm6, %v7515_v5 }
 0x15c   : > { %v1319_v62 = vsel %vm1303_vm7, %v1281_v8, %v1069_v46  ;;  %v1842_v50 = vmul.f32 %v7507_v42, %v1729_v35  ;;  %vm1809_vm13 = vcmp.ge.f32.partialorder %v1729_v35, 0.0 }
 0x15d   : > { %v1352_v58 = vsel %vm1334_vm8, %v1319_v62, %v1117_v47 }
 0x15e   : > { %v1874_v48 = vsel %vm1809_vm13, %v1729_v35, %v1842_v50 }
 0x15f   : > { %v1906_v2 = vpack.c.bf16 %v1874_v48, %v1874_v48 }
 0x160   : > { %1160 = vrot.lane.b32.xlu2 %v7454_v55, %s6755_s24  ;;  %1128 = vrot.lane.b32.xlu0 %v7487_v25, %s6758_s19 }
 0x161   : > { %v1641_v51 = vpop.f32.mrf.mxu0  ;;  %1193 = vrot.lane.b32.xlu1 %v7515_v5, %s6756_s27  ;;  %v1955_v3 = vunpack.c.l.b16 %v1906_v2 }
 0x162   : > { %v1731_v56 = vadd.f32 %v1730_v23, %v1641_v51  ;;  %v1149_v63 = vpop.permute.xlu0 %1148  ;;  %v1184_v52 = vpop.permute.xlu2 %1183  ;;  %v505_v51 = vld [vmem:[%s6954_s15 + $0xf0] sm:$0xff] }
 0x163   : > { %v1385_v21 = vsel %vm1367_vm9, %v1352_v58, %v1149_v63  ;;  %v1182_v1 = vpop.permute.xlu1 %1181  ;;  %v1738_v9 = vpop.f32.mrf.mxu1  ;;  %v1971_v31 = vpack.c.b16 %v1955_v3, %v1955_v3  ;;  %v537_v63 = vpack.c.bf16 %v505_v51, %v505_v51 }
 0x164   : > { %vm1810_vm14 = vcmp.ge.f32.partialorder %v1731_v56, 0.0  ;;  %v1843_v32 = vmul.f32 %v7507_v42, %v1731_v56  ;;  %v1418_v60 = vsel %vm1400_vm10, %v1385_v21, %v1182_v1 }
 0x165   : > { %v1451_v10 = vsel %vm1433_vm11, %v1418_v60, %v1214_v17  ;;  %v1990_v30 = vshrl.u32 %v1971_v31, 16 }
 0x166   : > { %v1875_v38 = vsel %vm1810_vm14, %v1731_v56, %v1843_v32 }
 0x167   : > { %v1907_v4 = vpack.c.bf16 %v1875_v38, %v1875_v38 }
 0x169   : > { %v2067_v13 = vunpack.c.l.b16 %v1907_v4 }
 0x16a   : > { %v1244_v14 = vpop.permute.xlu0 %1243  ;;  %v1644_v11 = vpop.f32.mrf.mxu0 }
 0x16b   : > { %v1734_v15 = vadd.f32 %v1733_v61, %v1644_v11  ;;  %v1026_v47 = vpop.permute.xlu1 %1025  ;;  %v1491_v18 = vsel %vm1465_vm12, %v1451_v10, %v1244_v14  ;;  %v2083_v39 = vpack.c.b16 %v2067_v13, %v1955_v3  ;;  %v7534_v27 = vpop.permute.xlu2 %1027  ;;  %v2291_v20 = vpack.c.b16 %v2067_v13, %v2067_v13 }
 0x16c   : > { %1678 = vmatmul.bf16.gmra.mxu0 %v1491_v18  ;;  %v1284_v54 = vsel %vm1257_vm6, %v7235_v34, %v1026_v47  ;;  %v1740_v50 = vpop.f32.mrf.mxu1 }
 0x16d   : > { %2404 = vrot.lane.b32.xlu1 %v2083_v39, %s6754_s28  ;;  %2525 = vrot.lane.b32.xlu2 %v2083_v39, %s6755_s24  ;;  %v2106_v23 = vshrl.u32 %v2083_v39, 16  ;;  %v2109_v19 = vshll.u32 %v2083_v39, 16  ;;  %v2311_v26 = vshll.u32 %v2291_v20, 16  ;;  %v1844_v17 = vmul.f32 %v7507_v42, %v1734_v15 }
 0x16e   : > { %vm1811_vm15 = vcmp.ge.f32.partialorder %v1734_v15, 0.0  ;;  %v1321_v49 = vsel %vm1303_vm7, %v1284_v54, %v1071_v6  ;;  %v1287_v54 = vsel %vm1257_vm6, %v7290_v22, %v7534_v27 }
 0x16f   : > { %v2108_v24 = vrot.slane %v2106_v23, 7  ;;  %v2244_v28 = vrot.slane %v2109_v19, 1  ;;  %v2313_v61 = vrot.slane %v2311_v26, 4  ;;  %v1876_v43 = vsel %vm1811_vm15, %v1734_v15, %v1844_v17 }
 0x170   : > { %v1908_v58 = vpack.c.bf16 %v1876_v43, %v1876_v43 }
 0x171   : > { %v2111_v40 = vor.u32 %v2109_v19, %v2108_v24  ;;  %v2245_v34 = vor.u32 %v2244_v28, %v2106_v23 }
 0x172   : > { %v1119_v36 = vpop.permute.xlu0 %1118  ;;  %v1646_v59 = vpop.f32.mrf.mxu0  ;;  %v1954_v1 = vunpack.c.l.b16 %v1908_v58 }
 0x173   : > { %v1354_v35 = vsel %vm1334_vm8, %v1321_v49, %v1119_v36  ;;  %v1736_v0 = vadd.f32 %v1735_v12, %v1646_v59  ;;  %v1151_v45 = vpop.permute.xlu1 %1150  ;;  %v7545_v37 = vsel %vm6992_vm5, %v1990_v30, %v2111_v40  ;;  %v7547_v8 = vpop.permute.xlu2 %1152  ;;  %v2387_v6 = vsel %vm6987_vm4, %v2245_v34, %v2313_v61  ;;  %v506_v12 = vld [vmem:[%s6954_s15 + $0xf8] sm:$0xff] }
 0x174   : > { %2493 = vrot.lane.b32.xlu0 %v7545_v37, %s6758_s19  ;;  %v1387_v62 = vsel %vm1367_vm9, %v1354_v35, %v1151_v45  ;;  %v538_v21 = vpack.c.bf16 %v506_v12, %v506_v12  ;;  %v1970_v18 = vpack.c.b16 %v1954_v1, %v1954_v1  ;;  %v1743_v20 = vpop.f32.mrf.mxu1 }
 0x175   : > { %vm1812_vm0 = vcmp.ge.f32.partialorder %v1736_v0, 0.0  ;;  %v1845_v46 = vmul.f32 %v7507_v42, %v1736_v0  ;;  %2558 = vrot.lane.b32.xlu1 %v2387_v6, %s6756_s27  ;;  %v1420_v56 = vsel %vm1400_vm10, %v1387_v62, %v1184_v52  ;;  %v570_v52 = vunpack.c.l.b16 %v537_v63 }
 0x176   : > { %v7566_v11 = vunpack.c.l.b16 %v538_v21  ;;  %v1987_v28 = vshrl.u32 %v1970_v18, 16 }
 0x177   : > { %v1877_v41 = vsel %vm1812_vm0, %v1736_v0, %v1845_v46  ;;  %v586_v58 = vpack.c.b16 %v570_v52, %v570_v52 }
 0x178   : > { %v1909_v48 = vpack.c.bf16 %v1877_v41, %v1877_v41  ;;  %v7575_v19 = vpack.c.b16 %v7566_v11, %v570_v52  ;;  %v909_v21 = vpack.c.b16 %v7566_v11, %v7566_v11 }
 0x17a   : > { %v2066_v32 = vunpack.c.l.b16 %v1909_v48  ;;  %v1216_v2 = vpop.permute.xlu0 %1215  ;;  %v1649_v60 = vpop.f32.mrf.mxu0  ;;  %v805_v0 = vshrl.u32 %v7575_v19, 16  ;;  %v808_v12 = vshll.u32 %v7575_v19, 16 }
 0x17b   : > { %v1453_v38 = vsel %vm1433_vm11, %v1420_v56, %v1216_v2  ;;  %v1739_v4 = vadd.f32 %v1738_v9, %v1649_v60  ;;  %v1246_v10 = vpop.permute.xlu1 %1245  ;;  %v7562_v3 = vpop.permute.xlu2 %1247 }
 0x17c   : > { %v2082_v13 = vpack.c.b16 %v2066_v32, %v1954_v1  ;;  %2449 = vrot.lane.b32.xlu0 %v2387_v6, %s6757_s25  ;;  %v1494_v44 = vsel %vm1465_vm12, %v1453_v38, %v1246_v10  ;;  %v2290_v14 = vpack.c.b16 %v2066_v32, %v2066_v32  ;;  %v807_v51 = vrot.slane %v805_v0, 7 }
 0x17d   : > { %1683 = vmatmul.bf16.gmra.mxu0 %v1494_v44  ;;  %v1846_v39 = vmul.f32 %v7507_v42, %v1739_v4  ;;  %vm1813_vm1 = vcmp.ge.f32.partialorder %v1739_v4, 0.0  ;;  %v876_v11 = vrot.slane %v808_v12, 1 }
 0x17e   : > { %2527 = vrot.lane.b32.xlu1 %v2082_v13, %s6755_s24  ;;  %2402 = vrot.lane.b32.xlu2 %v2082_v13, %s6754_s28  ;;  %v2099_v15 = vshrl.u32 %v2082_v13, 16  ;;  %v2102_v47 = vshll.u32 %v2082_v13, 16  ;;  %v2307_v9 = vshll.u32 %v2290_v14, 16  ;;  %v810_v44 = vor.u32 %v808_v12, %v807_v51 }
 0x17f   : > { %v1878_v40 = vsel %vm1813_vm1, %v1739_v4, %v1846_v39 }
 0x180   : > { %v2242_v31 = vrot.slane %v2102_v47, 1  ;;  %v2101_v23 = vrot.slane %v2099_v15, 7  ;;  %v2309_v49 = vrot.slane %v2307_v9, 4  ;;  %v1910_v45 = vpack.c.bf16 %v1878_v40, %v1878_v40 }
 0x182   : > { %v1073_v26 = vpop.permute.xlu0 %1072  ;;  %v1651_v17 = vpop.f32.mrf.mxu0  ;;  %v2243_v24 = vor.u32 %v2242_v31, %v2099_v15  ;;  %v2104_v30 = vor.u32 %v2102_v47, %v2101_v23  ;;  %v7599_v41 = vunpack.c.l.b16 %v1910_v45  ;;  %v971_v15 = vshll.u32 %v909_v21, 16 }
 0x183   : > { %v1323_v36 = vsel %vm1303_vm7, %v1287_v54, %v1073_v26  ;;  %v1741_v59 = vadd.f32 %v1740_v50, %v1651_v17  ;;  %v1121_v34 = vpop.permute.xlu1 %1120  ;;  %v7578_v61 = vpop.permute.xlu2 %1122  ;;  %v877_v23 = vor.u32 %v876_v11, %v805_v0 }
 0x184   : > { %v2386_v22 = vsel %vm6987_vm4, %v2243_v24, %v2309_v49  ;;  %v7584_v27 = vsel %vm6992_vm5, %v1987_v28, %v2104_v30  ;;  %v1356_v35 = vsel %vm1334_vm8, %v1323_v36, %v1121_v34  ;;  %v1745_v50 = vpop.f32.mrf.mxu1  ;;  %v973_v26 = vrot.slane %v971_v15, 4 }
 0x185   : > { %vm1814_vm2 = vcmp.ge.f32.partialorder %v1741_v59, 0.0  ;;  %v1847_v43 = vmul.f32 %v7507_v42, %v1741_v59  ;;  %6169 = vmatmul.msk.bf16.vlgmr.msra.gmra.mxu3 %vm1257_vm6, %v2386_v22  ;;  %2590 = vrot.lane.b32.xlu0 %v7584_v27, %s6759_s17  ;;  %v1389_v62 = vsel %vm1367_vm9, %v1356_v35, %v7547_v8 }
 0x186   : > { %2620 = vrot.lane.b32.xlu2 %v2082_v13, %s6760_s10  ;;  %2447 = vrot.lane.b32.xlu1 %v2386_v22, %s6757_s25  ;;  %v633_v13 = vshrl.u32 %v586_v58, 16 }
 0x187   : > { %v1879_v6 = vsel %vm1814_vm2, %v1741_v59, %v1847_v43 }
 0x188   : > { %v1911_v46 = vpack.c.bf16 %v1879_v6, %v1879_v6  ;;  %v845_v18 = vsel %vm6992_vm5, %v633_v13, %v810_v44 }
 0x18a   : > { %v2068_v48 = vunpack.c.l.b16 %v1911_v46  ;;  %v1186_v56 = vpop.permute.xlu0 %1185  ;;  %v1654_v63 = vpop.f32.mrf.mxu0 }
 0x18b   : > { %v1422_v1 = vsel %vm1400_vm10, %v1389_v62, %v1186_v56  ;;  %v1744_v32 = vadd.f32 %v1743_v20, %v1654_v63  ;;  %v1218_v2 = vpop.permute.xlu1 %1217  ;;  %v7604_v60 = vpop.permute.xlu2 %1219 }
 0x18c   : > { %v7607_v8 = vpack.c.b16 %v2068_v48, %v7599_v41  ;;  %v1455_v38 = vsel %vm1433_vm11, %v1422_v1, %v1218_v2  ;;  %v2292_v4 = vpack.c.b16 %v2068_v48, %v2068_v48  ;;  %v1748_v36 = vpop.f32.mrf.mxu1  ;;  %v1972_v2 = vpack.c.b16 %v7599_v41, %v7599_v41 }
 0x18d   : > { %2560 = vrot.lane.b32.xlu0 %v2386_v22, %s6756_s27  ;;  %v1497_v10 = vsel %vm1465_vm12, %v1455_v38, %v7562_v3  ;;  %v1848_v47 = vmul.f32 %v7507_v42, %v1744_v32  ;;  %vm1815_vm3 = vcmp.ge.f32.partialorder %v1744_v32, 0.0  ;;  %v1008_v22 = vsel %vm6987_vm4, %v877_v23, %v973_v26 }
 0x18e   : > { %1082 = vrot.lane.b32.xlu1 %v7515_v5, %s6757_s25  ;;  %2495 = vrot.lane.b32.xlu2 %v7584_v27, %s6758_s19  ;;  %v2116_v14 = vshll.u32 %v7607_v8, 16  ;;  %v2315_v52 = vshll.u32 %v2292_v4, 16  ;;  %v2113_v9 = vshrl.u32 %v7607_v8, 16 }
 0x18f   : > { %1688 = vmatmul.bf16.gmra.mxu0 %v1497_v10  ;;  %v1880_v17 = vsel %vm1815_vm3, %v1744_v32, %v1848_v47  ;;  %6131 = vmatmul.msk.bf16.gmra.mxu1 %vm1257_vm6, %v1008_v22 }
 0x190   : > { %v2246_v3 = vrot.slane %v2116_v14, 1  ;;  %v2317_v31 = vrot.slane %v2315_v52, 4  ;;  %v2115_v63 = vrot.slane %v2113_v9, 7 }
 0x192   : > { %v1030_v39 = vpop.permute.xlu0 %1029  ;;  %v1656_v20 = vpop.f32.mrf.mxu0  ;;  %v2247_v54 = vor.u32 %v2246_v3, %v2113_v9  ;;  %v2118_v13 = vor.u32 %v2116_v14, %v2115_v63  ;;  %v1993_v3 = vshrl.u32 %v1972_v2, 16 }
 0x193   : > { %v1290_v24 = vsel %vm1257_vm6, %v7322_v57, %v1030_v39  ;;  %v1746_v49 = vadd.f32 %v1745_v50, %v1656_v20  ;;  %v1075_v28 = vpop.permute.xlu1 %1074  ;;  %v7628_v40 = vpop.permute.xlu2 %1076  ;;  %v1912_v57 = vpack.c.bf16 %v1880_v17, %v1880_v17 }
 0x194   : > { %v7626_v30 = vsel %vm6987_vm4, %v2247_v54, %v2317_v31  ;;  %v1325_v34 = vsel %vm1303_vm7, %v1290_v24, %v1075_v28  ;;  %v1750_v21 = vpop.f32.mrf.mxu1  ;;  %v7675_v14 = vsel %vm6992_vm5, %v1993_v3, %v2118_v13 }
 0x195   : > { %vm1816_vm13 = vcmp.ge.f32.partialorder %v1746_v49, 0.0  ;;  %v1849_v59 = vmul.f32 %v7507_v42, %v1746_v49  ;;  %1225 = vrot.lane.b32.xlu0 %v845_v18, %s6759_s17  ;;  %6170 = vmatmul.msk.bf16.gmra.mxu3 %vm1257_vm6, %v7626_v30  ;;  %v1358_v0 = vsel %vm1334_vm8, %v1325_v34, %v7578_v61  ;;  %v7644_v45 = vunpack.c.l.b16 %v1912_v57 }
 0x196   : > { %1255 = vrot.lane.b32.xlu2 %v7575_v19, %s6760_s10  ;;  %2622 = vrot.lane.b32.xlu1 %v7607_v8, %s6760_s10 }
 0x197   : > { %v1881_v43 = vsel %vm1816_vm13, %v1746_v49, %v1849_v59 }
 0x198   : > { %v1913_v35 = vpack.c.bf16 %v1881_v43, %v1881_v43 }
 0x19a   : > { %v2069_v6 = vunpack.c.l.b16 %v1913_v35  ;;  %v1155_v46 = vpop.permute.xlu0 %1154 }
 0x19b   : > { %v1391_v62 = vsel %vm1367_vm9, %v1358_v0, %v1155_v46  ;;  %v1659_v50 = vpop.f32.mrf.mxu0  ;;  %v1188_v58 = vpop.permute.xlu1 %1187 }
 0x19c   : > { %v7648_v51 = vpack.c.b16 %v2069_v6, %v7644_v45  ;;  %v1749_v12 = vadd.f32 %v1748_v36, %v1659_v50  ;;  %v2293_v48 = vpack.c.b16 %v2069_v6, %v2069_v6  ;;  %v1424_v56 = vsel %vm1400_vm10, %v1391_v62, %v1188_v58  ;;  %v1190_v61 = vpop.permute.xlu2 %1189 }
 0x19d   : > { %1037 = vrot.lane.b32.xlu0 %v7454_v55, %s6754_s28  ;;  %v1457_v4 = vsel %vm1433_vm11, %v1424_v56, %v7604_v60 }
 0x19e   : > { %1130 = vrot.lane.b32.xlu2 %v845_v18, %s6758_s19  ;;  %1195 = vrot.lane.b32.xlu1 %v1008_v22, %s6756_s27  ;;  %v2123_v1 = vshll.u32 %v7648_v51, 16  ;;  %v2319_v32 = vshll.u32 %v2293_v48, 16  ;;  %v1850_v38 = vmul.f32 %v7507_v42, %v1749_v12  ;;  %v2120_v55 = vshrl.u32 %v7648_v51, 16 }
 0x19f   : > { %vm1817_vm14 = vcmp.ge.f32.partialorder %v1749_v12, 0.0  ;;  %6132 = vmatmul.msk.bf16.gmra.mxu1 %vm1257_vm6, %v7515_v5 }
 0x1a0   : > { %v2248_v10 = vrot.slane %v2123_v1, 1  ;;  %v2321_v11 = vrot.slane %v2319_v32, 4  ;;  %v1882_v18 = vsel %vm1817_vm14, %v1749_v12, %v1850_v38  ;;  %v2122_v5 = vrot.slane %v2120_v55, 7 }
 0x1a1   : > { %v1914_v54 = vpack.c.bf16 %v1882_v18, %v1882_v18 }
 0x1a2   : > { %v1250_v44 = vpop.permute.xlu0 %1249  ;;  %v2249_v52 = vor.u32 %v2248_v10, %v2120_v55  ;;  %v2125_v46 = vor.u32 %v2123_v1, %v2122_v5 }
 0x1a3   : > { %v1661_v15 = vpop.f32.mrf.mxu0  ;;  %v1032_v47 = vpop.permute.xlu1 %1031  ;;  %v1500_v9 = vsel %vm1465_vm12, %v1457_v4, %v1250_v44  ;;  %v7686_v24 = vunpack.c.l.b16 %v1914_v54 }
 0x1a4   : > { %v1751_v41 = vadd.f32 %v1750_v21, %v1661_v15  ;;  %1693 = vmatmul.bf16.gmra.mxu0 %v1500_v9  ;;  %v7665_v39 = vsel %vm6987_vm4, %v2249_v52, %v2321_v11  ;;  %v1293_v60 = vsel %vm1257_vm6, %v7363_v7, %v1032_v47  ;;  %v1753_v7 = vpop.f32.mrf.mxu1  ;;  %v1079_v31 = vpop.permute.xlu2 %1078 }
 0x1a5   : > { %1162 = vrot.lane.b32.xlu0 %v7575_v19, %s6755_s24  ;;  %6171 = vmatmul.msk.bf16.gmra.mxu3 %vm1257_vm6, %v7665_v39  ;;  %v1327_v23 = vsel %vm1303_vm7, %v1293_v60, %v7628_v40  ;;  %v1973_v40 = vpack.c.b16 %v7644_v45, %v7644_v45  ;;  %v6327_v60 = vld [vmem:[%s10197_s3 + $0x38] sm:$0xff] }
 0x1a6   : > { %vm1818_vm15 = vcmp.ge.f32.partialorder %v1751_v41, 0.0  ;;  %v1851_v20 = vmul.f32 %v7507_v42, %v1751_v41  ;;  %2562 = vrot.lane.b32.xlu1 %v7626_v30, %s6756_s27  ;;  %2592 = vrot.lane.b32.xlu2 %v7675_v14, %s6759_s17 }
 0x1a7   : > { %v1996_v63 = vshrl.u32 %v1973_v40, 16  ;;  %3016 = vmatpush.bf16.msra.mxu2 %v6327_v60 }
 0x1a8   : > { %v1883_v19 = vsel %vm1818_vm15, %v1751_v41, %v1851_v20 }
 0x1a9   : > { %v1915_v26 = vpack.c.bf16 %v1883_v19, %v1883_v19 }
 0x1aa   : > { %v1125_v17 = vpop.permute.xlu0 %1124 }
 0x1ab   : > { %v2070_v49 = vunpack.c.l.b16 %v1915_v26  ;;  %v1360_v28 = vsel %vm1334_vm8, %v1327_v23, %v1125_v17  ;;  %v1157_v36 = vpop.permute.xlu1 %1156 }
 0x1ac   : > { %v1393_v34 = vsel %vm1367_vm9, %v1360_v28, %v1157_v36  ;;  %v1755_v0 = vpop.f32.mrf.mxu1  ;;  %v1192_v58 = vpop.permute.xlu2 %1191  ;;  %v6326_v36 = vld [vmem:[%s10197_s3 + $0x30] sm:$0xff] }
 0x1ad   : > { %v7690_v59 = vpack.c.b16 %v2070_v49, %v7686_v24  ;;  %2529 = vrot.lane.b32.xlu0 %v7607_v8, %s6755_s24  ;;  %v2294_v57 = vpack.c.b16 %v2070_v49, %v2070_v49  ;;  %v1426_v35 = vsel %vm1400_vm10, %v1393_v34, %v1190_v61  ;;  %v7710_v61 = vsel %vm6992_vm5, %v1996_v63, %v2125_v46 }
 0x1ae   : > { %2406 = vrot.lane.b32.xlu1 %v7607_v8, %s6754_s28  ;;  %2497 = vrot.lane.b32.xlu2 %v7675_v14, %s6758_s19 }
 0x1af   : > { %v2130_v22 = vshll.u32 %v7690_v59, 16  ;;  %v2323_v43 = vshll.u32 %v2294_v57, 16  ;;  %v2127_v62 = vshrl.u32 %v7690_v59, 16  ;;  %3017 = vmatpush.bf16.msra.mxu2 %v6326_v36 }
 0x1b1   : > { %v1664_v6 = vpop.f32.mrf.mxu0  ;;  %v2250_v50 = vrot.slane %v2130_v22, 1  ;;  %v2325_v45 = vrot.slane %v2323_v43, 4  ;;  %v2129_v47 = vrot.slane %v2127_v62, 7 }
 0x1b2   : > { %v1754_v12 = vadd.f32 %v1753_v7, %v1664_v6  ;;  %v1222_v8 = vpop.permute.xlu0 %1221 }
 0x1b3   : > { %v1459_v48 = vsel %vm1433_vm11, %v1426_v35, %v1222_v8  ;;  %v1252_v56 = vpop.permute.xlu1 %1251  ;;  %v2251_v21 = vor.u32 %v2250_v50, %v2127_v62  ;;  %v2132_v7 = vor.u32 %v2130_v22, %v2129_v47  ;;  %v6325_v62 = vld [vmem:[%s10197_s3 + $0x28] sm:$0xff]  ;;  %v6323_v47 = vld [vmem:[%s10197_s3 + $0x18] sm:$0xff] }
 0x1b4   : > { %v1503_v32 = vsel %vm1465_vm12, %v1459_v48, %v1252_v56  ;;  %v1852_v2 = vmul.f32 %v7507_v42, %v1754_v12  ;;  %vm1819_vm0 = vcmp.ge.f32.partialorder %v1754_v12, 0.0  ;;  %v1758_v13 = vpop.f32.mrf.mxu1  ;;  %v7725_v11 = vpop.permute.xlu2 %1035  ;;  %3018 = vmatpush.bf16.msra.mxu2 %v6325_v62 }
 0x1b5   : > { %2624 = vrot.lane.b32.xlu0 %v7648_v51, %s6760_s10  ;;  %1698 = vmatmul.bf16.gmra.mxu0 %v1503_v32  ;;  %v7714_v1 = vsel %vm6987_vm4, %v2251_v21, %v2325_v45 }
 0x1b6   : > { %2531 = vrot.lane.b32.xlu1 %v7648_v51, %s6755_s24  ;;  %2594 = vrot.lane.b32.xlu2 %v7710_v61, %s6759_s17  ;;  %v1884_v4 = vsel %vm1819_vm0, %v1754_v12, %v1852_v2 }
 0x1b7   : > { %6172 = vmatmul.msk.bf16.gmra.mxu3 %vm1257_vm6, %v7714_v1  ;;  %v1916_v9 = vpack.c.bf16 %v1884_v4, %v1884_v4  ;;  %v6324_v4 = vld [vmem:[%s10197_s3 + $0x20] sm:$0xff] }
 0x1b8   : > { %3019 = vmatpush.bf16.msra.mxu2 %v6324_v4 }
 0x1b9   : > { %v1666_v38 = vpop.f32.mrf.mxu0  ;;  %v1959_v54 = vunpack.c.l.b16 %v1916_v9 }
 0x1ba   : > { %v1756_v55 = vadd.f32 %v1755_v0, %v1666_v38  ;;  %v1034_v10 = vpop.permute.xlu0 %1033 }
 0x1bb   : > { %v1296_v44 = vsel %vm1257_vm6, %v7417_v16, %v1034_v10  ;;  %v1127_v52 = vpop.permute.xlu1 %1126  ;;  %v1974_v16 = vpack.c.b16 %v7686_v24, %v7686_v24  ;;  %v1975_v6 = vpack.c.b16 %v1959_v54, %v1959_v54 }
 0x1bc   : > { %vm1820_vm1 = vcmp.ge.f32.partialorder %v1756_v55, 0.0  ;;  %v1853_v15 = vmul.f32 %v7507_v42, %v1756_v55  ;;  %v1329_v3 = vsel %vm1303_vm7, %v1296_v44, %v1079_v31  ;;  %v1760_v5 = vpop.f32.mrf.mxu1  ;;  %v7757_v22 = vpop.permute.xlu2 %1160  ;;  %3020 = vmatpush.bf16.msra.mxu2 %v6323_v47 }
 0x1bd   : > { %2499 = vrot.lane.b32.xlu0 %v7710_v61, %s6758_s19  ;;  %v1362_v20 = vsel %vm1334_vm8, %v1329_v3, %v1127_v52  ;;  %v2002_v2 = vshrl.u32 %v1975_v6, 16 }
 0x1be   : > { %v1885_v18 = vsel %vm1820_vm1, %v1756_v55, %v1853_v15  ;;  %2451 = vrot.lane.b32.xlu2 %v7626_v30, %s6757_s25  ;;  %2626 = vrot.lane.b32.xlu1 %v7690_v59, %s6760_s10  ;;  %v1999_v30 = vshrl.u32 %v1974_v16, 16 }
 0x1bf   : > { %v1917_v41 = vpack.c.bf16 %v1885_v18, %v1885_v18 }
 0x1c0   : > { %v7751_v34 = vsel %vm6992_vm5, %v1999_v30, %v2132_v7 }
 0x1c1   : > { %v2071_v19 = vunpack.c.l.b16 %v1917_v41 }
 0x1c2   : > { %v1159_v31 = vpop.permute.xlu0 %1158  ;;  %v1669_v23 = vpop.f32.mrf.mxu0 }
 0x1c3   : > { %v7741_v26 = vpack.c.b16 %v2071_v19, %v1959_v54  ;;  %v1395_v17 = vsel %vm1367_vm9, %v1362_v20, %v1159_v31  ;;  %v1759_v49 = vadd.f32 %v1758_v13, %v1669_v23  ;;  %v7744_v24 = vpop.permute.xlu1 %1223  ;;  %v2295_v28 = vpack.c.b16 %v2071_v19, %v2071_v19  ;;  %v6321_v31 = vld [vmem:[%s10197_s3 + $0x8] sm:$0xff] }
 0x1c4   : > { %v1428_v57 = vsel %vm1400_vm10, %v1395_v17, %v1192_v58  ;;  %v1763_v52 = vpop.f32.mrf.mxu1 }
 0x1c5   : > { %2596 = vrot.lane.b32.xlu0 %v7751_v34, %s6759_s17  ;;  %v2134_v40 = vshrl.u32 %v7741_v26, 16  ;;  %v2137_v43 = vshll.u32 %v7741_v26, 16  ;;  %v2327_v35 = vshll.u32 %v2295_v28, 16  ;;  %v1854_v0 = vmul.f32 %v7507_v42, %v1759_v49 }
 0x1c6   : > { %2564 = vrot.lane.b32.xlu2 %v7665_v39, %s6756_s27  ;;  %2501 = vrot.lane.b32.xlu1 %v7751_v34, %s6758_s19  ;;  %vm1821_vm2 = vcmp.ge.f32.partialorder %v1759_v49, 0.0  ;;  %v1461_v50 = vsel %vm1433_vm11, %v1428_v57, %v7744_v24  ;;  %v6320_v57 = vld [vmem:[%s10197_s3] sm:$0xff] }
 0x1c7   : > { %v2136_v46 = vrot.slane %v2134_v40, 7  ;;  %v2252_v58 = vrot.slane %v2137_v43, 1  ;;  %v2329_v63 = vrot.slane %v2327_v35, 4  ;;  %v1886_v21 = vsel %vm1821_vm2, %v1759_v49, %v1854_v0  ;;  %v7799_v9 = vpop.permute.xlu2 %2525 }
 0x1c8   : > { %v1918_v44 = vpack.c.bf16 %v1886_v21, %v1886_v21 }
 0x1c9   : > { %v2139_v12 = vor.u32 %v2137_v43, %v2136_v46  ;;  %v2253_v56 = vor.u32 %v2252_v58, %v2134_v40 }
 0x1ca   : > { %v7770_v8 = vpop.permute.xlu0 %1253  ;;  %v1671_v48 = vpop.f32.mrf.mxu0  ;;  %v7801_v3 = vunpack.c.l.b16 %v1918_v44 }
 0x1cb   : > { %v1761_v45 = vadd.f32 %v1760_v5, %v1671_v48  ;;  %v1506_v32 = vsel %vm1465_vm12, %v1461_v50, %v7770_v8  ;;  %v7774_v38 = vpop.permute.xlu1 %1080  ;;  %v7781_v55 = vsel %vm6987_vm4, %v2253_v56, %v2329_v63  ;;  %v7790_v13 = vsel %vm6992_vm5, %v2002_v2, %v2139_v12 }
 0x1cc   : > { %1703 = vmatmul.bf16.gmra.mxu0 %v1506_v32  ;;  %6173 = vmatmul.msk.bf16.gmra.mxu3 %vm1257_vm6, %v7781_v55  ;;  %v1765_v17 = vpop.f32.mrf.mxu1  ;;  %v1976_v4 = vpack.c.b16 %v7801_v3, %v7801_v3 }
 0x1cd   : > { %vm1822_vm3 = vcmp.ge.f32.partialorder %v1761_v45, 0.0  ;;  %v1855_v10 = vmul.f32 %v7507_v42, %v1761_v45  ;;  %2453 = vrot.lane.b32.xlu0 %v7665_v39, %s6757_s25 }
 0x1ce   : > { %2408 = vrot.lane.b32.xlu2 %v7648_v51, %s6754_s28  ;;  %2598 = vrot.lane.b32.xlu1 %v7790_v13, %s6759_s17  ;;  %v6322_v51 = vld [vmem:[%s10197_s3 + $0x10] sm:$0xff] }
 0x1cf   : > { %v1887_v15 = vsel %vm1822_vm3, %v1761_v45, %v1855_v10  ;;  %3021 = vmatpush.bf16.msra.mxu2 %v6322_v51 }
 0x1d0   : > { %v1919_v39 = vpack.c.bf16 %v1887_v15, %v1887_v15 }
 0x1d2   : > { %v2072_v18 = vunpack.c.l.b16 %v1919_v39  ;;  %v7836_v0 = vpop.permute.xlu0 %1128 }
 0x1d3   : > { %v1674_v16 = vpop.f32.mrf.mxu0  ;;  %v7811_v7 = vpop.permute.xlu1 %1193  ;;  %3022 = vmatpush.bf16.msra.mxu2 %v6321_v31 }
 0x1d4   : > { %v7807_v41 = vpack.c.b16 %v2072_v18, %v7801_v3  ;;  %v1764_v60 = vadd.f32 %v1763_v52, %v1674_v16  ;;  %v2296_v20 = vpack.c.b16 %v2072_v18, %v2072_v18  ;;  %v1768_v58 = vpop.f32.mrf.mxu1 }
 0x1d5   : > { %2566 = vrot.lane.b32.xlu0 %v7714_v1, %s6756_s27 }
 0x1d6   : > { %2533 = vrot.lane.b32.xlu2 %v7690_v59, %s6755_s24  ;;  %2455 = vrot.lane.b32.xlu1 %v7714_v1, %s6757_s25  ;;  %v2144_v54 = vshll.u32 %v7807_v41, 16  ;;  %v2331_v19 = vshll.u32 %v2296_v20, 16  ;;  %v1856_v23 = vmul.f32 %v7507_v42, %v1764_v60  ;;  %v2141_v49 = vshrl.u32 %v7807_v41, 16 }
 0x1d7   : > { %vm1823_vm13 = vcmp.ge.f32.partialorder %v1764_v60, 0.0  ;;  %3023 = vmatpush.bf16.msra.mxu2 %v6320_v57 }
 0x1d8   : > { %v7822_v30 = vpop.permute.xlu2 %2402  ;;  %v2254_v28 = vrot.slane %v2144_v54, 1  ;;  %v2333_v5 = vrot.slane %v2331_v19, 4  ;;  %v1888_v40 = vsel %vm1823_vm13, %v1764_v60, %v1856_v23  ;;  %v2143_v21 = vrot.slane %v2141_v49, 7 }
 0x1d9   : > { %v1920_v46 = vpack.c.bf16 %v1888_v40, %v1888_v40  ;;  %v2005_v60 = vshrl.u32 %v1976_v4, 16 }
 0x1da   : > { %v2255_v36 = vor.u32 %v2254_v28, %v2141_v49  ;;  %v2146_v47 = vor.u32 %v2144_v54, %v2143_v21 }
 0x1db   : > { %v1676_v1 = vpop.f32.mrf.mxu0  ;;  %v1961_v48 = vunpack.c.l.b16 %v1920_v46 }
 0x1dc   : > { %v1766_v43 = vadd.f32 %v1765_v17, %v1676_v1  ;;  %v7830_v35 = vsel %vm6987_vm4, %v2255_v36, %v2333_v5  ;;  %v1770_v51 = vpop.f32.mrf.mxu1 }
 0x1dd   : > { %2410 = vrot.lane.b32.xlu0 %v7690_v59, %s6754_s28  ;;  %6174 = vmatmul.msk.bf16.gmra.mxu3 %vm1257_vm6, %v7830_v35 }
 0x1de   : > { %vm1824_vm14 = vcmp.ge.f32.partialorder %v1766_v43, 0.0  ;;  %v1857_v6 = vmul.f32 %v7507_v42, %v1766_v43  ;;  %2628 = vrot.lane.b32.xlu2 %v7741_v26, %s6760_s10  ;;  %2568 = vrot.lane.b32.xlu1 %v7781_v55, %s6756_s27 }
 0x1df   : > { %v7843_v62 = vpop.permute.xlu1 %2404 }
 0x1e0   : > { %v1889_v50 = vsel %vm1824_vm14, %v1766_v43, %v1857_v6  ;;  %v7845_v59 = vpop.permute.xlu2 %2620  ;;  %v1977_v43 = vpack.c.b16 %v1961_v48, %v1961_v48 }
 0x1e1   : > { %v1921_v12 = vpack.c.bf16 %v1889_v50, %v1889_v50 }
 0x1e3   : > { %v2073_v56 = vunpack.c.l.b16 %v1921_v12 }
 0x1e4   : > { %v1773_v1 = vpop.f32.mrf.mxu1 }
 0x1e5   : > { %v7847_v63 = vpack.c.b16 %v2073_v56, %v1961_v48  ;;  %2535 = vrot.lane.b32.xlu0 %v7741_v26, %s6755_s24  ;;  %v2297_v45 = vpack.c.b16 %v2073_v56, %v2073_v56 }
 0x1e6   : > { %v2494_v32 = vpop.permute.xlu0 %2493  ;;  %2503 = vrot.lane.b32.xlu2 %v7790_v13, %s6758_s19  ;;  %2412 = vrot.lane.b32.xlu1 %v7741_v26, %s6754_s28  ;;  %v7865_v26 = vsel %vm6992_vm5, %v2005_v60, %v2146_v47  ;;  %v2008_v47 = vshrl.u32 %v1977_v43, 16 }
 0x1e7   : > { %v2559_v2 = vpop.permute.xlu1 %2558  ;;  %v2151_v10 = vshll.u32 %v7847_v63, 16  ;;  %v2335_v44 = vshll.u32 %v2297_v45, 16  ;;  %v2148_v39 = vshrl.u32 %v7847_v63, 16 }
 0x1e8   : > { %v7858_v52 = vpop.permute.xlu2 %2495 }
 0x1e9   : > { %v1679_v15 = vpop.f32.mrf.mxu0  ;;  %v2256_v18 = vrot.slane %v2151_v10, 1  ;;  %v2337_v19 = vrot.slane %v2335_v44, 4  ;;  %v2150_v57 = vrot.slane %v2148_v39, 7 }
 0x1ea   : > { %v1769_v16 = vadd.f32 %v1768_v58, %v1679_v15  ;;  %v2652_v58 = vsel %vm1257_vm6, %v7584_v27, %v7822_v30 }
 0x1eb   : > { %v2257_v20 = vor.u32 %v2256_v18, %v2148_v39  ;;  %v2153_v21 = vor.u32 %v2151_v10, %v2150_v57 }
 0x1ec   : > { %v1858_v54 = vmul.f32 %v7507_v42, %v1769_v16  ;;  %vm1825_vm15 = vcmp.ge.f32.partialorder %v1769_v16, 0.0 }
 0x1ed   : > { %2630 = vrot.lane.b32.xlu0 %v7807_v41, %s6760_s10  ;;  %v7869_v3 = vsel %vm6987_vm4, %v2257_v20, %v2337_v19  ;;  %v7910_v18 = vsel %vm6992_vm5, %v2008_v47, %v2153_v21 }
 0x1ee   : > { %v7872_v31 = vpop.permute.xlu0 %2449  ;;  %2537 = vrot.lane.b32.xlu1 %v7807_v41, %s6755_s24  ;;  %2600 = vrot.lane.b32.xlu2 %v7865_v26, %s6759_s17  ;;  %v1890_v28 = vsel %vm1825_vm15, %v1769_v16, %v1858_v54 }
 0x1ef   : > { %6175 = vmatmul.msk.bf16.gmra.mxu3 %vm1257_vm6, %v7869_v3  ;;  %v1922_v40 = vpack.c.bf16 %v1890_v28, %v1890_v28 }
 0x1f0   : > { %v7880_v23 = vpop.permute.xlu2 %1255  ;;  %v7882_v17 = vpop.permute.xlu1 %2527 }
 0x1f1   : > { %v1681_v49 = vpop.f32.mrf.mxu0  ;;  %v1962_v45 = vunpack.c.l.b16 %v1922_v40 }
 0x1f2   : > { %v1771_v36 = vadd.f32 %v1770_v51, %v1681_v49 }
 0x1f3   : > { %v1978_v20 = vpack.c.b16 %v1962_v45, %v1962_v45 }
 0x1f4   : > { %vm1826_vm0 = vcmp.ge.f32.partialorder %v1771_v36, 0.0  ;;  %v1859_v5 = vmul.f32 %v7507_v42, %v1771_v36 }
 0x1f5   : > { %2505 = vrot.lane.b32.xlu0 %v7865_v26, %s6758_s19 }
 0x1f6   : > { %v1891_v6 = vsel %vm1826_vm0, %v1771_v36, %v1859_v5  ;;  %2457 = vrot.lane.b32.xlu2 %v7781_v55, %s6757_s25  ;;  %2632 = vrot.lane.b32.xlu1 %v7847_v63, %s6760_s10  ;;  %v1299_v55 = vsel %vm1257_vm6, %v7448_v53, %v7725_v11 }
 0x1f7   : > { %v1923_v46 = vpack.c.bf16 %v1891_v6, %v1891_v6  ;;  %v2591_v50 = vpop.permute.xlu0 %2590 }
 0x1f8   : > { %v7894_v12 = vpop.permute.xlu2 %1130  ;;  %v2448_v56 = vpop.permute.xlu1 %2447 }
 0x1f9   : > { %v2074_v4 = vunpack.c.l.b16 %v1923_v46  ;;  %v7897_v48 = vsel %vm1303_vm7, %v2652_v58, %v2448_v56  ;;  %v2011_v58 = vshrl.u32 %v1978_v20, 16 }
 0x1fa   : > { %v2726_v44 = vsel %vm1334_vm8, %v7897_v48, %v2494_v32  ;;  %v1684_v15 = vpop.f32.mrf.mxu0  ;;  %v1331_v32 = vsel %vm1303_vm7, %v1299_v55, %v7774_v38 }
 0x1fb   : > { %v7904_v39 = vpack.c.b16 %v2074_v4, %v1962_v45  ;;  %v2758_v27 = vsel %vm1367_vm9, %v2726_v44, %v7799_v9  ;;  %v1774_v30 = vadd.f32 %v1773_v1, %v1684_v15  ;;  %v2298_v10 = vpack.c.b16 %v2074_v4, %v2074_v4 }
 0x1fc   : > { %v2790_v16 = vsel %vm1400_vm10, %v2758_v27, %v2559_v2  ;;  %v1775_v2 = vpop.f32.mrf.mxu1  ;;  %v1364_v5 = vsel %vm1334_vm8, %v1331_v32, %v7836_v0 }
 0x1fd   : > { %2602 = vrot.lane.b32.xlu0 %v7910_v18, %s6759_s17  ;;  %v2822_v53 = vsel %vm1433_vm11, %v2790_v16, %v2591_v50  ;;  %v2155_v11 = vshrl.u32 %v7904_v39, 16  ;;  %v2158_v51 = vshll.u32 %v7904_v39, 16  ;;  %v2339_v60 = vshll.u32 %v2298_v10, 16 }
 0x1fe   : > { %2570 = vrot.lane.b32.xlu2 %v7830_v35, %s6756_s27  ;;  %2507 = vrot.lane.b32.xlu1 %v7910_v18, %s6758_s19  ;;  %v2853_v9 = vsel %vm1465_vm12, %v2822_v53, %v7845_v59  ;;  %v1860_v19 = vmul.f32 %v7507_v42, %v1774_v30  ;;  %vm1827_vm1 = vcmp.ge.f32.partialorder %v1774_v30, 0.0  ;;  %v2655_v59 = vsel %vm1257_vm6, %v7545_v37, %v7843_v62 }
 0x1ff   : > { %v2561_v54 = vpop.permute.xlu0 %2560  ;;  %3024 = vmatmul.bf16.vlgmr.msra.gmra.mxu2 %v2853_v9  ;;  %v2157_v49 = vrot.slane %v2155_v11, 7  ;;  %v2258_v36 = vrot.slane %v2158_v51, 1  ;;  %v2341_v43 = vrot.slane %v2339_v60, 4  ;;  %v2698_v6 = vsel %vm1303_vm7, %v2655_v59, %v7872_v31 }
 0x200   : > { %v2593_v38 = vpop.permute.xlu2 %2592  ;;  %v1083_v28 = vpop.permute.xlu1 %1082  ;;  %v1892_v46 = vsel %vm1827_vm1, %v1774_v30, %v1860_v19  ;;  %v1397_v56 = vsel %vm1367_vm9, %v1364_v5, %v7757_v22  ;;  %v2728_v22 = vsel %vm1334_vm8, %v2698_v6, %v7858_v52 }
 0x201   : > { %v2160_v1 = vor.u32 %v2158_v51, %v2157_v49  ;;  %v2259_v40 = vor.u32 %v2258_v36, %v2155_v11  ;;  %v1924_v62 = vpack.c.bf16 %v1892_v46, %v1892_v46  ;;  %v1430_v4 = vsel %vm1400_vm10, %v1397_v56, %v7811_v7 }
 0x202   : > { %v1686_v57 = vpop.f32.mrf.mxu0  ;;  %v2760_v52 = vsel %vm1367_vm9, %v2728_v22, %v7882_v17 }
 0x203   : > { %v1776_v50 = vadd.f32 %v1775_v2, %v1686_v57  ;;  %v7938_v0 = vsel %vm6987_vm4, %v2259_v40, %v2341_v43  ;;  %v7947_v37 = vsel %vm6992_vm5, %v2011_v58, %v2160_v1  ;;  %v7964_v27 = vunpack.c.l.b16 %v1924_v62 }
 0x204   : > { %6176 = vmatmul.msk.bf16.gmra.mxu3 %vm1257_vm6, %v7938_v0  ;;  %v1778_v15 = vpop.f32.mrf.mxu1  ;;  %v2792_v30 = vsel %vm1400_vm10, %v2760_v52, %v2561_v54 }
 0x205   : > { %vm1828_vm2 = vcmp.ge.f32.partialorder %v1776_v50, 0.0  ;;  %v1861_v21 = vmul.f32 %v7507_v42, %v1776_v50  ;;  %2459 = vrot.lane.b32.xlu0 %v7830_v35, %s6757_s25  ;;  %v2824_v11 = vsel %vm1433_vm11, %v2792_v30, %v2593_v38 }
 0x206   : > { %2414 = vrot.lane.b32.xlu2 %v7807_v41, %s6754_s28  ;;  %2604 = vrot.lane.b32.xlu1 %v7947_v37, %s6759_s17 }
 0x207   : > { %v1893_v31 = vsel %vm1828_vm2, %v1776_v50, %v1861_v21  ;;  %v1226_v45 = vpop.permute.xlu0 %1225 }
 0x208   : > { %v1925_v35 = vpack.c.bf16 %v1893_v31, %v1893_v31  ;;  %v1463_v55 = vsel %vm1433_vm11, %v1430_v4, %v1226_v45  ;;  %v7958_v44 = vpop.permute.xlu2 %2497  ;;  %v2623_v47 = vpop.permute.xlu1 %2622 }
 0x209   : > { %v1509_v41 = vsel %vm1465_vm12, %v1463_v55, %v7880_v23  ;;  %v2856_v23 = vsel %vm1465_vm12, %v2824_v11, %v2623_v47 }
 0x20a   : > { %v2075_v10 = vunpack.c.l.b16 %v1925_v35  ;;  %1708 = vmatmul.bf16.gmra.mxu0 %v1509_v41 }
 0x20c   : > { %v7968_v7 = vpack.c.b16 %v2075_v10, %v7964_v27  ;;  %v1689_v16 = vpop.f32.mrf.mxu0  ;;  %v2299_v53 = vpack.c.b16 %v2075_v10, %v2075_v10 }
 0x20d   : > { %v1779_v32 = vadd.f32 %v1778_v15, %v1689_v16  ;;  %2572 = vrot.lane.b32.xlu0 %v7869_v3, %s6756_s27  ;;  %v2730_v15 = vsel %vm1334_vm8, %v7897_v48, %v7958_v44 }
 0x20e   : > { %2539 = vrot.lane.b32.xlu2 %v7847_v63, %s6755_s24  ;;  %2461 = vrot.lane.b32.xlu1 %v7869_v3, %s6757_s25  ;;  %v2165_v17 = vshll.u32 %v7968_v7, 16  ;;  %v2343_v9 = vshll.u32 %v2299_v53, 16  ;;  %v2162_v60 = vshrl.u32 %v7968_v7, 16  ;;  %v1780_v3 = vpop.f32.mrf.mxu1 }
 0x20f   : > { %v1038_v2 = vpop.permute.xlu0 %1037  ;;  %3029 = vmatmul.bf16.gmra.mxu2 %v2856_v23  ;;  %v1862_v19 = vmul.f32 %v7507_v42, %v1779_v32  ;;  %vm1829_vm3 = vcmp.ge.f32.partialorder %v1779_v32, 0.0 }
 0x210   : > { %v7979_v51 = vpop.permute.xlu2 %2594  ;;  %v2260_v20 = vrot.slane %v2165_v17, 1  ;;  %v1302_v54 = vsel %vm1257_vm6, %v7487_v25, %v1038_v2  ;;  %v1196_v49 = vpop.permute.xlu1 %1195  ;;  %v2345_v36 = vrot.slane %v2343_v9, 4  ;;  %v2164_v4 = vrot.slane %v2162_v60, 7 }
 0x211   : > { %v1333_v5 = vsel %vm1303_vm7, %v1302_v54, %v1083_v28  ;;  %v1894_v57 = vsel %vm1829_vm3, %v1779_v32, %v1862_v19 }
 0x212   : > { %v2261_v38 = vor.u32 %v2260_v20, %v2162_v60  ;;  %v1366_v43 = vsel %vm1334_vm8, %v1333_v5, %v7894_v12  ;;  %v1926_v6 = vpack.c.bf16 %v1894_v57, %v1894_v57  ;;  %v2167_v53 = vor.u32 %v2165_v17, %v2164_v4 }
 0x214   : > { %v1691_v1 = vpop.f32.mrf.mxu0  ;;  %v7988_v59 = vsel %vm6987_vm4, %v2261_v38, %v2345_v36  ;;  %v8009_v45 = vunpack.c.l.b16 %v1926_v6 }
 0x215   : > { %v1781_v40 = vadd.f32 %v1780_v3, %v1691_v1  ;;  %2416 = vrot.lane.b32.xlu0 %v7847_v63, %s6754_s28  ;;  %6177 = vmatmul.msk.bf16.gmra.mxu3 %vm1257_vm6, %v7988_v59 }
 0x216   : > { %2634 = vrot.lane.b32.xlu2 %v7904_v39, %s6760_s10  ;;  %2574 = vrot.lane.b32.xlu1 %v7938_v0, %s6756_s27  ;;  %v1783_v62 = vpop.f32.mrf.mxu1 }
 0x217   : > { %vm1830_vm13 = vcmp.ge.f32.partialorder %v1781_v40, 0.0  ;;  %v1863_v25 = vmul.f32 %v7507_v42, %v1781_v40  ;;  %v1163_v28 = vpop.permute.xlu0 %1162 }
 0x218   : > { %v1399_v46 = vsel %vm1367_vm9, %v1366_v43, %v1163_v28  ;;  %v8002_v63 = vpop.permute.xlu2 %2451  ;;  %v2563_v56 = vpop.permute.xlu1 %2562 }
 0x219   : > { %v1895_v50 = vsel %vm1830_vm13, %v1781_v40, %v1863_v25  ;;  %v1432_v58 = vsel %vm1400_vm10, %v1399_v46, %v1196_v49 }
 0x21a   : > { %v1927_v21 = vpack.c.bf16 %v1895_v50, %v1895_v50  ;;  %v1464_v22 = vsel %vm1433_vm11, %v1432_v58, %v7744_v24 }
 0x21b   : > { %v1511_v31 = vsel %vm1465_vm12, %v1464_v22, %v7770_v8  ;;  %v1979_v8 = vpack.c.b16 %v7964_v27, %v7964_v27 }
 0x21c   : > { %v2076_v12 = vunpack.c.l.b16 %v1927_v21  ;;  %1713 = vmatmul.bf16.gmra.mxu0 %v1511_v31 }
 0x21d   : > { %2541 = vrot.lane.b32.xlu0 %v7904_v39, %s6755_s24  ;;  %v2014_v27 = vshrl.u32 %v1979_v8, 16 }
 0x21e   : > { %v8014_v35 = vpack.c.b16 %v2076_v12, %v8009_v45  ;;  %2509 = vrot.lane.b32.xlu2 %v7947_v37, %s6758_s19  ;;  %2418 = vrot.lane.b32.xlu1 %v7904_v39, %s6754_s28  ;;  %v2300_v24 = vpack.c.b16 %v2076_v12, %v2076_v12  ;;  %v1785_v48 = vpop.f32.mrf.mxu1 }
 0x21f   : > { %v2530_v55 = vpop.permute.xlu0 %2529  ;;  %v8035_v44 = vsel %vm6992_vm5, %v2014_v27, %v2167_v53 }
 0x220   : > { %v8025_v52 = vpop.permute.xlu2 %2564  ;;  %v2172_v47 = vshll.u32 %v8014_v35, 16  ;;  %v2347_v41 = vshll.u32 %v2300_v24, 16  ;;  %v2762_v30 = vsel %vm1367_vm9, %v2730_v15, %v2530_v55  ;;  %v2407_v10 = vpop.permute.xlu1 %2406  ;;  %v2169_v11 = vshrl.u32 %v8014_v35, 16 }
 0x221   : > { %v1694_v16 = vpop.f32.mrf.mxu0  ;;  %v2794_v23 = vsel %vm1400_vm10, %v2762_v30, %v2563_v56  ;;  %v2658_v40 = vsel %vm1257_vm6, %v7675_v14, %v2407_v10 }
 0x222   : > { %v1784_v39 = vadd.f32 %v1783_v62, %v1694_v16  ;;  %v2262_v32 = vrot.slane %v2172_v47, 1  ;;  %v2349_v2 = vrot.slane %v2347_v41, 4  ;;  %v2826_v19 = vsel %vm1433_vm11, %v2794_v23, %v7979_v51 }
 0x223   : > { %v2171_v57 = vrot.slane %v2169_v11, 7  ;;  %v1980_v51 = vpack.c.b16 %v8009_v45, %v8009_v45  ;;  %v2700_v14 = vsel %vm1303_vm7, %v2658_v40, %v8002_v63 }
 0x224   : > { %v2263_v9 = vor.u32 %v2262_v32, %v2169_v11  ;;  %v1864_v60 = vmul.f32 %v7507_v42, %v1784_v39  ;;  %vm1831_vm14 = vcmp.ge.f32.partialorder %v1784_v39, 0.0 }
 0x225   : > { %2636 = vrot.lane.b32.xlu0 %v7968_v7, %s6760_s10  ;;  %v2174_v58 = vor.u32 %v2172_v47, %v2171_v57  ;;  %v2017_v45 = vshrl.u32 %v1980_v51, 16 }
 0x226   : > { %2543 = vrot.lane.b32.xlu1 %v7968_v7, %s6755_s24  ;;  %2606 = vrot.lane.b32.xlu2 %v8035_v44, %s6759_s17  ;;  %v8044_v17 = vsel %vm6987_vm4, %v2263_v9, %v2349_v2  ;;  %v1896_v36 = vsel %vm1831_vm14, %v1784_v39, %v1864_v60  ;;  %v1788_v43 = vpop.f32.mrf.mxu1 }
 0x227   : > { %6178 = vmatmul.msk.bf16.gmra.mxu3 %vm1257_vm6, %v8044_v17  ;;  %v2625_v20 = vpop.permute.xlu0 %2624  ;;  %v1928_v25 = vpack.c.bf16 %v1896_v36, %v1896_v36  ;;  %v8074_v8 = vsel %vm6992_vm5, %v2017_v45, %v2174_v58 }
 0x228   : > { %v8050_v54 = vpop.permute.xlu2 %2408  ;;  %v2859_v49 = vsel %vm1465_vm12, %v2826_v19, %v2625_v20  ;;  %v2532_v3 = vpop.permute.xlu1 %2531 }
 0x229   : > { %v1696_v38 = vpop.f32.mrf.mxu0  ;;  %3034 = vmatmul.bf16.gmra.mxu2 %v2859_v49  ;;  %v1965_v56 = vunpack.c.l.b16 %v1928_v25  ;;  %v2661_v57 = vsel %vm1257_vm6, %v7710_v61, %v8050_v54 }
 0x22a   : > { %v1786_v5 = vadd.f32 %v1785_v48, %v1696_v38 }
 0x22b   : > { %v1981_v15 = vpack.c.b16 %v1965_v56, %v1965_v56 }
 0x22c   : > { %vm1832_vm15 = vcmp.ge.f32.partialorder %v1786_v5, 0.0  ;;  %v1865_v1 = vmul.f32 %v7507_v42, %v1786_v5 }
 0x22d   : > { %2511 = vrot.lane.b32.xlu0 %v8035_v44, %s6758_s19  ;;  %v2020_v49 = vshrl.u32 %v1981_v15, 16 }
 0x22e   : > { %v1897_v28 = vsel %vm1832_vm15, %v1786_v5, %v1865_v1  ;;  %2463 = vrot.lane.b32.xlu2 %v7938_v0, %s6757_s25  ;;  %2638 = vrot.lane.b32.xlu1 %v8014_v35, %s6760_s10  ;;  %v1790_v32 = vpop.f32.mrf.mxu1 }
 0x22f   : > { %v1929_v6 = vpack.c.bf16 %v1897_v28, %v1897_v28  ;;  %v2500_v46 = vpop.permute.xlu0 %2499 }
 0x230   : > { %v8066_v50 = vpop.permute.xlu2 %2533  ;;  %v2732_v22 = vsel %vm1334_vm8, %v2700_v14, %v2500_v46  ;;  %v2627_v62 = vpop.permute.xlu1 %2626 }
 0x231   : > { %v2077_v21 = vunpack.c.l.b16 %v1929_v6  ;;  %v2764_v24 = vsel %vm1367_vm9, %v2732_v22, %v2532_v3 }
 0x232   : > { %v1699_v31 = vpop.f32.mrf.mxu0  ;;  %v2796_v10 = vsel %vm1400_vm10, %v2764_v24, %v8025_v52 }
 0x233   : > { %v8069_v0 = vpack.c.b16 %v2077_v21, %v1965_v56  ;;  %v1789_v12 = vadd.f32 %v1788_v43, %v1699_v31  ;;  %v2301_v4 = vpack.c.b16 %v2077_v21, %v2077_v21 }
 0x235   : > { %2608 = vrot.lane.b32.xlu0 %v8074_v8, %s6759_s17  ;;  %v2176_v63 = vshrl.u32 %v8069_v0, 16  ;;  %v2179_v55 = vshll.u32 %v8069_v0, 16  ;;  %v2351_v47 = vshll.u32 %v2301_v4, 16  ;;  %v1866_v41 = vmul.f32 %v7507_v42, %v1789_v12 }
 0x236   : > { %2576 = vrot.lane.b32.xlu2 %v7988_v59, %s6756_s27  ;;  %2513 = vrot.lane.b32.xlu1 %v8074_v8, %s6758_s19  ;;  %vm1833_vm0 = vcmp.ge.f32.partialorder %v1789_v12, 0.0  ;;  %v1793_v14 = vpop.f32.mrf.mxu1 }
 0x237   : > { %v2597_v30 = vpop.permute.xlu0 %2596  ;;  %v2264_v16 = vrot.slane %v2179_v55, 1  ;;  %v2178_v53 = vrot.slane %v2176_v63, 7  ;;  %v2353_v2 = vrot.slane %v2351_v47, 4  ;;  %v1898_v20 = vsel %vm1833_vm0, %v1789_v12, %v1866_v41 }
 0x238   : > { %v2828_v39 = vsel %vm1433_vm11, %v2796_v10, %v2597_v30  ;;  %v2629_v11 = vpop.permute.xlu2 %2628  ;;  %v2502_v27 = vpop.permute.xlu1 %2501  ;;  %v1930_v36 = vpack.c.bf16 %v1898_v20, %v1898_v20 }
 0x239   : > { %v2862_v23 = vsel %vm1465_vm12, %v2828_v39, %v2627_v62  ;;  %v2265_v9 = vor.u32 %v2264_v16, %v2176_v63  ;;  %v2181_v48 = vor.u32 %v2179_v55, %v2178_v53 }
 0x23a   : > { %v1701_v60 = vpop.f32.mrf.mxu0  ;;  %3039 = vmatmul.bf16.gmra.mxu2 %v2862_v23  ;;  %v1966_v28 = vunpack.c.l.b16 %v1930_v36 }
 0x23b   : > { %v1791_v19 = vadd.f32 %v1790_v32, %v1701_v60  ;;  %v8091_v52 = vsel %vm6987_vm4, %v2265_v9, %v2353_v2  ;;  %v8100_v38 = vsel %vm6992_vm5, %v2020_v49, %v2181_v48 }
 0x23c   : > { %6179 = vmatmul.msk.bf16.gmra.mxu3 %vm1257_vm6, %v8091_v52  ;;  %v1982_v2 = vpack.c.b16 %v1966_v28, %v1966_v28 }
 0x23d   : > { %vm1834_vm1 = vcmp.ge.f32.partialorder %v1791_v19, 0.0  ;;  %v1867_v3 = vmul.f32 %v7507_v42, %v1791_v19  ;;  %2465 = vrot.lane.b32.xlu0 %v7988_v59, %s6757_s25 }
 0x23e   : > { %2420 = vrot.lane.b32.xlu2 %v7968_v7, %s6754_s28  ;;  %2610 = vrot.lane.b32.xlu1 %v8100_v38, %s6759_s17  ;;  %v1795_v41 = vpop.f32.mrf.mxu1 }
 0x23f   : > { %v1899_v5 = vsel %vm1834_vm1, %v1791_v19, %v1867_v3  ;;  %v2454_v1 = vpop.permute.xlu0 %2453 }
 0x240   : > { %v1931_v40 = vpack.c.bf16 %v1899_v5, %v1899_v5  ;;  %v2504_v25 = vpop.permute.xlu2 %2503  ;;  %v2702_v59 = vsel %vm1303_vm7, %v2661_v57, %v2454_v1  ;;  %v2599_v51 = vpop.permute.xlu1 %2598 }
 0x241   : > { %v2734_v7 = vsel %vm1334_vm8, %v2702_v59, %v2502_v27  ;;  %v8151_v1 = vpop.f32.mrf.mxu3 }
 0x242   : > { %v2078_v43 = vunpack.c.l.b16 %v1931_v40  ;;  %v2766_v56 = vsel %vm1367_vm9, %v2734_v7, %v8066_v50  ;;  %v2023_v40 = vshrl.u32 %v1982_v2, 16 }
 0x244   : > { %v8110_v6 = vpack.c.b16 %v2078_v43, %v1966_v28  ;;  %v2302_v46 = vpack.c.b16 %v2078_v43, %v2078_v43 }
 0x245   : > { %2578 = vrot.lane.b32.xlu0 %v8044_v17, %s6756_s27 }
 0x246   : > { %2545 = vrot.lane.b32.xlu2 %v8014_v35, %s6755_s24  ;;  %2467 = vrot.lane.b32.xlu1 %v8044_v17, %s6757_s25  ;;  %v2186_v61 = vshll.u32 %v8110_v6, 16  ;;  %v2355_v54 = vshll.u32 %v2302_v46, 16  ;;  %v2183_v62 = vshrl.u32 %v8110_v6, 16 }
 0x247   : > { %v2567_v58 = vpop.permute.xlu0 %2566 }
 0x248   : > { %v2798_v21 = vsel %vm1400_vm10, %v2766_v56, %v2567_v58  ;;  %v2601_v22 = vpop.permute.xlu2 %2600  ;;  %v2266_v31 = vrot.slane %v2186_v61, 1  ;;  %v2456_v45 = vpop.permute.xlu1 %2455  ;;  %v2357_v55 = vrot.slane %v2355_v54, 4  ;;  %v2185_v23 = vrot.slane %v2183_v62, 7 }
 0x249   : > { %v1704_v12 = vpop.f32.mrf.mxu0  ;;  %v2830_v4 = vsel %vm1433_vm11, %v2798_v21, %v2599_v51 }
 0x24a   : > { %v1794_v24 = vadd.f32 %v1793_v14, %v1704_v12  ;;  %v2865_v17 = vsel %vm1465_vm12, %v2830_v4, %v2629_v11  ;;  %v2267_v63 = vor.u32 %v2266_v31, %v2183_v62  ;;  %v2188_v5 = vor.u32 %v2186_v61, %v2185_v23  ;;  %v8174_v31 = vpop.f32.mrf.mxu3 }
 0x24b   : > { %3044 = vmatmul.bf16.gmra.mxu2 %v2865_v17 }
 0x24c   : > { %v8128_v15 = vsel %vm6987_vm4, %v2267_v63, %v2357_v55  ;;  %v1868_v50 = vmul.f32 %v7507_v42, %v1794_v24  ;;  %vm1835_vm2 = vcmp.ge.f32.partialorder %v1794_v24, 0.0 }
 0x24d   : > { %2422 = vrot.lane.b32.xlu0 %v8014_v35, %s6754_s28  ;;  %6180 = vmatmul.msk.bf16.gmra.mxu3 %vm1257_vm6, %v8128_v15 }
 0x24e   : > { %2640 = vrot.lane.b32.xlu2 %v8069_v0, %s6760_s10  ;;  %2580 = vrot.lane.b32.xlu1 %v8091_v52, %s6756_s27  ;;  %v1900_v53 = vsel %vm1835_vm2, %v1794_v24, %v1868_v50 }
 0x24f   : > { %v2411_v47 = vpop.permute.xlu0 %2410  ;;  %v1932_v32 = vpack.c.bf16 %v1900_v53, %v1900_v53 }
 0x250   : > { %v2458_v30 = vpop.permute.xlu2 %2457  ;;  %v2569_v10 = vpop.permute.xlu1 %2568  ;;  %v2664_v35 = vsel %vm1257_vm6, %v7751_v34, %v2411_v47 }
 0x251   : > { %v1706_v16 = vpop.f32.mrf.mxu0  ;;  %v2704_v27 = vsel %vm1303_vm7, %v2664_v35, %v2456_v45  ;;  %v1967_v19 = vunpack.c.l.b16 %v1932_v32 }
 0x252   : > { %v1796_v39 = vadd.f32 %v1795_v41, %v1706_v16  ;;  %v2736_v60 = vsel %vm1334_vm8, %v2704_v27, %v2504_v25  ;;  %v8160_v25 = vsel %vm6992_vm5, %v2023_v40, %v2188_v5 }
 0x253   : > { %v1983_v12 = vpack.c.b16 %v1967_v19, %v1967_v19 }
 0x254   : > { %vm1836_vm3 = vcmp.ge.f32.partialorder %v1796_v39, 0.0  ;;  %v1869_v11 = vmul.f32 %v7507_v42, %v1796_v39 }
 0x255   : > { %2547 = vrot.lane.b32.xlu0 %v8069_v0, %s6755_s24  ;;  %v2026_v47 = vshrl.u32 %v1983_v12, 16 }
 0x256   : > { %v1901_v9 = vsel %vm1836_vm3, %v1796_v39, %v1869_v11  ;;  %2515 = vrot.lane.b32.xlu2 %v8100_v38, %s6758_s19  ;;  %2424 = vrot.lane.b32.xlu1 %v8069_v0, %s6754_s28  ;;  %v6337_v11 = vld [vmem:[%s10198_s4 + $0x40] sm:$0xff] }
 0x257   : > { %v1933_v34 = vpack.c.bf16 %v1901_v9, %v1901_v9  ;;  %v2536_v48 = vpop.permute.xlu0 %2535  ;;  %4530 = vmatpush.bf16.msrb.mxu3 %v6337_v11 }
 0x258   : > { %v2571_v20 = vpop.permute.xlu2 %2570  ;;  %v2768_v3 = vsel %vm1367_vm9, %v2736_v60, %v2536_v48  ;;  %v2413_v36 = vpop.permute.xlu1 %2412  ;;  %v6336_v48 = vld [vmem:[%s10198_s4 + $0x38] sm:$0xff] }
 0x259   : > { %v2079_v49 = vunpack.c.l.b16 %v1933_v34  ;;  %v2800_v0 = vsel %vm1400_vm10, %v2768_v3, %v2569_v10  ;;  %v2667_v45 = vsel %vm1257_vm6, %v7790_v13, %v2413_v36  ;;  %4434 = vmatpush.bf16.msrb.mxu1 %v6336_v48  ;;  %v1798_v36 = vpop.f32.mrf.mxu1 }
 0x25a   : > { %v2832_v7 = vsel %vm1433_vm11, %v2800_v0, %v2601_v22  ;;  %v2706_v24 = vsel %vm1303_vm7, %v2667_v45, %v2458_v30 }
 0x25b   : > { %v8153_v57 = vpack.c.b16 %v2079_v49, %v1967_v19  ;;  %v2303_v59 = vpack.c.b16 %v2079_v49, %v2079_v49 }
 0x25d   : > { %2642 = vrot.lane.b32.xlu0 %v8110_v6, %s6760_s10  ;;  %v2193_v51 = vshll.u32 %v8153_v57, 16  ;;  %v2359_v28 = vshll.u32 %v2303_v59, 16  ;;  %v2190_v46 = vshrl.u32 %v8153_v57, 16 }
 0x25e   : > { %2549 = vrot.lane.b32.xlu1 %v8110_v6, %s6755_s24  ;;  %2612 = vrot.lane.b32.xlu2 %v8160_v25, %s6759_s17 }
 0x25f   : > { %v2631_v43 = vpop.permute.xlu0 %2630  ;;  %v2268_v14 = vrot.slane %v2193_v51, 1  ;;  %v2361_v21 = vrot.slane %v2359_v28, 4  ;;  %v2192_v22 = vrot.slane %v2190_v46, 7 }
 0x260   : > { %v2415_v61 = vpop.permute.xlu2 %2414  ;;  %v2868_v54 = vsel %vm1465_vm12, %v2832_v7, %v2631_v43  ;;  %v2538_v58 = vpop.permute.xlu1 %2537 }
 0x261   : > { %3049 = vmatmul.bf16.gmra.mxu2 %v2868_v54  ;;  %v2269_v56 = vor.u32 %v2268_v14, %v2190_v46  ;;  %v2195_v63 = vor.u32 %v2193_v51, %v2192_v22  ;;  %v2670_v23 = vsel %vm1257_vm6, %v7865_v26, %v2415_v61  ;;  %v1800_v61 = vpop.f32.mrf.mxu1 }
 0x263   : > { %v8172_v62 = vsel %vm6987_vm4, %v2269_v56, %v2361_v21  ;;  %v8191_v41 = vsel %vm6992_vm5, %v2026_v47, %v2195_v63 }
 0x264   : > { %6181 = vmatmul.msk.bf16.gmra.mxu3 %vm1257_vm6, %v8172_v62 }
 0x265   : > { %2517 = vrot.lane.b32.xlu0 %v8160_v25, %s6758_s19 }
 0x266   : > { %2469 = vrot.lane.b32.xlu2 %v8091_v52, %s6757_s25  ;;  %2644 = vrot.lane.b32.xlu1 %v8153_v57, %s6760_s10  ;;  %v8195_v52 = vpop.f32.mrf.mxu3 }
 0x267   : > { %v2506_v4 = vpop.permute.xlu0 %2505 }
 0x268   : > { %v2540_v17 = vpop.permute.xlu2 %2539  ;;  %v2738_v55 = vsel %vm1334_vm8, %v2706_v24, %v2506_v4  ;;  %v2633_v50 = vpop.permute.xlu1 %2632 }
 0x269   : > { %v2770_v13 = vsel %vm1367_vm9, %v2738_v55, %v2538_v58 }
 0x26a   : > { %v2802_v10 = vsel %vm1400_vm10, %v2770_v13, %v2571_v20 }
 0x26d   : > { %2614 = vrot.lane.b32.xlu0 %v8191_v41, %s6759_s17 }
 0x26e   : > { %2582 = vrot.lane.b32.xlu2 %v8128_v15, %s6756_s27  ;;  %2519 = vrot.lane.b32.xlu1 %v8191_v41, %s6758_s19  ;;  %v8211_v27 = vpop.f32.mrf.mxu3 }
 0x26f   : > { %v2603_v30 = vpop.permute.xlu0 %2602 }
 0x270   : > { %v2834_v16 = vsel %vm1433_vm11, %v2802_v10, %v2603_v30  ;;  %v2635_v53 = vpop.permute.xlu2 %2634  ;;  %v2508_v35 = vpop.permute.xlu1 %2507  ;;  %v6335_v10 = vld [vmem:[%s10198_s4 + $0x30] sm:$0xff] }
 0x271   : > { %v2871_v39 = vsel %vm1465_vm12, %v2834_v16, %v2633_v50  ;;  %v1803_v30 = vpop.f32.mrf.mxu1  ;;  %4435 = vmatpush.bf16.msrb.mxu1 %v6335_v10 }
 0x272   : > { %3054 = vmatmul.bf16.gmra.mxu2 %v2871_v39 }
 0x275   : > { %2471 = vrot.lane.b32.xlu0 %v8128_v15, %s6757_s25 }
 0x276   : > { %2426 = vrot.lane.b32.xlu2 %v8110_v6, %s6754_s28  ;;  %v8227_v3 = vpop.f32.mrf.mxu3 }
 0x277   : > { %v2460_v32 = vpop.permute.xlu0 %2459 }
 0x278   : > { %v2510_v9 = vpop.permute.xlu2 %2509  ;;  %v2708_v2 = vsel %vm1303_vm7, %v2670_v23, %v2460_v32  ;;  %v2605_v34 = vpop.permute.xlu1 %2604 }
 0x279   : > { %v2740_v15 = vsel %vm1334_vm8, %v2708_v2, %v2508_v35 }
 0x27a   : > { %v2772_v26 = vsel %vm1367_vm9, %v2740_v15, %v2540_v17 }
 0x27d   : > { %2584 = vrot.lane.b32.xlu0 %v8172_v62, %s6756_s27 }
 0x27e   : > { %2551 = vrot.lane.b32.xlu2 %v8153_v57, %s6755_s24  ;;  %v8232_v46 = vpop.f32.mrf.mxu3 }
 0x27f   : > { %v2573_v6 = vpop.permute.xlu0 %2572 }
 0x280   : > { %v2804_v60 = vsel %vm1400_vm10, %v2772_v26, %v2573_v6  ;;  %v2607_v20 = vpop.permute.xlu2 %2606  ;;  %v2462_v19 = vpop.permute.xlu1 %2461 }
 0x281   : > { %v2836_v49 = vsel %vm1433_vm11, %v2804_v60, %v2605_v34 }
 0x282   : > { %v2874_v5 = vsel %vm1465_vm12, %v2836_v49, %v2635_v53  ;;  %v3025_v40 = vpop.f32.mrf.mxu2 }
 0x283   : > { %3059 = vmatmul.bf16.gmra.mxu2 %v2874_v5 }
 0x286   : > { %v8242_v13 = vpop.f32.mrf.mxu3 }
 0x287   : > { %v2417_v59 = vpop.permute.xlu0 %2416  ;;  %v1709_v0 = vpop.f32.mrf.mxu0 }
 0x288   : > { %v1799_v51 = vadd.f32 %v1798_v36, %v1709_v0  ;;  %v2464_v28 = vpop.permute.xlu2 %2463  ;;  %v2575_v43 = vpop.permute.xlu1 %2574  ;;  %v2673_v7 = vsel %vm1257_vm6, %v7910_v18, %v2417_v59 }
 0x289   : > { %v2710_v54 = vsel %vm1303_vm7, %v2673_v7, %v2462_v19  ;;  %v6504_v19 = vld [vmem:[%s6954_s15 + $0x8] sm:$0xff] }
 0x28a   : > { %v1870_v14 = vmul.f32 %v7507_v42, %v1799_v51  ;;  %vm1837_vm13 = vcmp.ge.f32.partialorder %v1799_v51, 0.0  ;;  %v3027_v22 = vpop.f32.mrf.mxu2  ;;  %v2742_v45 = vsel %vm1334_vm8, %v2710_v54, %v2510_v9 }
 0x28b   : > { %v3028_v49 = vadd.f32 %v6504_v19, %v3027_v22 }
 0x28c   : > { %v1902_v21 = vsel %vm1837_vm13, %v1799_v51, %v1870_v14  ;;  %v6505_v51 = vld [vmem:[%s6954_s15] sm:$0xff] }
 0x28d   : > { %v1934_v63 = vpack.c.bf16 %v1902_v21, %v1902_v21 }
 0x28e   : > { %v8266_v54 = vpop.f32.mrf.mxu3 }
 0x28f   : > { %v2542_v58 = vpop.permute.xlu0 %2541  ;;  %v1711_v56 = vpop.f32.mrf.mxu0  ;;  %v1968_v16 = vunpack.c.l.b16 %v1934_v63 }
 0x290   : > { %v1801_v12 = vadd.f32 %v1800_v61, %v1711_v56  ;;  %v2774_v4 = vsel %vm1367_vm9, %v2742_v45, %v2542_v58  ;;  %v2419_v24 = vpop.permute.xlu1 %2418  ;;  %v8239_v17 = vpop.permute.xlu2 %2576 }
 0x291   : > { %v2806_v55 = vsel %vm1400_vm10, %v2774_v4, %v2575_v43  ;;  %v2676_v36 = vsel %vm1257_vm6, %v7947_v37, %v2419_v24  ;;  %v3026_v43 = vadd.f32 %v6505_v51, %v3025_v40  ;;  %v1805_v58 = vpop.f32.mrf.mxu1  ;;  %v3117_v37 = vadd.f32 %v8174_v31, %v3028_v49 }
 0x292   : > { %vm1838_vm14 = vcmp.ge.f32.partialorder %v1801_v12, 0.0  ;;  %v1871_v18 = vmul.f32 %v7507_v42, %v1801_v12  ;;  %v2838_v39 = vsel %vm1433_vm11, %v2806_v55, %v2607_v20  ;;  %v8251_v34 = vpop.f32.mrf.mxu2  ;;  %v1984_v20 = vpack.c.b16 %v1968_v16, %v1968_v16 }
 0x293   : > { %v2712_v56 = vsel %vm1303_vm7, %v2676_v36, %v2464_v28  ;;  %v3115_v63 = vadd.f32 %v8151_v1, %v3026_v43  ;;  %v8287_v31 = vstv %s8257_s13  ;;  %vm3196_vm1 = vcmp.ge.f32.partialorder %v3117_v37, 0.0  ;;  %s6272_s13 = sld [smem:[#allocation8 + $0x3]] }
 0x294   : > { %v1903_v50 = vsel %vm1838_vm14, %v1801_v12, %v1871_v18  ;;  %v2029_v21 = vshrl.u32 %v1984_v20, 16 }
 0x295   : > { %v1935_v47 = vpack.c.bf16 %v1903_v50, %v1903_v50  ;;  %vm3195_vm2 = vcmp.ge.f32.partialorder %v3115_v63, 0.0 }
 0x297   : > { %v2080_v53 = vunpack.c.l.b16 %v1935_v47  ;;  %v2637_v35 = vpop.permute.xlu0 %2636 }
 0x298   : > { %v2877_v11 = vsel %vm1465_vm12, %v2838_v39, %v2637_v35  ;;  %v2544_v23 = vpop.permute.xlu1 %2543  ;;  %v8259_v60 = vpop.permute.xlu2 %2420 }
 0x299   : > { %v8249_v32 = vpack.c.b16 %v2080_v53, %v1968_v16  ;;  %v1714_v9 = vpop.f32.mrf.mxu0  ;;  %3064 = vmatmul.bf16.gmra.mxu2 %v2877_v11  ;;  %v2304_v2 = vpack.c.b16 %v2080_v53, %v2080_v53  ;;  %v3228_v53 = vmul.f32 %v8287_v31, %v3115_v63 }
 0x29a   : > { %v1804_v48 = vadd.f32 %v1803_v30, %v1714_v9  ;;  %v3032_v55 = vpop.f32.mrf.mxu2  ;;  %v3229_v30 = vmul.f32 %v8287_v31, %v3117_v37 }
 0x29b   : > { %2646 = vrot.lane.b32.xlu2 %v8249_v32, %s6760_s10  ;;  %v2197_v15 = vshrl.u32 %v8249_v32, 16  ;;  %v2200_v6 = vshll.u32 %v8249_v32, 16  ;;  %v2363_v26 = vshll.u32 %v2304_v2, 16 }
 0x29c   : > { %v1872_v0 = vmul.f32 %v7507_v42, %v1804_v48  ;;  %vm1839_vm15 = vcmp.ge.f32.partialorder %v1804_v48, 0.0 }
 0x29d   : > { %v2270_v5 = vrot.slane %v2200_v6, 1  ;;  %v2199_v59 = vrot.slane %v2197_v15, 7  ;;  %v2365_v61 = vrot.slane %v2363_v26, 4  ;;  %v6506_v26 = vld [vmem:[%s6954_s15 + $0x18] sm:$0xff] }
 0x29e   : > { %v1904_v24 = vsel %vm1839_vm15, %v1804_v48, %v1872_v0  ;;  %v3033_v20 = vadd.f32 %v6506_v26, %v3032_v55 }
 0x29f   : > { %v2512_v7 = vpop.permute.xlu0 %2511  ;;  %v2271_v14 = vor.u32 %v2270_v5, %v2197_v15  ;;  %v2202_v22 = vor.u32 %v2200_v6, %v2199_v59  ;;  %v1936_v1 = vpack.c.bf16 %v1904_v24, %v1904_v24  ;;  %v3260_v6 = vsel %vm3195_vm2, %v3115_v63, %v3228_v53  ;;  %v6507_v5 = vld [vmem:[%s6954_s15 + $0x10] sm:$0xff] }
 0x2a0   : > { %v2744_v45 = vsel %vm1334_vm8, %v2712_v56, %v2512_v7  ;;  %v2639_v12 = vpop.permute.xlu1 %2638  ;;  %v8294_v10 = vpop.permute.xlu2 %2545  ;;  %v3031_v59 = vadd.f32 %v6507_v5, %v8251_v34  ;;  %v3292_v7 = vpack.c.bf16 %v3260_v6, %v3260_v6 }
 0x2a1   : > { %v1716_v4 = vpop.f32.mrf.mxu0  ;;  %v8273_v40 = vsel %vm6987_vm4, %v2271_v14, %v2365_v61  ;;  %v8279_v28 = vsel %vm6992_vm5, %v2029_v21, %v2202_v22  ;;  %v2776_v50 = vsel %vm1367_vm9, %v2744_v45, %v2544_v23  ;;  %v8299_v23 = vpop.f32.mrf.mxu3  ;;  %v1969_v9 = vunpack.c.l.b16 %v1936_v1 }
 0x2a2   : > { %v1806_v18 = vadd.f32 %v1805_v58, %v1716_v4  ;;  %6182 = vmatmul.msk.bf16.gmra.mxu3 %vm1257_vm6, %v8273_v40  ;;  %2521 = vrot.lane.b32.xlu0 %v8279_v28, %s6758_s19  ;;  %v2808_v11 = vsel %vm1400_vm10, %v2776_v50, %v8239_v17  ;;  %v3122_v61 = vadd.f32 %v8211_v27, %v3033_v20  ;;  %v3341_v27 = vunpack.c.l.b16 %v3292_v7  ;;  %v6508_v20 = vld [vmem:[%s6954_s15 + $0x28] sm:$0xff] }
 0x2a3   : > { %2616 = vrot.lane.b32.xlu1 %v8279_v28, %s6759_s17  ;;  %2473 = vrot.lane.b32.xlu2 %v8172_v62, %s6757_s25  ;;  %v3261_v62 = vsel %vm3196_vm1, %v3117_v37, %v3229_v30  ;;  %v1985_v14 = vpack.c.b16 %v1969_v9, %v1969_v9  ;;  %v2679_v22 = vsel %vm1257_vm6, %v8035_v44, %v8259_v60 }
 0x2a4   : > { %vm1840_vm0 = vcmp.ge.f32.partialorder %v1806_v18, 0.0  ;;  %v1873_v47 = vmul.f32 %v7507_v42, %v1806_v18  ;;  %v3293_v49 = vpack.c.bf16 %v3261_v62, %v3261_v62  ;;  %v3120_v34 = vadd.f32 %v8195_v52, %v3031_v59 }
 0x2a5   : > { %v2032_v63 = vshrl.u32 %v1985_v14, 16  ;;  %v3231_v50 = vmul.f32 %v8287_v31, %v3122_v61  ;;  %vm3198_vm3 = vcmp.ge.f32.partialorder %v3122_v61, 0.0  ;;  %v3357_v59 = vpack.c.b16 %v3341_v27, %v3341_v27 }
 0x2a6   : > { %v1905_v16 = vsel %vm1840_vm0, %v1806_v18, %v1873_v47  ;;  %v8317_v21 = vunpack.c.l.b16 %v3293_v49  ;;  %v3230_v1 = vmul.f32 %v8287_v31, %v3120_v34  ;;  %vm3197_vm13 = vcmp.ge.f32.partialorder %v3120_v34, 0.0 }
 0x2a7   : > { %v1937_v35 = vpack.c.bf16 %v1905_v16, %v1905_v16  ;;  %v2609_v39 = vpop.permute.xlu0 %2608  ;;  %v3263_v16 = vsel %vm3198_vm3, %v3122_v61, %v3231_v50 }
 0x2a8   : > { %v2840_v42 = vsel %vm1433_vm11, %v2808_v11, %v2609_v39  ;;  %v2514_v48 = vpop.permute.xlu1 %2513  ;;  %v2641_v37 = vpop.permute.xlu2 %2640  ;;  %v3469_v30 = vpack.c.b16 %v8317_v21, %v3341_v27  ;;  %v3262_v62 = vsel %vm3197_vm13, %v3120_v34, %v3230_v1  ;;  %v3677_v61 = vpack.c.b16 %v8317_v21, %v8317_v21 }
 0x2a9   : > { %v2081_v2 = vunpack.c.l.b16 %v1937_v35  ;;  %v2880_v15 = vsel %vm1465_vm12, %v2840_v42, %v2639_v12  ;;  %v8324_v18 = vpop.f32.mrf.mxu3  ;;  %v6334_v42 = vld [vmem:[%s10198_s4 + $0x28] sm:$0xff]  ;;  %v3294_v26 = vpack.c.bf16 %v3262_v62, %v3262_v62 }
 0x2aa   : > { %3069 = vmatmul.bf16.gmra.mxu2 %v2880_v15  ;;  %v3492_v11 = vshrl.u32 %v3469_v30, 16  ;;  %4436 = vmatpush.bf16.msrb.mxu1 %v6334_v42  ;;  %v3495_v7 = vshll.u32 %v3469_v30, 16  ;;  %v3697_v21 = vshll.u32 %v3677_v61, 16 }
 0x2ab   : > { %v8304_v19 = vpack.c.b16 %v2081_v2, %v1969_v9  ;;  %2428 = vrot.lane.b32.xlu1 %v8153_v57, %s6754_s28  ;;  %v2305_v17 = vpack.c.b16 %v2081_v2, %v2081_v2  ;;  %2586 = vrot.lane.b32.xlu2 %v8273_v40, %s6756_s27 }
 0x2ac   : > { %v8310_v36 = vpop.f32.mrf.mxu2  ;;  %v3494_v49 = vrot.slane %v3492_v11, 7  ;;  %v3699_v50 = vrot.slane %v3697_v21, 4 }
 0x2ad   : > { %v2204_v0 = vshrl.u32 %v8304_v19, 16  ;;  %v2207_v51 = vshll.u32 %v8304_v19, 16  ;;  %v2367_v43 = vshll.u32 %v2305_v17, 16 }
 0x2af   : > { %v2466_v57 = vpop.permute.xlu0 %2465  ;;  %v2272_v58 = vrot.slane %v2207_v51, 1  ;;  %v2206_v56 = vrot.slane %v2204_v0, 7  ;;  %v2369_v24 = vrot.slane %v2367_v43, 4 }
 0x2b0   : > { %v2714_v45 = vsel %vm1303_vm7, %v2679_v22, %v2466_v57  ;;  %v2611_v12 = vpop.permute.xlu1 %2610  ;;  %v2516_v15 = vpop.permute.xlu2 %2515  ;;  %v8362_v57 = vunpack.c.l.b16 %v3294_v26  ;;  %v3376_v22 = vshrl.u32 %v3357_v59, 16 }
 0x2b1   : > { %v2273_v4 = vor.u32 %v2272_v58, %v2204_v0  ;;  %v2209_v55 = vor.u32 %v2207_v51, %v2206_v56  ;;  %v2746_v52 = vsel %vm1334_vm8, %v2714_v45, %v2514_v48  ;;  %v3295_v48 = vpack.c.bf16 %v3263_v16, %v3263_v16  ;;  %v6509_v51 = vld [vmem:[%s6954_s15 + $0x20] sm:$0xff] }
 0x2b2   : > { %v2778_v35 = vsel %vm1367_vm9, %v2746_v52, %v8294_v10  ;;  %v8352_v10 = vpop.f32.mrf.mxu3  ;;  %v3036_v43 = vadd.f32 %v6509_v51, %v8310_v36  ;;  %v3497_v56 = vor.u32 %v3495_v7, %v3494_v49  ;;  %v3630_v45 = vrot.slane %v3495_v7, 1 }
 0x2b3   : > { %2553 = vrot.lane.b32.xlu1 %v8249_v32, %s6755_s24  ;;  %v8331_v44 = vsel %vm6987_vm4, %v2273_v4, %v2369_v24  ;;  %v2241_v60 = vsel %vm6992_vm5, %v2032_v63, %v2209_v55  ;;  %v3452_v0 = vunpack.c.l.b16 %v3295_v48  ;;  %v3356_v49 = vpack.c.b16 %v8362_v57, %v8362_v57 }
 0x2b4   : > { %6183 = vmatmul.msk.bf16.gmra.mxu3 %vm1257_vm6, %v8331_v44  ;;  %v3037_v47 = vpop.f32.mrf.mxu2  ;;  %2523 = vrot.lane.b32.xlu2 %v2241_v60, %s6758_s19  ;;  %v3631_v63 = vor.u32 %v3630_v45, %v3492_v11  ;;  %v6510_v11 = vld [vmem:[%s6954_s15 + $0x38] sm:$0xff] }
 0x2b5   : > { %2618 = vrot.lane.b32.xlu0 %v2241_v60, %s6759_s17  ;;  %v3038_v17 = vadd.f32 %v6508_v20, %v3037_v47  ;;  %v3676_v1 = vpack.c.b16 %v3452_v0, %v3452_v0 }
 0x2b7   : > { %v2579_v53 = vpop.permute.xlu0 %2578  ;;  %v3127_v58 = vadd.f32 %v8232_v46, %v3038_v17  ;;  %v8378_v46 = vsel %vm6992_vm5, %v3376_v22, %v3497_v56 }
 0x2b8   : > { %v2810_v39 = vsel %vm1400_vm10, %v2778_v35, %v2579_v53  ;;  %v2468_v9 = vpop.permute.xlu1 %2467  ;;  %v2613_v4 = vpop.permute.xlu2 %2612  ;;  %v3773_v53 = vsel %vm6987_vm4, %v3631_v63, %v3699_v50 }
 0x2b9   : > { %v2842_v2 = vsel %vm1433_vm11, %v2810_v39, %v2611_v12  ;;  %v3233_v12 = vmul.f32 %v8287_v31, %v3127_v58  ;;  %vm3200_vm14 = vcmp.ge.f32.partialorder %v3127_v58, 0.0 }
 0x2ba   : > { %v2883_v6 = vsel %vm1465_vm12, %v2842_v2, %v2641_v37  ;;  %v8366_v37 = vpack.c.b16 %v3452_v0, %v8362_v57  ;;  %v8384_v24 = vpop.f32.mrf.mxu3  ;;  %v3693_v2 = vshll.u32 %v3676_v1, 16 }
 0x2bb   : > { %2648 = vrot.lane.b32.xlu1 %v8304_v19, %s6760_s10  ;;  %3074 = vmatmul.bf16.gmra.mxu2 %v2883_v6  ;;  %v3265_v52 = vsel %vm3200_vm14, %v3127_v58, %v3233_v12  ;;  %v6511_v6 = vld [vmem:[%s6954_s15 + $0x30] sm:$0xff] }
 0x2bc   : > { %3790 = vrot.lane.b32.xlu2 %v3469_v30, %s6754_s28  ;;  %v3485_v47 = vshrl.u32 %v8366_v37, 16  ;;  %v3297_v39 = vpack.c.bf16 %v3265_v52, %v3265_v52  ;;  %v3695_v58 = vrot.slane %v3693_v2, 4 }
 0x2bd   : > { %2430 = vrot.lane.b32.xlu0 %v8249_v32, %s6754_s28  ;;  %v3040_v5 = vpop.f32.mrf.mxu2  ;;  %v3125_v32 = vadd.f32 %v8227_v3, %v3036_v43 }
 0x2be   : > { %v3487_v48 = vrot.slane %v3485_v47, 7  ;;  %v3041_v26 = vadd.f32 %v6511_v6, %v3040_v5  ;;  %v3454_v59 = vunpack.c.l.b16 %v3297_v39 }
 0x2bf   : > { %v2423_v14 = vpop.permute.xlu0 %2422  ;;  %v3232_v27 = vmul.f32 %v8287_v31, %v3125_v32  ;;  %vm3199_vm15 = vcmp.ge.f32.partialorder %v3125_v32, 0.0 }
 0x2c0   : > { %v2682_v34 = vsel %vm1257_vm6, %v8074_v8, %v2423_v14  ;;  %v2581_v36 = vpop.permute.xlu1 %2580  ;;  %v2470_v20 = vpop.permute.xlu2 %2469  ;;  %v3130_v5 = vadd.f32 %v8242_v13, %v3041_v26  ;;  %v3678_v50 = vpack.c.b16 %v3454_v59, %v3454_v59 }
 0x2c1   : > { %v2716_v3 = vsel %vm1303_vm7, %v2682_v34, %v2468_v9  ;;  %v3264_v16 = vsel %vm3199_vm15, %v3125_v32, %v3232_v27  ;;  %v3373_v32 = vshrl.u32 %v3356_v49, 16 }
 0x2c2   : > { %v2748_v60 = vsel %vm1334_vm8, %v2716_v3, %v2516_v15  ;;  %v3296_v15 = vpack.c.bf16 %v3264_v16, %v3264_v16  ;;  %v8403_v7 = vpop.f32.mrf.mxu3  ;;  %v3234_v45 = vmul.f32 %v8287_v31, %v3130_v5  ;;  %vm3201_vm1 = vcmp.ge.f32.partialorder %v3130_v5, 0.0 }
 0x2c3   : > { %2475 = vrot.lane.b32.xlu1 %v8273_v40, %s6757_s25 }
 0x2c4   : > { %6184 = vmatmul.msk.bf16.gmra.mxu3 %vm1257_vm6, %v8273_v40  ;;  %3879 = vrot.lane.b32.xlu2 %v8378_v46, %s6758_s19  ;;  %v3488_v40 = vshll.u32 %v8366_v37, 16  ;;  %v3342_v22 = vunpack.c.l.b16 %v3296_v15 }
 0x2c5   : > { %3911 = vrot.lane.b32.xlu0 %v3469_v30, %s6755_s24  ;;  %v3042_v8 = vpop.f32.mrf.mxu2 }
 0x2c6   : > { %v3628_v35 = vrot.slane %v3488_v40, 1  ;;  %v3043_v42 = vadd.f32 %v6510_v11, %v3042_v8  ;;  %v3490_v56 = vor.u32 %v3488_v40, %v3487_v48  ;;  %v8412_v34 = vpack.c.b16 %v3454_v59, %v3342_v22 }
 0x2c7   : > { %v2548_v55 = vpop.permute.xlu0 %2547  ;;  %v3701_v11 = vshll.u32 %v3678_v50, 16 }
 0x2c8   : > { %v2780_v30 = vsel %vm1367_vm9, %v2748_v60, %v2548_v55  ;;  %v2425_v9 = vpop.permute.xlu1 %2424  ;;  %v3629_v17 = vor.u32 %v3628_v35, %v3485_v47  ;;  %v3132_v14 = vadd.f32 %v8266_v54, %v3043_v42  ;;  %v3499_v27 = vshrl.u32 %v8412_v34, 16  ;;  %v2583_v63 = vpop.permute.xlu2 %2582  ;;  %v6513_v42 = vld [vmem:[%s6954_s15 + $0x40] sm:$0xff] }
 0x2c9   : > { %v2812_v62 = vsel %vm1400_vm10, %v2780_v30, %v2581_v36  ;;  %v8421_v36 = vsel %vm6992_vm5, %v3373_v32, %v3490_v56  ;;  %v2685_v13 = vsel %vm1257_vm6, %v8100_v38, %v2425_v9  ;;  %v6333_v38 = vld [vmem:[%s10198_s4 + $0x20] sm:$0xff]  ;;  %v3266_v60 = vsel %vm3201_vm1, %v3130_v5, %v3234_v45  ;;  %v6512_v30 = vld [vmem:[%s6954_s15 + $0x48] sm:$0xff] }
 0x2ca   : > { %v2844_v43 = vsel %vm1433_vm11, %v2812_v62, %v2613_v4  ;;  %v8410_v57 = vsel %vm6987_vm4, %v3629_v17, %v3695_v58  ;;  %v3235_v54 = vmul.f32 %v8287_v31, %v3132_v14  ;;  %vm3202_vm0 = vcmp.ge.f32.partialorder %v3132_v14, 0.0  ;;  %v8437_v52 = vpop.f32.mrf.mxu3  ;;  %4437 = vmatpush.bf16.msrb.mxu1 %v6333_v38  ;;  %v6514_v38 = vld [vmem:[%s6954_s15 + $0x58] sm:$0xff] }
 0x2cb   : > { %3944 = vrot.lane.b32.xlu1 %v3773_v53, %s6756_s27  ;;  %v3502_v4 = vshll.u32 %v8412_v34, 16  ;;  %v2718_v8 = vsel %vm1303_vm7, %v2685_v13, %v2470_v20  ;;  %v3501_v35 = vrot.slane %v3499_v27, 7  ;;  %v3298_v39 = vpack.c.bf16 %v3266_v60, %v3266_v60 }
 0x2cc   : > { %3913 = vrot.lane.b32.xlu2 %v8366_v37, %s6755_s24  ;;  %v3267_v3 = vsel %vm3202_vm0, %v3132_v14, %v3235_v54  ;;  %v3358_v9 = vpack.c.b16 %v3342_v22, %v3342_v22 }
 0x2cd   : > { %3835 = vrot.lane.b32.xlu0 %v3773_v53, %s6757_s25  ;;  %v3299_v47 = vpack.c.bf16 %v3267_v3, %v3267_v3  ;;  %v3632_v1 = vrot.slane %v3502_v4, 1  ;;  %v3504_v49 = vor.u32 %v3502_v4, %v3501_v35  ;;  %v3343_v59 = vunpack.c.l.b16 %v3298_v39 }
 0x2ce   : > { %v3045_v0 = vpop.f32.mrf.mxu2  ;;  %v3379_v14 = vshrl.u32 %v3358_v9, 16 }
 0x2cf   : > { %v2643_v51 = vpop.permute.xlu0 %2642  ;;  %v3046_v62 = vadd.f32 %v6513_v42, %v3045_v0  ;;  %v3455_v2 = vunpack.c.l.b16 %v3299_v47  ;;  %v3633_v6 = vor.u32 %v3632_v1, %v3499_v27  ;;  %v3359_v60 = vpack.c.b16 %v3343_v59, %v3343_v59 }
 0x2d0   : > { %v2886_v61 = vsel %vm1465_vm12, %v2844_v43, %v2643_v51  ;;  %v2550_v21 = vpop.permute.xlu1 %2549  ;;  %v3703_v51 = vrot.slane %v3701_v11, 4  ;;  %v8457_v58 = vpop.permute.xlu2 %2426  ;;  %v8467_v22 = vsel %vm6992_vm5, %v3379_v14, %v3504_v49 }
 0x2d1   : > { %3079 = vmatmul.bf16.gmra.mxu2 %v2886_v61  ;;  %v3135_v0 = vadd.f32 %v8299_v23, %v3046_v62  ;;  %v8455_v61 = vpack.c.b16 %v3455_v2, %v3343_v59  ;;  %v3679_v13 = vpack.c.b16 %v3455_v2, %v3455_v2  ;;  %v3382_v11 = vshrl.u32 %v3359_v60, 16 }
 0x2d2   : > { %v8452_v43 = vpop.f32.mrf.mxu3 }
 0x2d3   : > { %3833 = vrot.lane.b32.xlu1 %v8410_v57, %s6757_s25  ;;  %vm3203_vm3 = vcmp.ge.f32.partialorder %v3135_v0, 0.0  ;;  %v3509_v5 = vshll.u32 %v8455_v61, 16  ;;  %v3506_v54 = vshrl.u32 %v8455_v61, 16 }
 0x2d4   : > { %6222 = vmatmul.msk.bf16.vlgmr.msrb.gmra.mxu3 %vm1257_vm6, %v8410_v57  ;;  %3976 = vrot.lane.b32.xlu2 %v8421_v36, %s6759_s17 }
 0x2d5   : > { %3788 = vrot.lane.b32.xlu0 %v8366_v37, %s6754_s28  ;;  %v3508_v3 = vrot.slane %v3506_v54, 7 }
 0x2d6   : > { %v3047_v40 = vpop.f32.mrf.mxu2 }
 0x2d7   : > { %v2518_v12 = vpop.permute.xlu0 %2517  ;;  %v3048_v16 = vadd.f32 %v6512_v30, %v3047_v40  ;;  %v3705_v40 = vshll.u32 %v3679_v13, 16 }
 0x2d8   : > { %v2750_v55 = vsel %vm1334_vm8, %v2718_v8, %v2518_v12  ;;  %v2645_v20 = vpop.permute.xlu1 %2644  ;;  %v8480_v27 = vpop.permute.xlu2 %2551 }
 0x2d9   : > { %v2782_v53 = vsel %vm1367_vm9, %v2750_v55, %v2550_v21  ;;  %v3137_v26 = vadd.f32 %v8324_v18, %v3048_v16  ;;  %v3774_v18 = vsel %vm6987_vm4, %v3633_v6, %v3703_v51  ;;  %v6515_v55 = vld [vmem:[%s6954_s15 + $0x50] sm:$0xff]  ;;  %v3511_v16 = vor.u32 %v3509_v5, %v3508_v3 }
 0x2da   : > { %v2814_v15 = vsel %vm1400_vm10, %v2782_v53, %v2583_v63  ;;  %v8478_v12 = vpop.f32.mrf.mxu3  ;;  %v3707_v35 = vrot.slane %v3705_v40, 4 }
 0x2db   : > { %3881 = vrot.lane.b32.xlu1 %v8421_v36, %s6758_s19  ;;  %v3237_v56 = vmul.f32 %v8287_v31, %v3137_v26  ;;  %vm3204_vm2 = vcmp.ge.f32.partialorder %v3137_v26, 0.0 }
 0x2dc   : > { %4008 = vrot.lane.b32.xlu2 %v8412_v34, %s6760_s10 }
 0x2dd   : > { %4006 = vrot.lane.b32.xlu0 %v8366_v37, %s6760_s10  ;;  %v3269_v32 = vsel %vm3204_vm2, %v3137_v26, %v3237_v56 }
 0x2de   : > { %v3301_v21 = vpack.c.bf16 %v3269_v32, %v3269_v32 }
 0x2df   : > { %v2615_v48 = vpop.permute.xlu0 %2614 }
 0x2e0   : > { %v2846_v17 = vsel %vm1433_vm11, %v2814_v15, %v2615_v48  ;;  %v3456_v47 = vunpack.c.l.b16 %v3301_v21 }
 0x2e1   : > { %v2889_v37 = vsel %vm1465_vm12, %v2846_v17, %v2645_v20  ;;  %v6332_v17 = vld [vmem:[%s10198_s4 + $0x18] sm:$0xff] }
 0x2e2   : > { %3084 = vmatmul.bf16.gmra.mxu2 %v2889_v37  ;;  %v8512_v2 = vpop.f32.mrf.mxu3  ;;  %v3680_v26 = vpack.c.b16 %v3456_v47, %v3456_v47  ;;  %4438 = vmatpush.bf16.msrb.mxu1 %v6332_v17 }
 0x2e3   : > { %2588 = vrot.lane.b32.xlu1 %v8331_v44, %s6756_s27  ;;  %v3236_v44 = vmul.f32 %v8287_v31, %v3135_v0 }
 0x2e4   : > { %6223 = vmatmul.msk.bf16.gmra.mxu3 %vm1257_vm6, %v3774_v18  ;;  %v3050_v23 = vpop.f32.mrf.mxu2  ;;  %3883 = vrot.lane.b32.xlu2 %v8467_v22, %s6758_s19  ;;  %v3709_v14 = vshll.u32 %v3680_v26, 16  ;;  %v6518_v26 = vld [vmem:[%s6954_s15 + $0x70] sm:$0xff] }
 0x2e5   : > { %3946 = vrot.lane.b32.xlu0 %v8410_v57, %s6756_s27  ;;  %v3268_v45 = vsel %vm3203_vm3, %v3135_v0, %v3236_v44  ;;  %v3634_v57 = vrot.slane %v3509_v5, 1  ;;  %v3051_v50 = vadd.f32 %v6515_v55, %v3050_v23 }
 0x2e6   : > { %v3300_v8 = vpack.c.bf16 %v3268_v45, %v3268_v45  ;;  %v3711_v21 = vrot.slane %v3709_v14, 4 }
 0x2e7   : > { %v3635_v1 = vor.u32 %v3634_v57, %v3506_v54  ;;  %v3140_v39 = vadd.f32 %v8352_v10, %v3051_v50  ;;  %v2472_v55 = vpop.permute.xlu0 %2471 }
 0x2e8   : > { %v8488_v53 = vunpack.c.l.b16 %v3300_v8 }
 0x2e9   : > { %v8497_v42 = vsel %vm6987_vm4, %v3635_v1, %v3707_v35  ;;  %v3238_v48 = vmul.f32 %v8287_v31, %v3140_v39  ;;  %vm3205_vm14 = vcmp.ge.f32.partialorder %v3140_v39, 0.0 }
 0x2ea   : > { %v8532_v54 = vpop.f32.mrf.mxu3  ;;  %v3360_v35 = vpack.c.b16 %v8488_v53, %v8488_v53 }
 0x2eb   : > { %3978 = vrot.lane.b32.xlu1 %v8467_v22, %s6759_s17  ;;  %v3270_v20 = vsel %vm3205_vm14, %v3140_v39, %v3238_v48  ;;  %v2688_v39 = vsel %vm1257_vm6, %v8160_v25, %v8457_v58 }
 0x2ec   : > { %v3052_v4 = vpop.f32.mrf.mxu2  ;;  %3837 = vrot.lane.b32.xlu2 %v3774_v18, %s6757_s25  ;;  %v3302_v37 = vpack.c.bf16 %v3270_v20, %v3270_v20 }
 0x2ed   : > { %2555 = vrot.lane.b32.xlu0 %v8304_v19, %s6755_s24  ;;  %v3053_v63 = vadd.f32 %v6514_v38, %v3052_v4  ;;  %v8492_v19 = vpack.c.b16 %v3456_v47, %v8488_v53 }
 0x2ee   : > { %v8535_v45 = vunpack.c.l.b16 %v3302_v37  ;;  %v3385_v37 = vshrl.u32 %v3360_v35, 16 }
 0x2ef   : > { %v3142_v30 = vadd.f32 %v8384_v24, %v3053_v63  ;;  %v8504_v24 = vsel %vm6992_vm5, %v3382_v11, %v3511_v16  ;;  %v3516_v15 = vshll.u32 %v8492_v19, 16  ;;  %v3513_v0 = vshrl.u32 %v8492_v19, 16  ;;  %v4745_v63 = vld [vmem:[%s10199_s5 + $0x18] sm:$0xff]  ;;  %v2520_v11 = vpop.permute.xlu1 %2519 }
 0x2f0   : > { %4854 = vmatpush.msrb.mxu0 %v4745_v63  ;;  %6342 = vmatpush.msra.mxu3 %v4745_v63 }
 0x2f1   : > { %v3239_v62 = vmul.f32 %v8287_v31, %v3142_v30  ;;  %vm3206_vm13 = vcmp.ge.f32.partialorder %v3142_v30, 0.0  ;;  %v3636_v59 = vrot.slane %v3516_v15, 1  ;;  %v3515_v1 = vrot.slane %v3513_v0, 7 }
 0x2f2   : > { %v8561_v47 = vpop.f32.mrf.mxu3 }
 0x2f3   : > { %3948 = vrot.lane.b32.xlu1 %v3774_v18, %s6756_s27  ;;  %v3271_v6 = vsel %vm3206_vm13, %v3142_v30, %v3239_v62  ;;  %v6516_v18 = vld [vmem:[%s6954_s15 + $0x60] sm:$0xff]  ;;  %v3637_v32 = vor.u32 %v3636_v59, %v3513_v0  ;;  %v3518_v17 = vor.u32 %v3516_v15, %v3515_v1 }
 0x2f4   : > { %6224 = vmatmul.msk.bf16.gmra.mxu3 %vm1257_vm6, %v8497_v42  ;;  %3980 = vrot.lane.b32.xlu2 %v8504_v24, %s6759_s17  ;;  %v3303_v49 = vpack.c.bf16 %v3271_v6, %v3271_v6  ;;  %v2720_v6 = vsel %vm1303_vm7, %v2688_v39, %v2472_v55 }
 0x2f5   : > { %3915 = vrot.lane.b32.xlu0 %v8412_v34, %s6755_s24  ;;  %v8510_v10 = vpop.permute.xlu2 %2646  ;;  %v3055_v9 = vpop.f32.mrf.mxu2  ;;  %v8545_v3 = vsel %vm6987_vm4, %v3637_v32, %v3711_v21  ;;  %v8589_v15 = vsel %vm6992_vm5, %v3385_v37, %v3518_v17 }
 0x2f6   : > { %v3056_v56 = vadd.f32 %v6516_v18, %v3055_v9  ;;  %v3457_v5 = vunpack.c.l.b16 %v3303_v49  ;;  %v6519_v49 = vld [vmem:[%s6954_s15 + $0x78] sm:$0xff] }
 0x2f8   : > { %v3145_v57 = vadd.f32 %v8403_v7, %v3056_v56  ;;  %v8539_v4 = vpack.c.b16 %v3457_v5, %v8535_v45  ;;  %v3681_v60 = vpack.c.b16 %v3457_v5, %v3457_v5  ;;  %v2585_v56 = vpop.permute.xlu0 %2584 }
 0x2fa   : > { %v3240_v7 = vmul.f32 %v8287_v31, %v3145_v57  ;;  %vm3207_vm0 = vcmp.ge.f32.partialorder %v3145_v57, 0.0  ;;  %v3523_v40 = vshll.u32 %v8539_v4, 16  ;;  %v3520_v9 = vshrl.u32 %v8539_v4, 16  ;;  %v8600_v32 = vpop.f32.mrf.mxu3 }
 0x2fb   : > { %3792 = vrot.lane.b32.xlu1 %v8412_v34, %s6754_s28  ;;  %v6517_v34 = vld [vmem:[%s6954_s15 + $0x68] sm:$0xff]  ;;  %v3713_v48 = vshll.u32 %v3681_v60, 16 }
 0x2fc   : > { %3950 = vrot.lane.b32.xlu2 %v8497_v42, %s6756_s27  ;;  %v3638_v16 = vrot.slane %v3523_v40, 1 }
 0x2fd   : > { %4010 = vrot.lane.b32.xlu0 %v8455_v61, %s6760_s10  ;;  %v3057_v51 = vpop.f32.mrf.mxu2  ;;  %v8529_v23 = vpop.permute.xlu2 %2473  ;;  %v3715_v18 = vrot.slane %v3713_v48, 4 }
 0x2fe   : > { %v3058_v44 = vadd.f32 %v6517_v34, %v3057_v51  ;;  %v2752_v51 = vsel %vm1334_vm8, %v2720_v6, %v2520_v11 }
 0x300   : > { %v3147_v13 = vadd.f32 %v8437_v52, %v3058_v44 }
 0x302   : > { %v3241_v8 = vmul.f32 %v8287_v31, %v3147_v13  ;;  %vm3208_vm15 = vcmp.ge.f32.partialorder %v3147_v13, 0.0  ;;  %v8629_v39 = vpop.f32.mrf.mxu3 }
 0x303   : > { %3917 = vrot.lane.b32.xlu1 %v8455_v61, %s6755_s24 }
 0x304   : > { %6225 = vmatmul.msk.bf16.gmra.mxu3 %vm1257_vm6, %v8545_v3  ;;  %3794 = vrot.lane.b32.xlu2 %v8455_v61, %s6754_s28  ;;  %v3273_v50 = vsel %vm3208_vm15, %v3147_v13, %v3241_v8  ;;  %v3272_v61 = vsel %vm3207_vm0, %v3145_v57, %v3240_v7  ;;  %v3522_v13 = vrot.slane %v3520_v9, 7  ;;  %v3361_v7 = vpack.c.b16 %v8535_v45, %v8535_v45 }
 0x305   : > { %3885 = vrot.lane.b32.xlu0 %v8504_v24, %s6758_s19  ;;  %v8555_v52 = vpop.permute.xlu2 %2586  ;;  %v3305_v30 = vpack.c.bf16 %v3273_v50, %v3273_v50  ;;  %v3304_v62 = vpack.c.bf16 %v3272_v61, %v3272_v61  ;;  %v6331_v50 = vld [vmem:[%s10198_s4 + $0x10] sm:$0xff] }
 0x306   : > { %v3060_v38 = vpop.f32.mrf.mxu2  ;;  %v3525_v61 = vor.u32 %v3523_v40, %v3522_v13  ;;  %4439 = vmatpush.bf16.msrb.mxu1 %v6331_v50  ;;  %v3388_v45 = vshrl.u32 %v3361_v7, 16 }
 0x307   : > { %v3061_v20 = vadd.f32 %v6518_v26, %v3060_v38  ;;  %v3458_v25 = vunpack.c.l.b16 %v3305_v30  ;;  %v8583_v0 = vunpack.c.l.b16 %v3304_v62  ;;  %v6520_v26 = vld [vmem:[%s6954_s15 + $0x80] sm:$0xff] }
 0x308   : > { %v8633_v11 = vsel %vm6992_vm5, %v3388_v45, %v3525_v61 }
 0x309   : > { %v3150_v34 = vadd.f32 %v8452_v43, %v3061_v20  ;;  %v8592_v44 = vpack.c.b16 %v3458_v25, %v8583_v0  ;;  %v3682_v1 = vpack.c.b16 %v3458_v25, %v3458_v25 }
 0x30b   : > { %4012 = vrot.lane.b32.xlu1 %v8492_v19, %s6760_s10  ;;  %v3242_v8 = vmul.f32 %v8287_v31, %v3150_v34  ;;  %vm3209_vm2 = vcmp.ge.f32.partialorder %v3150_v34, 0.0  ;;  %v3530_v55 = vshll.u32 %v8592_v44, 16  ;;  %v3527_v48 = vshrl.u32 %v8592_v44, 16 }
 0x30c   : > { %3919 = vrot.lane.b32.xlu2 %v8492_v19, %s6755_s24  ;;  %v3717_v6 = vshll.u32 %v3682_v1, 16 }
 0x30d   : > { %3839 = vrot.lane.b32.xlu0 %v8497_v42, %s6757_s25  ;;  %v3639_v42 = vor.u32 %v3638_v16, %v3520_v9  ;;  %v3274_v30 = vsel %vm3209_vm2, %v3150_v34, %v3242_v8  ;;  %v3640_v35 = vrot.slane %v3530_v55, 1 }
 0x30e   : > { %v3062_v53 = vpop.f32.mrf.mxu2  ;;  %v8579_v58 = vpop.permute.xlu2 %2523  ;;  %v3306_v9 = vpack.c.bf16 %v3274_v30, %v3274_v30 }
 0x30f   : > { %v3063_v59 = vadd.f32 %v6519_v49, %v3062_v53  ;;  %v8598_v5 = vsel %vm6987_vm4, %v3639_v42, %v3715_v18  ;;  %v3641_v49 = vor.u32 %v3640_v35, %v3527_v48 }
 0x310   : > { %v8645_v42 = vunpack.c.l.b16 %v3306_v9 }
 0x311   : > { %v3152_v14 = vadd.f32 %v8478_v12, %v3063_v59  ;;  %v2784_v12 = vsel %vm1367_vm9, %v2752_v51, %v8480_v27 }
 0x312   : > { %v2816_v21 = vsel %vm1400_vm10, %v2784_v12, %v2585_v56  ;;  %v8666_v12 = vpop.f32.mrf.mxu3 }
 0x313   : > { %3887 = vrot.lane.b32.xlu1 %v8589_v15, %s6758_s19  ;;  %v3243_v43 = vmul.f32 %v8287_v31, %v3152_v14  ;;  %vm3210_vm1 = vcmp.ge.f32.partialorder %v3152_v14, 0.0 }
 0x314   : > { %6226 = vmatmul.msk.bf16.gmra.mxu3 %vm1257_vm6, %v8598_v5  ;;  %4014 = vrot.lane.b32.xlu2 %v8539_v4, %s6760_s10  ;;  %v2522_v17 = vpop.permute.xlu0 %2521 }
 0x315   : > { %3982 = vrot.lane.b32.xlu0 %v8589_v15, %s6759_s17  ;;  %v8612_v57 = vpop.permute.xlu1 %2616  ;;  %v3275_v60 = vsel %vm3210_vm1, %v3152_v14, %v3243_v43 }
 0x316   : > { %v2848_v27 = vsel %vm1433_vm11, %v2816_v21, %v8612_v57  ;;  %v8619_v38 = vpop.permute.xlu2 %3790  ;;  %v3307_v16 = vpack.c.bf16 %v3275_v60, %v3275_v60  ;;  %v3362_v21 = vpack.c.b16 %v8583_v0, %v8583_v0 }
 0x317   : > { %v2892_v63 = vsel %vm1465_vm12, %v2848_v27, %v8510_v10 }
 0x318   : > { %3089 = vmatmul.bf16.gmra.mxu2 %v2892_v63  ;;  %v3459_v53 = vunpack.c.l.b16 %v3307_v16  ;;  %v3391_v0 = vshrl.u32 %v3362_v21, 16 }
 0x31a   : > { %v8649_v51 = vpack.c.b16 %v3459_v53, %v8645_v42  ;;  %v3683_v61 = vpack.c.b16 %v3459_v53, %v3459_v53 }
 0x31b   : > { %3841 = vrot.lane.b32.xlu1 %v8545_v3, %s6757_s25 }
 0x31c   : > { %v3065_v62 = vpop.f32.mrf.mxu2  ;;  %3889 = vrot.lane.b32.xlu2 %v8633_v11, %s6758_s19  ;;  %v3537_v63 = vshll.u32 %v8649_v51, 16 }
 0x31d   : > { %3952 = vrot.lane.b32.xlu0 %v8545_v3, %s6756_s27  ;;  %v2429_v40 = vpop.permute.xlu1 %2428  ;;  %v3066_v20 = vadd.f32 %v6520_v26, %v3065_v62  ;;  %v3719_v3 = vrot.slane %v3717_v6, 4  ;;  %v6522_v6 = vld [vmem:[%s6954_s15 + $0x90] sm:$0xff] }
 0x31e   : > { %v8641_v25 = vpop.permute.xlu2 %3879  ;;  %v2691_v59 = vsel %vm1257_vm6, %v8191_v41, %v2429_v40  ;;  %v3529_v41 = vrot.slane %v3527_v48, 7  ;;  %v3534_v40 = vshrl.u32 %v8649_v51, 16  ;;  %v3721_v48 = vshll.u32 %v3683_v61, 16 }
 0x31f   : > { %v3155_v37 = vadd.f32 %v8512_v2, %v3066_v20  ;;  %v2722_v14 = vsel %vm1303_vm7, %v2691_v59, %v8529_v23  ;;  %v8657_v18 = vsel %vm6987_vm4, %v3641_v49, %v3719_v3  ;;  %v6521_v2 = vld [vmem:[%s6954_s15 + $0x88] sm:$0xff]  ;;  %v6329_v3 = vld [vmem:[%s10198_s4] sm:$0xff] }
 0x320   : > { %v2754_v13 = vsel %vm1334_vm8, %v2722_v14, %v2522_v17  ;;  %v3532_v50 = vor.u32 %v3530_v55, %v3529_v41  ;;  %v6330_v55 = vld [vmem:[%s10198_s4 + $0x8] sm:$0xff] }
 0x321   : > { %v3244_v43 = vmul.f32 %v8287_v31, %v3155_v37  ;;  %vm3211_vm3 = vcmp.ge.f32.partialorder %v3155_v37, 0.0  ;;  %4440 = vmatpush.bf16.msrb.mxu1 %v6330_v55 }
 0x322   : > { %v8689_v35 = vsel %vm6992_vm5, %v3391_v0, %v3532_v50 }
 0x323   : > { %3984 = vrot.lane.b32.xlu1 %v8633_v11, %s6759_s17  ;;  %v3276_v1 = vsel %vm3211_vm3, %v3155_v37, %v3244_v43  ;;  %v8706_v37 = vpop.f32.mrf.mxu3 }
 0x324   : > { %v3067_v56 = vpop.f32.mrf.mxu2  ;;  %6227 = vmatmul.msk.bf16.gmra.mxu3 %vm1257_vm6, %v8657_v18  ;;  %3843 = vrot.lane.b32.xlu2 %v8598_v5, %s6757_s25  ;;  %v3308_v62 = vpack.c.bf16 %v3276_v1, %v3276_v1 }
 0x325   : > { %3796 = vrot.lane.b32.xlu0 %v8492_v19, %s6754_s28  ;;  %v3068_v23 = vadd.f32 %v6521_v2, %v3067_v56  ;;  %v2554_v34 = vpop.permute.xlu1 %2553  ;;  %v3723_v56 = vrot.slane %v3721_v48, 4  ;;  %4441 = vmatpush.bf16.msrb.mxu1 %v6329_v3 }
 0x326   : > { %v2786_v19 = vsel %vm1367_vm9, %v2754_v13, %v2554_v34  ;;  %v8674_v27 = vpop.permute.xlu2 %3913  ;;  %v8708_v14 = vunpack.c.l.b16 %v3308_v62  ;;  %v6523_v13 = vld [vmem:[%s6954_s15 + $0x98] sm:$0xff] }
 0x327   : > { %v3157_v8 = vadd.f32 %v8532_v54, %v3068_v23  ;;  %v2619_v7 = vpop.permute.xlu0 %2618  ;;  %v2818_v30 = vsel %vm1400_vm10, %v2786_v19, %v8555_v52  ;;  %v3642_v54 = vrot.slane %v3537_v63, 1 }
 0x328   : > { %v2850_v52 = vsel %vm1433_vm11, %v2818_v30, %v2619_v7 }
 0x329   : > { %vm3212_vm13 = vcmp.ge.f32.partialorder %v3157_v8, 0.0  ;;  %v3245_v60 = vmul.f32 %v8287_v31, %v3157_v8  ;;  %v3643_v59 = vor.u32 %v3642_v54, %v3534_v40 }
 0x32b   : > { %v3277_v45 = vsel %vm3212_vm13, %v3157_v8, %v3245_v60  ;;  %3954 = vrot.lane.b32.xlu1 %v8598_v5, %s6756_s27  ;;  %v8718_v23 = vsel %vm6987_vm4, %v3643_v59, %v3723_v56  ;;  %v8736_v60 = vpop.f32.mrf.mxu3 }
 0x32c   : > { %v3309_v16 = vpack.c.bf16 %v3277_v45, %v3277_v45  ;;  %3986 = vrot.lane.b32.xlu2 %v8689_v35, %s6759_s17  ;;  %v3536_v45 = vrot.slane %v3534_v40, 7 }
 0x32d   : > { %3921 = vrot.lane.b32.xlu0 %v8539_v4, %s6755_s24  ;;  %v2649_v5 = vpop.permute.xlu1 %2648  ;;  %v3070_v9 = vpop.f32.mrf.mxu2 }
 0x32e   : > { %v3071_v26 = vadd.f32 %v6522_v6, %v3070_v9  ;;  %v2895_v20 = vsel %vm1465_vm12, %v2850_v52, %v2649_v5  ;;  %v3460_v53 = vunpack.c.l.b16 %v3309_v16  ;;  %v8699_v17 = vpop.permute.xlu2 %3976  ;;  %v3363_v5 = vpack.c.b16 %v8645_v42, %v8645_v42  ;;  %v6524_v6 = vld [vmem:[%s6954_s15 + $0xa0] sm:$0xff] }
 0x32f   : > { %v8701_v49 = vpop.permute.xlu0 %2430  ;;  %3094 = vmatmul.bf16.gmra.mxu2 %v2895_v20 }
 0x330   : > { %v3160_v41 = vadd.f32 %v8561_v47, %v3071_v26  ;;  %v8712_v2 = vpack.c.b16 %v3460_v53, %v8708_v14  ;;  %v3684_v50 = vpack.c.b16 %v3460_v53, %v3460_v53  ;;  %v3539_v53 = vor.u32 %v3537_v63, %v3536_v45 }
 0x331   : > { %v3394_v42 = vshrl.u32 %v3363_v5, 16 }
 0x332   : > { %v3246_v43 = vmul.f32 %v8287_v31, %v3160_v41  ;;  %vm3213_vm14 = vcmp.ge.f32.partialorder %v3160_v41, 0.0  ;;  %v3544_v19 = vshll.u32 %v8712_v2, 16  ;;  %v3541_v16 = vshrl.u32 %v8712_v2, 16 }
 0x333   : > { %3798 = vrot.lane.b32.xlu1 %v8539_v4, %s6754_s28  ;;  %v3725_v62 = vshll.u32 %v3684_v50, 16  ;;  %v8759_v3 = vpop.f32.mrf.mxu3  ;;  %v8773_v63 = vsel %vm6992_vm5, %v3394_v42, %v3539_v53  ;;  %v6525_v50 = vld [vmem:[%s6954_s15 + $0xa8] sm:$0xff] }
 0x334   : > { %6228 = vmatmul.msk.bf16.gmra.mxu3 %vm1257_vm6, %v8718_v23  ;;  %3956 = vrot.lane.b32.xlu2 %v8657_v18, %s6756_s27  ;;  %v3278_v61 = vsel %vm3213_vm14, %v3160_v41, %v3246_v43  ;;  %v3644_v30 = vrot.slane %v3544_v19, 1  ;;  %v3543_v5 = vrot.slane %v3541_v16, 7 }
 0x335   : > { %4016 = vrot.lane.b32.xlu0 %v8592_v44, %s6760_s10  ;;  %v8726_v47 = vpop.permute.xlu1 %2475  ;;  %v3072_v34 = vpop.f32.mrf.mxu2  ;;  %v3310_v54 = vpack.c.bf16 %v3278_v61, %v3278_v61  ;;  %v3727_v59 = vrot.slane %v3725_v62, 4 }
 0x336   : > { %v3073_v4 = vadd.f32 %v6523_v13, %v3072_v34  ;;  %v8732_v8 = vpop.permute.xlu2 %4008  ;;  %v3645_v20 = vor.u32 %v3644_v30, %v3541_v16  ;;  %v3546_v42 = vor.u32 %v3544_v19, %v3543_v5 }
 0x337   : > { %v8730_v21 = vpop.permute.xlu0 %3911 }
 0x338   : > { %v3162_v7 = vadd.f32 %v8600_v32, %v3073_v4  ;;  %v8769_v34 = vsel %vm6987_vm4, %v3645_v20, %v3727_v59  ;;  %v3364_v20 = vpack.c.b16 %v8708_v14, %v8708_v14 }
 0x33a   : > { %vm3214_vm15 = vcmp.ge.f32.partialorder %v3162_v7, 0.0  ;;  %v3247_v1 = vmul.f32 %v8287_v31, %v3162_v7 }
 0x33b   : > { %3923 = vrot.lane.b32.xlu1 %v8592_v44, %s6755_s24 }
 0x33c   : > { %v3279_v0 = vsel %vm3214_vm15, %v3162_v7, %v3247_v1  ;;  %3800 = vrot.lane.b32.xlu2 %v8592_v44, %s6754_s28  ;;  %v8757_v44 = vunpack.c.l.b16 %v3310_v54 }
 0x33d   : > { %v3311_v55 = vpack.c.bf16 %v3279_v0, %v3279_v0  ;;  %3891 = vrot.lane.b32.xlu0 %v8689_v35, %s6758_s19  ;;  %v3945_v32 = vpop.permute.xlu1 %3944  ;;  %v4744_v0 = vld [vmem:[%s10199_s5 + $0x10] sm:$0xff] }
 0x33e   : > { %v3075_v52 = vpop.f32.mrf.mxu2  ;;  %v8752_v40 = vpop.permute.xlu2 %3883  ;;  %4855 = vmatpush.msrb.mxu0 %v4744_v0  ;;  %6343 = vmatpush.msra.mxu3 %v4744_v0 }
 0x33f   : > { %v3461_v9 = vunpack.c.l.b16 %v3311_v55  ;;  %v8750_v48 = vpop.permute.xlu0 %3835  ;;  %v3076_v26 = vadd.f32 %v6524_v6, %v3075_v52 }
 0x341   : > { %v3165_v56 = vadd.f32 %v8629_v39, %v3076_v26  ;;  %v8763_v41 = vpack.c.b16 %v3461_v9, %v8757_v44  ;;  %v3685_v55 = vpack.c.b16 %v3461_v9, %v3461_v9 }
 0x343   : > { %4018 = vrot.lane.b32.xlu1 %v8649_v51, %s6760_s10  ;;  %v3248_v43 = vmul.f32 %v8287_v31, %v3165_v56  ;;  %vm3215_vm0 = vcmp.ge.f32.partialorder %v3165_v56, 0.0  ;;  %v3551_v1 = vshll.u32 %v8763_v41, 16  ;;  %v3548_v59 = vshrl.u32 %v8763_v41, 16 }
 0x344   : > { %6229 = vmatmul.msk.bf16.gmra.mxu3 %vm1257_vm6, %v8769_v34  ;;  %3925 = vrot.lane.b32.xlu2 %v8649_v51, %s6755_s24 }
 0x345   : > { %3988 = vrot.lane.b32.xlu0 %v8773_v63, %s6759_s17  ;;  %v3834_v39 = vpop.permute.xlu1 %3833  ;;  %v3280_v62 = vsel %vm3215_vm0, %v3165_v56, %v3248_v43  ;;  %v3646_v26 = vrot.slane %v3551_v1, 1 }
 0x346   : > { %v3077_v13 = vpop.f32.mrf.mxu2  ;;  %v8782_v7 = vpop.permute.xlu2 %3837 }
 0x347   : > { %v3789_v4 = vpop.permute.xlu0 %3788  ;;  %v3078_v61 = vadd.f32 %v6525_v50, %v3077_v13  ;;  %v3647_v43 = vor.u32 %v3646_v26, %v3548_v59 }
 0x348   : > { %v4038_v30 = vsel %vm1257_vm6, %v8421_v36, %v3789_v4  ;;  %v3397_v4 = vshrl.u32 %v3364_v20, 16 }
 0x349   : > { %v8792_v45 = vsel %vm1303_vm7, %v4038_v30, %v3834_v39  ;;  %v3167_v54 = vadd.f32 %v8666_v12, %v3078_v61  ;;  %v8803_v12 = vpop.f32.mrf.mxu3 }
 0x34a   : > { %v4112_v52 = vsel %vm1334_vm8, %v8792_v45, %v8641_v25  ;;  %v3312_v25 = vpack.c.bf16 %v3280_v62, %v3280_v62  ;;  %v8824_v30 = vsel %vm6992_vm5, %v3397_v4, %v3546_v42  ;;  %v6526_v62 = vld [vmem:[%s6954_s15 + $0xb0] sm:$0xff] }
 0x34b   : > { %vm3216_vm1 = vcmp.ge.f32.partialorder %v3167_v54, 0.0  ;;  %v3249_v36 = vmul.f32 %v8287_v31, %v3167_v54  ;;  %3893 = vrot.lane.b32.xlu1 %v8773_v63, %s6758_s19  ;;  %v4144_v6 = vsel %vm1367_vm9, %v4112_v52, %v8730_v21  ;;  %v3729_v21 = vshll.u32 %v3685_v55, 16 }
 0x34c   : > { %v4176_v9 = vsel %vm1400_vm10, %v4144_v6, %v3945_v32  ;;  %4020 = vrot.lane.b32.xlu2 %v8712_v2, %s6760_s10  ;;  %v8820_v50 = vunpack.c.l.b16 %v3312_v25  ;;  %v3550_v55 = vrot.slane %v3548_v59, 7  ;;  %v4041_v6 = vsel %vm1257_vm6, %v8378_v46, %v8619_v38 }
 0x34d   : > { %v3281_v16 = vsel %vm3216_vm1, %v3167_v54, %v3249_v36  ;;  %3845 = vrot.lane.b32.xlu0 %v8657_v18, %s6757_s25  ;;  %v3882_v53 = vpop.permute.xlu1 %3881  ;;  %v4208_v14 = vsel %vm1433_vm11, %v4176_v9, %v8699_v17  ;;  %v3731_v61 = vrot.slane %v3729_v21, 4  ;;  %v3365_v36 = vpack.c.b16 %v8757_v44, %v8757_v44 }
 0x34e   : > { %v3313_v56 = vpack.c.bf16 %v3281_v16, %v3281_v16  ;;  %v8817_v39 = vpop.permute.xlu2 %3980  ;;  %v4084_v16 = vsel %vm1303_vm7, %v4041_v6, %v8750_v48  ;;  %v3553_v59 = vor.u32 %v3551_v1, %v3550_v55  ;;  %v2694_v44 = vsel %vm1257_vm6, %v8279_v28, %v8701_v49 }
 0x34f   : > { %v4007_v32 = vpop.permute.xlu0 %4006  ;;  %v8833_v17 = vsel %vm6987_vm4, %v3647_v43, %v3731_v61  ;;  %v4114_v21 = vsel %vm1334_vm8, %v4084_v16, %v3882_v53  ;;  %v3400_v46 = vshrl.u32 %v3365_v36, 16  ;;  %v2724_v38 = vsel %vm1303_vm7, %v2694_v44, %v8726_v47 }
 0x350   : > { %v3462_v13 = vunpack.c.l.b16 %v3313_v56  ;;  %v4239_v18 = vsel %vm1465_vm12, %v4208_v14, %v4007_v32  ;;  %v4146_v1 = vsel %vm1367_vm9, %v4114_v21, %v8674_v27 }
 0x351   : > { %4442 = vmatmul.bf16.vlgmr.msrb.gmra.mxu1 %v4239_v18  ;;  %v8835_v0 = vpop.f32.mrf.mxu3  ;;  %v8870_v53 = vsel %vm6992_vm5, %v3400_v46, %v3553_v59 }
 0x352   : > { %v8827_v19 = vpack.c.b16 %v3462_v13, %v8820_v50  ;;  %v3686_v56 = vpack.c.b16 %v3462_v13, %v3462_v13  ;;  %v2756_v13 = vsel %vm1334_vm8, %v2724_v38, %v8579_v58 }
 0x353   : > { %3990 = vrot.lane.b32.xlu1 %v8824_v30, %s6759_s17 }
 0x354   : > { %v3080_v54 = vpop.f32.mrf.mxu2  ;;  %6230 = vmatmul.msk.bf16.gmra.mxu3 %vm1257_vm6, %v8833_v17  ;;  %3895 = vrot.lane.b32.xlu2 %v8824_v30, %s6758_s19  ;;  %v3558_v25 = vshll.u32 %v8827_v19, 16  ;;  %v3555_v32 = vshrl.u32 %v8827_v19, 16  ;;  %v3733_v14 = vshll.u32 %v3686_v56, 16  ;;  %v6528_v56 = vld [vmem:[%s6954_s15 + $0xc0] sm:$0xff] }
 0x355   : > { %3958 = vrot.lane.b32.xlu0 %v8718_v23, %s6756_s27  ;;  %v3081_v52 = vadd.f32 %v6526_v62, %v3080_v54  ;;  %v2589_v5 = vpop.permute.xlu1 %2588 }
 0x356   : > { %v8850_v20 = vpop.permute.xlu2 %3950  ;;  %v3648_v48 = vrot.slane %v3558_v25, 1  ;;  %v3735_v58 = vrot.slane %v3733_v14, 4  ;;  %v6529_v14 = vld [vmem:[%s6954_s15 + $0xc8] sm:$0xff] }
 0x357   : > { %v3170_v26 = vadd.f32 %v8706_v37, %v3081_v52  ;;  %v3947_v9 = vpop.permute.xlu0 %3946 }
 0x358   : > { %v4178_v49 = vsel %vm1400_vm10, %v4146_v1, %v3947_v9  ;;  %v3649_v55 = vor.u32 %v3648_v48, %v3555_v32  ;;  %v4116_v48 = vsel %vm1334_vm8, %v8792_v45, %v8752_v40 }
 0x359   : > { %v3250_v37 = vmul.f32 %v8287_v31, %v3170_v26  ;;  %vm3217_vm2 = vcmp.ge.f32.partialorder %v3170_v26, 0.0  ;;  %v8879_v27 = vpop.f32.mrf.mxu3 }
 0x35a   : > { %v8902_v9 = vsel %vm6987_vm4, %v3649_v55, %v3735_v58 }
 0x35b   : > { %3847 = vrot.lane.b32.xlu1 %v8718_v23, %s6757_s25  ;;  %v6527_v23 = vld [vmem:[%s6954_s15 + $0xb8] sm:$0xff]  ;;  %v3282_v18 = vsel %vm3217_vm2, %v3170_v26, %v3250_v37 }
 0x35c   : > { %v3082_v28 = vpop.f32.mrf.mxu2  ;;  %3992 = vrot.lane.b32.xlu2 %v8870_v53, %s6759_s17  ;;  %v3314_v6 = vpack.c.bf16 %v3282_v18, %v3282_v18 }
 0x35d   : > { %3802 = vrot.lane.b32.xlu0 %v8649_v51, %s6754_s28  ;;  %v3083_v47 = vadd.f32 %v6527_v23, %v3082_v28  ;;  %v3979_v42 = vpop.permute.xlu1 %3978 }
 0x35e   : > { %v4210_v43 = vsel %vm1433_vm11, %v4178_v49, %v3979_v42  ;;  %v8885_v61 = vpop.permute.xlu2 %3794 }
 0x35f   : > { %v3172_v4 = vadd.f32 %v8736_v60, %v3083_v47  ;;  %v2556_v51 = vpop.permute.xlu0 %2555  ;;  %v4242_v54 = vsel %vm1465_vm12, %v4210_v43, %v8732_v8 }
 0x360   : > { %v2788_v62 = vsel %vm1367_vm9, %v2756_v13, %v2556_v51 }
 0x361   : > { %vm3218_vm3 = vcmp.ge.f32.partialorder %v3172_v4, 0.0  ;;  %v3251_v52 = vmul.f32 %v8287_v31, %v3172_v4  ;;  %v2820_v36 = vsel %vm1400_vm10, %v2788_v62, %v2589_v5  ;;  %4447 = vmatmul.bf16.gmra.mxu1 %v4242_v54  ;;  %v8910_v59 = vpop.f32.mrf.mxu3 }
 0x362   : > { %v2851_v60 = vsel %vm1433_vm11, %v2820_v36, %v8612_v57 }
 0x363   : > { %v3283_v26 = vsel %vm3218_vm3, %v3172_v4, %v3251_v52  ;;  %3960 = vrot.lane.b32.xlu1 %v8769_v34, %s6756_s27  ;;  %v2897_v8 = vsel %vm1465_vm12, %v2851_v60, %v8510_v10  ;;  %v8912_v10 = vunpack.c.l.b16 %v3314_v6 }
 0x364   : > { %v3315_v16 = vpack.c.bf16 %v3283_v26, %v3283_v26  ;;  %3099 = vmatmul.bf16.gmra.mxu2 %v2897_v8  ;;  %6231 = vmatmul.msk.bf16.gmra.mxu3 %vm1257_vm6, %v8902_v9 }
 0x365   : > { %3927 = vrot.lane.b32.xlu0 %v8712_v2, %s6755_s24  ;;  %3849 = vrot.lane.b32.xlu2 %v8769_v34, %s6757_s25  ;;  %v3949_v57 = vpop.permute.xlu1 %3948  ;;  %v3085_v5 = vpop.f32.mrf.mxu2 }
 0x366   : > { %v3463_v21 = vunpack.c.l.b16 %v3315_v16  ;;  %v3086_v44 = vadd.f32 %v6528_v56, %v3085_v5  ;;  %v8922_v34 = vpop.permute.xlu2 %3919  ;;  %v3366_v16 = vpack.c.b16 %v8820_v50, %v8820_v50 }
 0x367   : > { %v3916_v46 = vpop.permute.xlu0 %3915 }
 0x368   : > { %v8916_v38 = vpack.c.b16 %v3463_v21, %v8912_v10  ;;  %v3175_v37 = vadd.f32 %v8759_v3, %v3086_v44  ;;  %v4148_v1 = vsel %vm1367_vm9, %v4116_v48, %v3916_v46  ;;  %v3687_v28 = vpack.c.b16 %v3463_v21, %v3463_v21 }
 0x369   : > { %v4180_v47 = vsel %vm1400_vm10, %v4148_v1, %v3949_v57  ;;  %v8940_v51 = vpop.f32.mrf.mxu3 }
 0x36a   : > { %v3565_v49 = vshll.u32 %v8916_v38, 16  ;;  %v3252_v23 = vmul.f32 %v8287_v31, %v3175_v37  ;;  %vm3219_vm13 = vcmp.ge.f32.partialorder %v3175_v37, 0.0  ;;  %v3562_v45 = vshrl.u32 %v8916_v38, 16 }
 0x36b   : > { %3804 = vrot.lane.b32.xlu1 %v8712_v2, %s6754_s28  ;;  %v3737_v42 = vshll.u32 %v3687_v28, 16  ;;  %v4212_v18 = vsel %vm1433_vm11, %v4180_v47, %v8817_v39 }
 0x36c   : > { %v3650_v2 = vrot.slane %v3565_v49, 1  ;;  %v3284_v54 = vsel %vm3219_vm13, %v3175_v37, %v3252_v23  ;;  %v3403_v37 = vshrl.u32 %v3366_v16, 16 }
 0x36d   : > { %4022 = vrot.lane.b32.xlu0 %v8763_v41, %s6760_s10  ;;  %3962 = vrot.lane.b32.xlu2 %v8833_v17, %s6756_s27  ;;  %v3793_v40 = vpop.permute.xlu1 %3792  ;;  %v3087_v3 = vpop.f32.mrf.mxu2  ;;  %v3739_v52 = vrot.slane %v3737_v42, 4  ;;  %v3316_v6 = vpack.c.bf16 %v3284_v54, %v3284_v54 }
 0x36e   : > { %v3088_v43 = vadd.f32 %v6529_v14, %v3087_v3  ;;  %v3651_v4 = vor.u32 %v3650_v2, %v3562_v45  ;;  %v8945_v58 = vpop.permute.xlu2 %4014 }
 0x36f   : > { %v4011_v13 = vpop.permute.xlu0 %4010  ;;  %v3352_v57 = vunpack.c.l.b16 %v3316_v6 }
 0x370   : > { %v3177_v55 = vadd.f32 %v8803_v12, %v3088_v43  ;;  %v4245_v62 = vsel %vm1465_vm12, %v4212_v18, %v4011_v13  ;;  %v8951_v39 = vsel %vm6987_vm4, %v3651_v4, %v3739_v52  ;;  %v3557_v12 = vrot.slane %v3555_v32, 7 }
 0x371   : > { %4452 = vmatmul.bf16.gmra.mxu1 %v4245_v62  ;;  %v8967_v46 = vpop.f32.mrf.mxu3 }
 0x372   : > { %vm3220_vm14 = vcmp.ge.f32.partialorder %v3177_v55, 0.0  ;;  %v3253_v36 = vmul.f32 %v8287_v31, %v3177_v55  ;;  %v3560_v56 = vor.u32 %v3558_v25, %v3557_v12  ;;  %v4044_v25 = vsel %vm1257_vm6, %v8467_v22, %v3793_v40 }
 0x373   : > { %3929 = vrot.lane.b32.xlu1 %v8763_v41, %s6755_s24  ;;  %v4086_v42 = vsel %vm1303_vm7, %v4044_v25, %v8782_v7  ;;  %v3564_v22 = vrot.slane %v3562_v45, 7  ;;  %v3367_v7 = vpack.c.b16 %v8912_v10, %v8912_v10 }
 0x374   : > { %v3285_v60 = vsel %vm3220_vm14, %v3177_v55, %v3253_v36  ;;  %6232 = vmatmul.msk.bf16.gmra.mxu3 %vm1257_vm6, %v8951_v39  ;;  %v8976_v50 = vsel %vm6992_vm5, %v3403_v37, %v3560_v56 }
 0x375   : > { %v3317_v26 = vpack.c.bf16 %v3285_v60, %v3285_v60  ;;  %3897 = vrot.lane.b32.xlu0 %v8870_v53, %s6758_s19  ;;  %3806 = vrot.lane.b32.xlu2 %v8763_v41, %s6754_s28  ;;  %v3918_v8 = vpop.permute.xlu1 %3917  ;;  %v3567_v54 = vor.u32 %v3565_v49, %v3564_v22  ;;  %v3406_v36 = vshrl.u32 %v3367_v7, 16  ;;  %v3368_v49 = vpack.c.b16 %v3352_v57, %v3352_v57  ;;  %v6531_v22 = vld [vmem:[%s6954_s15 + $0xd8] sm:$0xff] }
 0x376   : > { %v8972_v48 = vpop.permute.xlu2 %3889  ;;  %v4047_v60 = vsel %vm1257_vm6, %v8504_v24, %v8885_v61 }
 0x377   : > { %v3464_v5 = vunpack.c.l.b16 %v3317_v26  ;;  %v3886_v21 = vpop.permute.xlu0 %3885  ;;  %v4743_v26 = vld [vmem:[%s10199_s5 + $0x8] sm:$0xff]  ;;  %v3409_v56 = vshrl.u32 %v3368_v49, 16 }
 0x378   : > { %v4118_v14 = vsel %vm1334_vm8, %v4086_v42, %v3886_v21  ;;  %4856 = vmatpush.msrb.mxu0 %v4743_v26  ;;  %6344 = vmatpush.msra.mxu3 %v4743_v26 }
 0x379   : > { %v8965_v44 = vpack.c.b16 %v3464_v5, %v3352_v57  ;;  %v3688_v32 = vpack.c.b16 %v3464_v5, %v3464_v5  ;;  %v8994_v13 = vpop.f32.mrf.mxu3  ;;  %v4150_v18 = vsel %vm1367_vm9, %v4118_v14, %v3918_v8 }
 0x37a   : > { %v4182_v62 = vsel %vm1400_vm10, %v4150_v18, %v8850_v20 }
 0x37b   : > { %4024 = vrot.lane.b32.xlu1 %v8827_v19, %s6760_s10  ;;  %v3572_v41 = vshll.u32 %v8965_v44, 16  ;;  %v3569_v28 = vshrl.u32 %v8965_v44, 16  ;;  %v3741_v47 = vshll.u32 %v3688_v32, 16 }
 0x37d   : > { %3931 = vrot.lane.b32.xlu2 %v8827_v19, %s6755_s24  ;;  %3994 = vrot.lane.b32.xlu0 %v8976_v50, %s6759_s17  ;;  %v4013_v1 = vpop.permute.xlu1 %4012  ;;  %v3652_v23 = vrot.slane %v3572_v41, 1  ;;  %v3743_v43 = vrot.slane %v3741_v47, 4  ;;  %v3571_v6 = vrot.slane %v3569_v28, 7 }
 0x37e   : > { %v9005_v4 = vpop.permute.xlu2 %3843 }
 0x37f   : > { %v3840_v3 = vpop.permute.xlu0 %3839  ;;  %v3653_v2 = vor.u32 %v3652_v23, %v3569_v28  ;;  %v3574_v5 = vor.u32 %v3572_v41, %v3571_v6 }
 0x380   : > { %v4088_v8 = vsel %vm1303_vm7, %v4047_v60, %v3840_v3 }
 0x381   : > { %v8992_v40 = vsel %vm6987_vm4, %v3653_v2, %v3743_v43  ;;  %v9037_v61 = vsel %vm6992_vm5, %v3409_v56, %v3574_v5  ;;  %v9086_v49 = vpop.f32.mrf.mxu3 }
 0x383   : > { %3899 = vrot.lane.b32.xlu1 %v8976_v50, %s6758_s19 }
 0x384   : > { %6233 = vmatmul.msk.bf16.gmra.mxu3 %vm1257_vm6, %v8992_v40 }
 0x385   : > { %3851 = vrot.lane.b32.xlu0 %v8833_v17, %s6757_s25  ;;  %4026 = vrot.lane.b32.xlu2 %v8916_v38, %s6760_s10  ;;  %v3888_v45 = vpop.permute.xlu1 %3887  ;;  %v9015_v17 = vsel %vm6992_vm5, %v3406_v36, %v3567_v54 }
 0x386   : > { %v3987_v16 = vpop.permute.xlu2 %3986  ;;  %v4120_v21 = vsel %vm1334_vm8, %v4088_v8, %v3888_v45 }
 0x387   : > { %v3983_v55 = vpop.permute.xlu0 %3982  ;;  %v4152_v24 = vsel %vm1367_vm9, %v4120_v21, %v8922_v34 }
 0x388   : > { %v4214_v52 = vsel %vm1433_vm11, %v4182_v62, %v3983_v55 }
 0x389   : > { %v4248_v10 = vsel %vm1465_vm12, %v4214_v52, %v4013_v1  ;;  %v6530_v1 = vld [vmem:[%s6954_s15 + $0xd0] sm:$0xff] }
 0x38a   : > { %4457 = vmatmul.bf16.gmra.mxu1 %v4248_v10 }
 0x38b   : > { %3996 = vrot.lane.b32.xlu1 %v9015_v17, %s6759_s17 }
 0x38d   : > { %3964 = vrot.lane.b32.xlu0 %v8902_v9, %s6756_s27  ;;  %3901 = vrot.lane.b32.xlu2 %v9015_v17, %s6758_s19  ;;  %v3842_v20 = vpop.permute.xlu1 %3841 }
 0x38e   : > { %v9047_v34 = vpop.permute.xlu2 %3956 }
 0x38f   : > { %v3953_v12 = vpop.permute.xlu0 %3952 }
 0x390   : > { %v4184_v57 = vsel %vm1400_vm10, %v4152_v24, %v3953_v12 }
 0x393   : > { %3853 = vrot.lane.b32.xlu1 %v8902_v9, %s6757_s25 }
 0x395   : > { %3808 = vrot.lane.b32.xlu0 %v8827_v19, %s6754_s28  ;;  %3998 = vrot.lane.b32.xlu2 %v9037_v61, %s6759_s17  ;;  %v3985_v32 = vpop.permute.xlu1 %3984 }
 0x396   : > { %v4216_v37 = vsel %vm1433_vm11, %v4184_v57, %v3985_v32  ;;  %v9066_v43 = vpop.permute.xlu2 %3800  ;;  %v6532_v57 = vld [vmem:[%s6954_s15 + $0xe0] sm:$0xff] }
 0x397   : > { %v3797_v41 = vpop.permute.xlu0 %3796  ;;  %v4251_v9 = vsel %vm1465_vm12, %v4216_v37, %v8945_v58 }
 0x398   : > { %v4050_v25 = vsel %vm1257_vm6, %v8589_v15, %v3797_v41 }
 0x399   : > { %v4090_v23 = vsel %vm1303_vm7, %v4050_v25, %v3842_v20 }
 0x39a   : > { %4462 = vmatmul.bf16.gmra.mxu1 %v4251_v9  ;;  %v4122_v3 = vsel %vm1334_vm8, %v4090_v23, %v8972_v48 }
 0x39b   : > { %3966 = vrot.lane.b32.xlu1 %v8951_v39, %s6756_s27  ;;  %v3090_v19 = vpop.f32.mrf.mxu2 }
 0x39c   : > { %v3091_v28 = vadd.f32 %v6530_v1, %v3090_v19 }
 0x39d   : > { %3933 = vrot.lane.b32.xlu0 %v8916_v38, %s6755_s24  ;;  %3855 = vrot.lane.b32.xlu2 %v8951_v39, %s6757_s25  ;;  %v3955_v58 = vpop.permute.xlu1 %3954 }
 0x39e   : > { %v3180_v47 = vadd.f32 %v8835_v0, %v3091_v28  ;;  %v9088_v60 = vpop.permute.xlu2 %3925 }
 0x39f   : > { %v3922_v15 = vpop.permute.xlu0 %3921 }
 0x3a0   : > { %v3254_v2 = vmul.f32 %v8287_v31, %v3180_v47  ;;  %v4154_v42 = vsel %vm1367_vm9, %v4122_v3, %v3922_v15  ;;  %vm3221_vm15 = vcmp.ge.f32.partialorder %v3180_v47, 0.0 }
 0x3a1   : > { %v4186_v39 = vsel %vm1400_vm10, %v4154_v42, %v3955_v58 }
 0x3a2   : > { %v3286_v0 = vsel %vm3221_vm15, %v3180_v47, %v3254_v2 }
 0x3a3   : > { %3810 = vrot.lane.b32.xlu1 %v8916_v38, %s6754_s28  ;;  %v3092_v14 = vpop.f32.mrf.mxu2  ;;  %v4218_v38 = vsel %vm1433_vm11, %v4186_v39, %v3987_v16  ;;  %v3318_v54 = vpack.c.bf16 %v3286_v0, %v3286_v0 }
 0x3a4   : > { %v3093_v18 = vadd.f32 %v6531_v22, %v3092_v14 }
 0x3a5   : > { %4028 = vrot.lane.b32.xlu0 %v8965_v44, %s6760_s10  ;;  %3968 = vrot.lane.b32.xlu2 %v8992_v40, %s6756_s27  ;;  %v3799_v48 = vpop.permute.xlu1 %3798  ;;  %v3353_v10 = vunpack.c.l.b16 %v3318_v54 }
 0x3a6   : > { %v3182_v7 = vadd.f32 %v8879_v27, %v3093_v18  ;;  %v4053_v27 = vsel %vm1257_vm6, %v8633_v11, %v3799_v48  ;;  %v4021_v42 = vpop.permute.xlu2 %4020  ;;  %v6533_v18 = vld [vmem:[%s6954_s15 + $0xe8] sm:$0xff] }
 0x3a7   : > { %v4017_v45 = vpop.permute.xlu0 %4016  ;;  %v4092_v16 = vsel %vm1303_vm7, %v4053_v27, %v9005_v4  ;;  %v3369_v11 = vpack.c.b16 %v3353_v10, %v3353_v10  ;;  %v4742_v4 = vld [vmem:[%s10199_s5] sm:$0xff] }
 0x3a8   : > { %vm3222_vm0 = vcmp.ge.f32.partialorder %v3182_v7, 0.0  ;;  %v3255_v55 = vmul.f32 %v8287_v31, %v3182_v7  ;;  %v4254_v62 = vsel %vm1465_vm12, %v4218_v38, %v4017_v45  ;;  %4857 = vmatpush.msrb.mxu0 %v4742_v4  ;;  %6345 = vmatpush.msra.mxu3 %v4742_v4 }
 0x3a9   : > { %v3412_v25 = vshrl.u32 %v3369_v11, 16 }
 0x3aa   : > { %v3287_v52 = vsel %vm3222_vm0, %v3182_v7, %v3255_v55  ;;  %4467 = vmatmul.bf16.gmra.mxu1 %v4254_v62  ;;  %v4056_v62 = vsel %vm1257_vm6, %v8689_v35, %v9066_v43 }
 0x3ab   : > { %v3319_v36 = vpack.c.bf16 %v3287_v52, %v3287_v52  ;;  %3935 = vrot.lane.b32.xlu1 %v8965_v44, %s6755_s24 }
 0x3ad   : > { %v3465_v6 = vunpack.c.l.b16 %v3319_v36  ;;  %3903 = vrot.lane.b32.xlu0 %v9037_v61, %s6758_s19  ;;  %3812 = vrot.lane.b32.xlu2 %v8965_v44, %s6754_s28  ;;  %v3924_v20 = vpop.permute.xlu1 %3923 }
 0x3af   : > { %v9090_v12 = vpack.c.b16 %v3465_v6, %v3353_v10  ;;  %v3892_v26 = vpop.permute.xlu0 %3891  ;;  %v3689_v8 = vpack.c.b16 %v3465_v6, %v3465_v6  ;;  %v3896_v10 = vpop.permute.xlu2 %3895 }
 0x3b0   : > { %v4124_v5 = vsel %vm1334_vm8, %v4092_v16, %v3892_v26 }
 0x3b1   : > { %v3576_v21 = vshrl.u32 %v9090_v12, 16  ;;  %v3579_v56 = vshll.u32 %v9090_v12, 16  ;;  %v3745_v44 = vshll.u32 %v3689_v8, 16  ;;  %v4156_v9 = vsel %vm1367_vm9, %v4124_v5, %v3924_v20 }
 0x3b2   : > { %v3095_v24 = vpop.f32.mrf.mxu2  ;;  %v4188_v15 = vsel %vm1400_vm10, %v4156_v9, %v9047_v34 }
 0x3b3   : > { %v3096_v32 = vadd.f32 %v6532_v57, %v3095_v24  ;;  %4030 = vrot.lane.b32.xlu1 %v9090_v12, %s6760_s10  ;;  %v3654_v37 = vrot.slane %v3579_v56, 1  ;;  %v3578_v41 = vrot.slane %v3576_v21, 7  ;;  %v3747_v23 = vrot.slane %v3745_v44, 4 }
 0x3b5   : > { %v3185_v19 = vadd.f32 %v8910_v59, %v3096_v32  ;;  %3937 = vrot.lane.b32.xlu2 %v9090_v12, %s6755_s24  ;;  %v4019_v1 = vpop.permute.xlu1 %4018  ;;  %v3655_v28 = vor.u32 %v3654_v37, %v3576_v21  ;;  %v3581_v58 = vor.u32 %v3579_v56, %v3578_v41  ;;  %v9117_v59 = vpop.f32.mrf.mxu3  ;;  %v4303_v41 = vld [vmem:[%s6962_s22] sm:$0xff] }
 0x3b7   : > { %v3989_v47 = vpop.permute.xlu0 %3988  ;;  %v9111_v3 = vsel %vm6987_vm4, %v3655_v28, %v3747_v23  ;;  %v9115_v2 = vsel %vm6992_vm5, %v3412_v25, %v3581_v58  ;;  %v3256_v14 = vmul.f32 %v8287_v31, %v3185_v19  ;;  %vm3223_vm1 = vcmp.ge.f32.partialorder %v3185_v19, 0.0  ;;  %v3993_v37 = vpop.permute.xlu2 %3992 }
 0x3b8   : > { %v4220_v39 = vsel %vm1433_vm11, %v4188_v15, %v3989_v47  ;;  %6234 = vmatmul.msk.bf16.gmra.mxu3 %vm1257_vm6, %v9111_v3  ;;  %4000 = vrot.lane.b32.xlu0 %v9115_v2, %s6759_s17 }
 0x3b9   : > { %v4257_v34 = vsel %vm1465_vm12, %v4220_v39, %v4019_v1  ;;  %v3288_v48 = vsel %vm3223_vm1, %v3185_v19, %v3256_v14  ;;  %v9166_v14 = vstv %s6238_s26 }
 0x3ba   : > { %v3097_v22 = vpop.f32.mrf.mxu2  ;;  %4472 = vmatmul.bf16.gmra.mxu1 %v4257_v34  ;;  %v3320_v38 = vpack.c.bf16 %v3288_v48, %v3288_v48 }
 0x3bb   : > { %v3098_v0 = vadd.f32 %v6533_v18, %v3097_v22  ;;  %3905 = vrot.lane.b32.xlu1 %v9115_v2, %s6758_s19  ;;  %v4304_v18 = vld [vmem:[%s6962_s22 + $0x8] sm:$0xff] }
 0x3bc   : > { %v3354_v27 = vunpack.c.l.b16 %v3320_v38 }
 0x3bd   : > { %v3187_v7 = vadd.f32 %v8940_v51, %v3098_v0  ;;  %v3894_v45 = vpop.permute.xlu1 %3893  ;;  %v9138_v26 = vpop.f32.mrf.mxu3 }
 0x3bf   : > { %vm3224_vm2 = vcmp.ge.f32.partialorder %v3187_v7, 0.0  ;;  %v3257_v54 = vmul.f32 %v8287_v31, %v3187_v7  ;;  %v3846_v55 = vpop.permute.xlu0 %3845 }
 0x3c0   : > { %3857 = vrot.lane.b32.xlu0 %v8992_v40, %s6757_s25  ;;  %v4094_v36 = vsel %vm1303_vm7, %v4056_v62, %v3846_v55  ;;  %v3370_v40 = vpack.c.b16 %v3354_v27, %v3354_v27 }
 0x3c1   : > { %v3289_v52 = vsel %vm3224_vm2, %v3187_v7, %v3257_v54  ;;  %v4126_v20 = vsel %vm1334_vm8, %v4094_v36, %v3894_v45  ;;  %v3850_v45 = vpop.permute.xlu2 %3849  ;;  %v4305_v36 = vld [vmem:[%s6962_s22 + $0x10] sm:$0xff] }
 0x3c2   : > { %v3321_v6 = vpack.c.bf16 %v3289_v52, %v3289_v52  ;;  %v4158_v35 = vsel %vm1367_vm9, %v4126_v20, %v9088_v60  ;;  %v3415_v25 = vshrl.u32 %v3370_v40, 16  ;;  %v4306_v40 = vld [vmem:[%s6962_s22 + $0x18] sm:$0xff] }
 0x3c4   : > { %v3466_v51 = vunpack.c.l.b16 %v3321_v6 }
 0x3c5   : > { %v3991_v8 = vpop.permute.xlu1 %3990  ;;  %v4539_v47 = vpop.f32.mrf.mxu3 }
 0x3c6   : > { %v9140_v16 = vpack.c.b16 %v3466_v51, %v3354_v27  ;;  %v3690_v11 = vpack.c.b16 %v3466_v51, %v3466_v51 }
 0x3c7   : > { %v3959_v5 = vpop.permute.xlu0 %3958 }
 0x3c8   : > { %v4190_v43 = vsel %vm1400_vm10, %v4158_v35, %v3959_v5  ;;  %3970 = vrot.lane.b32.xlu0 %v9111_v3, %s6756_s27  ;;  %4032 = vrot.lane.b32.xlu2 %v9140_v16, %s6760_s10  ;;  %v3583_v21 = vshrl.u32 %v9140_v16, 16  ;;  %v3586_v56 = vshll.u32 %v9140_v16, 16  ;;  %v3749_v44 = vshll.u32 %v3690_v11, 16 }
 0x3c9   : > { %v4222_v24 = vsel %vm1433_vm11, %v4190_v43, %v3991_v8  ;;  %v3963_v8 = vpop.permute.xlu2 %3962 }
 0x3ca   : > { %v4260_v57 = vsel %vm1465_vm12, %v4222_v24, %v4021_v42  ;;  %v3656_v60 = vrot.slane %v3586_v56, 1  ;;  %v3585_v32 = vrot.slane %v3583_v21, 7  ;;  %v3751_v9 = vrot.slane %v3749_v44, 4 }
 0x3cb   : > { %4477 = vmatmul.bf16.gmra.mxu1 %v4260_v57 }
 0x3cc   : > { %v3657_v4 = vor.u32 %v3656_v60, %v3583_v21  ;;  %v3588_v19 = vor.u32 %v3586_v56, %v3585_v32 }
 0x3cd   : > { %v3848_v1 = vpop.permute.xlu1 %3847 }
 0x3ce   : > { %v4443_v28 = vpop.f32.mrf.mxu1  ;;  %v9156_v23 = vsel %vm6987_vm4, %v3657_v4, %v3751_v9  ;;  %v9160_v58 = vsel %vm6992_vm5, %v3415_v25, %v3588_v19 }
 0x3cf   : > { %v4444_v15 = vadd.f32 %v4443_v28, %v4303_v41  ;;  %v3803_v42 = vpop.permute.xlu0 %3802  ;;  %6235 = vmatmul.msk.bf16.gmra.mxu3 %vm1257_vm6, %v9156_v23  ;;  %4002 = vrot.lane.b32.xlu1 %v9160_v58, %s6759_s17  ;;  %v6534_v41 = vld [vmem:[%s6954_s15 + $0xf0] sm:$0xff] }
 0x3d0   : > { %3814 = vrot.lane.b32.xlu0 %v9090_v12, %s6754_s28  ;;  %3907 = vrot.lane.b32.xlu2 %v9160_v58, %s6758_s19  ;;  %v4059_v34 = vsel %vm1257_vm6, %v8773_v63, %v3803_v42 }
 0x3d1   : > { %v4533_v39 = vadd.f32 %v9086_v49, %v4444_v15  ;;  %v4096_v0 = vsel %vm1303_vm7, %v4059_v34, %v3848_v1  ;;  %v3807_v9 = vpop.permute.xlu2 %3806 }
 0x3d2   : > { %v4128_v38 = vsel %vm1334_vm8, %v4096_v0, %v3896_v10 }
 0x3d3   : > { %vm4613_vm3 = vcmp.ge.f32.partialorder %v4533_v39, 0.0  ;;  %v4646_v22 = vmul.f32 %v9166_v14, %v4533_v39 }
 0x3d5   : > { %v3961_v48 = vpop.permute.xlu1 %3960  ;;  %v9178_v7 = vsel %vm4613_vm3, %v4533_v39, %v4646_v22 }
 0x3d6   : > { %v4445_v12 = vpop.f32.mrf.mxu1  ;;  %4710 = vst.msk [vmem:[%s9181_s9] sm:$0xff] %vm1303_vm7, %v9178_v7  ;;  %6239 = vmatmul.msk.f32.vlgmr.msrb.gmra.mxu0 %vm1303_vm7, %v9178_v7 }
 0x3d7   : > { %v4446_v63 = vadd.f32 %v4445_v12, %v4304_v18  ;;  %v3928_v49 = vpop.permute.xlu0 %3927  ;;  %3859 = vrot.lane.b32.xlu1 %v9111_v3, %s6757_s25 }
 0x3d8   : > { %3939 = vrot.lane.b32.xlu0 %v9140_v16, %s6755_s24  ;;  %v4160_v55 = vsel %vm1367_vm9, %v4128_v38, %v3928_v49 }
 0x3d9   : > { %v4535_v54 = vadd.f32 %v9117_v59, %v4446_v63  ;;  %v4192_v52 = vsel %vm1400_vm10, %v4160_v55, %v3961_v48  ;;  %v4542_v59 = vpop.f32.mrf.mxu3  ;;  %v6535_v48 = vld [vmem:[%s6954_s15 + $0xf8] sm:$0xff]  ;;  %v3932_v55 = vpop.permute.xlu2 %3931 }
 0x3da   : > { %v4224_v20 = vsel %vm1433_vm11, %v4192_v52, %v3993_v37 }
 0x3db   : > { %vm4614_vm13 = vcmp.ge.f32.partialorder %v4535_v54, 0.0  ;;  %v4647_v62 = vmul.f32 %v9166_v14, %v4535_v54 }
 0x3dd   : > { %v3805_v6 = vpop.permute.xlu1 %3804  ;;  %v9198_v27 = vsel %vm4614_vm13, %v4535_v54, %v4647_v62  ;;  %v4308_v62 = vld [vmem:[%s6962_s22 + $0x28] sm:$0xff] }
 0x3de   : > { %v4448_v3 = vpop.f32.mrf.mxu1  ;;  %4711 = vst.msk [vmem:[%s9181_s9 + $0x8] sm:$0xff] %vm1303_vm7, %v9198_v27  ;;  %6240 = vmatmul.msk.f32.gmra.mxu0 %vm1303_vm7, %v9198_v27  ;;  %v4062_v43 = vsel %vm1257_vm6, %v8824_v30, %v3805_v6 }
 0x3df   : > { %v4449_v10 = vadd.f32 %v4448_v3, %v4305_v36  ;;  %v4023_v51 = vpop.permute.xlu0 %4022  ;;  %3972 = vrot.lane.b32.xlu1 %v9156_v23, %s6756_s27  ;;  %v4098_v57 = vsel %vm1303_vm7, %v4062_v43, %v3850_v45 }
 0x3e0   : > { %v4263_v11 = vsel %vm1465_vm12, %v4224_v20, %v4023_v51  ;;  %v4065_v20 = vsel %vm1257_vm6, %v8870_v53, %v3807_v9 }
 0x3e1   : > { %v4538_v5 = vadd.f32 %v9138_v26, %v4449_v10  ;;  %4482 = vmatmul.bf16.gmra.mxu1 %v4263_v11  ;;  %v4544_v30 = vpop.f32.mrf.mxu3  ;;  %v4027_v53 = vpop.permute.xlu2 %4026 }
 0x3e3   : > { %v4648_v35 = vmul.f32 %v9166_v14, %v4538_v5  ;;  %vm4615_vm14 = vcmp.ge.f32.partialorder %v4538_v5, 0.0 }
 0x3e5   : > { %v3930_v21 = vpop.permute.xlu1 %3929  ;;  %v9214_v56 = vsel %vm4615_vm14, %v4538_v5, %v4648_v35 }
 0x3e6   : > { %v4450_v44 = vpop.f32.mrf.mxu1  ;;  %4712 = vst.msk [vmem:[%s9181_s9 + $0x10] sm:$0xff] %vm1303_vm7, %v9214_v56  ;;  %6241 = vmatmul.msk.f32.gmra.mxu0 %vm1303_vm7, %v9214_v56 }
 0x3e7   : > { %v4451_v26 = vadd.f32 %v4450_v44, %v4306_v40  ;;  %v3898_v24 = vpop.permute.xlu0 %3897  ;;  %3816 = vrot.lane.b32.xlu1 %v9140_v16, %s6754_s28  ;;  %v3100_v60 = vpop.f32.mrf.mxu2  ;;  %v4307_v16 = vld [vmem:[%s6962_s22 + $0x20] sm:$0xff]  ;;  %s6300_s28 = sld [smem:[#allocation8 + $0x4]] }
 0x3e8   : > { %v4130_v37 = vsel %vm1334_vm8, %v4098_v57, %v3898_v24  ;;  %v3101_v4 = vadd.f32 %v6534_v41, %v3100_v60 }
 0x3e9   : > { %v4540_v32 = vadd.f32 %v4539_v47, %v4451_v26  ;;  %v4162_v1 = vsel %vm1367_vm9, %v4130_v37, %v3930_v21  ;;  %v9242_v49 = vpop.f32.mrf.mxu3 }
 0x3ea   : > { %v3190_v25 = vadd.f32 %v8967_v46, %v3101_v4  ;;  %v4194_v34 = vsel %vm1400_vm10, %v4162_v1, %v3963_v8 }
 0x3eb   : > { %vm4616_vm15 = vcmp.ge.f32.partialorder %v4540_v32, 0.0  ;;  %v4649_v19 = vmul.f32 %v9166_v14, %v4540_v32 }
 0x3ec   : > { %v3258_v42 = vmul.f32 %v8287_v31, %v3190_v25  ;;  %vm3225_vm0 = vcmp.ge.f32.partialorder %v3190_v25, 0.0 }
 0x3ed   : > { %v4025_v28 = vpop.permute.xlu1 %4024  ;;  %v9230_v15 = vsel %vm4616_vm15, %v4540_v32, %v4649_v19 }
 0x3ee   : > { %v4453_v47 = vpop.f32.mrf.mxu1  ;;  %4713 = vst.msk [vmem:[%s9181_s9 + $0x18] sm:$0xff] %vm1303_vm7, %v9230_v15  ;;  %6242 = vmatmul.msk.f32.gmra.mxu0 %vm1303_vm7, %v9230_v15  ;;  %v3290_v63 = vsel %vm3225_vm0, %v3190_v25, %v3258_v42 }
 0x3ef   : > { %v4454_v46 = vadd.f32 %v4453_v47, %v4307_v16  ;;  %v3995_v39 = vpop.permute.xlu0 %3994  ;;  %v3102_v18 = vpop.f32.mrf.mxu2  ;;  %v3322_v52 = vpack.c.bf16 %v3290_v63, %v3290_v63 }
 0x3f0   : > { %v4226_v22 = vsel %vm1433_vm11, %v4194_v34, %v3995_v39  ;;  %v3103_v45 = vadd.f32 %v6535_v48, %v3102_v18  ;;  %v4309_v18 = vld [vmem:[%s6962_s22 + $0x30] sm:$0xff] }
 0x3f1   : > { %v4543_v0 = vadd.f32 %v4542_v59, %v4454_v46  ;;  %v4266_v12 = vsel %vm1465_vm12, %v4226_v22, %v4025_v28  ;;  %v3355_v11 = vunpack.c.l.b16 %v3322_v52  ;;  %v4549_v26 = vpop.f32.mrf.mxu3 }
 0x3f2   : > { %4487 = vmatmul.bf16.gmra.mxu1 %v4266_v12  ;;  %v3192_v54 = vadd.f32 %v8994_v13, %v3103_v45  ;;  %v3902_v45 = vpop.permute.xlu2 %3901 }
 0x3f3   : > { %v4650_v38 = vmul.f32 %v9166_v14, %v4543_v0  ;;  %vm4617_vm1 = vcmp.ge.f32.partialorder %v4543_v0, 0.0  ;;  %v3371_v60 = vpack.c.b16 %v3355_v11, %v3355_v11 }
 0x3f4   : > { %vm3226_vm2 = vcmp.ge.f32.partialorder %v3192_v54, 0.0  ;;  %v3259_v36 = vmul.f32 %v8287_v31, %v3192_v54 }
 0x3f5   : > { %v3900_v6 = vpop.permute.xlu1 %3899  ;;  %v9248_v3 = vsel %vm4617_vm1, %v4543_v0, %v4650_v38  ;;  %v3418_v16 = vshrl.u32 %v3371_v60, 16 }
 0x3f6   : > { %v4455_v59 = vpop.f32.mrf.mxu1  ;;  %4714 = vst.msk [vmem:[%s9181_s9 + $0x20] sm:$0xff] %vm1303_vm7, %v9248_v3  ;;  %6243 = vmatmul.msk.f32.gmra.mxu0 %vm1303_vm7, %v9248_v3  ;;  %v3291_v10 = vsel %vm3226_vm2, %v3192_v54, %v3259_v36 }
 0x3f7   : > { %v4456_v51 = vadd.f32 %v4455_v59, %v4308_v62  ;;  %v3852_v13 = vpop.permute.xlu0 %3851  ;;  %v3323_v8 = vpack.c.bf16 %v3291_v10, %v3291_v10  ;;  %v4310_v62 = vld [vmem:[%s6962_s22 + $0x38] sm:$0xff] }
 0x3f8   : > { %v4100_v5 = vsel %vm1303_vm7, %v4065_v20, %v3852_v13 }
 0x3f9   : > { %v4545_v31 = vadd.f32 %v4544_v30, %v4456_v51  ;;  %v3467_v35 = vunpack.c.l.b16 %v3323_v8  ;;  %v4132_v43 = vsel %vm1334_vm8, %v4100_v5, %v3900_v6  ;;  %v4552_v0 = vpop.f32.mrf.mxu3 }
 0x3fa   : > { %v4164_v4 = vsel %vm1367_vm9, %v4132_v43, %v3932_v55  ;;  %v3999_v51 = vpop.permute.xlu2 %3998 }
 0x3fb   : > { %vm4618_vm3 = vcmp.ge.f32.partialorder %v4545_v31, 0.0  ;;  %v4651_v40 = vmul.f32 %v9166_v14, %v4545_v31  ;;  %v3483_v21 = vpack.c.b16 %v3467_v35, %v3355_v11  ;;  %v3691_v44 = vpack.c.b16 %v3467_v35, %v3467_v35  ;;  %v4311_v11 = vld [vmem:[%s6962_s22 + $0x40] sm:$0xff] }
 0x3fd   : > { %v3997_v24 = vpop.permute.xlu1 %3996  ;;  %v9260_v57 = vsel %vm4618_vm3, %v4545_v31, %v4651_v40  ;;  %3941 = vrot.lane.b32.xlu1 %v3483_v21, %s6755_s24  ;;  %4034 = vrot.lane.b32.xlu0 %v3483_v21, %s6760_s10  ;;  %v3590_v30 = vshrl.u32 %v3483_v21, 16  ;;  %v3593_v32 = vshll.u32 %v3483_v21, 16  ;;  %v3753_v37 = vshll.u32 %v3691_v44, 16  ;;  %s9977_s24 = scalar_lea.vmem [#allocation9], %s6950_s16  ;;  %s6340_s16 = sshll.u32 %s6845_s21, 8 }
 0x3fe   : > { %4715 = vst.msk [vmem:[%s9181_s9 + $0x28] sm:$0xff] %vm1303_vm7, %v9260_v57  ;;  %6244 = vmatmul.msk.f32.gmra.mxu0 %vm1303_vm7, %v9260_v57 }
 0x3ff   : > { %v3965_v41 = vpop.permute.xlu0 %3964  ;;  %v3658_v25 = vrot.slane %v3593_v32, 1  ;;  %v3592_v19 = vrot.slane %v3590_v30, 7  ;;  %v3755_v47 = vrot.slane %v3753_v37, 4 }
 0x400   : > { %v4196_v9 = vsel %vm1400_vm10, %v4164_v4, %v3965_v41 }
 0x401   : > { %v4228_v1 = vsel %vm1433_vm11, %v4196_v9, %v3997_v24  ;;  %v3659_v42 = vor.u32 %v3658_v25, %v3590_v30  ;;  %v3595_v46 = vor.u32 %v3593_v32, %v3592_v19 }
 0x402   : > { %v4269_v28 = vsel %vm1465_vm12, %v4228_v1, %v4027_v53  ;;  %v3856_v24 = vpop.permute.xlu2 %3855  ;;  %v4312_v53 = vld [vmem:[%s6962_s22 + $0x48] sm:$0xff] }
 0x403   : > { %4492 = vmatmul.bf16.gmra.mxu1 %v4269_v28  ;;  %v3787_v39 = vsel %vm6987_vm4, %v3659_v42, %v3755_v47  ;;  %v3627_v34 = vsel %vm6992_vm5, %v3418_v16, %v3595_v46  ;;  %v4313_v42 = vld [vmem:[%s6962_s22 + $0x50] sm:$0xff] }
 0x404   : > { %6236 = vmatmul.msk.bf16.gmra.mxu3 %vm1257_vm6, %v3787_v39  ;;  %4004 = vrot.lane.b32.xlu2 %v3627_v34, %s6759_s17  ;;  %s10340_s17 = sld [smem:[#allocation51_spill]] }
 0x405   : > { %v3854_v22 = vpop.permute.xlu1 %3853  ;;  %3909 = vrot.lane.b32.xlu0 %v3627_v34, %s6758_s19 }
 0x407   : > { %v3809_v48 = vpop.permute.xlu0 %3808  ;;  %v4458_v12 = vpop.f32.mrf.mxu1 }
 0x408   : > { %v4459_v63 = vadd.f32 %v4458_v12, %v4309_v18  ;;  %v4068_v29 = vsel %vm1257_vm6, %v8976_v50, %v3809_v48  ;;  %v4554_v50 = vpop.f32.mrf.mxu3 }
 0x409   : > { %v4102_v38 = vsel %vm1303_vm7, %v4068_v29, %v3854_v22  ;;  %v4314_v29 = vld [vmem:[%s6962_s22 + $0x58] sm:$0xff] }
 0x40a   : > { %v4548_v33 = vadd.f32 %v9242_v49, %v4459_v63  ;;  %v4134_v6 = vsel %vm1334_vm8, %v4102_v38, %v3902_v45  ;;  %v3969_v28 = vpop.permute.xlu2 %3968  ;;  %s10341_s10 = smov %s10340_s17  ;;  %s5920_s23 = scalar_lea.hbm %s10340_s17, %s6340_s16 }
 0x40b   : > { %s5923_s20 = sshll.u32 %s5920_s23, 4  ;;  %s5924_s20 = int_to_ptr.hbm [resolvable:$true] %s5923_s20 }
 0x40c   : > { %v4652_v54 = vmul.f32 %v9166_v14, %v4548_v33  ;;  %3861 = vrot.lane.b32.xlu2 %v9156_v23, %s6757_s25  ;;  %vm4619_vm4 = vcmp.ge.f32.partialorder %v4548_v33, 0.0 }
 0x40d   : > { %v3967_v55 = vpop.permute.xlu1 %3966 }
 0x40e   : > { %v9289_v36 = vsel %vm4619_vm4, %v4548_v33, %v4652_v54 }
 0x40f   : > { %v3934_v52 = vpop.permute.xlu0 %3933  ;;  %v4460_v59 = vpop.f32.mrf.mxu1  ;;  %4716 = vst.msk [vmem:[%s9181_s9 + $0x30] sm:$0xff] %vm1303_vm7, %v9289_v36  ;;  %6245 = vmatmul.msk.f32.gmra.mxu0 %vm1303_vm7, %v9289_v36 }
 0x410   : > { %v4166_v49 = vsel %vm1367_vm9, %v4134_v6, %v3934_v52  ;;  %v4461_v10 = vadd.f32 %v4460_v59, %v4310_v62  ;;  %v4557_v44 = vpop.f32.mrf.mxu3 }
 0x411   : > { %v4198_v20 = vsel %vm1400_vm10, %v4166_v49, %v3967_v55 }
 0x412   : > { %v4550_v13 = vadd.f32 %v4549_v26, %v4461_v10  ;;  %v4230_v40 = vsel %vm1433_vm11, %v4198_v20, %v3999_v51  ;;  %v3813_v54 = vpop.permute.xlu2 %3812 }
 0x413   : > { %v4074_v51 = vsel %vm1257_vm6, %v9037_v61, %v3813_v54 }
 0x414   : > { %6237 = vmatmul.msk.bf16.gmra.mxu3 %vm1257_vm6, %v9156_v23  ;;  %3974 = vrot.lane.b32.xlu2 %v3787_v39, %s6756_s27  ;;  %vm4620_vm5 = vcmp.ge.f32.partialorder %v4550_v13, 0.0  ;;  %v4653_v8 = vmul.f32 %v9166_v14, %v4550_v13 }
 0x415   : > { %v3811_v31 = vpop.permute.xlu1 %3810 }
 0x416   : > { %v9304_v35 = vsel %vm4620_vm5, %v4550_v13, %v4653_v8  ;;  %v4071_v32 = vsel %vm1257_vm6, %v9015_v17, %v3811_v31 }
 0x417   : > { %v4029_v5 = vpop.permute.xlu0 %4028  ;;  %10289 = vst [vmem:[#allocation24_spill] sm:$0xff] %v9304_v35  ;;  %v4463_v43 = vpop.f32.mrf.mxu1  ;;  %6246 = vmatmul.msk.f32.gmra.mxu0 %vm1303_vm7, %v9304_v35  ;;  %v4104_v25 = vsel %vm1303_vm7, %v4071_v32, %v3856_v24 }
 0x418   : > { %4717 = vst.msk [vmem:[%s9181_s9 + $0x38] sm:$0xff] %vm1303_vm7, %v9304_v35  ;;  %v4272_v23 = vsel %vm1465_vm12, %v4230_v40, %v4029_v5  ;;  %v4464_v21 = vadd.f32 %v4463_v43, %v4311_v11  ;;  %v4559_v16 = vpop.f32.mrf.mxu3 }
 0x419   : > { %4497 = vmatmul.bf16.gmra.mxu1 %v4272_v23 }
 0x41a   : > { %v4553_v26 = vadd.f32 %v4552_v0, %v4464_v21  ;;  %v3938_v11 = vpop.permute.xlu2 %3937  ;;  %v4316_v21 = vld [vmem:[%s6962_s22 + $0x68] sm:$0xff] }
 0x41c   : > { %v4654_v60 = vmul.f32 %v9166_v14, %v4553_v26  ;;  %vm4621_vm13 = vcmp.ge.f32.partialorder %v4553_v26, 0.0 }
 0x41d   : > { %v3936_v41 = vpop.permute.xlu1 %3935 }
 0x41e   : > { %v9315_v30 = vsel %vm4621_vm13, %v4553_v26, %v4654_v60 }
 0x41f   : > { %10290 = vst [vmem:[#allocation25_spill] sm:$0xff] %v9315_v30  ;;  %v4465_v37 = vpop.f32.mrf.mxu1  ;;  %6247 = vmatmul.msk.f32.gmra.mxu0 %vm1303_vm7, %v9315_v30  ;;  %v3904_v4 = vpop.permute.xlu0 %3903 }
 0x420   : > { %4718 = vst.msk [vmem:[%s9181_s9 + $0x40] sm:$0xff] %vm1303_vm7, %v9315_v30  ;;  %v4466_v9 = vadd.f32 %v4465_v37, %v4312_v53  ;;  %v4136_v1 = vsel %vm1334_vm8, %v4104_v25, %v3904_v4  ;;  %v4562_v33 = vpop.f32.mrf.mxu3 }
 0x421   : > { %v4168_v47 = vsel %vm1367_vm9, %v4136_v1, %v3936_v41 }
 0x422   : > { %v4555_v19 = vadd.f32 %v4554_v50, %v4466_v9  ;;  %v4200_v18 = vsel %vm1400_vm10, %v4168_v47, %v3969_v28  ;;  %v4315_v50 = vld [vmem:[%s6962_s22 + $0x60] sm:$0xff]  ;;  %v9374_v32 = vpop.permute.xlu2 %4032 }
 0x424   : > { %vm4622_vm14 = vcmp.ge.f32.partialorder %v4555_v19, 0.0  ;;  %v4655_v17 = vmul.f32 %v9166_v14, %v4555_v19 }
 0x425   : > { %v4031_v0 = vpop.permute.xlu1 %4030 }
 0x426   : > { %v9329_v46 = vsel %vm4622_vm14, %v4555_v19, %v4655_v17  ;;  %v4317_v19 = vld [vmem:[%s6962_s22 + $0x70] sm:$0xff] }
 0x427   : > { %10291 = vst [vmem:[#allocation26_spill] sm:$0xff] %v9329_v46  ;;  %v4468_v39 = vpop.f32.mrf.mxu1  ;;  %6248 = vmatmul.msk.f32.gmra.mxu0 %vm1303_vm7, %v9329_v46 }
 0x428   : > { %4719 = vst.msk [vmem:[%s9181_s9 + $0x48] sm:$0xff] %vm1303_vm7, %v9329_v46  ;;  %v4469_v34 = vadd.f32 %v4468_v39, %v4313_v42  ;;  %v4564_v8 = vpop.f32.mrf.mxu3  ;;  %v4318_v39 = vld [vmem:[%s6962_s22 + $0x78] sm:$0xff] }
 0x42a   : > { %v4001_v22 = vpop.permute.xlu0 %4000  ;;  %v4558_v48 = vadd.f32 %v4557_v44, %v4469_v34 }
 0x42b   : > { %v4232_v45 = vsel %vm1433_vm11, %v4200_v18, %v4001_v22 }
 0x42c   : > { %v4275_v12 = vsel %vm1465_vm12, %v4232_v45, %v4031_v0  ;;  %v4656_v63 = vmul.f32 %v9166_v14, %v4558_v48  ;;  %vm4623_vm15 = vcmp.ge.f32.partialorder %v4558_v48, 0.0 }
 0x42d   : > { %4502 = vmatmul.bf16.gmra.mxu1 %v4275_v12  ;;  %v3906_v13 = vpop.permute.xlu1 %3905 }
 0x42e   : > { %v9341_v38 = vsel %vm4623_vm15, %v4558_v48, %v4656_v63  ;;  %v4319_v63 = vld [vmem:[%s6962_s22 + $0x80] sm:$0xff] }
 0x42f   : > { %10292 = vst [vmem:[#allocation27_spill] sm:$0xff] %v9341_v38  ;;  %v4470_v55 = vpop.f32.mrf.mxu1  ;;  %6249 = vmatmul.msk.f32.gmra.mxu0 %vm1303_vm7, %v9341_v38 }
 0x430   : > { %4720 = vst.msk [vmem:[%s9181_s9 + $0x50] sm:$0xff] %vm1303_vm7, %v9341_v38  ;;  %v4471_v62 = vadd.f32 %v4470_v55, %v4314_v29  ;;  %v4567_v9 = vpop.f32.mrf.mxu3  ;;  %v3908_v29 = vpop.permute.xlu2 %3907 }
 0x432   : > { %v4560_v52 = vadd.f32 %v4559_v16, %v4471_v62  ;;  %v3858_v6 = vpop.permute.xlu0 %3857 }
 0x433   : > { %v4106_v31 = vsel %vm1303_vm7, %v4074_v51, %v3858_v6 }
 0x434   : > { %v4657_v59 = vmul.f32 %v9166_v14, %v4560_v52  ;;  %vm4624_vm0 = vcmp.ge.f32.partialorder %v4560_v52, 0.0  ;;  %v4138_v40 = vsel %vm1334_vm8, %v4106_v31, %v3906_v13 }
 0x435   : > { %v4170_v26 = vsel %vm1367_vm9, %v4138_v40, %v3938_v11 }
 0x436   : > { %v9350_v49 = vsel %vm4624_vm0, %v4560_v52, %v4657_v59 }
 0x437   : > { %10293 = vst [vmem:[#allocation28_spill] sm:$0xff] %v9350_v49  ;;  %v4473_v10 = vpop.f32.mrf.mxu1  ;;  %6250 = vmatmul.msk.f32.gmra.mxu0 %vm1303_vm7, %v9350_v49 }
 0x438   : > { %4721 = vst.msk [vmem:[%s9181_s9 + $0x58] sm:$0xff] %vm1303_vm7, %v9350_v49  ;;  %v4474_v20 = vadd.f32 %v4473_v10, %v4315_v50  ;;  %v4569_v47 = vpop.f32.mrf.mxu3  ;;  %v4320_v50 = vld [vmem:[%s6962_s22 + $0x88] sm:$0xff] }
 0x43a   : > { %v4563_v5 = vadd.f32 %v4562_v33, %v4474_v20  ;;  %v3971_v23 = vpop.permute.xlu0 %3970 }
 0x43b   : > { %v4202_v24 = vsel %vm1400_vm10, %v4170_v26, %v3971_v23 }
 0x43c   : > { %v4658_v43 = vmul.f32 %v9166_v14, %v4563_v5  ;;  %vm4625_vm1 = vcmp.ge.f32.partialorder %v4563_v5, 0.0 }
 0x43e   : > { %v9363_v44 = vsel %vm4625_vm1, %v4563_v5, %v4658_v43 }
 0x43f   : > { %10294 = vst [vmem:[#allocation29_spill] sm:$0xff] %v9363_v44  ;;  %v4475_v61 = vpop.f32.mrf.mxu1  ;;  %6251 = vmatmul.msk.f32.gmra.mxu0 %vm1303_vm7, %v9363_v44 }
 0x440   : > { %4722 = vst.msk [vmem:[%s9181_s9 + $0x60] sm:$0xff] %vm1303_vm7, %v9363_v44  ;;  %v4476_v60 = vadd.f32 %v4475_v61, %v4316_v21  ;;  %v4572_v12 = vpop.f32.mrf.mxu3  ;;  %v4321_v61 = vld [vmem:[%s6962_s22 + $0x90] sm:$0xff] }
 0x441   : > { %v9372_v53 = vpop.permute.xlu1 %4002 }
 0x442   : > { %v4234_v37 = vsel %vm1433_vm11, %v4202_v24, %v9372_v53  ;;  %v4565_v41 = vadd.f32 %v4564_v8, %v4476_v60  ;;  %v3815_v54 = vpop.permute.xlu0 %3814 }
 0x443   : > { %v4278_v4 = vsel %vm1465_vm12, %v4234_v37, %v9374_v32  ;;  %v4077_v20 = vsel %vm1257_vm6, %v9115_v2, %v3815_v54 }
 0x444   : > { %4507 = vmatmul.bf16.gmra.mxu1 %v4278_v4  ;;  %v4659_v25 = vmul.f32 %v9166_v14, %v4565_v41  ;;  %vm4626_vm2 = vcmp.ge.f32.partialorder %v4565_v41, 0.0 }
 0x446   : > { %v9382_v1 = vsel %vm4626_vm2, %v4565_v41, %v4659_v25 }
 0x447   : > { %10295 = vst [vmem:[#allocation30_spill] sm:$0xff] %v9382_v1  ;;  %6252 = vmatmul.msk.f32.gmra.mxu0 %vm1303_vm7, %v9382_v1 }
 0x448   : > { %4723 = vst.msk [vmem:[%s9181_s9 + $0x68] sm:$0xff] %vm1303_vm7, %v9382_v1  ;;  %v4478_v16 = vpop.f32.mrf.mxu1  ;;  %v4574_v6 = vpop.f32.mrf.mxu3 }
 0x449   : > { %v4479_v17 = vadd.f32 %v4478_v16, %v4317_v19  ;;  %v3860_v33 = vpop.permute.xlu1 %3859 }
 0x44a   : > { %v4108_v31 = vsel %vm1303_vm7, %v4077_v20, %v3860_v33  ;;  %v3940_v5 = vpop.permute.xlu0 %3939 }
 0x44b   : > { %v4568_v28 = vadd.f32 %v4567_v9, %v4479_v17  ;;  %v4140_v43 = vsel %vm1334_vm8, %v4108_v31, %v3908_v29 }
 0x44c   : > { %v4172_v24 = vsel %vm1367_vm9, %v4140_v43, %v3940_v5 }
 0x44d   : > { %v4660_v42 = vmul.f32 %v9166_v14, %v4568_v28  ;;  %vm4627_vm3 = vcmp.ge.f32.partialorder %v4568_v28, 0.0 }
 0x44f   : > { %v9391_v34 = vsel %vm4627_vm3, %v4568_v28, %v4660_v42  ;;  %v4322_v42 = vld [vmem:[%s6962_s22 + $0x98] sm:$0xff] }
 0x450   : > { %10296 = vst [vmem:[#allocation31_spill] sm:$0xff] %v9391_v34  ;;  %v4480_v22 = vpop.f32.mrf.mxu1  ;;  %6253 = vmatmul.msk.f32.gmra.mxu0 %vm1303_vm7, %v9391_v34  ;;  %v4577_v21 = vpop.f32.mrf.mxu3 }
 0x451   : > { %4724 = vst.msk [vmem:[%s9181_s9 + $0x70] sm:$0xff] %vm1303_vm7, %v9391_v34  ;;  %v4481_v18 = vadd.f32 %v4480_v22, %v4318_v39  ;;  %v3973_v8 = vpop.permute.xlu1 %3972 }
 0x452   : > { %v4204_v2 = vsel %vm1400_vm10, %v4172_v24, %v3973_v8 }
 0x453   : > { %v4570_v0 = vadd.f32 %v4569_v47, %v4481_v18  ;;  %v9425_v60 = vpop.f32.mrf.mxu0 }
 0x455   : > { %v4661_v48 = vmul.f32 %v9166_v14, %v4570_v0  ;;  %vm4628_vm4 = vcmp.ge.f32.partialorder %v4570_v0, 0.0 }
 0x457   : > { %v9399_v45 = vsel %vm4628_vm4, %v4570_v0, %v4661_v48 }
 0x458   : > { %10297 = vst [vmem:[#allocation32_spill] sm:$0xff] %v9399_v45  ;;  %6254 = vmatmul.msk.f32.gmra.mxu0 %vm1303_vm7, %v9399_v45  ;;  %v4579_v47 = vpop.f32.mrf.mxu3 }
 0x459   : > { %4725 = vst.msk [vmem:[%s9181_s9 + $0x78] sm:$0xff] %vm1303_vm7, %v9399_v45  ;;  %v3817_v19 = vpop.permute.xlu1 %3816 }
 0x45a   : > { %v4080_v22 = vsel %vm1257_vm6, %v9160_v58, %v3817_v19 }
 0x45b   : > { %v9446_v0 = vpop.f32.mrf.mxu0 }
 0x45e   : > { %v4483_v55 = vpop.f32.mrf.mxu1  ;;  %v4005_v51 = vpop.permute.xlu2 %4004 }
 0x45f   : > { %v4484_v62 = vadd.f32 %v4483_v55, %v4319_v63  ;;  %v4236_v41 = vsel %vm1433_vm11, %v4204_v2, %v4005_v51 }
 0x460   : > { %v4582_v51 = vpop.f32.mrf.mxu3 }
 0x461   : > { %v4573_v52 = vadd.f32 %v4572_v12, %v4484_v62 }
 0x463   : > { %v4662_v59 = vmul.f32 %v9166_v14, %v4573_v52  ;;  %vm4629_vm5 = vcmp.ge.f32.partialorder %v4573_v52, 0.0 }
 0x465   : > { %v9409_v10 = vsel %vm4629_vm5, %v4573_v52, %v4662_v59  ;;  %v4323_v59 = vld [vmem:[%s6962_s22 + $0xa0] sm:$0xff] }
 0x466   : > { %10298 = vst [vmem:[#allocation33_spill] sm:$0xff] %v9409_v10  ;;  %v4485_v13 = vpop.f32.mrf.mxu1  ;;  %6255 = vmatmul.msk.f32.gmra.mxu0 %vm1303_vm7, %v9409_v10  ;;  %v3862_v4 = vpop.permute.xlu2 %3861 }
 0x467   : > { %4726 = vst.msk [vmem:[%s9181_s9 + $0x80] sm:$0xff] %vm1303_vm7, %v9409_v10  ;;  %v4486_v11 = vadd.f32 %v4485_v13, %v4320_v50  ;;  %v4110_v48 = vsel %vm1303_vm7, %v4080_v22, %v3862_v4 }
 0x469   : > { %v4575_v40 = vadd.f32 %v4574_v6, %v4486_v11  ;;  %v9465_v11 = vpop.f32.mrf.mxu0 }
 0x46b   : > { %v4663_v23 = vmul.f32 %v9166_v14, %v4575_v40  ;;  %vm4630_vm13 = vcmp.ge.f32.partialorder %v4575_v40, 0.0 }
 0x46d   : > { %v9421_v26 = vsel %vm4630_vm13, %v4575_v40, %v4663_v23  ;;  %v4584_v23 = vpop.f32.mrf.mxu3 }
 0x46e   : > { %10299 = vst [vmem:[#allocation34_spill] sm:$0xff] %v9421_v26  ;;  %6256 = vmatmul.msk.f32.gmra.mxu0 %vm1303_vm7, %v9421_v26  ;;  %v3975_v54 = vpop.permute.xlu2 %3974 }
 0x46f   : > { %4727 = vst.msk [vmem:[%s9181_s9 + $0x88] sm:$0xff] %vm1303_vm7, %v9421_v26  ;;  %v4488_v37 = vpop.f32.mrf.mxu1  ;;  %v4035_v9 = vpop.permute.xlu0 %4034 }
 0x470   : > { %v4489_v25 = vadd.f32 %v4488_v37, %v4321_v61  ;;  %v4281_v16 = vsel %vm1465_vm12, %v4236_v41, %v4035_v9  ;;  %v3942_v29 = vpop.permute.xlu1 %3941  ;;  %v4325_v37 = vld [vmem:[%s6962_s22 + $0xb0] sm:$0xff] }
 0x471   : > { %4512 = vmatmul.bf16.gmra.mxu1 %v4281_v16  ;;  %v9476_v61 = vpop.f32.mrf.mxu0 }
 0x472   : > { %v4578_v17 = vadd.f32 %v4577_v21, %v4489_v25 }
 0x474   : > { %v4664_v28 = vmul.f32 %v9166_v14, %v4578_v17  ;;  %vm4631_vm14 = vcmp.ge.f32.partialorder %v4578_v17, 0.0 }
 0x475   : > { %v4587_v41 = vpop.f32.mrf.mxu3 }
 0x476   : > { %v9437_v39 = vsel %vm4631_vm14, %v4578_v17, %v4664_v28  ;;  %v4326_v17 = vld [vmem:[%s6962_s22 + $0xb8] sm:$0xff]  ;;  %vm4955_vm14 = vcmask 7168  }
 0x477   : > { %10300 = vst [vmem:[#allocation35_spill] sm:$0xff] %v9437_v39  ;;  %v4490_v18 = vpop.f32.mrf.mxu1  ;;  %6257 = vmatmul.msk.f32.gmra.mxu0 %vm1303_vm7, %v9437_v39  ;;  %v3910_v12 = vpop.permute.xlu0 %3909 }
 0x478   : > { %4728 = vst.msk [vmem:[%s9181_s9 + $0x90] sm:$0xff] %vm1303_vm7, %v9437_v39  ;;  %v4491_v63 = vadd.f32 %v4490_v18, %v4322_v42  ;;  %v4142_v33 = vsel %vm1334_vm8, %v4110_v48, %v3910_v12 }
 0x479   : > { %v4174_v58 = vsel %vm1367_vm9, %v4142_v33, %v3942_v29  ;;  %v9487_v4 = vpop.f32.mrf.mxu0  ;;  %v4327_v33 = vld [vmem:[%s6962_s22 + $0xc0] sm:$0xff] }
 0x47a   : > { %v4580_v55 = vadd.f32 %v4579_v47, %v4491_v63  ;;  %v4206_v62 = vsel %vm1400_vm10, %v4174_v58, %v3975_v54 }
 0x47b   : > { %v4237_v50 = vsel %vm1433_vm11, %v4206_v62, %v9372_v53  ;;  %v4324_v53 = vld [vmem:[%s6962_s22 + $0xa8] sm:$0xff] }
 0x47c   : > { %v4665_v52 = vmul.f32 %v9166_v14, %v4580_v55  ;;  %vm4632_vm15 = vcmp.ge.f32.partialorder %v4580_v55, 0.0  ;;  %v4283_v8 = vsel %vm1465_vm12, %v4237_v50, %v9374_v32 }
 0x47d   : > { %v4589_v22 = vpop.f32.mrf.mxu3 }
 0x47e   : > { %v9453_v6 = vsel %vm4632_vm15, %v4580_v55, %v4665_v52  ;;  %vm5511_vm15 = vcmask 1041408  }
 0x47f   : > { %10301 = vst [vmem:[#allocation36_spill] sm:$0xff] %v9453_v6  ;;  %6258 = vmatmul.msk.f32.gmra.mxu0 %vm1303_vm7, %v9453_v6 }
 0x480   : > { %4729 = vst.msk [vmem:[%s9181_s9 + $0x98] sm:$0xff] %vm1303_vm7, %v9453_v6  ;;  %v4493_v13 = vpop.f32.mrf.mxu1 }
 0x481   : > { %v4494_v20 = vadd.f32 %v4493_v13, %v4323_v59  ;;  %4517 = vmatmul.bf16.gmra.mxu1 %v4283_v8  ;;  %v9498_v18 = vpop.f32.mrf.mxu0  ;;  %v4328_v59 = vld [vmem:[%s6962_s22 + $0xc8] sm:$0xff] }
 0x483   : > { %v4583_v31 = vadd.f32 %v4582_v51, %v4494_v20 }
 0x485   : > { %v4666_v5 = vmul.f32 %v9166_v14, %v4583_v31  ;;  %vm4633_vm8 = vcmp.ge.f32.partialorder %v4583_v31, 0.0  ;;  %v4592_v54 = vpop.f32.mrf.mxu3 }
 0x487   : > { %v9469_v40 = vsel %vm4633_vm8, %v4583_v31, %v4666_v5 }
 0x488   : > { %10302 = vst [vmem:[#allocation37_spill] sm:$0xff] %v9469_v40  ;;  %v4495_v43 = vpop.f32.mrf.mxu1  ;;  %6259 = vmatmul.msk.f32.gmra.mxu0 %vm1303_vm7, %v9469_v40 }
 0x489   : > { %4730 = vst.msk [vmem:[%s9181_s9 + $0xa0] sm:$0xff] %vm1303_vm7, %v9469_v40  ;;  %v4496_v32 = vadd.f32 %v4495_v43, %v4324_v53 }
 0x48b   : > { %v4585_v21 = vadd.f32 %v4584_v23, %v4496_v32  ;;  %v4329_v32 = vld [vmem:[%s6962_s22 + $0xd0] sm:$0xff] }
 0x48c   : > { %v9508_v29 = vpop.f32.mrf.mxu0 }
 0x48d   : > { %v4667_v24 = vmul.f32 %v9166_v14, %v4585_v21  ;;  %vm4634_vm9 = vcmp.ge.f32.partialorder %v4585_v21, 0.0  ;;  %v4594_v8 = vpop.f32.mrf.mxu3 }
 0x48f   : > { %v9479_v2 = vsel %vm4634_vm9, %v4585_v21, %v4667_v24 }
 0x490   : > { %10303 = vst [vmem:[#allocation38_spill] sm:$0xff] %v9479_v2  ;;  %6260 = vmatmul.msk.f32.gmra.mxu0 %vm1303_vm7, %v9479_v2 }
 0x491   : > { %4731 = vst.msk [vmem:[%s9181_s9 + $0xa8] sm:$0xff] %vm1303_vm7, %v9479_v2 }
 0x494   : > { %v9515_v51 = vpop.f32.mrf.mxu0 }
 0x495   : > { %v4597_v23 = vpop.f32.mrf.mxu3 }
 0x496   : > { %v4498_v9 = vpop.f32.mrf.mxu1 }
 0x497   : > { %v4499_v25 = vadd.f32 %v4498_v9, %v4325_v37 }
 0x499   : > { %v4588_v19 = vadd.f32 %v4587_v41, %v4499_v25  ;;  %v4330_v25 = vld [vmem:[%s6962_s22 + $0xd8] sm:$0xff] }
 0x49b   : > { %v4668_v16 = vmul.f32 %v9166_v14, %v4588_v19  ;;  %vm4635_vm10 = vcmp.ge.f32.partialorder %v4588_v19, 0.0 }
 0x49c   : > { %v9530_v43 = vpop.f32.mrf.mxu0 }
 0x49d   : > { %v9491_v28 = vsel %vm4635_vm10, %v4588_v19, %v4668_v16 }
 0x49e   : > { %10304 = vst [vmem:[#allocation39_spill] sm:$0xff] %v9491_v28  ;;  %v4500_v42 = vpop.f32.mrf.mxu1  ;;  %6261 = vmatmul.msk.f32.gmra.mxu0 %vm1303_vm7, %v9491_v28 }
 0x49f   : > { %4732 = vst.msk [vmem:[%s9181_s9 + $0xb0] sm:$0xff] %vm1303_vm7, %v9491_v28  ;;  %v4501_v47 = vadd.f32 %v4500_v42, %v4326_v17  ;;  %v4599_v42 = vpop.f32.mrf.mxu3  ;;  %v4968_v28 = vsel %vm4955_vm14, %v9530_v43, -inf }
 0x4a1   : > { %v4590_v48 = vadd.f32 %v4589_v22, %v4501_v47 }
 0x4a3   : > { %v4669_v12 = vmul.f32 %v9166_v14, %v4590_v48  ;;  %vm4636_vm11 = vcmp.ge.f32.partialorder %v4590_v48, 0.0 }
 0x4a4   : > { %v9533_v41 = vpop.f32.mrf.mxu0 }
 0x4a5   : > { %v9501_v63 = vsel %vm4636_vm11, %v4590_v48, %v4669_v12 }
 0x4a6   : > { %10305 = vst [vmem:[#allocation40_spill] sm:$0xff] %v9501_v63  ;;  %6262 = vmatmul.msk.f32.gmra.mxu0 %vm1303_vm7, %v9501_v63 }
 0x4a7   : > { %4733 = vst.msk [vmem:[%s9181_s9 + $0xb8] sm:$0xff] %vm1303_vm7, %v9501_v63 }
 0x4aa   : > { %v4503_v58 = vpop.f32.mrf.mxu1 }
 0x4ab   : > { %v4504_v55 = vadd.f32 %v4503_v58, %v4327_v33  ;;  %v4602_v58 = vpop.f32.mrf.mxu3 }
 0x4ac   : > { %v9545_v48 = vpop.f32.mrf.mxu0 }
 0x4ad   : > { %v4593_v62 = vadd.f32 %v4592_v54, %v4504_v55  ;;  %v4331_v55 = vld [vmem:[%s6962_s22 + $0xe0] sm:$0xff]  ;;  %v4972_v63 = vsel %vm4955_vm14, %v9545_v48, -inf }
 0x4af   : > { %v4670_v52 = vmul.f32 %v9166_v14, %v4593_v62  ;;  %vm4637_vm12 = vcmp.ge.f32.partialorder %v4593_v62, 0.0 }
 0x4b1   : > { %v9513_v50 = vsel %vm4637_vm12, %v4593_v62, %v4670_v52 }
 0x4b2   : > { %10306 = vst [vmem:[#allocation41_spill] sm:$0xff] %v9513_v50  ;;  %v4505_v13 = vpop.f32.mrf.mxu1  ;;  %6263 = vmatmul.msk.f32.gmra.mxu0 %vm1303_vm7, %v9513_v50 }
 0x4b3   : > { %4734 = vst.msk [vmem:[%s9181_s9 + $0xc0] sm:$0xff] %vm1303_vm7, %v9513_v50  ;;  %v4506_v20 = vadd.f32 %v4505_v13, %v4328_v59 }
 0x4b4   : > { %v9554_v33 = vpop.f32.mrf.mxu0 }
 0x4b5   : > { %v4595_v31 = vadd.f32 %v4594_v8, %v4506_v20  ;;  %v4604_v8 = vpop.f32.mrf.mxu3  ;;  %v4974_v2 = vsel %vm4955_vm14, %v9554_v33, -inf }
 0x4b7   : > { %v4671_v5 = vmul.f32 %v9166_v14, %v4595_v31  ;;  %vm4638_vm0 = vcmp.ge.f32.partialorder %v4595_v31, 0.0 }
 0x4b9   : > { %v9523_v53 = vsel %vm4638_vm0, %v4595_v31, %v4671_v5  ;;  %v4332_v31 = vld [vmem:[%s6962_s22 + $0xe8] sm:$0xff]  ;;  %vm5507_vm0 = vcmask 15360  }
 0x4ba   : > { %10307 = vst [vmem:[#allocation42_spill] sm:$0xff] %v9523_v53  ;;  %6264 = vmatmul.msk.f32.gmra.mxu0 %vm1303_vm7, %v9523_v53 }
 0x4bb   : > { %4735 = vst.msk [vmem:[%s9181_s9 + $0xc8] sm:$0xff] %vm1303_vm7, %v9523_v53  ;;  %v4959_v53 = vsel %vm4955_vm14, %v9476_v61, -inf }
 0x4bc   : > { %v9556_v54 = vpop.f32.mrf.mxu0 }
 0x4bd   : > { %v4976_v45 = vsel %vm4955_vm14, %v9556_v54, -inf }
 0x4c1   : > { %v4508_v21 = vpop.f32.mrf.mxu1 }
 0x4c2   : > { %v4509_v24 = vadd.f32 %v4508_v21, %v4329_v32 }
 0x4c4   : > { %v4598_v37 = vadd.f32 %v4597_v23, %v4509_v24  ;;  %v9559_v62 = vpop.f32.mrf.mxu0 }
 0x4c5   : > { %v4978_v40 = vsel %vm4955_vm14, %v9559_v62, -inf }
 0x4c6   : > { %v4672_v9 = vmul.f32 %v9166_v14, %v4598_v37  ;;  %vm4639_vm1 = vcmp.ge.f32.partialorder %v4598_v37, 0.0 }
 0x4c8   : > { %v9537_v19 = vsel %vm4639_vm1, %v4598_v37, %v4672_v9  ;;  %v4333_v9 = vld [vmem:[%s6962_s22 + $0xf0] sm:$0xff] }
 0x4c9   : > { %10308 = vst [vmem:[#allocation43_spill] sm:$0xff] %v9537_v19  ;;  %v4510_v16 = vpop.f32.mrf.mxu1  ;;  %6265 = vmatmul.msk.f32.gmra.mxu0 %vm1303_vm7, %v9537_v19 }
 0x4ca   : > { %4736 = vst.msk [vmem:[%s9181_s9 + $0xd0] sm:$0xff] %vm1303_vm7, %v9537_v19  ;;  %v4511_v17 = vadd.f32 %v4510_v16, %v4330_v25  ;;  %v4607_v16 = vpop.f32.mrf.mxu3  ;;  %v4958_v19 = vsel %vm4955_vm14, %v9465_v11, -inf }
 0x4cc   : > { %v4600_v47 = vadd.f32 %v4599_v42, %v4511_v17 }
 0x4cd   : > { %v9570_v23 = vpop.f32.mrf.mxu0 }
 0x4ce   : > { %v4673_v22 = vmul.f32 %v9166_v14, %v4600_v47  ;;  %vm4640_vm2 = vcmp.ge.f32.partialorder %v4600_v47, 0.0 }
 0x4d0   : > { %v9547_v12 = vsel %vm4640_vm2, %v4600_v47, %v4673_v22 }
 0x4d1   : > { %10309 = vst [vmem:[#allocation44_spill] sm:$0xff] %v9547_v12  ;;  %6266 = vmatmul.msk.f32.gmra.mxu0 %vm1303_vm7, %v9547_v12 }
 0x4d2   : > { %4737 = vst.msk [vmem:[%s9181_s9 + $0xd8] sm:$0xff] %vm1303_vm7, %v9547_v12  ;;  %v4956_v12 = vsel %vm4955_vm14, %v9425_v60, -inf }
 0x4d5   : > { %v9581_v47 = vpop.f32.mrf.mxu0 }
 0x4ee   : > { %v4513_v52 = vpop.f32.mrf.mxu1 }
 0x4ef   : > { %v4514_v59 = vadd.f32 %v4513_v52, %v4331_v55  ;;  %v4334_v55 = vld [vmem:[%s6962_s22 + $0xf8] sm:$0xff] }
 0x4f1   : > { %v4603_v13 = vadd.f32 %v4602_v58, %v4514_v59 }
 0x4f3   : > { %v4674_v20 = vmul.f32 %v9166_v14, %v4603_v13  ;;  %vm4641_vm3 = vcmp.ge.f32.partialorder %v4603_v13, 0.0 }
 0x4f5   : > { %v9563_v5 = vsel %vm4641_vm3, %v4603_v13, %v4674_v20  ;;  %v4609_v20 = vpop.f32.mrf.mxu3 }
 0x4f6   : > { %10310 = vst [vmem:[#allocation45_spill] sm:$0xff] %v9563_v5  ;;  %v4515_v32 = vpop.f32.mrf.mxu1  ;;  %6267 = vmatmul.msk.f32.gmra.mxu0 %vm1303_vm7, %v9563_v5 }
 0x4f7   : > { %4738 = vst.msk [vmem:[%s9181_s9 + $0xe0] sm:$0xff] %vm1303_vm7, %v9563_v5  ;;  %v4516_v21 = vadd.f32 %v4515_v32, %v4332_v31  ;;  %v4970_v5 = vsel %vm4955_vm14, %v9533_v41, -inf }
 0x4f9   : > { %v4605_v24 = vadd.f32 %v4604_v8, %v4516_v21  ;;  %v9592_v8 = vpop.f32.mrf.mxu0 }
 0x4fb   : > { %v4675_v37 = vmul.f32 %v9166_v14, %v4605_v24  ;;  %vm4642_vm4 = vcmp.ge.f32.partialorder %v4605_v24, 0.0 }
 0x4fd   : > { %v9574_v25 = vsel %vm4642_vm4, %v4605_v24, %v4675_v37 }
 0x4fe   : > { %10311 = vst [vmem:[#allocation46_spill] sm:$0xff] %v9574_v25  ;;  %v4518_v17 = vpop.f32.mrf.mxu1  ;;  %6268 = vmatmul.msk.f32.gmra.mxu0 %vm1303_vm7, %v9574_v25 }
 0x4ff   : > { %4739 = vst.msk [vmem:[%s9181_s9 + $0xe8] sm:$0xff] %vm1303_vm7, %v9574_v25  ;;  %v4519_v42 = vadd.f32 %v4518_v17, %v4333_v9  ;;  %v4966_v25 = vsel %vm4955_vm14, %v9515_v51, -inf }
 0x500   : > { %v4967_v26 = vmax.f32 %v4959_v53, %v4966_v25  ;;  %v4984_v53 = vsel %vm4955_vm14, %v9592_v8, -inf }
 0x501   : > { %v4608_v22 = vadd.f32 %v4607_v16, %v4519_v42  ;;  %v9602_v24 = vpop.f32.mrf.mxu0 }
 0x502   : > { %v4986_v34 = vsel %vm4955_vm14, %v9602_v24, -inf  ;;  %v4975_v49 = vmax.f32 %v4967_v26, %v4974_v2 }
 0x503   : > { %v4676_v58 = vmul.f32 %v9166_v14, %v4608_v22  ;;  %vm4643_vm5 = vcmp.ge.f32.partialorder %v4608_v22, 0.0 }
 0x505   : > { %v9585_v52 = vsel %vm4643_vm5, %v4608_v22, %v4676_v58 }
 0x506   : > { %10312 = vst [vmem:[#allocation47_spill] sm:$0xff] %v9585_v52  ;;  %v4520_v59 = vpop.f32.mrf.mxu1  ;;  %6269 = vmatmul.msk.f32.gmra.mxu0 %vm1303_vm7, %v9585_v52 }
 0x507   : > { %4740 = vst.msk [vmem:[%s9181_s9 + $0xf0] sm:$0xff] %vm1303_vm7, %v9585_v52  ;;  %v4521_v13 = vadd.f32 %v4520_v59, %v4334_v55  ;;  %v4964_v52 = vsel %vm4955_vm14, %v9508_v29, -inf }
 0x508   : > { %v4965_v39 = vmax.f32 %v4958_v19, %v4964_v52 }
 0x509   : > { %v4610_v31 = vadd.f32 %v4609_v20, %v4521_v13  ;;  %v9604_v37 = vpop.f32.mrf.mxu0  ;;  %v4962_v20 = vsel %vm4955_vm14, %v9498_v18, -inf }
 0x50a   : > { %v4973_v44 = vmax.f32 %v4965_v39, %v4972_v63 }
 0x50b   : > { %vm4644_vm13 = vcmp.ge.f32.partialorder %v4610_v31, 0.0  ;;  %v4677_v32 = vmul.f32 %v9166_v14, %v4610_v31 }
 0x50d   : > { %v9595_v21 = vsel %vm4644_vm13, %v4610_v31, %v4677_v32  ;;  %v4957_v31 = vsel %vm4955_vm14, %v9446_v0, -inf }
 0x50e   : > { %10313 = vst [vmem:[#allocation48_spill] sm:$0xff] %v9595_v21  ;;  %6270 = vmatmul.msk.f32.vlgmr.msra.gmra.mxu3 %vm1303_vm7, %v9595_v21  ;;  %v4963_v50 = vmax.f32 %v4957_v31, %v4962_v20  ;;  %v4980_v20 = vsel %vm4955_vm14, %v9570_v23, -inf  ;;  %v4982_v31 = vsel %vm4955_vm14, %v9581_v47, -inf }
 0x50f   : > { %4741 = vst.msk [vmem:[%s9181_s9 + $0xf8] sm:$0xff] %vm1303_vm7, %v9595_v21  ;;  %v4960_v21 = vsel %vm4955_vm14, %v9487_v4, -inf  ;;  %v4981_v25 = vmax.f32 %v4973_v44, %v4980_v20  ;;  %v4983_v52 = vmax.f32 %v4975_v49, %v4982_v31 }
 0x510   : > { %v4961_v6 = vmax.f32 %v4956_v12, %v4960_v21  ;;  %v4971_v10 = vmax.f32 %v4963_v50, %v4970_v5  ;;  %v4988_v50 = vsel %vm4955_vm14, %v9604_v37, -inf }
 0x511   : > { %v9606_v9 = vpop.f32.mrf.mxu0  ;;  %v4989_v2 = vmax.f32 %v4981_v25, %v4988_v50 }
 0x512   : > { %v4969_v1 = vmax.f32 %v4961_v6, %v4968_v28  ;;  %v4979_v38 = vmax.f32 %v4971_v10, %v4978_v40  ;;  %v4990_v19 = vsel %vm4955_vm14, %v9606_v9, -inf }
 0x513   : > { %v4991_v28 = vmax.f32 %v4983_v52, %v4990_v19 }
 0x514   : > { %v4977_v5 = vmax.f32 %v4969_v1, %v4976_v45  ;;  %v4987_v21 = vmax.f32 %v4979_v38, %v4986_v34 }
 0x516   : > { %v4985_v40 = vmax.f32 %v4977_v5, %v4984_v53 }
 0x519   : > { %v9608_v16 = vpop.f32.mrf.mxu0 }
 0x51a   : > { %v4992_v26 = vsel %vm4955_vm14, %v9608_v16, -inf }
 0x51b   : > { %v4993_v45 = vmax.f32 %v4985_v40, %v4992_v26 }
 0x521   : > { %v9610_v17 = vpop.f32.mrf.mxu0 }
 0x522   : > { %v4994_v12 = vsel %vm4955_vm14, %v9610_v17, -inf }
 0x523   : > { %v4995_v63 = vmax.f32 %v4987_v21, %v4994_v12 }
 0x529   : > { %v9612_v42 = vpop.f32.mrf.mxu0 }
 0x52a   : > { %v4996_v10 = vsel %vm4955_vm14, %v9612_v42, -inf }
 0x52b   : > { %v4997_v20 = vmax.f32 %v4989_v2, %v4996_v10 }
 0x531   : > { %v9614_v14 = vpop.f32.mrf.mxu0 }
 0x532   : > { %v4998_v39 = vsel %vm4955_vm14, %v9614_v14, -inf }
 0x533   : > { %v4999_v31 = vmax.f32 %v4991_v28, %v4998_v39 }
 0x539   : > { %v9616_v22 = vpop.f32.mrf.mxu0 }
 0x53a   : > { %v5000_v38 = vsel %vm4955_vm14, %v9616_v22, -inf }
 0x53b   : > { %v5001_v12 = vmax.f32 %v4993_v45, %v5000_v38 }
 0x541   : > { %v9618_v58 = vpop.f32.mrf.mxu0 }
 0x542   : > { %v5002_v6 = vsel %vm4955_vm14, %v9618_v58, -inf }
 0x543   : > { %v5003_v53 = vmax.f32 %v4995_v63, %v5002_v6 }
 0x549   : > { %v9620_v55 = vpop.f32.mrf.mxu0 }
 0x54a   : > { %v5004_v49 = vsel %vm4955_vm14, %v9620_v55, -inf }
 0x54b   : > { %v5005_v5 = vmax.f32 %v4997_v20, %v5004_v49 }
 0x551   : > { %v9622_v59 = vpop.f32.mrf.mxu0 }
 0x552   : > { %v5006_v44 = vsel %vm4955_vm14, %v9622_v59, -inf }
 0x553   : > { %v5007_v25 = vmax.f32 %v4999_v31, %v5006_v44 }
 0x573   : > { %v9624_v13 = vpop.f32.mrf.mxu0 }
 0x574   : > { %v5008_v50 = vsel %vm4955_vm14, %v9624_v13, -inf }
 0x575   : > { %v5009_v30 = vmax.f32 %v5001_v12, %v5008_v50 }
 0x57b   : > { %v9630_v32 = vpop.f32.mrf.mxu0 }
 0x57c   : > { %v5010_v34 = vsel %vm4955_vm14, %v9630_v32, -inf }
 0x57d   : > { %v5011_v52 = vmax.f32 %v5003_v53, %v5010_v34  ;;  %v6761_v34 = vmov 0  }
 0x57e   : > { %6433 = vset.pattern.permute.xlu1 %v6761_v34  ;;  %6432 = vset.pattern.permute.xlu0 %v6761_v34 }
 0x57f   : > { %v5016_v39 = vmax.f32 %v5009_v30, %v5011_v52  ;;  %6431 = vset.pattern.permute.xlu2 %v6761_v34 }
 0x583   : > { %v9678_v1 = vpop.f32.mrf.mxu0 }
 0x584   : > { %v5012_v19 = vsel %vm4955_vm14, %v9678_v1, -inf }
 0x585   : > { %v5013_v26 = vmax.f32 %v5005_v5, %v5012_v19 }
 0x591   : > { %v9692_v21 = vpop.f32.mrf.mxu3 }
 0x592   : > { %v5014_v46 = vsel %vm4955_vm14, %v9692_v21, -inf }
 0x593   : > { %v5015_v10 = vmax.f32 %v5007_v25, %v5014_v46 }
 0x595   : > { %v5017_v6 = vmax.f32 %v5013_v26, %v5015_v10 }
 0x597   : > { %v5018_v40 = vmax.f32 %v5016_v39, %v5017_v6 }
 0x599   : > { %5019 = vmax.xlane.f32.xlu0 %v5018_v40 }
 0x60c   : > { %v5020_v2 = vpop.xlane.xlu0 %5019 }
 0x60d   : > { %v5021_v28 = vrot.slane %v5020_v2, 4 }
 0x60f   : > { %v5022_v63 = vmax.f32 %v5020_v2, %v5021_v28 }
 0x611   : > { %v5023_v35 = vrot.slane %v5022_v63, 2 }
 0x613   : > { %v5024_v38 = vmax.f32 %v5022_v63, %v5023_v35 }
 0x615   : > { %v5025_v49 = vrot.slane %v5024_v38, 1 }
 0x617   : > { %v5026_v44 = vmax.f32 %v5024_v38, %v5025_v49 }
 0x619   : > { %6348 = vpush %v5026_v44 }
 0x64a   : > { %s6349_s22 = spop %6348 }
 0x64b   : > { %v9696_v45 = vstv %s6349_s22  ;;  %s6663_s22 = scalar_lea.hbm %s10341_s10, 512 }
 0x64c   : > { %v5029_v30 = vsub.f32 %v9425_v60, %v9696_v45  ;;  %v5030_v46 = vsub.f32 %v9446_v0, %v9696_v45  ;;  %v5031_v20 = vsub.f32 %v9465_v11, %v9696_v45  ;;  %v5032_v35 = vsub.f32 %v9476_v61, %v9696_v45 }
 0x64d   : > { %v5033_v31 = vsub.f32 %v9487_v4, %v9696_v45  ;;  %v5035_v53 = vsub.f32 %v9508_v29, %v9696_v45  ;;  %v5036_v60 = vsub.f32 %v9515_v51, %v9696_v45  ;;  %v5034_v0 = vsub.f32 %v9498_v18, %v9696_v45 }
 0x64e   : > { %v5061_v50 = vmul.f32 1.442695, %v5029_v30  ;;  %v5063_v19 = vmul.f32 1.442695, %v5030_v46  ;;  %v5065_v12 = vmul.f32 1.442695, %v5031_v20  ;;  %v5037_v29 = vsub.f32 %v9530_v43, %v9696_v45 }
 0x64f   : > { %v5067_v5 = vmul.f32 1.442695, %v5032_v35  ;;  %v5069_v11 = vmul.f32 1.442695, %v5033_v31  ;;  %v5073_v61 = vmul.f32 1.442695, %v5035_v53  ;;  %v5040_v51 = vsub.f32 %v9554_v33, %v9696_v45 }
 0x650   : > { %6434 = vpow2.f32 %v5061_v50  ;;  %v5075_v25 = vmul.f32 1.442695, %v5036_v60  ;;  %v5071_v4 = vmul.f32 1.442695, %v5034_v0  ;;  %v5044_v18 = vsub.f32 %v9581_v47, %v9696_v45 }
 0x651   : > { %6436 = vpow2.f32 %v5063_v19  ;;  %v5038_v39 = vsub.f32 %v9533_v41, %v9696_v45  ;;  %v5077_v43 = vmul.f32 1.442695, %v5037_v29  ;;  %v5039_v33 = vsub.f32 %v9545_v48, %v9696_v45 }
 0x652   : > { %6438 = vpow2.f32 %v5065_v12  ;;  %v5083_v28 = vmul.f32 1.442695, %v5040_v51  ;;  %v5091_v38 = vmul.f32 1.442695, %v5044_v18  ;;  %v5041_v46 = vsub.f32 %v9556_v54, %v9696_v45 }
 0x653   : > { %6440 = vpow2.f32 %v5067_v5  ;;  %v5079_v41 = vmul.f32 1.442695, %v5038_v39  ;;  %v5042_v35 = vsub.f32 %v9559_v62, %v9696_v45  ;;  %v5081_v31 = vmul.f32 1.442695, %v5039_v33 }
 0x654   : > { %6442 = vpow2.f32 %v5069_v11  ;;  %v5047_v50 = vsub.f32 %v9604_v37, %v9696_v45  ;;  %v5085_v12 = vmul.f32 1.442695, %v5041_v46  ;;  %v5043_v62 = vsub.f32 %v9570_v23, %v9696_v45 }
 0x655   : > { %6444 = vpow2.f32 %v5073_v61  ;;  %v5087_v0 = vmul.f32 1.442695, %v5042_v35  ;;  %v5050_v39 = vsub.f32 %v9610_v17, %v9696_v45  ;;  %v5049_v46 = vsub.f32 %v9608_v16, %v9696_v45 }
 0x656   : > { %v6435_v52 = vpop.eup %6434  ;;  %6446 = vpow2.f32 %v5075_v25  ;;  %v5097_v37 = vmul.f32 1.442695, %v5047_v50  ;;  %v5089_v23 = vmul.f32 1.442695, %v5043_v62  ;;  %v5053_v35 = vsub.f32 %v9616_v22, %v9696_v45 }
 0x657   : > { %v6437_v26 = vpop.eup %6436  ;;  %5199 = vperm.xlu2 %6431, %v6435_v52   ;;  %6448 = vpow2.f32 %v5071_v4  ;;  %v5125_v6 = vsel %vm4955_vm14, %v6435_v52, 0.0  ;;  %v5103_v17 = vmul.f32 1.442695, %v5050_v39 }
 0x658   : > { %v6439_v10 = vpop.eup %6438  ;;  %v5126_v40 = vsel %vm4955_vm14, %v6437_v26, 0.0  ;;  %6450 = vpow2.f32 %v5077_v43 }
 0x659   : > { %v9724_v2 = vpop.eup %6440  ;;  %v5127_v63 = vadd.f32 %v5126_v40, %v5125_v6  ;;  %v5128_v49 = vsel %vm4955_vm14, %v6439_v10, 0.0  ;;  %6452 = vpow2.f32 %v5083_v28  ;;  %v5046_v40 = vsub.f32 %v9602_v24, %v9696_v45 }
 0x65a   : > { %v9728_v47 = vpop.eup %6442  ;;  %v5130_v20 = vsel %vm4955_vm14, %v9724_v2, 0.0  ;;  %6454 = vpow2.f32 %v5091_v38 }
 0x65b   : > { %v6445_v44 = vpop.eup %6444  ;;  %v5129_v34 = vadd.f32 %v5128_v49, %v5127_v63  ;;  %v5132_v54 = vsel %vm4955_vm14, %v9728_v47, 0.0  ;;  %6456 = vpow2.f32 %v5079_v41  ;;  %v5095_v41 = vmul.f32 1.442695, %v5046_v40 }
 0x65c   : > { %v6447_v30 = vpop.eup %6446  ;;  %5229 = vperm.xlu0 %6432, %v6445_v44   ;;  %6458 = vpow2.f32 %v5081_v31  ;;  %v5136_v61 = vsel %vm4955_vm14, %v6445_v44, 0.0 }
 0x65d   : > { %v9735_v48 = vpop.eup %6448  ;;  %5234 = vperm.xlu1 %6433, %v6447_v30   ;;  %v5131_v53 = vadd.f32 %v5130_v20, %v5129_v34  ;;  %6460 = vpow2.f32 %v5085_v12  ;;  %v5138_v52 = vsel %vm4955_vm14, %v6447_v30, 0.0 }
 0x65e   : > { %v5134_v60 = vsel %vm4955_vm14, %v9735_v48, 0.0  ;;  %v9747_v11 = vpop.eup %6450  ;;  %6462 = vpow2.f32 %v5087_v0 }
 0x65f   : > { %5204 = vperm.xlu2 %6431, %v6437_v26   ;;  %v5133_v19 = vadd.f32 %v5132_v54, %v5131_v53  ;;  %v6453_v25 = vpop.eup %6452  ;;  %v5045_v26 = vsub.f32 %v9592_v8, %v9696_v45  ;;  %6464 = vpow2.f32 %v5097_v37  ;;  %v5140_v6 = vsel %vm4955_vm14, %v9747_v11, 0.0 }
 0x660   : > { %v6455_v29 = vpop.eup %6454  ;;  %6466 = vpow2.f32 %v5089_v23  ;;  %v5146_v30 = vsel %vm4955_vm14, %v6453_v25, 0.0  ;;  %v5051_v54 = vsub.f32 %v9612_v42, %v9696_v45 }
 0x661   : > { %v5135_v5 = vadd.f32 %v5134_v60, %v5133_v19  ;;  %v9751_v51 = vpop.eup %6456  ;;  %v5093_v28 = vmul.f32 1.442695, %v5045_v26  ;;  %v5101_v19 = vmul.f32 1.442695, %v5049_v46  ;;  %v5109_v60 = vmul.f32 1.442695, %v5053_v35 }
 0x662   : > { %v9759_v43 = vpop.eup %6458  ;;  %v5142_v8 = vsel %vm4955_vm14, %v9751_v51, 0.0  ;;  %v5154_v37 = vsel %vm4955_vm14, %v6455_v29, 0.0 }
 0x663   : > { %v5137_v4 = vadd.f32 %v5136_v61, %v5135_v5  ;;  %v9765_v38 = vpop.eup %6460  ;;  %v5144_v49 = vsel %vm4955_vm14, %v9759_v43, 0.0  ;;  %6468 = vpow2.f32 %v5093_v28 }
 0x664   : > { %5274 = vperm.xlu0 %6432, %v6455_v29   ;;  %v6463_v44 = vpop.eup %6462  ;;  %6470 = vpow2.f32 %v5103_v17  ;;  %v5148_v31 = vsel %vm4955_vm14, %v9765_v38, 0.0 }
 0x665   : > { %5254 = vperm.xlu1 %6433, %v6453_v25   ;;  %v5139_v18 = vadd.f32 %v5138_v52, %v5137_v4  ;;  %v6465_v24 = vpop.eup %6464  ;;  %6472 = vpow2.f32 %v5095_v41  ;;  %v5150_v16 = vsel %vm4955_vm14, %v6463_v44, 0.0  ;;  %v5105_v25 = vmul.f32 1.442695, %v5051_v54 }
 0x666   : > { %v5056_v4 = vsub.f32 %v9622_v59, %v9696_v45  ;;  %v5054_v59 = vsub.f32 %v9618_v58, %v9696_v45  ;;  %v5055_v58 = vsub.f32 %v9620_v55, %v9696_v45  ;;  %v5057_v55 = vsub.f32 %v9624_v13, %v9696_v45 }
 0x667   : > { %5209 = vperm.xlu2 %6431, %v6439_v10   ;;  %v5141_v33 = vadd.f32 %v5140_v6, %v5139_v18  ;;  %v5048_v10 = vsub.f32 %v9606_v9, %v9696_v45  ;;  %v9779_v9 = vpop.eup %6466  ;;  %v5160_v6 = vsel %vm4955_vm14, %v6465_v24, 0.0  ;;  %v5058_v54 = vsub.f32 %v9630_v32, %v9696_v45 }
 0x668   : > { %v5152_v22 = vsel %vm4955_vm14, %v9779_v9, 0.0  ;;  %v5115_v39 = vmul.f32 1.442695, %v5056_v4 }
 0x669   : > { %v5143_v63 = vadd.f32 %v5142_v8, %v5141_v33  ;;  %v5099_v53 = vmul.f32 1.442695, %v5048_v10  ;;  %v6469_v62 = vpop.eup %6468 }
 0x66a   : > { %v6471_v5 = vpop.eup %6470  ;;  %v5156_v52 = vsel %vm4955_vm14, %v6469_v62, 0.0 }
 0x66b   : > { %v5145_v34 = vadd.f32 %v5144_v49, %v5143_v63  ;;  %6474 = vpow2.f32 %v5099_v53  ;;  %v9789_v61 = vpop.eup %6472  ;;  %v5059_v63 = vsub.f32 %v9678_v1, %v9696_v45  ;;  %v5166_v41 = vsel %vm4955_vm14, %v6471_v5, 0.0 }
 0x66c   : > { %5289 = vperm.xlu0 %6432, %v6465_v24   ;;  %6476 = vpow2.f32 %v5101_v19  ;;  %v5158_v29 = vsel %vm4955_vm14, %v9789_v61, 0.0  ;;  %v5113_v1 = vmul.f32 1.442695, %v5055_v58  ;;  %v5117_v19 = vmul.f32 1.442695, %v5057_v55 }
 0x66d   : > { %5264 = vperm.xlu1 %6433, %v6463_v44   ;;  %v5147_v20 = vadd.f32 %v5146_v30, %v5145_v34  ;;  %6478 = vpow2.f32 %v5109_v60  ;;  %v5111_v44 = vmul.f32 1.442695, %v5054_v59  ;;  %v5121_v30 = vmul.f32 1.442695, %v5059_v63 }
 0x66e   : > { %6480 = vpow2.f32 %v5105_v25 }
 0x66f   : > { %5214 = vperm.xlu2 %6431, %v9724_v2   ;;  %v5149_v50 = vadd.f32 %v5148_v31, %v5147_v20  ;;  %v5052_v2 = vsub.f32 %v9614_v14, %v9696_v45 }
 0x671   : > { %v5151_v12 = vadd.f32 %v5150_v16, %v5149_v50  ;;  %v5107_v14 = vmul.f32 1.442695, %v5052_v2  ;;  %v6475_v23 = vpop.eup %6474 }
 0x672   : > { %v9798_v40 = vpop.eup %6476 }
 0x673   : > { %v5153_v0 = vadd.f32 %v5152_v22, %v5151_v12  ;;  %6482 = vpow2.f32 %v5107_v14  ;;  %v6479_v8 = vpop.eup %6478  ;;  %v5164_v17 = vsel %vm4955_vm14, %v9798_v40, 0.0 }
 0x674   : > { %5304 = vperm.xlu0 %6432, %v6471_v5   ;;  %6484 = vpow2.f32 %v5115_v39  ;;  %v6481_v49 = vpop.eup %6480  ;;  %v5172_v53 = vsel %vm4955_vm14, %v6479_v8, 0.0 }
 0x675   : > { %5279 = vperm.xlu1 %6433, %v6469_v62   ;;  %v5155_v42 = vadd.f32 %v5154_v37, %v5153_v0  ;;  %v5168_v46 = vsel %vm4955_vm14, %v6481_v49, 0.0  ;;  %6486 = vpow2.f32 %v5111_v44  ;;  %v5060_v0 = vsub.f32 %v9692_v21, %v9696_v45 }
 0x676   : > { %6488 = vpow2.f32 %v5121_v30 }
 0x677   : > { %5219 = vperm.xlu2 %6431, %v9728_v47   ;;  %v5157_v26 = vadd.f32 %v5156_v52, %v5155_v42  ;;  %v5162_v47 = vsel %vm4955_vm14, %v6475_v23, 0.0  ;;  %6490 = vpow2.f32 %v5113_v1  ;;  %v5123_v25 = vmul.f32 1.442695, %v5060_v0 }
 0x678   : > { %6492 = vpow2.f32 %v5117_v19 }
 0x679   : > { %v5159_v18 = vadd.f32 %v5158_v29, %v5157_v26  ;;  %v6483_v34 = vpop.eup %6482 }
 0x67a   : > { %v6485_v35 = vpop.eup %6484  ;;  %v5170_v31 = vsel %vm4955_vm14, %v6483_v34, 0.0 }
 0x67b   : > { %v5161_v33 = vadd.f32 %v5160_v6, %v5159_v18  ;;  %v6487_v50 = vpop.eup %6486  ;;  %v5178_v32 = vsel %vm4955_vm14, %v6485_v35, 0.0  ;;  %v5506_v6 = vld [vmem:[%s10201_s7] sm:$0x3] }
 0x67c   : > { %5319 = vperm.xlu0 %6432, %v6479_v8   ;;  %v6489_v12 = vpop.eup %6488  ;;  %v5174_v60 = vsel %vm4955_vm14, %v6487_v50, 0.0  ;;  %6273 = vmatpush.msk.msrb.mxu2 %vm5511_vm15, %v5506_v6 }
 0x67d   : > { %5294 = vperm.xlu1 %6433, %v6475_v23   ;;  %v5163_v28 = vadd.f32 %v5162_v47, %v5161_v33  ;;  %v6491_v22 = vpop.eup %6490  ;;  %v5184_v21 = vsel %vm4955_vm14, %v6489_v12, 0.0 }
 0x67e   : > { %v5176_v13 = vsel %vm4955_vm14, %v6491_v22, 0.0  ;;  %v6493_v5 = vpop.eup %6492 }
 0x67f   : > { %5224 = vperm.xlu2 %6431, %v9735_v48   ;;  %v5165_v10 = vadd.f32 %v5164_v17, %v5163_v28  ;;  %v5180_v42 = vsel %vm4955_vm14, %v6493_v5, 0.0 }
 0x681   : > { %v5167_v24 = vadd.f32 %v5166_v41, %v5165_v10 }
 0x683   : > { %v5169_v20 = vadd.f32 %v5168_v46, %v5167_v24 }
 0x684   : > { %5334 = vperm.xlu0 %6432, %v6485_v35  }
 0x685   : > { %v5171_v48 = vadd.f32 %v5170_v31, %v5169_v20 }
 0x687   : > { %5239 = vperm.xlu2 %6431, %v9747_v11   ;;  %v5173_v16 = vadd.f32 %v5172_v53, %v5171_v48  ;;  %v5119_v11 = vmul.f32 1.442695, %v5058_v54 }
 0x689   : > { %v5175_v62 = vadd.f32 %v5174_v60, %v5173_v16  ;;  %6494 = vpow2.f32 %v5119_v11  ;;  %v10314_v16 = vld [vmem:[#allocation24_spill] sm:$0xff] }
 0x68a   : > { %6496 = vpow2.f32 %v5123_v25 }
 0x68b   : > { %v5177_v2 = vadd.f32 %v5176_v13, %v5175_v62  ;;  %v10316_v62 = vld [vmem:[#allocation26_spill] sm:$0xff] }
 0x68c   : > { %5349 = vperm.xlu0 %6432, %v6489_v12   ;;  %v10315_v12 = vld [vmem:[#allocation25_spill] sm:$0xff] }
 0x68d   : > { %v5179_v37 = vadd.f32 %v5178_v32, %v5177_v2 }
 0x68f   : > { %5244 = vperm.xlu2 %6431, %v9751_v51   ;;  %v6495_v4 = vpop.eup %6494  ;;  %v5181_v51 = vadd.f32 %v5180_v42, %v5179_v37 }
 0x690   : > { %v5182_v52 = vsel %vm4955_vm14, %v6495_v4, 0.0  ;;  %v6497_v45 = vpop.eup %6496 }
 0x691   : > { %v5183_v14 = vadd.f32 %v5182_v52, %v5181_v51  ;;  %v5186_v29 = vsel %vm4955_vm14, %v6497_v45, 0.0 }
 0x693   : > { %v5185_v26 = vadd.f32 %v5184_v21, %v5183_v14  ;;  %v10318_v14 = vld [vmem:[#allocation28_spill] sm:$0xff] }
 0x695   : > { %v5187_v23 = vadd.f32 %v5186_v29, %v5185_v26 }
 0x697   : > { %5249 = vperm.xlu2 %6431, %v9759_v43  }
 0x69f   : > { %5259 = vperm.xlu2 %6431, %v9765_v38  }
 0x6a7   : > { %5269 = vperm.xlu2 %6431, %v9779_v9   ;;  %5188 = vadd.xlane.f32.xlu1 %v5187_v23 }
 0x6af   : > { %5284 = vperm.xlu2 %6431, %v9789_v61  }
 0x6b1   : > { %v5200_v43 = vpop.permute.xlu2 %5199 }
 0x6b2   : > { %v5357_v28 = vmul.f32 %v5200_v43, %v9178_v7 }
 0x6b4   : > { %v5389_v58 = vsel %vm1303_vm7, %v5357_v28, 0.0 }
 0x6b7   : > { %5299 = vperm.xlu2 %6431, %v9798_v40  }
 0x6b9   : > { %v5205_v18 = vpop.permute.xlu2 %5204 }
 0x6ba   : > { %v5358_v33 = vmul.f32 %v5205_v18, %v9198_v27 }
 0x6bc   : > { %v5390_v17 = vsel %vm1303_vm7, %v5358_v33, 0.0 }
 0x6bd   : > { %v5391_v41 = vadd.f32 %v5390_v17, %v5389_v58  ;;  %v10322_v17 = vld [vmem:[#allocation32_spill] sm:$0xff] }
 0x6bf   : > { %5314 = vperm.xlu2 %6431, %v6483_v34  }
 0x6c0   : > { %5309 = vperm.xlu1 %6433, %v6481_v49  }
 0x6c1   : > { %v5210_v39 = vpop.permute.xlu2 %5209 }
 0x6c2   : > { %v5359_v63 = vmul.f32 %v5210_v39, %v9214_v56 }
 0x6c4   : > { %v5392_v44 = vsel %vm1303_vm7, %v5359_v63, 0.0 }
 0x6c5   : > { %v5393_v30 = vadd.f32 %v5392_v44, %v5391_v41 }
 0x6c7   : > { %5329 = vperm.xlu2 %6431, %v6491_v22  }
 0x6c8   : > { %5324 = vperm.xlu1 %6433, %v6487_v50  }
 0x6c9   : > { %v5215_v38 = vpop.permute.xlu2 %5214 }
 0x6ca   : > { %v5360_v49 = vmul.f32 %v5215_v38, %v9230_v15 }
 0x6cc   : > { %v5394_v34 = vsel %vm1303_vm7, %v5360_v49, 0.0 }
 0x6cd   : > { %v5395_v35 = vadd.f32 %v5394_v34, %v5393_v30  ;;  %v10323_v30 = vld [vmem:[#allocation33_spill] sm:$0xff] }
 0x6ce   : > { %v5230_v20 = vpop.permute.xlu0 %5229 }
 0x6cf   : > { %5344 = vperm.xlu2 %6431, %v6495_v4   ;;  %v5235_v40 = vpop.permute.xlu1 %5234  ;;  %v5363_v53 = vmul.f32 %v5230_v20, %v9289_v36 }
 0x6d0   : > { %5339 = vperm.xlu1 %6433, %v6493_v5   ;;  %v5364_v54 = vmul.f32 %v5235_v40, %v10314_v16  ;;  %v10317_v5 = vld [vmem:[#allocation27_spill] sm:$0xff] }
 0x6d1   : > { %v5220_v9 = vpop.permute.xlu2 %5219  ;;  %v5400_v19 = vsel %vm1303_vm7, %v5363_v53, 0.0 }
 0x6d2   : > { %v5361_v10 = vmul.f32 %v5220_v9, %v9248_v3  ;;  %v5402_v0 = vsel %vm1303_vm7, %v5364_v54, 0.0  ;;  %v10320_v9 = vld [vmem:[#allocation30_spill] sm:$0xff] }
 0x6d4   : > { %v5396_v46 = vsel %vm1303_vm7, %v5361_v10, 0.0 }
 0x6d5   : > { %v5397_v55 = vadd.f32 %v5396_v46, %v5395_v35 }
 0x6d6   : > { %v5275_v6 = vpop.permute.xlu0 %5274 }
 0x6d7   : > { %v5255_v47 = vpop.permute.xlu1 %5254  ;;  %v5372_v49 = vmul.f32 %v5275_v6, %v10322_v17 }
 0x6d8   : > { %5354 = vperm.xlu1 %6433, %v6497_v45   ;;  %v5368_v21 = vmul.f32 %v5255_v47, %v10318_v14  ;;  %v10319_v45 = vld [vmem:[#allocation29_spill] sm:$0xff] }
 0x6d9   : > { %v5225_v61 = vpop.permute.xlu2 %5224  ;;  %v5418_v34 = vsel %vm1303_vm7, %v5372_v49, 0.0 }
 0x6da   : > { %v5362_v24 = vmul.f32 %v5225_v61, %v9260_v57  ;;  %v5410_v18 = vsel %vm1303_vm7, %v5368_v21, 0.0 }
 0x6dc   : > { %v5398_v48 = vsel %vm1303_vm7, %v5362_v24, 0.0 }
 0x6dd   : > { %v5399_v50 = vadd.f32 %v5398_v48, %v5397_v55 }
 0x6de   : > { %v5290_v24 = vpop.permute.xlu0 %5289 }
 0x6df   : > { %v5265_v31 = vpop.permute.xlu1 %5264  ;;  %v5401_v22 = vadd.f32 %v5400_v19, %v5399_v50  ;;  %v10325_v19 = vld [vmem:[#allocation35_spill] sm:$0xff] }
 0x6e0   : > { %v5370_v61 = vmul.f32 %v5265_v31, %v10320_v9 }
 0x6e1   : > { %v5240_v59 = vpop.permute.xlu2 %5239  ;;  %v5403_v25 = vadd.f32 %v5402_v0, %v5401_v22 }
 0x6e2   : > { %v5365_v60 = vmul.f32 %v5240_v59, %v10315_v12  ;;  %v10321_v59 = vld [vmem:[#allocation31_spill] sm:$0xff] }
 0x6e4   : > { %v5404_v32 = vsel %vm1303_vm7, %v5365_v60, 0.0  ;;  %v5375_v60 = vmul.f32 %v5290_v24, %v10325_v19  ;;  %v10332_v24 = vld [vmem:[#allocation42_spill] sm:$0xff] }
 0x6e5   : > { %v5405_v4 = vadd.f32 %v5404_v32, %v5403_v25  ;;  %v10326_v32 = vld [vmem:[#allocation36_spill] sm:$0xff]  ;;  %v10327_v25 = vld [vmem:[#allocation37_spill] sm:$0xff] }
 0x6e6   : > { %v5424_v0 = vsel %vm1303_vm7, %v5375_v60, 0.0 }
 0x6e7   : > { %v5280_v2 = vpop.permute.xlu1 %5279 }
 0x6e8   : > { %v5373_v46 = vmul.f32 %v5280_v2, %v10323_v30  ;;  %v5305_v2 = vpop.permute.xlu0 %5304 }
 0x6e9   : > { %v5245_v8 = vpop.permute.xlu2 %5244 }
 0x6ea   : > { %v5366_v11 = vmul.f32 %v5245_v8, %v10316_v62  ;;  %v5414_v8 = vsel %vm1303_vm7, %v5370_v61, 0.0  ;;  %v5420_v55 = vsel %vm1303_vm7, %v5373_v46, 0.0  ;;  %v10329_v61 = vld [vmem:[#allocation40_spill] sm:$0xff] }
 0x6ec   : > { %v5406_v42 = vsel %vm1303_vm7, %v5366_v11, 0.0 }
 0x6ed   : > { %v5407_v52 = vadd.f32 %v5406_v42, %v5405_v4 }
 0x6ef   : > { %v5295_v43 = vpop.permute.xlu1 %5294 }
 0x6f0   : > { %v5320_v6 = vpop.permute.xlu0 %5319 }
 0x6f1   : > { %v5250_v1 = vpop.permute.xlu2 %5249 }
 0x6f2   : > { %v5367_v37 = vmul.f32 %v5250_v1, %v10317_v5  ;;  %v10324_v1 = vld [vmem:[#allocation34_spill] sm:$0xff] }
 0x6f4   : > { %v5408_v51 = vsel %vm1303_vm7, %v5367_v37, 0.0  ;;  %v5376_v37 = vmul.f32 %v5295_v43, %v10326_v32 }
 0x6f5   : > { %v5409_v29 = vadd.f32 %v5408_v51, %v5407_v52 }
 0x6f6   : > { %v5426_v51 = vsel %vm1303_vm7, %v5376_v37, 0.0 }
 0x6f7   : > { %v5411_v38 = vadd.f32 %v5410_v18, %v5409_v29 }
 0x6f9   : > { %v5260_v13 = vpop.permute.xlu2 %5259 }
 0x6fa   : > { %v5369_v26 = vmul.f32 %v5260_v13, %v10319_v45 }
 0x6fc   : > { %v5412_v39 = vsel %vm1303_vm7, %v5369_v26, 0.0  ;;  %v10328_v26 = vld [vmem:[#allocation38_spill] sm:$0xff] }
 0x6fd   : > { %v5413_v33 = vadd.f32 %v5412_v39, %v5411_v38  ;;  %v5378_v29 = vmul.f32 %v5305_v2, %v10328_v26 }
 0x6ff   : > { %v5415_v28 = vadd.f32 %v5414_v8, %v5413_v33  ;;  %v5430_v38 = vsel %vm1303_vm7, %v5378_v29, 0.0  ;;  %v10330_v33 = vld [vmem:[#allocation39_spill] sm:$0xff] }
 0x701   : > { %v5270_v23 = vpop.permute.xlu2 %5269 }
 0x702   : > { %v5371_v40 = vmul.f32 %v5270_v23, %v10321_v59 }
 0x704   : > { %v5416_v47 = vsel %vm1303_vm7, %v5371_v40, 0.0 }
 0x705   : > { %v5417_v10 = vadd.f32 %v5416_v47, %v5415_v28 }
 0x707   : > { %v5419_v31 = vadd.f32 %v5418_v34, %v5417_v10 }
 0x709   : > { %v5285_v58 = vpop.permute.xlu2 %5284  ;;  %v5421_v54 = vadd.f32 %v5420_v55, %v5419_v31 }
 0x70a   : > { %v5374_v20 = vmul.f32 %v5285_v58, %v10324_v1 }
 0x70c   : > { %v5422_v53 = vsel %vm1303_vm7, %v5374_v20, 0.0  ;;  %v10333_v20 = vld [vmem:[#allocation43_spill] sm:$0xff] }
 0x70d   : > { %v5423_v13 = vadd.f32 %v5422_v53, %v5421_v54 }
 0x70f   : > { %v5425_v4 = vadd.f32 %v5424_v0, %v5423_v13  ;;  %v10335_v0 = vld [vmem:[#allocation45_spill] sm:$0xff] }
 0x711   : > { %v5300_v22 = vpop.permute.xlu2 %5299  ;;  %v5427_v21 = vadd.f32 %v5426_v51, %v5425_v4  ;;  %v10336_v51 = vld [vmem:[#allocation46_spill] sm:$0xff] }
 0x712   : > { %v5377_v42 = vmul.f32 %v5300_v22, %v10327_v25 }
 0x714   : > { %v5428_v52 = vsel %vm1303_vm7, %v5377_v42, 0.0 }
 0x715   : > { %v5429_v18 = vadd.f32 %v5428_v52, %v5427_v21 }
 0x717   : > { %v5431_v8 = vadd.f32 %v5430_v38, %v5429_v18 }
 0x719   : > { %v5315_v23 = vpop.permute.xlu2 %5314 }
 0x71a   : > { %v5189_v63 = vpop.xlane.xlu1 %5188  ;;  %v5380_v40 = vmul.f32 %v5315_v23, %v10329_v61  ;;  %v10337_v23 = vld [vmem:[#allocation47_spill] sm:$0xff] }
 0x71b   : > { %v5190_v44 = vrot.slane %v5189_v63, 4 }
 0x71c   : > { %v5434_v58 = vsel %vm1303_vm7, %v5380_v40, 0.0  ;;  %v10338_v40 = vld [vmem:[#allocation48_spill] sm:$0xff] }
 0x71d   : > { %v5191_v41 = vadd.f32 %v5190_v44, %v5189_v63  ;;  %v10331_v63 = vld [vmem:[#allocation41_spill] sm:$0xff] }
 0x71e   : > { %v5381_v49 = vmul.f32 %v5320_v6, %v10331_v63 }
 0x71f   : > { %v5192_v35 = vrot.slane %v5191_v41, 2 }
 0x720   : > { %v5436_v34 = vsel %vm1303_vm7, %v5381_v49, 0.0 }
 0x721   : > { %v5193_v48 = vadd.f32 %v5192_v35, %v5191_v41  ;;  %v5330_v10 = vpop.permute.xlu2 %5329 }
 0x722   : > { %v5383_v35 = vmul.f32 %v5330_v10, %v10333_v20  ;;  %v5474_v10 = vld [vmem:[%s10200_s6] sm:$0xff] }
 0x723   : > { %v5194_v50 = vrot.slane %v5193_v48, 1 }
 0x724   : > { %v5440_v60 = vsel %vm1303_vm7, %v5383_v35, 0.0 }
 0x725   : > { %v5195_v11 = vadd.f32 %v5194_v50, %v5193_v48  ;;  %v5335_v48 = vpop.permute.xlu0 %5334  ;;  %v10334_v50 = vld [vmem:[#allocation44_spill] sm:$0xff] }
 0x726   : > { %v5384_v54 = vmul.f32 %v5335_v48, %v10334_v50 }
 0x727   : > { %6350 = vpush %v5195_v11 }
 0x728   : > { %v5442_v37 = vsel %vm1303_vm7, %v5384_v54, 0.0 }
 0x729   : > { %v5345_v13 = vpop.permute.xlu2 %5344 }
 0x72a   : > { %v5386_v52 = vmul.f32 %v5345_v13, %v10336_v51 }
 0x72d   : > { %v5350_v21 = vpop.permute.xlu0 %5349 }
 0x72e   : > { %v5387_v18 = vmul.f32 %v5350_v21, %v10337_v23 }
 0x730   : > { %v5448_v49 = vsel %vm1303_vm7, %v5387_v18, 0.0 }
 0x732   : > { %v5310_v39 = vpop.permute.xlu1 %5309 }
 0x733   : > { %v5379_v43 = vmul.f32 %v5310_v39, %v10330_v33  ;;  %v5446_v39 = vsel %vm1303_vm7, %v5386_v52, 0.0 }
 0x735   : > { %v5432_v47 = vsel %vm1303_vm7, %v5379_v43, 0.0 }
 0x736   : > { %v5433_v28 = vadd.f32 %v5432_v47, %v5431_v8  ;;  %v5477_v8 = vld [vmem:[%s10200_s6 + $0x18] sm:$0xff]  ;;  %v5476_v47 = vld [vmem:[%s10200_s6 + $0x10] sm:$0xff] }
 0x737   : > { %5493 = vmatpush.msrb.mxu3 %v5477_v8  ;;  %v6339_v8 = vld [vmem:[%s10202_s8 + $0x8] sm:$0xff] }
 0x738   : > { %v5435_v44 = vadd.f32 %v5434_v58, %v5433_v28  ;;  %v5475_v28 = vld [vmem:[%s10200_s6 + $0x8] sm:$0xff]  ;;  %5673 = vmatpush.bf16.msra.mxu1 %v6339_v8  ;;  %6346 = vmatpush.bf16.msra.mxu2 %v6339_v8 }
 0x739   : > { %5494 = vmatpush.msrb.mxu3 %v5476_v47 }
 0x73a   : > { %v5325_v41 = vpop.permute.xlu1 %5324  ;;  %v5437_v31 = vadd.f32 %v5436_v34, %v5435_v44 }
 0x73b   : > { %v5382_v46 = vmul.f32 %v5325_v41, %v10332_v24  ;;  %5495 = vmatpush.msrb.mxu3 %v5475_v28  ;;  %v6338_v28 = vld [vmem:[%s10202_s8] sm:$0xff] }
 0x73c   : > { %6347 = vmatpush.bf16.msra.mxu2 %v6338_v28  ;;  %5674 = vmatpush.bf16.msra.mxu1 %v6338_v28 }
 0x73d   : > { %v5438_v55 = vsel %vm1303_vm7, %v5382_v46, 0.0  ;;  %5496 = vmatpush.msrb.mxu3 %v5474_v10 }
 0x73e   : > { %v5439_v53 = vadd.f32 %v5438_v55, %v5437_v31 }
 0x740   : > { %v5441_v22 = vadd.f32 %v5440_v60, %v5439_v53 }
 0x742   : > { %v5340_v11 = vpop.permute.xlu1 %5339  ;;  %v5443_v42 = vadd.f32 %v5442_v37, %v5441_v22 }
 0x743   : > { %v5385_v2 = vmul.f32 %v5340_v11, %v10335_v0 }
 0x745   : > { %v5444_v4 = vsel %vm1303_vm7, %v5385_v2, 0.0 }
 0x746   : > { %v5445_v29 = vadd.f32 %v5444_v4, %v5443_v42 }
 0x748   : > { %v5447_v6 = vadd.f32 %v5446_v39, %v5445_v29  ;;  %v5503_v29 = vstv %s6272_s13  ;;  %s6657_s13 = sshra.s32 %s5924_s20, 4  ;;  %s6658_s13 = int_to_ptr.hbm [resolvable:$true] %s6657_s13 }
 0x749   : > { %s6659_s12 = scalar_lea.hbm %s6658_s13, 256  ;;  %p6664_p3 = scmp.lt.s32.totalorder %s6658_s13, %s10341_s10 }
 0x74a   : > { %v5355_v38 = vpop.permute.xlu1 %5354  ;;  %v5449_v44 = vadd.f32 %v5448_v49, %v5447_v6  ;;  %p6660_p4 = scmp.ne.s32.totalorder %s6658_s13, %s6659_s12  ;;  %p6665_p8 = scmp.lt.s32.totalorder %s6663_s22, %s6659_s12 }
 0x74b   : > { %v5388_v43 = vmul.f32 %v5355_v38, %v10338_v40 }
 0x74c   : > { %p6661_p6 = pnand %p6660_p4, %p6876_p11  ;;  %p6666_p0 = por %p6665_p8, %p6664_p3 }
 0x74d   : > { %v5450_v58 = vsel %vm1303_vm7, %v5388_v43, 0.0 }
 0x74e   : > { %v5451_v41 = vadd.f32 %v5450_v58, %v5449_v44  ;;  %p6662_p13 = pneg %p6661_p6 }
 0x750   : > { %v5452_v34 = vrot.slane %v5451_v41, 4  ;;  %p6667_p5 = pnand %p6666_p0, %p6662_p13 }
 0x752   : > { %v5453_v46 = vadd.f32 %v5452_v34, %v5451_v41 }
 0x754   : > { %v5454_v31 = vrot.slane %v5453_v46, 2 }
 0x756   : > { %v5455_v55 = vadd.f32 %v5454_v31, %v5453_v46 }
 0x758   : > { %s6351_s30 = spop %6350  ;;  %v5456_v22 = vrot.slane %v5455_v55, 1 }
 0x759   : > { %v5458_v35 = vstv %s6351_s30  ;;  %s5892_s30 = scalar_lea.sflag [#allocation11], %s6947_s29 }
 0x75a   : > { %6498 = vrcp.f32 %v5458_v35  ;;  %v5470_v60 = vand.u32 2147483648, %v5458_v35  ;;  %v5468_v13 = vand.u32 2147483647, %v5458_v35  ;;  %vm5464_vm9 = vweird.f32 %v5458_v35 }
 0x75b   : > { %v5457_v42 = vadd.f32 %v5456_v22, %v5455_v55 }
 0x75c   : > { %v5471_v37 = vor.u32 1.1754944e-38, %v5470_v60  ;;  %vm5469_vm11 = vcmp.eq.f32.partialorder %v5468_v13, 8.507059e+37 }
 0x760   : > { %v6499_v48 = vpop.eup %6498 }
 0x761   : > { %v5460_v53 = vmul.f32 %v6499_v48, %v5458_v35  ;;  %vm5465_vm8 = vweird.f32 %v6499_v48 }
 0x762   : > { %vm5466_vm10 = vmor %vm5464_vm9, %vm5465_vm8 }
 0x763   : > { %v5461_v54 = vsub.f32 1.0, %v5460_v53 }
 0x765   : > { %v5462_v11 = vmul.f32 %v6499_v48, %v5461_v54 }
 0x767   : > { %v5463_v2 = vadd.f32 %v6499_v48, %v5462_v11 }
 0x769   : > { %v5467_v4 = vsel %vm5466_vm10, %v6499_v48, %v5463_v2 }
 0x76a   : > { %v5472_v52 = vsel %vm5469_vm11, %v5471_v37, %v5467_v4 }
 0x76b   : > { %v5473_v21 = vmul.f32 %v5472_v52, %v5457_v42 }
 0x76d   : > { %6271 = vmatmul.msk.f32.vlgmr.msrb.gmra.mxu3 %vm1303_vm7, %v5473_v21 }
 0x7f0   : > { %v5498_v18 = vpop.f32.mrf.mxu3 }
 0x7f1   : > { %vm5502_vm12 = vcmp.ge.f32.partialorder %v5498_v18, 0.0  ;;  %v5504_v39 = vmul.f32 %v5503_v29, %v5498_v18 }
 0x7f3   : > { %v5505_v38 = vsel %vm5502_vm12, %v5498_v18, %v5504_v39 }
 0x7f4   : > { %6274 = vmatmul.msk.f32.vlgmr.msrb.gmra.mxu2 %vm5507_vm0, %v5505_v38  ;;  %v9971_v38 = vstv %s6300_s28 }
 0x877   : > { %v5532_v6 = vpop.f32.mrf.mxu2 }
 0x878   : > { %v6275_v43 = vmul.f32 -1.442695, %v5532_v6 }
 0x87a   : > { %6500 = vpow2.f32 %v6275_v43 }
 0x880   : > { %v6501_v47 = vpop.eup %6500 }
 0x881   : > { %v5538_v49 = vadd.f32 1.0, %v6501_v47 }
 0x883   : > { %6502 = vrcp.f32 %v5538_v49  ;;  %v5550_v41 = vand.u32 2147483648, %v5538_v49  ;;  %v5548_v46 = vand.u32 2147483647, %v5538_v49  ;;  %vm5544_vm2 = vweird.f32 %v5538_v49 }
 0x885   : > { %v5551_v31 = vor.u32 1.1754944e-38, %v5550_v41  ;;  %vm5549_vm4 = vcmp.eq.f32.partialorder %v5548_v46, 8.507059e+37 }
 0x889   : > { %v6503_v58 = vpop.eup %6502 }
 0x88a   : > { %v5540_v44 = vmul.f32 %v6503_v58, %v5538_v49  ;;  %vm5545_vm1 = vweird.f32 %v6503_v58  ;;  %v6538_v49 = vld [vmem:[%s6954_s15 + $0x8] sm:$0xff] }
 0x88b   : > { %vm5546_vm3 = vmor %vm5544_vm2, %vm5545_vm1 }
 0x88c   : > { %v5541_v10 = vsub.f32 1.0, %v5540_v44 }
 0x88e   : > { %v5542_v34 = vmul.f32 %v6503_v58, %v5541_v10 }
 0x890   : > { %v5543_v35 = vadd.f32 %v6503_v58, %v5542_v34 }
 0x892   : > { %v5547_v48 = vsel %vm5546_vm3, %v6503_v58, %v5543_v35 }
 0x893   : > { %v5552_v55 = vsel %vm5549_vm4, %v5551_v31, %v5547_v48  ;;  %v6539_v48 = vld [vmem:[%s6954_s15 + $0x18] sm:$0xff] }
 0x894   : > { %v9920_v53 = vperm.slane %v5552_v55, 0 }
 0x896   : > { %v5555_v54 = vmul.f32 %v9920_v53, %v9178_v7  ;;  %v5556_v60 = vmul.f32 %v9920_v53, %v9198_v27  ;;  %v5557_v22 = vmul.f32 %v9920_v53, %v9214_v56  ;;  %v5558_v11 = vmul.f32 %v9920_v53, %v9230_v15 }
 0x897   : > { %v5559_v37 = vmul.f32 %v9920_v53, %v9248_v3  ;;  %v5560_v7 = vmul.f32 %v9920_v53, %v9260_v57  ;;  %v5561_v27 = vmul.f32 %v9920_v53, %v9289_v36  ;;  %v5562_v56 = vmul.f32 %v9920_v53, %v10314_v16 }
 0x898   : > { %v5587_v13 = vpack.c.bf16 %v5556_v60, %v5555_v54  ;;  %v5588_v2 = vpack.c.bf16 %v5558_v11, %v5557_v22  ;;  %v5563_v4 = vmul.f32 %v9920_v53, %v10315_v12  ;;  %v5564_v3 = vmul.f32 %v9920_v53, %v10316_v62  ;;  %v6540_v11 = vld [vmem:[%s6954_s15 + $0x20] sm:$0xff] }
 0x899   : > { %v5589_v42 = vpack.c.bf16 %v5560_v7, %v5559_v37  ;;  %v5590_v15 = vpack.c.bf16 %v5562_v56, %v5561_v27  ;;  %v5565_v57 = vmul.f32 %v9920_v53, %v10317_v5  ;;  %v5566_v36 = vmul.f32 %v9920_v53, %v10318_v14  ;;  %v6541_v27 = vld [vmem:[%s6954_s15 + $0x28] sm:$0xff] }
 0x89a   : > { %6284 = vmatmul.msk.bf16.vlgmr.msra.gmra.mxu1 %vm1303_vm7, %v5587_v13  ;;  %6285 = vmatmul.msk.bf16.vlgmr.msra.gmra.mxu2 %vm1303_vm7, %v5588_v2  ;;  %v5591_v52 = vpack.c.bf16 %v5564_v3, %v5563_v4  ;;  %v5567_v16 = vmul.f32 %v9920_v53, %v10319_v45  ;;  %v5568_v12 = vmul.f32 %v9920_v53, %v10320_v9 }
 0x89b   : > { %v5592_v21 = vpack.c.bf16 %v5566_v36, %v5565_v57  ;;  %v5569_v29 = vmul.f32 %v9920_v53, %v10321_v59  ;;  %v5570_v5 = vmul.f32 %v9920_v53, %v10322_v17  ;;  %v5571_v18 = vmul.f32 %v9920_v53, %v10323_v30  ;;  %v6536_v30 = vld [vmem:[%s6954_s15] sm:$0xff]  ;;  %v6542_v57 = vld [vmem:[%s6954_s15 + $0x30] sm:$0xff] }
 0x89c   : > { %v5593_v62 = vpack.c.bf16 %v5568_v12, %v5567_v16  ;;  %v5572_v45 = vmul.f32 %v9920_v53, %v10324_v1  ;;  %v5573_v59 = vmul.f32 %v9920_v53, %v10325_v19  ;;  %v5574_v17 = vmul.f32 %v9920_v53, %v10326_v32  ;;  %v6537_v32 = vld [vmem:[%s6954_s15 + $0x10] sm:$0xff] }
 0x89d   : > { %v5594_v14 = vpack.c.bf16 %v5570_v5, %v5569_v29  ;;  %v5575_v46 = vmul.f32 %v9920_v53, %v10327_v25  ;;  %v5576_v35 = vmul.f32 %v9920_v53, %v10328_v26  ;;  %v5577_v37 = vmul.f32 %v9920_v53, %v10330_v33 }
 0x89e   : > { %v5595_v9 = vpack.c.bf16 %v5572_v45, %v5571_v18  ;;  %v5596_v43 = vpack.c.bf16 %v5574_v17, %v5573_v59  ;;  %v5578_v7 = vmul.f32 %v9920_v53, %v10329_v61  ;;  %v5580_v16 = vmul.f32 %v9920_v53, %v10332_v24 }
 0x89f   : > { %v5597_v60 = vpack.c.bf16 %v5576_v35, %v5575_v46  ;;  %v5581_v17 = vmul.f32 %v9920_v53, %v10333_v20 }
 0x8a0   : > { %v5598_v4 = vpack.c.bf16 %v5578_v7, %v5577_v37  ;;  %v6550_v37 = vld [vmem:[%s6954_s15 + $0x70] sm:$0xff] }
 0x8aa   : > { %6286 = vmatmul.msk.bf16.gmra.mxu2 %vm1303_vm7, %v5589_v42 }
 0x8ba   : > { %6287 = vmatmul.msk.bf16.gmra.mxu2 %vm1303_vm7, %v5590_v15 }
 0x8ca   : > { %6288 = vmatmul.msk.bf16.gmra.mxu2 %vm1303_vm7, %v5591_v52 }
 0x8da   : > { %6289 = vmatmul.msk.bf16.gmra.mxu2 %vm1303_vm7, %v5592_v21  ;;  %v5579_v21 = vmul.f32 %v9920_v53, %v10331_v63 }
 0x8ea   : > { %6290 = vmatmul.msk.bf16.gmra.mxu2 %vm1303_vm7, %v5593_v62  ;;  %v6543_v62 = vld [vmem:[%s6954_s15 + $0x38] sm:$0xff] }
 0x8fa   : > { %6291 = vmatmul.msk.bf16.gmra.mxu2 %vm1303_vm7, %v5594_v14  ;;  %v5599_v14 = vpack.c.bf16 %v5580_v16, %v5579_v21 }
 0x90a   : > { %6292 = vmatmul.msk.bf16.gmra.mxu2 %vm1303_vm7, %v5595_v9  ;;  %v6544_v9 = vld [vmem:[%s6954_s15 + $0x40] sm:$0xff] }
 0x917   : > { %v5676_v39 = vpop.f32.mrf.mxu1 }
 0x918   : > { %v5677_v6 = vadd.f32 %v6536_v30, %v5676_v39  ;;  %v5582_v39 = vmul.f32 %v9920_v53, %v10334_v50 }
 0x91a   : > { %vm5757_vm5 = vcmp.ge.f32.partialorder %v5677_v6, 0.0  ;;  %v5790_v1 = vmul.f32 %v9971_v38, %v5677_v6  ;;  %6293 = vmatmul.msk.bf16.gmra.mxu2 %vm1303_vm7, %v5596_v43 }
 0x91c   : > { %v5822_v8 = vsel %vm5757_vm5, %v5677_v6, %v5790_v1  ;;  %v6545_v6 = vld [vmem:[%s6954_s15 + $0x48] sm:$0xff] }
 0x91d   : > { %5854 = vst.msk [vmem:[%s9977_s24] sm:$0xff] %vm1257_vm6, %v5822_v8  ;;  %v5681_v19 = vpop.f32.mrf.mxu2  ;;  %v5600_v8 = vpack.c.bf16 %v5582_v39, %v5581_v17 }
 0x91e   : > { %v5682_v47 = vadd.f32 %v6537_v32, %v5681_v19 }
 0x91f   : > { %v5678_v28 = vpop.f32.mrf.mxu1 }
 0x920   : > { %v5679_v58 = vadd.f32 %v6538_v49, %v5678_v28  ;;  %vm5759_vm13 = vcmp.ge.f32.partialorder %v5682_v47, 0.0  ;;  %v5792_v44 = vmul.f32 %v9971_v38, %v5682_v47  ;;  %v5583_v49 = vmul.f32 %v9920_v53, %v10335_v0 }
 0x922   : > { %vm5758_vm14 = vcmp.ge.f32.partialorder %v5679_v58, 0.0  ;;  %v5791_v10 = vmul.f32 %v9971_v38, %v5679_v58  ;;  %v5824_v41 = vsel %vm5759_vm13, %v5682_v47, %v5792_v44  ;;  %v6546_v47 = vld [vmem:[%s6954_s15 + $0x50] sm:$0xff] }
 0x923   : > { %5856 = vst.msk [vmem:[%s9977_s24 + $0x10] sm:$0xff] %vm1257_vm6, %v5824_v41 }
 0x924   : > { %v5823_v34 = vsel %vm5758_vm14, %v5679_v58, %v5791_v10  ;;  %v5584_v58 = vmul.f32 %v9920_v53, %v10336_v51  ;;  %v6547_v10 = vld [vmem:[%s6954_s15 + $0x58] sm:$0xff] }
 0x925   : > { %5855 = vst.msk [vmem:[%s9977_s24 + $0x8] sm:$0xff] %vm1257_vm6, %v5823_v34  ;;  %v5683_v31 = vpop.f32.mrf.mxu2 }
 0x926   : > { %v5684_v55 = vadd.f32 %v6539_v48, %v5683_v31  ;;  %v5601_v46 = vpack.c.bf16 %v5584_v58, %v5583_v49  ;;  %v6548_v48 = vld [vmem:[%s6954_s15 + $0x60] sm:$0xff] }
 0x928   : > { %vm5760_vm15 = vcmp.ge.f32.partialorder %v5684_v55, 0.0  ;;  %v5793_v54 = vmul.f32 %v9971_v38, %v5684_v55 }
 0x92a   : > { %v5825_v22 = vsel %vm5760_vm15, %v5684_v55, %v5793_v54  ;;  %6294 = vmatmul.msk.bf16.gmra.mxu2 %vm1303_vm7, %v5597_v60  ;;  %v5585_v54 = vmul.f32 %v9920_v53, %v10337_v23  ;;  %v5586_v60 = vmul.f32 %v9920_v53, %v10338_v40 }
 0x92b   : > { %5857 = vst.msk [vmem:[%s9977_s24 + $0x18] sm:$0xff] %vm1257_vm6, %v5825_v22 }
 0x92d   : > { %v5686_v25 = vpop.f32.mrf.mxu2 }
 0x92e   : > { %v5687_v26 = vadd.f32 %v6540_v11, %v5686_v25  ;;  %v6549_v25 = vld [vmem:[%s6954_s15 + $0x68] sm:$0xff] }
 0x930   : > { %vm5761_vm8 = vcmp.ge.f32.partialorder %v5687_v26, 0.0  ;;  %v5794_v13 = vmul.f32 %v9971_v38, %v5687_v26 }
 0x932   : > { %v5826_v2 = vsel %vm5761_vm8, %v5687_v26, %v5794_v13  ;;  %v5602_v13 = vpack.c.bf16 %v5586_v60, %v5585_v54 }
 0x933   : > { %5858 = vst.msk [vmem:[%s9977_s24 + $0x20] sm:$0xff] %vm1257_vm6, %v5826_v2 }
 0x935   : > { %v5688_v42 = vpop.f32.mrf.mxu2 }
 0x936   : > { %v5689_v56 = vadd.f32 %v6541_v27, %v5688_v42  ;;  %v6551_v27 = vld [vmem:[%s6954_s15 + $0x78] sm:$0xff] }
 0x938   : > { %vm5762_vm9 = vcmp.ge.f32.partialorder %v5689_v56, 0.0  ;;  %v5795_v15 = vmul.f32 %v9971_v38, %v5689_v56 }
 0x93a   : > { %v5827_v3 = vsel %vm5762_vm9, %v5689_v56, %v5795_v15  ;;  %6295 = vmatmul.msk.bf16.gmra.mxu2 %vm1303_vm7, %v5598_v4 }
 0x93b   : > { %5859 = vst.msk [vmem:[%s9977_s24 + $0x28] sm:$0xff] %vm1257_vm6, %v5827_v3 }
 0x93d   : > { %v5691_v52 = vpop.f32.mrf.mxu2 }
 0x93e   : > { %v5692_v33 = vadd.f32 %v6542_v57, %v5691_v52  ;;  %v6552_v52 = vld [vmem:[%s6954_s15 + $0x80] sm:$0xff] }
 0x940   : > { %vm5763_vm10 = vcmp.ge.f32.partialorder %v5692_v33, 0.0  ;;  %v5796_v61 = vmul.f32 %v9971_v38, %v5692_v33 }
 0x942   : > { %v5828_v36 = vsel %vm5763_vm10, %v5692_v33, %v5796_v61 }
 0x943   : > { %5860 = vst.msk [vmem:[%s9977_s24 + $0x30] sm:$0xff] %vm1257_vm6, %v5828_v36 }
 0x945   : > { %v5693_v12 = vpop.f32.mrf.mxu2 }
 0x946   : > { %v5694_v29 = vadd.f32 %v6543_v62, %v5693_v12 }
 0x948   : > { %vm5764_vm11 = vcmp.ge.f32.partialorder %v5694_v29, 0.0  ;;  %v5797_v5 = vmul.f32 %v9971_v38, %v5694_v29 }
 0x94a   : > { %v5829_v18 = vsel %vm5764_vm11, %v5694_v29, %v5797_v5  ;;  %6296 = vmatmul.msk.bf16.gmra.mxu2 %vm1303_vm7, %v5599_v14 }
 0x94b   : > { %5861 = vst.msk [vmem:[%s9977_s24 + $0x38] sm:$0xff] %vm1257_vm6, %v5829_v18 }
 0x94d   : > { %v5696_v45 = vpop.f32.mrf.mxu2 }
 0x94e   : > { %v5697_v63 = vadd.f32 %v6544_v9, %v5696_v45 }
 0x950   : > { %vm5765_vm12 = vcmp.ge.f32.partialorder %v5697_v63, 0.0  ;;  %v5798_v24 = vmul.f32 %v9971_v38, %v5697_v63 }
 0x952   : > { %v5830_v59 = vsel %vm5765_vm12, %v5697_v63, %v5798_v24 }
 0x953   : > { %5862 = vst.msk [vmem:[%s9977_s24 + $0x40] sm:$0xff] %vm1257_vm6, %v5830_v59 }
 0x955   : > { %v5698_v30 = vpop.f32.mrf.mxu2 }
 0x956   : > { %v5699_v43 = vadd.f32 %v6545_v6, %v5698_v30 }
 0x958   : > { %vm5766_vm0 = vcmp.ge.f32.partialorder %v5699_v43, 0.0  ;;  %v5799_v1 = vmul.f32 %v9971_v38, %v5699_v43 }
 0x95a   : > { %v5831_v19 = vsel %vm5766_vm0, %v5699_v43, %v5799_v1  ;;  %6297 = vmatmul.msk.bf16.gmra.mxu2 %vm1303_vm7, %v5600_v8 }
 0x95b   : > { %5863 = vst.msk [vmem:[%s9977_s24 + $0x48] sm:$0xff] %vm1257_vm6, %v5831_v19 }
 0x95d   : > { %v5701_v32 = vpop.f32.mrf.mxu2 }
 0x95e   : > { %v5702_v20 = vadd.f32 %v6546_v47, %v5701_v32 }
 0x960   : > { %vm5767_vm1 = vcmp.ge.f32.partialorder %v5702_v20, 0.0  ;;  %v5800_v50 = vmul.f32 %v9971_v38, %v5702_v20 }
 0x962   : > { %v5832_v28 = vsel %vm5767_vm1, %v5702_v20, %v5800_v50 }
 0x963   : > { %5864 = vst.msk [vmem:[%s9977_s24 + $0x50] sm:$0xff] %vm1257_vm6, %v5832_v28 }
 0x965   : > { %v5703_v44 = vpop.f32.mrf.mxu2 }
 0x966   : > { %v5704_v41 = vadd.f32 %v6547_v10, %v5703_v44 }
 0x968   : > { %vm5768_vm2 = vcmp.ge.f32.partialorder %v5704_v41, 0.0  ;;  %v5801_v34 = vmul.f32 %v9971_v38, %v5704_v41 }
 0x96a   : > { %v5833_v35 = vsel %vm5768_vm2, %v5704_v41, %v5801_v34  ;;  %6298 = vmatmul.msk.bf16.gmra.mxu2 %vm1303_vm7, %v5601_v46 }
 0x96b   : > { %5865 = vst.msk [vmem:[%s9977_s24 + $0x58] sm:$0xff] %vm1257_vm6, %v5833_v35 }
 0x96d   : > { %v5706_v31 = vpop.f32.mrf.mxu2 }
 0x96e   : > { %v5707_v0 = vadd.f32 %v6548_v48, %v5706_v31 }
 0x970   : > { %vm5769_vm3 = vcmp.ge.f32.partialorder %v5707_v0, 0.0  ;;  %v5802_v51 = vmul.f32 %v9971_v38, %v5707_v0 }
 0x972   : > { %v5834_v55 = vsel %vm5769_vm3, %v5707_v0, %v5802_v51 }
 0x973   : > { %5866 = vst.msk [vmem:[%s9977_s24 + $0x60] sm:$0xff] %vm1257_vm6, %v5834_v55 }
 0x975   : > { %v5708_v22 = vpop.f32.mrf.mxu2 }
 0x976   : > { %v5709_v11 = vadd.f32 %v6549_v25, %v5708_v22 }
 0x978   : > { %vm5770_vm4 = vcmp.ge.f32.partialorder %v5709_v11, 0.0  ;;  %v5803_v26 = vmul.f32 %v9971_v38, %v5709_v11 }
 0x97a   : > { %v5835_v2 = vsel %vm5770_vm4, %v5709_v11, %v5803_v26  ;;  %6299 = vmatmul.msk.bf16.gmra.mxu2 %vm1303_vm7, %v5602_v13 }
 0x97b   : > { %5867 = vst.msk [vmem:[%s9977_s24 + $0x68] sm:$0xff] %vm1257_vm6, %v5835_v2 }
 0x97d   : > { %v5711_v23 = vpop.f32.mrf.mxu2 }
 0x97e   : > { %v5712_v40 = vadd.f32 %v6550_v37, %v5711_v23 }
 0x980   : > { %vm5771_vm5 = vcmp.ge.f32.partialorder %v5712_v40, 0.0  ;;  %v5804_v53 = vmul.f32 %v9971_v38, %v5712_v40 }
 0x982   : > { %v5836_v7 = vsel %vm5771_vm5, %v5712_v40, %v5804_v53 }
 0x983   : > { %5868 = vst.msk [vmem:[%s9977_s24 + $0x70] sm:$0xff] %vm1257_vm6, %v5836_v7 }
 0x985   : > { %v5713_v42 = vpop.f32.mrf.mxu2 }
 0x986   : > { %v5714_v56 = vadd.f32 %v6551_v27, %v5713_v42 }
 0x988   : > { %vm5772_vm13 = vcmp.ge.f32.partialorder %v5714_v56, 0.0  ;;  %v5805_v15 = vmul.f32 %v9971_v38, %v5714_v56 }
 0x98a   : > { %v5837_v4 = vsel %vm5772_vm13, %v5714_v56, %v5805_v15 }
 0x98b   : > { %5869 = vst.msk [vmem:[%s9977_s24 + $0x78] sm:$0xff] %vm1257_vm6, %v5837_v4 }
 0x98d   : > { %v5716_v3 = vpop.f32.mrf.mxu2 }
 0x98e   : > { %v5717_v57 = vadd.f32 %v6552_v52, %v5716_v3 }
 0x990   : > { %vm5773_vm7 = vcmp.ge.f32.partialorder %v5717_v57, 0.0  ;;  %v5806_v33 = vmul.f32 %v9971_v38, %v5717_v57 }
 0x992   : > { %v5838_v61 = vsel %vm5773_vm7, %v5717_v57, %v5806_v33 }
 0x993   : > { %5870 = vst.msk [vmem:[%s9977_s24 + $0x80] sm:$0xff] %vm1257_vm6, %v5838_v61 }
 0x994   : > { %6670 = shalt.err (!%p6667_p5)
}
 0x995   : > { %s6762_s25 = smov 128   ;;  %s6763_s19 = smov 8   ;;  %v5718_v36 = vpop.f32.mrf.mxu2  ;;  %v6553_v21 = vld [vmem:[%s6954_s15 + $0x88] sm:$0xff]  ;;  %v6554_v5 = vld [vmem:[%s6954_s15 + $0x90] sm:$0xff]  ;;  %v6555_v63 = vld [vmem:[%s6954_s15 + $0x98] sm:$0xff] }
 0x996   : > { %6361 = dma.vmem_to_hbm [thread:$0]  (%p6876_p11), %s5922_s11, 4096, %s5924_s20, %s5892_s30, %s6762_s25, %s6762_s25, %s6763_s19   ;;  %v5719_v16 = vadd.f32 %v6553_v21, %v5718_v36 }
 0x997   : > { %v6556_v30 = vld [vmem:[%s6954_s15 + $0xa0] sm:$0xff]  ;;  %v6557_v19 = vld [vmem:[%s6954_s15 + $0xa8] sm:$0xff]  ;;  %v6558_v28 = vld [vmem:[%s6954_s15 + $0xb0] sm:$0xff]  ;;  %s10342_s11 = sld [smem:[#allocation50_spill]]  ;;  %s5904_s30 = sshll.u32 %s9977_s24, 4  ;;  %s5905_s30 = int_to_ptr.vmem [resolvable:$true] %s5904_s30 }
 0x998   : > { %vm5774_vm14 = vcmp.ge.f32.partialorder %v5719_v16, 0.0  ;;  %v5807_v12 = vmul.f32 %v9971_v38, %v5719_v16  ;;  %v6559_v41 = vld [vmem:[%s6954_s15 + $0xb8] sm:$0xff]  ;;  %v6560_v48 = vld [vmem:[%s6954_s15 + $0xc0] sm:$0xff]  ;;  %v6561_v60 = vld [vmem:[%s6954_s15 + $0xc8] sm:$0xff]  ;;  %s5887_s12 = scalar_lea.sflag [#allocation4], %s6947_s29 }
 0x999   : > { %v6562_v13 = vld [vmem:[%s6954_s15 + $0xd0] sm:$0xff]  ;;  %v6563_v53 = vld [vmem:[%s6954_s15 + $0xd8] sm:$0xff]  ;;  %v6564_v15 = vld [vmem:[%s6954_s15 + $0xe0] sm:$0xff] }
 0x99a   : > { %v5839_v62 = vsel %vm5774_vm14, %v5719_v16, %v5807_v12  ;;  %v6565_v33 = vld [vmem:[%s6954_s15 + $0xe8] sm:$0xff]  ;;  %v6566_v12 = vld [vmem:[%s6954_s15 + $0xf0] sm:$0xff] }
 0x99b   : > { %5871 = vst.msk [vmem:[%s9977_s24 + $0x88] sm:$0xff] %vm1257_vm6, %v5839_v62 }
 0x99d   : > { %v5721_v29 = vpop.f32.mrf.mxu2  ;;  %s5903_s20 = scalar_lea.hbm %s10342_s11, %s6340_s16  ;;  %s6691_s26 = scalar_lea.hbm %s10342_s11, 512 }
 0x99e   : > { %v5722_v14 = vadd.f32 %v6554_v5, %v5721_v29  ;;  %s5906_s13 = sshll.u32 %s5903_s20, 4  ;;  %s5907_s13 = int_to_ptr.hbm [resolvable:$true] %s5906_s13 }
 0x99f   : > { %s6685_s21 = sshra.s32 %s5907_s13, 4  ;;  %s6686_s21 = int_to_ptr.hbm [resolvable:$true] %s6685_s21 }
 0x9a0   : > { %vm5775_vm15 = vcmp.ge.f32.partialorder %v5722_v14, 0.0  ;;  %v5808_v18 = vmul.f32 %v9971_v38, %v5722_v14  ;;  %s6687_s14 = scalar_lea.hbm %s6686_s21, 256  ;;  %p6692_p2 = scmp.lt.s32.totalorder %s6686_s21, %s10342_s11 }
 0x9a1   : > { %p6688_p9 = scmp.ne.s32.totalorder %s6686_s21, %s6687_s14  ;;  %p6693_p7 = scmp.lt.s32.totalorder %s6691_s26, %s6687_s14 }
 0x9a2   : > { %v5840_v45 = vsel %vm5775_vm15, %v5722_v14, %v5808_v18  ;;  %v6567_v18 = vld [vmem:[%s6954_s15 + $0xf8] sm:$0xff] }
 0x9a3   : > { %5872 = vst.msk [vmem:[%s9977_s24 + $0x90] sm:$0xff] %vm1257_vm6, %v5840_v45  ;;  %p6689_p10 = pnand %p6688_p9, %p6876_p11  ;;  %p6694_p4 = por %p6693_p7, %p6692_p2 }
 0x9a5   : > { %v5723_v9 = vpop.f32.mrf.mxu2  ;;  %p6690_p1 = pneg %p6689_p10 }
 0x9a6   : > { %v5724_v24 = vadd.f32 %v6555_v63, %v5723_v9 }
 0x9a7   : > { %p6695_p6 = pnand %p6694_p4, %p6690_p1 }
 0x9a8   : > { %vm5776_vm8 = vcmp.ge.f32.partialorder %v5724_v24, 0.0  ;;  %v5809_v59 = vmul.f32 %v9971_v38, %v5724_v24 }
 0x9aa   : > { %v5841_v17 = vsel %vm5776_vm8, %v5724_v24, %v5809_v59 }
 0x9ab   : > { %5873 = vst.msk [vmem:[%s9977_s24 + $0x98] sm:$0xff] %vm1257_vm6, %v5841_v17 }
 0x9ad   : > { %v5726_v39 = vpop.f32.mrf.mxu2 }
 0x9ae   : > { %v5727_v6 = vadd.f32 %v6556_v30, %v5726_v39 }
 0x9b0   : > { %vm5777_vm9 = vcmp.ge.f32.partialorder %v5727_v6, 0.0  ;;  %v5810_v43 = vmul.f32 %v9971_v38, %v5727_v6 }
 0x9b2   : > { %v5842_v1 = vsel %vm5777_vm9, %v5727_v6, %v5810_v43 }
 0x9b3   : > { %5874 = vst.msk [vmem:[%s9977_s24 + $0xa0] sm:$0xff] %vm1257_vm6, %v5842_v1 }
 0x9b5   : > { %v5728_v8 = vpop.f32.mrf.mxu2 }
 0x9b6   : > { %v5729_v32 = vadd.f32 %v6557_v19, %v5728_v8 }
 0x9b8   : > { %vm5778_vm10 = vcmp.ge.f32.partialorder %v5729_v32, 0.0  ;;  %v5811_v47 = vmul.f32 %v9971_v38, %v5729_v32 }
 0x9ba   : > { %v5843_v20 = vsel %vm5778_vm10, %v5729_v32, %v5811_v47 }
 0x9bb   : > { %5875 = vst.msk [vmem:[%s9977_s24 + $0xa8] sm:$0xff] %vm1257_vm6, %v5843_v20 }
 0x9bd   : > { %v5731_v50 = vpop.f32.mrf.mxu2 }
 0x9be   : > { %v5732_v49 = vadd.f32 %v6558_v28, %v5731_v50 }
 0x9c0   : > { %vm5779_vm11 = vcmp.ge.f32.partialorder %v5732_v49, 0.0  ;;  %v5812_v58 = vmul.f32 %v9971_v38, %v5732_v49 }
 0x9c2   : > { %v5844_v44 = vsel %vm5779_vm11, %v5732_v49, %v5812_v58 }
 0x9c3   : > { %5876 = vst.msk [vmem:[%s9977_s24 + $0xb0] sm:$0xff] %vm1257_vm6, %v5844_v44 }
 0x9c5   : > { %v5733_v10 = vpop.f32.mrf.mxu2 }
 0x9c6   : > { %v5734_v34 = vadd.f32 %v6559_v41, %v5733_v10 }
 0x9c8   : > { %vm5780_vm12 = vcmp.ge.f32.partialorder %v5734_v34, 0.0  ;;  %v5813_v46 = vmul.f32 %v9971_v38, %v5734_v34 }
 0x9ca   : > { %v5845_v35 = vsel %vm5780_vm12, %v5734_v34, %v5813_v46 }
 0x9cb   : > { %5877 = vst.msk [vmem:[%s9977_s24 + $0xb8] sm:$0xff] %vm1257_vm6, %v5845_v35 }
 0x9cd   : > { %v5736_v31 = vpop.f32.mrf.mxu2 }
 0x9ce   : > { %v5737_v0 = vadd.f32 %v6560_v48, %v5736_v31 }
 0x9d0   : > { %vm5781_vm0 = vcmp.ge.f32.partialorder %v5737_v0, 0.0  ;;  %v5814_v51 = vmul.f32 %v9971_v38, %v5737_v0 }
 0x9d2   : > { %v5846_v55 = vsel %vm5781_vm0, %v5737_v0, %v5814_v51 }
 0x9d3   : > { %5878 = vst.msk [vmem:[%s9977_s24 + $0xc0] sm:$0xff] %vm1257_vm6, %v5846_v55 }
 0x9d5   : > { %v5738_v54 = vpop.f32.mrf.mxu2 }
 0x9d6   : > { %v5739_v22 = vadd.f32 %v6561_v60, %v5738_v54 }
 0x9d8   : > { %vm5782_vm1 = vcmp.ge.f32.partialorder %v5739_v22, 0.0  ;;  %v5815_v25 = vmul.f32 %v9971_v38, %v5739_v22 }
 0x9da   : > { %v5847_v11 = vsel %vm5782_vm1, %v5739_v22, %v5815_v25 }
 0x9db   : > { %5879 = vst.msk [vmem:[%s9977_s24 + $0xc8] sm:$0xff] %vm1257_vm6, %v5847_v11 }
 0x9dd   : > { %v5741_v26 = vpop.f32.mrf.mxu2 }
 0x9de   : > { %v5742_v2 = vadd.f32 %v6562_v13, %v5741_v26 }
 0x9e0   : > { %vm5783_vm2 = vcmp.ge.f32.partialorder %v5742_v2, 0.0  ;;  %v5816_v23 = vmul.f32 %v9971_v38, %v5742_v2 }
 0x9e2   : > { %v5848_v37 = vsel %vm5783_vm2, %v5742_v2, %v5816_v23 }
 0x9e3   : > { %5880 = vst.msk [vmem:[%s9977_s24 + $0xd0] sm:$0xff] %vm1257_vm6, %v5848_v37 }
 0x9e5   : > { %v5743_v40 = vpop.f32.mrf.mxu2 }
 0x9e6   : > { %v5744_v7 = vadd.f32 %v6563_v53, %v5743_v40 }
 0x9e8   : > { %vm5784_vm3 = vcmp.ge.f32.partialorder %v5744_v7, 0.0  ;;  %v5817_v42 = vmul.f32 %v9971_v38, %v5744_v7 }
 0x9ea   : > { %v5849_v27 = vsel %vm5784_vm3, %v5744_v7, %v5817_v42 }
 0x9eb   : > { %5881 = vst.msk [vmem:[%s9977_s24 + $0xd8] sm:$0xff] %vm1257_vm6, %v5849_v27 }
 0x9ed   : > { %v5746_v56 = vpop.f32.mrf.mxu2 }
 0x9ee   : > { %v5747_v4 = vadd.f32 %v6564_v15, %v5746_v56 }
 0x9f0   : > { %vm5785_vm4 = vcmp.ge.f32.partialorder %v5747_v4, 0.0  ;;  %v5818_v3 = vmul.f32 %v9971_v38, %v5747_v4 }
 0x9f2   : > { %v5850_v52 = vsel %vm5785_vm4, %v5747_v4, %v5818_v3 }
 0x9f3   : > { %5882 = vst.msk [vmem:[%s9977_s24 + $0xe0] sm:$0xff] %vm1257_vm6, %v5850_v52 }
 0x9f5   : > { %v5748_v57 = vpop.f32.mrf.mxu2 }
 0x9f6   : > { %v5749_v61 = vadd.f32 %v6565_v33, %v5748_v57 }
 0x9f8   : > { %vm5786_vm5 = vcmp.ge.f32.partialorder %v5749_v61, 0.0  ;;  %v5819_v36 = vmul.f32 %v9971_v38, %v5749_v61 }
 0x9fa   : > { %v5851_v21 = vsel %vm5786_vm5, %v5749_v61, %v5819_v36 }
 0x9fb   : > { %5883 = vst.msk [vmem:[%s9977_s24 + $0xe8] sm:$0xff] %vm1257_vm6, %v5851_v21 }
 0x9fd   : > { %v5751_v16 = vpop.f32.mrf.mxu2 }
 0x9fe   : > { %v5752_v62 = vadd.f32 %v6566_v12, %v5751_v16 }
 0xa00   : > { %vm5787_vm13 = vcmp.ge.f32.partialorder %v5752_v62, 0.0  ;;  %v5820_v29 = vmul.f32 %v9971_v38, %v5752_v62 }
 0xa02   : > { %v5852_v5 = vsel %vm5787_vm13, %v5752_v62, %v5820_v29 }
 0xa03   : > { %5884 = vst.msk [vmem:[%s9977_s24 + $0xf0] sm:$0xff] %vm1257_vm6, %v5852_v5 }
 0xa05   : > { %v5753_v14 = vpop.f32.mrf.mxu2 }
 0xa06   : > { %v5754_v45 = vadd.f32 %v6567_v18, %v5753_v14 }
 0xa08   : > { %vm5788_vm7 = vcmp.ge.f32.partialorder %v5754_v45, 0.0  ;;  %v5821_v9 = vmul.f32 %v9971_v38, %v5754_v45 }
 0xa0a   : > { %v5853_v63 = vsel %vm5788_vm7, %v5754_v45, %v5821_v9 }
 0xa0b   : > { %5885 = vst.msk [vmem:[%s9977_s24 + $0xf8] sm:$0xff] %vm1257_vm6, %v5853_v63 }
 0xa0c   : > { %6698 = shalt.err (!%p6695_p6)
}
 0xa0d   : > { %6360 = dma.vmem_to_hbm [thread:$0]  (%p6876_p11), %s5905_s30, 4096, %s5907_s13, %s5887_s12, %s6762_s25, %s6762_s25, %s6763_s19  }
 0xa0e PF: > { %s10343_s29 = sld [smem:[#allocation17_spill]] }
 0xa0f   : > { %s10345_s9 = sld [smem:[#allocation19_spill]] }
 0xa14   : > { %s5938_s17 = sand.u32 1, %s10343_s29  }
 0xa15   : > { %p10346_p13 = scmp.ge.s32.totalorder %s10345_s9, 2  ;;  %s5939_s23 = scalar_lea.sflag [#allocation4], %s5938_s17 }
 0xa17   : > { %p6376_p3 = pnand %p10346_p13, %p6880_p12 }
 0xa19   : > { %p6377_p8 = pneg %p6376_p3 }
 0xa1b   : > { %6728 = dma.done.wait (%p6377_p8), %s5939_s23, 4096  }
 0xa1c   : > { %6730 = vsyncadd (%p6377_p8), %s5939_s23, 4294963200  ;;  %s5949_s20 = scalar_lea.sflag [#allocation11], %s5938_s17 }
 0xa1d   : > { %6732 = dma.done.wait (%p6377_p8), %s5949_s20, 4096  }
 0xa1e   : > { %6734 = vsyncadd (%p6377_p8), %s5949_s20, 4294963200  ;;  %s10347_s20 = sld [smem:[#allocation20_spill]]  ;;  %s10350_s17 = smov %s6741_s18 }
 0xa1f   : > { %s10348_s27 = sld [smem:[#allocation18_spill]] }
 0xa20   : > { %s10349_s19 = sld [smem:[#allocation21_spill]] }
 0xa24   : > { %p32_p11 = scmp.ge.s32.totalorder %s10347_s20, 4  }
 0xa25   : > { %s10351_s18 = smov %s10348_s27 }
 0xa26   :  { %34 = sbr.rel (!%p32_p11) target bundleno = 14 (0xe), region = 140 }
 0xa2b   :  { %5955 = vsyncpa [#allocation3], 1 }
 0xa2c   :  { %5957 = vsyncpa [#allocation3 + $0x1], 1 }
 0xa2d   :  { %5958 = vsyncpa [#allocation7], 1 }
 0xa2e   :  { %5960 = vsyncpa [#allocation7 + $0x1], 1 }
 0xa2f   :  { %5961 = vsyncpa [#allocation4], 1 }
 0xa30   :  { %5963 = vsyncpa [#allocation4 + $0x1], 1 }
 0xa31   :  { %5964 = vsyncpa [#allocation11], 1 }
 0xa32   :  { %5966 = vsyncpa [#allocation11 + $0x1], 1 }
 0xa33   :  { %5967 = vsyncpa [#allocation5], 1 }
 0xa34   :  { %5969 = vsyncpa [#allocation5 + $0x1], 1 }

</bundles_post_ra>
